<compile_context>
chip_gen: v6e
topology: v6e:2x2x1
jax: 0.10.0
libtpu: 0.0.40
codegen_flags: <defaults>
</compile_context>

<pallas_src>
import math

import jax
import jax.numpy as jnp
from jax import lax
from jax.experimental import pallas as pl
from jax.experimental.pallas import tpu as pltpu

# ----------------------------- configuration -----------------------------
INPUT_SIZE = 16          # conv input channels
CNN_FILTER = 32          # conv filter size
NUM_LAYERS_LSTM = 2
HIDDEN = 32              # LSTM hidden size (d_model = 2 * HIDDEN = 64)
NUM_HEADS = 4
N_EMOTION = 4
N_GENDER = 2
N_AGE = 3
D_FF = 512
SEQ_LEN = 100            # raw input length L


def _sigmoid(x):
    # exp() runs on the EUP; the single divide per gate tensor is negligible.
    return 1.0 / (1.0 + jnp.exp(-x))


# ----------------------------- the fused kernel -----------------------------
def _model_kernel(
    xs_ref,                                                 # (B*L, Cin)
    cw1_ref, cb1_ref, cw2_ref, cb2_ref, cw3_ref, cb3_ref,   # conv (K,Cin,Cout)/(1,Cout)
    sel1_ref, sel2_ref, sel3_ref,                           # maxpool row-selection matrices
    wih1_ref, whh1_ref, bl1_ref,                            # biLSTM layer 0 (dirs fused)
    wih2_ref, whh2_ref, bl2_ref,                            # biLSTM layer 1
    wqkv_ref, bqkv_ref, wo_ref, bo_ref,                     # attention projections
    ln1g_ref, ln1b_ref, wf1_ref, bf1_ref, wf2_ref, bf2_ref,
    ln2g_ref, ln2b_ref,                                     # FFN + layer norms
    psel_ref, hsum_ref, hexp_ref,                           # attention helper matrices
    mavg_ref, msel_ref,                                     # temporal pooling matrices
    whead_ref, bhead_ref,                                   # fused classifier heads
    out_ref,                                                # (B, n_gender+n_age+n_emotion)
):
    B = out_ref.shape[0]
    H = whh1_ref.shape[0] // 2
    E = 2 * H
    NH = hsum_ref.shape[1]
    R = psel_ref.shape[1]
    T = R // B
    K = cw1_ref.shape[0]

    # ---------- Conv1d(k=3, stride=1) + MaxPool1d(2), whole batch stacked ----------
    def conv_pool(x, w_ref, b_ref, sel_ref):
        rows = x.shape[0] - (K - 1)
        acc = jnp.dot(x[0:rows, :], w_ref[0],
                      preferred_element_type=jnp.float32) + b_ref[...]
        for k in range(1, K):
            acc = acc + jnp.dot(x[k:k + rows, :], w_ref[k],
                                preferred_element_type=jnp.float32)
        # max over adjacent conv rows, then a constant 0/1 selection matmul picks
        # the even positions per batch item (vectorized maxpool) and drops the
        # invalid cross-batch rows; sel3 additionally re-orders rows to t-major.
        m = jnp.maximum(acc[:rows - 1, :], acc[1:, :])
        return jnp.dot(sel_ref[...], m, preferred_element_type=jnp.float32)

    x = conv_pool(xs_ref[...], cw1_ref, cb1_ref, sel1_ref)
    x = conv_pool(x, cw2_ref, cb2_ref, sel2_ref)
    x = conv_pool(x, cw3_ref, cb3_ref, sel3_ref)            # (T*B, C), row = t*B + b

    # ---------- bidirectional LSTM (2 layers, eval mode) ----------
    # TODO(synk): nn.LSTM inter-layer dropout(0.5) is train-only; eval semantics here.
    def bilstm(x_all, wih_ref, whh_ref, b_ref):
        # Input projection for every timestep and BOTH directions in one matmul.
        gx = jnp.dot(x_all, wih_ref[...],
                     preferred_element_type=jnp.float32) + b_ref[...]     # (T*B, 8H)
        h_f = jnp.zeros((B, H), jnp.float32)
        c_f = jnp.zeros((B, H), jnp.float32)
        h_b = jnp.zeros((B, H), jnp.float32)
        c_b = jnp.zeros((B, H), jnp.float32)
        outs_f = [None] * T
        outs_b = [None] * T
        for s in range(T):                                  # fully unrolled; h/c stay in vregs
            g = jnp.concatenate(
                [gx[s * B:(s + 1) * B, 0:4 * H],
                 gx[(T - 1 - s) * B:(T - s) * B, 4 * H:8 * H]], axis=1)
            # single 256-wide recurrent matmul (block-diagonal fwd/bwd weights)
            g = g + jnp.dot(jnp.concatenate([h_f, h_b], axis=1), whh_ref[...],
                            preferred_element_type=jnp.float32)
            i_f = _sigmoid(g[:, 0 * H:1 * H])
            f_f = _sigmoid(g[:, 1 * H:2 * H])
            gg_f = jnp.tanh(g[:, 2 * H:3 * H])
            o_f = _sigmoid(g[:, 3 * H:4 * H])
            i_b = _sigmoid(g[:, 4 * H:5 * H])
            f_b = _sigmoid(g[:, 5 * H:6 * H])
            gg_b = jnp.tanh(g[:, 6 * H:7 * H])
            o_b = _sigmoid(g[:, 7 * H:8 * H])
            c_f = f_f * c_f + i_f * gg_f
            h_f = o_f * jnp.tanh(c_f)
            c_b = f_b * c_b + i_b * gg_b
            h_b = o_b * jnp.tanh(c_b)
            outs_f[s] = h_f
            outs_b[T - 1 - s] = h_b
        fwd = jnp.concatenate(outs_f, axis=0)               # (T*B, H) t-major
        bwd = jnp.concatenate(outs_b, axis=0)
        return jnp.concatenate([fwd, bwd], axis=1)          # (T*B, 2H)

    x = bilstm(x, wih1_ref, whh1_ref, bl1_ref)
    x = bilstm(x, wih2_ref, whh2_ref, bl2_ref)

    # ---------- TransformerEncoderLayer (post-norm, eval) ----------
    # Self-attention runs over the original batch axis (size B) within each time
    # index (PyTorch seq-first encoder fed with a batch-first tensor).
    # TODO(synk): transformer dropout(0.1) is train-only; eval semantics here.
    dh = E // NH
    scale = 1.0 / math.sqrt(dh)
    qkv = jnp.dot(x, wqkv_ref[...],
                  preferred_element_type=jnp.float32) + bqkv_ref[...]     # (R, 3E)
    q = qkv[:, 0:E] * scale
    k = qkv[:, E:2 * E]
    v = qkv[:, 2 * E:3 * E]
    hs = hsum_ref[...]                                      # (E, NH) per-head lane pooling
    he = hexp_ref[...]                                      # (NH, E) per-head lane broadcast
    s_list = []
    v_list = []
    for j in range(B):                                      # attend to batch item j of same t
        pj = psel_ref[j]                                    # (R, R) constant selection
        kj = jnp.dot(pj, k, preferred_element_type=jnp.float32)
        v_list.append(jnp.dot(pj, v, preferred_element_type=jnp.float32))
        s_list.append(jnp.dot(q * kj, hs, preferred_element_type=jnp.float32))  # (R, NH)
    smax = s_list[0]
    for j in range(1, B):
        smax = jnp.maximum(smax, s_list[j])
    p_list = [jnp.exp(s - smax) for s in s_list]
    denom = p_list[0]
    for j in range(1, B):
        denom = denom + p_list[j]
    inv = pl.reciprocal(denom, approx=True)                 # softmax denom on the EUP
    attn = jnp.zeros((R, E), jnp.float32)
    for j in range(B):
        wj = jnp.dot(p_list[j] * inv, he, preferred_element_type=jnp.float32)  # (R, E)
        attn = attn + wj * v_list[j]
    attn = jnp.dot(attn, wo_ref[...],
                   preferred_element_type=jnp.float32) + bo_ref[...]

    y = x + attn                                            # residual + LayerNorm1
    mu = jnp.mean(y, axis=-1, keepdims=True)
    var = jnp.mean((y - mu) * (y - mu), axis=-1, keepdims=True)
    y = (y - mu) * lax.rsqrt(var + 1e-5) * ln1g_ref[...] + ln1b_ref[...]

    f = jnp.dot(y, wf1_ref[...],
                preferred_element_type=jnp.float32) + bf1_ref[...]        # FFN (ReLU)
    f = jnp.maximum(f, 0.0)
    f = jnp.dot(f, wf2_ref[...],
                preferred_element_type=jnp.float32) + bf2_ref[...]
    z = y + f                                               # residual + LayerNorm2
    mu2 = jnp.mean(z, axis=-1, keepdims=True)
    var2 = jnp.mean((z - mu2) * (z - mu2), axis=-1, keepdims=True)
    z = (z - mu2) * lax.rsqrt(var2 + 1e-5) * ln2g_ref[...] + ln2b_ref[...]

    # ---------- mean/std over time + fused classifier heads ----------
    mavg = mavg_ref[...]                                    # (B, R), entries 1/T
    mean = jnp.dot(mavg, z, preferred_element_type=jnp.float32)                 # (B, E)
    mean_full = jnp.dot(msel_ref[...], mean, preferred_element_type=jnp.float32)  # (R, E)
    d = z - mean_full
    var_sum = jnp.dot(mavg * float(T), d * d, preferred_element_type=jnp.float32)  # (B, E)
    std = jnp.sqrt(var_sum / float(T - 1))                  # unbiased, matches torch.std
    stat = jnp.concatenate([mean, std], axis=1)             # (B, 2E) -- dense 128 lanes
    out_ref[...] = (jnp.dot(stat, whead_ref[...], preferred_element_type=jnp.float32)
                    + bhead_ref[...])


# --------------------- wrapper-side constant matrices & packing ---------------------
def _pool_select(b, lin, t_major=False):
    # (B*Lp, B*Lin - 3) selection matrix for stacked maxpool-by-2.
    lp = (lin - 2) // 2
    p = jnp.arange(b * lp, dtype=jnp.int32)[:, None]
    r = jnp.arange(b * lin - 3, dtype=jnp.int32)[None, :]
    if t_major:                                             # output row = t*B + b
        src = (p % b) * lin + 2 * (p // b)
    else:                                                   # output row = b*Lp + j
        src = (p // lp) * lin + 2 * (p % lp)
    return (r == src).astype(jnp.float32)


def _attn_select(b, t):
    # psel[j][r, c] = 1 iff row c is batch item j of row r's time group.
    rr = b * t
    rows = jnp.arange(rr, dtype=jnp.int32)[:, None]
    cols = jnp.arange(rr, dtype=jnp.int32)[None, :]
    mats = [(cols == (rows // b) * b + j).astype(jnp.float32) for j in range(b)]
    return jnp.stack(mats, axis=0)                          # (B, R, R)


def _head_maps(e, nh):
    dh = e // nh
    eidx = jnp.arange(e, dtype=jnp.int32)
    hidx = jnp.arange(nh, dtype=jnp.int32)
    hs = (eidx[:, None] // dh == hidx[None, :]).astype(jnp.float32)   # (E, NH)
    return hs, hs.T                                                    # and (NH, E)


def _stat_maps(b, t):
    rr = b * t
    r = jnp.arange(rr, dtype=jnp.int32)
    bi = jnp.arange(b, dtype=jnp.int32)
    mavg = (r[None, :] % b == bi[:, None]).astype(jnp.float32) / t     # (B, R)
    msel = (r[:, None] % b == bi[None, :]).astype(jnp.float32)         # (R, B)
    return mavg, msel


def _pack_conv(w_oik, bias):
    # PyTorch (Cout, Cin, K) -> (K, Cin, Cout); bias -> (1, Cout)
    return jnp.transpose(w_oik, (2, 1, 0)), bias.reshape(1, -1)


def _pack_bilstm(layer):
    w_ih_f, w_hh_f, b_ih_f, b_hh_f = layer['fwd']
    w_ih_b, w_hh_b, b_ih_b, b_hh_b = layer['bwd']
    g4 = w_ih_f.shape[0]                                    # 4H
    h = w_hh_f.shape[1]
    wih = jnp.concatenate([w_ih_f.T, w_ih_b.T], axis=1)     # (Din, 8H)
    zero = jnp.zeros((h, g4), jnp.float32)
    whh = jnp.concatenate(
        [jnp.concatenate([w_hh_f.T, zero], axis=1),
         jnp.concatenate([zero, w_hh_b.T], axis=1)], axis=0)            # (2H, 8H) block-diag
    bias = jnp.concatenate([b_ih_f + b_hh_f, b_ih_b + b_hh_b]).reshape(1, -1)
    return wih, whh, bias


# ----------------------------- full forward pass -----------------------------
@jax.jit
def forward(x_bcl, p):
    # x_bcl: (B, C_in, L) -- PyTorch NCL input
    B, cin, L = x_bcl.shape
    l1 = (L - 2) // 2
    l2 = (l1 - 2) // 2
    T = (l2 - 2) // 2
    E = 2 * HIDDEN

    xs = jnp.transpose(x_bcl, (0, 2, 1)).astype(jnp.float32).reshape(B * L, cin)

    cw1, cb1 = _pack_conv(p['conv1_w'], p['conv1_b'])
    cw2, cb2 = _pack_conv(p['conv2_w'], p['conv2_b'])
    cw3, cb3 = _pack_conv(p['conv3_w'], p['conv3_b'])
    sel1 = _pool_select(B, L)
    sel2 = _pool_select(B, l1)
    sel3 = _pool_select(B, l2, t_major=True)

    wih1, whh1, bl1 = _pack_bilstm(p['lstm'][0])
    wih2, whh2, bl2 = _pack_bilstm(p['lstm'][1])

    enc = p['enc']
    wqkv = enc['in_proj_w'].T
    bqkv = enc['in_proj_b'].reshape(1, -1)
    wo = enc['out_proj_w'].T
    bo = enc['out_proj_b'].reshape(1, -1)
    ln1g = enc['ln1_g'].reshape(1, -1)
    ln1b = enc['ln1_b'].reshape(1, -1)
    wf1 = enc['lin1_w'].T
    bf1 = enc['lin1_b'].reshape(1, -1)
    wf2 = enc['lin2_w'].T
    bf2 = enc['lin2_b'].reshape(1, -1)
    ln2g = enc['ln2_g'].reshape(1, -1)
    ln2b = enc['ln2_b'].reshape(1, -1)

    psel = _attn_select(B, T)
    hsum, hexp = _head_maps(E, NUM_HEADS)
    mavg, msel = _stat_maps(B, T)

    whead = jnp.concatenate([p['gender_w'].T, p['age_w'].T, p['emotion_w'].T], axis=1)
    bhead = jnp.concatenate([p['gender_b'], p['age_b'], p['emotion_b']]).reshape(1, -1)

    args = (xs, cw1, cb1, cw2, cb2, cw3, cb3, sel1, sel2, sel3,
            wih1, whh1, bl1, wih2, whh2, bl2,
            wqkv, bqkv, wo, bo, ln1g, ln1b, wf1, bf1, wf2, bf2, ln2g, ln2b,
            psel, hsum, hexp, mavg, msel, whead, bhead)

    n_out = N_GENDER + N_AGE + N_EMOTION
    logits = pl.pallas_call(
        _model_kernel,
        out_shape=jax.ShapeDtypeStruct((B, n_out), jnp.float32),
        in_specs=[pl.BlockSpec(memory_space=pltpu.MemorySpace.VMEM)] * len(args),
        out_specs=pl.BlockSpec(memory_space=pltpu.MemorySpace.VMEM),
    )(*args)

    pred_gender = logits[:, 0:N_GENDER]
    pred_age = logits[:, N_GENDER:N_GENDER + N_AGE]
    pred_emotion = logits[:, N_GENDER + N_AGE:]
    return pred_gender, pred_age, pred_emotion


# ----------------------------- parameter init -----------------------------
def init_params(key):
    keys = iter(jax.random.split(key, 48))

    def nrm(shape, scale=0.1):
        return scale * jax.random.normal(next(keys), shape, dtype=jnp.float32)

    p = {}
    # conv weights in PyTorch layout (Cout, Cin, K)
    p['conv1_w'] = nrm((CNN_FILTER, INPUT_SIZE, 3))
    p['conv1_b'] = nrm((CNN_FILTER,))
    p['conv2_w'] = nrm((CNN_FILTER, CNN_FILTER, 3))
    p['conv2_b'] = nrm((CNN_FILTER,))
    p['conv3_w'] = nrm((CNN_FILTER, CNN_FILTER, 3))
    p['conv3_b'] = nrm((CNN_FILTER,))

    lstm = []
    for layer in range(NUM_LAYERS_LSTM):
        din = CNN_FILTER if layer == 0 else 2 * HIDDEN
        layer_p = {}
        for d in ('fwd', 'bwd'):
            layer_p[d] = (nrm((4 * HIDDEN, din)),      # w_ih
                          nrm((4 * HIDDEN, HIDDEN)),   # w_hh
                          nrm((4 * HIDDEN,)),          # b_ih
                          nrm((4 * HIDDEN,)))          # b_hh
        lstm.append(layer_p)
    p['lstm'] = lstm

    E = 2 * HIDDEN
    p['enc'] = {
        'in_proj_w': nrm((3 * E, E)),
        'in_proj_b': nrm((3 * E,)),
        'out_proj_w': nrm((E, E)),
        'out_proj_b': nrm((E,)),
        'ln1_g': jnp.ones((E,), jnp.float32),
        'ln1_b': jnp.zeros((E,), jnp.float32),
        'lin1_w': nrm((D_FF, E)),
        'lin1_b': nrm((D_FF,)),
        'lin2_w': nrm((E, D_FF)),
        'lin2_b': nrm((E,)),
        'ln2_g': jnp.ones((E,), jnp.float32),
        'ln2_b': jnp.zeros((E,), jnp.float32),
    }
    p['gender_w'] = nrm((N_GENDER, 4 * HIDDEN))
    p['gender_b'] = nrm((N_GENDER,))
    p['age_w'] = nrm((N_AGE, 4 * HIDDEN))
    p['age_b'] = nrm((N_AGE,))
    p['emotion_w'] = nrm((N_EMOTION, 4 * HIDDEN))
    p['emotion_b'] = nrm((N_EMOTION,))
    return p


if __name__ == "__main__":
    key = jax.random.PRNGKey(0)
    pkey, xkey = jax.random.split(key)
    params = init_params(pkey)

    # PyTorch-style NCL input: (batch=2, channels=input_size, length=100)
    x = jax.random.normal(xkey, (2, INPUT_SIZE, SEQ_LEN), dtype=jnp.float32)

    pred_gender, pred_age, pred_emotion = forward(x, params)
    jax.block_until_ready((pred_gender, pred_age, pred_emotion))

    assert pred_gender.shape == (2, N_GENDER)
    assert pred_age.shape == (2, N_AGE)
    assert pred_emotion.shape == (2, N_EMOTION)
    assert bool(jnp.all(jnp.isfinite(pred_gender)))
    assert bool(jnp.all(jnp.isfinite(pred_age)))
    assert bool(jnp.all(jnp.isfinite(pred_emotion)))
    print("KERNEL_OK")
</pallas_src>

<mosaic_0001>
module attributes {stable_mosaic.version = 11 : i64} {
  func.func @_model_kernel(%arg0: memref<200x16xf32, #tpu.memory_space<vmem>>, %arg1: memref<3x16x32xf32, #tpu.memory_space<vmem>>, %arg2: memref<1x32xf32, #tpu.memory_space<vmem>>, %arg3: memref<3x32x32xf32, #tpu.memory_space<vmem>>, %arg4: memref<1x32xf32, #tpu.memory_space<vmem>>, %arg5: memref<3x32x32xf32, #tpu.memory_space<vmem>>, %arg6: memref<1x32xf32, #tpu.memory_space<vmem>>, %arg7: memref<98x197xf32, #tpu.memory_space<vmem>>, %arg8: memref<46x95xf32, #tpu.memory_space<vmem>>, %arg9: memref<20x43xf32, #tpu.memory_space<vmem>>, %arg10: memref<32x256xf32, #tpu.memory_space<vmem>>, %arg11: memref<64x256xf32, #tpu.memory_space<vmem>>, %arg12: memref<1x256xf32, #tpu.memory_space<vmem>>, %arg13: memref<64x256xf32, #tpu.memory_space<vmem>>, %arg14: memref<64x256xf32, #tpu.memory_space<vmem>>, %arg15: memref<1x256xf32, #tpu.memory_space<vmem>>, %arg16: memref<64x192xf32, #tpu.memory_space<vmem>>, %arg17: memref<1x192xf32, #tpu.memory_space<vmem>>, %arg18: memref<64x64xf32, #tpu.memory_space<vmem>>, %arg19: memref<1x64xf32, #tpu.memory_space<vmem>>, %arg20: memref<1x64xf32, #tpu.memory_space<vmem>>, %arg21: memref<1x64xf32, #tpu.memory_space<vmem>>, %arg22: memref<64x512xf32, #tpu.memory_space<vmem>>, %arg23: memref<1x512xf32, #tpu.memory_space<vmem>>, %arg24: memref<512x64xf32, #tpu.memory_space<vmem>>, %arg25: memref<1x64xf32, #tpu.memory_space<vmem>>, %arg26: memref<1x64xf32, #tpu.memory_space<vmem>>, %arg27: memref<1x64xf32, #tpu.memory_space<vmem>>, %arg28: memref<2x20x20xf32, #tpu.memory_space<vmem>>, %arg29: memref<64x4xf32, #tpu.memory_space<vmem>>, %arg30: memref<4x64xf32, #tpu.memory_space<vmem>>, %arg31: memref<2x20xf32, #tpu.memory_space<vmem>>, %arg32: memref<20x2xf32, #tpu.memory_space<vmem>>, %arg33: memref<128x9xf32, #tpu.memory_space<vmem>>, %arg34: memref<1x9xf32, #tpu.memory_space<vmem>>, %arg35: memref<2x9xf32, #tpu.memory_space<vmem>>) attributes {dimension_semantics = [], scalar_prefetch = 0 : i64, scratch_operands = 0 : i64, tpu.core_type = #tpu.core_type<tc>} {
    %c0 = arith.constant 0 : index
    %c0_0 = arith.constant 0 : index
    %0 = vector.load %arg0[%c0, %c0_0] : memref<200x16xf32, #tpu.memory_space<vmem>>, vector<200x16xf32>
    %1 = vector.extract_strided_slice %0 {offsets = [0, 0], sizes = [198, 16], strides = [1, 1]} : vector<200x16xf32> to vector<198x16xf32>
    %c0_1 = arith.constant 0 : index
    %c0_2 = arith.constant 0 : index
    %c0_3 = arith.constant 0 : index
    %2 = vector.load %arg1[%c0_1, %c0_2, %c0_3] : memref<3x16x32xf32, #tpu.memory_space<vmem>>, vector<1x16x32xf32>
    %3 = vector.shape_cast %2 : vector<1x16x32xf32> to vector<16x32xf32>
    %cst = arith.constant dense<0.000000e+00> : vector<198x32xf32>
    %4 = tpu.matmul %1, %3, %cst {dimension_numbers = #tpu.dot_dimension_numbers<[1], [0], [0], [1], [0, 0, 1, 1], [], []>} : vector<198x16xf32>, vector<16x32xf32>, vector<198x32xf32> -> vector<198x32xf32>
    %c0_4 = arith.constant 0 : index
    %c0_5 = arith.constant 0 : index
    %5 = vector.load %arg2[%c0_4, %c0_5] : memref<1x32xf32, #tpu.memory_space<vmem>>, vector<1x32xf32>
    %6 = vector.broadcast %5 : vector<1x32xf32> to vector<198x32xf32>
    %7 = arith.addf %4, %6 : vector<198x32xf32>
    %8 = vector.extract_strided_slice %0 {offsets = [1, 0], sizes = [198, 16], strides = [1, 1]} : vector<200x16xf32> to vector<198x16xf32>
    %c1 = arith.constant 1 : index
    %c0_6 = arith.constant 0 : index
    %c0_7 = arith.constant 0 : index
    %9 = vector.load %arg1[%c1, %c0_6, %c0_7] : memref<3x16x32xf32, #tpu.memory_space<vmem>>, vector<1x16x32xf32>
    %10 = vector.shape_cast %9 : vector<1x16x32xf32> to vector<16x32xf32>
    %cst_8 = arith.constant dense<0.000000e+00> : vector<198x32xf32>
    %11 = tpu.matmul %8, %10, %cst_8 {dimension_numbers = #tpu.dot_dimension_numbers<[1], [0], [0], [1], [0, 0, 1, 1], [], []>} : vector<198x16xf32>, vector<16x32xf32>, vector<198x32xf32> -> vector<198x32xf32>
    %12 = arith.addf %7, %11 : vector<198x32xf32>
    %13 = vector.extract_strided_slice %0 {offsets = [2, 0], sizes = [198, 16], strides = [1, 1]} : vector<200x16xf32> to vector<198x16xf32>
    %c2 = arith.constant 2 : index
    %c0_9 = arith.constant 0 : index
    %c0_10 = arith.constant 0 : index
    %14 = vector.load %arg1[%c2, %c0_9, %c0_10] : memref<3x16x32xf32, #tpu.memory_space<vmem>>, vector<1x16x32xf32>
    %15 = vector.shape_cast %14 : vector<1x16x32xf32> to vector<16x32xf32>
    %cst_11 = arith.constant dense<0.000000e+00> : vector<198x32xf32>
    %16 = tpu.matmul %13, %15, %cst_11 {dimension_numbers = #tpu.dot_dimension_numbers<[1], [0], [0], [1], [0, 0, 1, 1], [], []>} : vector<198x16xf32>, vector<16x32xf32>, vector<198x32xf32> -> vector<198x32xf32>
    %17 = arith.addf %12, %16 : vector<198x32xf32>
    %18 = vector.extract_strided_slice %17 {offsets = [0, 0], sizes = [197, 32], strides = [1, 1]} : vector<198x32xf32> to vector<197x32xf32>
    %19 = vector.extract_strided_slice %17 {offsets = [1, 0], sizes = [197, 32], strides = [1, 1]} : vector<198x32xf32> to vector<197x32xf32>
    %20 = arith.maximumf %18, %19 : vector<197x32xf32>
    %c0_12 = arith.constant 0 : index
    %c0_13 = arith.constant 0 : index
    %21 = vector.load %arg7[%c0_12, %c0_13] : memref<98x197xf32, #tpu.memory_space<vmem>>, vector<98x197xf32>
    %cst_14 = arith.constant dense<0.000000e+00> : vector<98x32xf32>
    %22 = tpu.matmul %21, %20, %cst_14 {dimension_numbers = #tpu.dot_dimension_numbers<[1], [0], [0], [1], [0, 0, 1, 1], [], []>} : vector<98x197xf32>, vector<197x32xf32>, vector<98x32xf32> -> vector<98x32xf32>
    %23 = vector.extract_strided_slice %22 {offsets = [0, 0], sizes = [96, 32], strides = [1, 1]} : vector<98x32xf32> to vector<96x32xf32>
    %c0_15 = arith.constant 0 : index
    %c0_16 = arith.constant 0 : index
    %c0_17 = arith.constant 0 : index
    %24 = vector.load %arg3[%c0_15, %c0_16, %c0_17] : memref<3x32x32xf32, #tpu.memory_space<vmem>>, vector<1x32x32xf32>
    %25 = vector.shape_cast %24 : vector<1x32x32xf32> to vector<32x32xf32>
    %cst_18 = arith.constant dense<0.000000e+00> : vector<96x32xf32>
    %26 = tpu.matmul %23, %25, %cst_18 {dimension_numbers = #tpu.dot_dimension_numbers<[1], [0], [0], [1], [0, 0, 1, 1], [], []>} : vector<96x32xf32>, vector<32x32xf32>, vector<96x32xf32> -> vector<96x32xf32>
    %c0_19 = arith.constant 0 : index
    %c0_20 = arith.constant 0 : index
    %27 = vector.load %arg4[%c0_19, %c0_20] : memref<1x32xf32, #tpu.memory_space<vmem>>, vector<1x32xf32>
    %28 = vector.broadcast %27 : vector<1x32xf32> to vector<96x32xf32>
    %29 = arith.addf %26, %28 : vector<96x32xf32>
    %30 = vector.extract_strided_slice %22 {offsets = [1, 0], sizes = [96, 32], strides = [1, 1]} : vector<98x32xf32> to vector<96x32xf32>
    %c1_21 = arith.constant 1 : index
    %c0_22 = arith.constant 0 : index
    %c0_23 = arith.constant 0 : index
    %31 = vector.load %arg3[%c1_21, %c0_22, %c0_23] : memref<3x32x32xf32, #tpu.memory_space<vmem>>, vector<1x32x32xf32>
    %32 = vector.shape_cast %31 : vector<1x32x32xf32> to vector<32x32xf32>
    %cst_24 = arith.constant dense<0.000000e+00> : vector<96x32xf32>
    %33 = tpu.matmul %30, %32, %cst_24 {dimension_numbers = #tpu.dot_dimension_numbers<[1], [0], [0], [1], [0, 0, 1, 1], [], []>} : vector<96x32xf32>, vector<32x32xf32>, vector<96x32xf32> -> vector<96x32xf32>
    %34 = arith.addf %29, %33 : vector<96x32xf32>
    %35 = vector.extract_strided_slice %22 {offsets = [2, 0], sizes = [96, 32], strides = [1, 1]} : vector<98x32xf32> to vector<96x32xf32>
    %c2_25 = arith.constant 2 : index
    %c0_26 = arith.constant 0 : index
    %c0_27 = arith.constant 0 : index
    %36 = vector.load %arg3[%c2_25, %c0_26, %c0_27] : memref<3x32x32xf32, #tpu.memory_space<vmem>>, vector<1x32x32xf32>
    %37 = vector.shape_cast %36 : vector<1x32x32xf32> to vector<32x32xf32>
    %cst_28 = arith.constant dense<0.000000e+00> : vector<96x32xf32>
    %38 = tpu.matmul %35, %37, %cst_28 {dimension_numbers = #tpu.dot_dimension_numbers<[1], [0], [0], [1], [0, 0, 1, 1], [], []>} : vector<96x32xf32>, vector<32x32xf32>, vector<96x32xf32> -> vector<96x32xf32>
    %39 = arith.addf %34, %38 : vector<96x32xf32>
    %40 = vector.extract_strided_slice %39 {offsets = [0, 0], sizes = [95, 32], strides = [1, 1]} : vector<96x32xf32> to vector<95x32xf32>
    %41 = vector.extract_strided_slice %39 {offsets = [1, 0], sizes = [95, 32], strides = [1, 1]} : vector<96x32xf32> to vector<95x32xf32>
    %42 = arith.maximumf %40, %41 : vector<95x32xf32>
    %c0_29 = arith.constant 0 : index
    %c0_30 = arith.constant 0 : index
    %43 = vector.load %arg8[%c0_29, %c0_30] : memref<46x95xf32, #tpu.memory_space<vmem>>, vector<46x95xf32>
    %cst_31 = arith.constant dense<0.000000e+00> : vector<46x32xf32>
    %44 = tpu.matmul %43, %42, %cst_31 {dimension_numbers = #tpu.dot_dimension_numbers<[1], [0], [0], [1], [0, 0, 1, 1], [], []>} : vector<46x95xf32>, vector<95x32xf32>, vector<46x32xf32> -> vector<46x32xf32>
    %45 = vector.extract_strided_slice %44 {offsets = [0, 0], sizes = [44, 32], strides = [1, 1]} : vector<46x32xf32> to vector<44x32xf32>
    %c0_32 = arith.constant 0 : index
    %c0_33 = arith.constant 0 : index
    %c0_34 = arith.constant 0 : index
    %46 = vector.load %arg5[%c0_32, %c0_33, %c0_34] : memref<3x32x32xf32, #tpu.memory_space<vmem>>, vector<1x32x32xf32>
    %47 = vector.shape_cast %46 : vector<1x32x32xf32> to vector<32x32xf32>
    %cst_35 = arith.constant dense<0.000000e+00> : vector<44x32xf32>
    %48 = tpu.matmul %45, %47, %cst_35 {dimension_numbers = #tpu.dot_dimension_numbers<[1], [0], [0], [1], [0, 0, 1, 1], [], []>} : vector<44x32xf32>, vector<32x32xf32>, vector<44x32xf32> -> vector<44x32xf32>
    %c0_36 = arith.constant 0 : index
    %c0_37 = arith.constant 0 : index
    %49 = vector.load %arg6[%c0_36, %c0_37] : memref<1x32xf32, #tpu.memory_space<vmem>>, vector<1x32xf32>
    %50 = vector.broadcast %49 : vector<1x32xf32> to vector<44x32xf32>
    %51 = arith.addf %48, %50 : vector<44x32xf32>
    %52 = vector.extract_strided_slice %44 {offsets = [1, 0], sizes = [44, 32], strides = [1, 1]} : vector<46x32xf32> to vector<44x32xf32>
    %c1_38 = arith.constant 1 : index
    %c0_39 = arith.constant 0 : index
    %c0_40 = arith.constant 0 : index
    %53 = vector.load %arg5[%c1_38, %c0_39, %c0_40] : memref<3x32x32xf32, #tpu.memory_space<vmem>>, vector<1x32x32xf32>
    %54 = vector.shape_cast %53 : vector<1x32x32xf32> to vector<32x32xf32>
    %cst_41 = arith.constant dense<0.000000e+00> : vector<44x32xf32>
    %55 = tpu.matmul %52, %54, %cst_41 {dimension_numbers = #tpu.dot_dimension_numbers<[1], [0], [0], [1], [0, 0, 1, 1], [], []>} : vector<44x32xf32>, vector<32x32xf32>, vector<44x32xf32> -> vector<44x32xf32>
    %56 = arith.addf %51, %55 : vector<44x32xf32>
    %57 = vector.extract_strided_slice %44 {offsets = [2, 0], sizes = [44, 32], strides = [1, 1]} : vector<46x32xf32> to vector<44x32xf32>
    %c2_42 = arith.constant 2 : index
    %c0_43 = arith.constant 0 : index
    %c0_44 = arith.constant 0 : index
    %58 = vector.load %arg5[%c2_42, %c0_43, %c0_44] : memref<3x32x32xf32, #tpu.memory_space<vmem>>, vector<1x32x32xf32>
    %59 = vector.shape_cast %58 : vector<1x32x32xf32> to vector<32x32xf32>
    %cst_45 = arith.constant dense<0.000000e+00> : vector<44x32xf32>
    %60 = tpu.matmul %57, %59, %cst_45 {dimension_numbers = #tpu.dot_dimension_numbers<[1], [0], [0], [1], [0, 0, 1, 1], [], []>} : vector<44x32xf32>, vector<32x32xf32>, vector<44x32xf32> -> vector<44x32xf32>
    %61 = arith.addf %56, %60 : vector<44x32xf32>
    %62 = vector.extract_strided_slice %61 {offsets = [0, 0], sizes = [43, 32], strides = [1, 1]} : vector<44x32xf32> to vector<43x32xf32>
    %63 = vector.extract_strided_slice %61 {offsets = [1, 0], sizes = [43, 32], strides = [1, 1]} : vector<44x32xf32> to vector<43x32xf32>
    %64 = arith.maximumf %62, %63 : vector<43x32xf32>
    %c0_46 = arith.constant 0 : index
    %c0_47 = arith.constant 0 : index
    %65 = vector.load %arg9[%c0_46, %c0_47] : memref<20x43xf32, #tpu.memory_space<vmem>>, vector<20x43xf32>
    %cst_48 = arith.constant dense<0.000000e+00> : vector<20x32xf32>
    %66 = tpu.matmul %65, %64, %cst_48 {dimension_numbers = #tpu.dot_dimension_numbers<[1], [0], [0], [1], [0, 0, 1, 1], [], []>} : vector<20x43xf32>, vector<43x32xf32>, vector<20x32xf32> -> vector<20x32xf32>
    %c0_49 = arith.constant 0 : index
    %c0_50 = arith.constant 0 : index
    %67 = vector.load %arg10[%c0_49, %c0_50] : memref<32x256xf32, #tpu.memory_space<vmem>>, vector<32x256xf32>
    %cst_51 = arith.constant dense<0.000000e+00> : vector<20x256xf32>
    %68 = tpu.matmul %66, %67, %cst_51 {dimension_numbers = #tpu.dot_dimension_numbers<[1], [0], [0], [1], [0, 0, 1, 1], [], []>} : vector<20x32xf32>, vector<32x256xf32>, vector<20x256xf32> -> vector<20x256xf32>
    %c0_52 = arith.constant 0 : index
    %c0_53 = arith.constant 0 : index
    %69 = vector.load %arg12[%c0_52, %c0_53] : memref<1x256xf32, #tpu.memory_space<vmem>>, vector<1x256xf32>
    %70 = vector.broadcast %69 : vector<1x256xf32> to vector<20x256xf32>
    %71 = arith.addf %68, %70 : vector<20x256xf32>
    %cst_54 = arith.constant 0.000000e+00 : f32
    %72 = vector.broadcast %cst_54 : f32 to vector<2x32xf32>
    %cst_55 = arith.constant 0.000000e+00 : f32
    %73 = vector.broadcast %cst_55 : f32 to vector<2x32xf32>
    %cst_56 = arith.constant 0.000000e+00 : f32
    %74 = vector.broadcast %cst_56 : f32 to vector<2x32xf32>
    %cst_57 = arith.constant 0.000000e+00 : f32
    %75 = vector.broadcast %cst_57 : f32 to vector<2x32xf32>
    %76 = vector.extract_strided_slice %71 {offsets = [0, 0], sizes = [2, 128], strides = [1, 1]} : vector<20x256xf32> to vector<2x128xf32>
    %77 = vector.extract_strided_slice %71 {offsets = [18, 128], sizes = [2, 128], strides = [1, 1]} : vector<20x256xf32> to vector<2x128xf32>
    %78 = tpu.concatenate %76, %77 in 1 : vector<2x128xf32>, vector<2x128xf32> -> vector<2x256xf32>
    %79 = tpu.concatenate %72, %74 in 1 : vector<2x32xf32>, vector<2x32xf32> -> vector<2x64xf32>
    %c0_58 = arith.constant 0 : index
    %c0_59 = arith.constant 0 : index
    %80 = vector.load %arg11[%c0_58, %c0_59] : memref<64x256xf32, #tpu.memory_space<vmem>>, vector<64x256xf32>
    %cst_60 = arith.constant dense<0.000000e+00> : vector<2x256xf32>
    %81 = tpu.matmul %79, %80, %cst_60 {dimension_numbers = #tpu.dot_dimension_numbers<[1], [0], [0], [1], [0, 0, 1, 1], [], []>} : vector<2x64xf32>, vector<64x256xf32>, vector<2x256xf32> -> vector<2x256xf32>
    %82 = arith.addf %78, %81 : vector<2x256xf32>
    %83 = vector.extract_strided_slice %82 {offsets = [0, 0], sizes = [2, 32], strides = [1, 1]} : vector<2x256xf32> to vector<2x32xf32>
    %cst_61 = arith.constant 0.000000e+00 : f32
    %84 = vector.broadcast %cst_61 : f32 to vector<2x32xf32>
    %85 = arith.subf %84, %83 : vector<2x32xf32>
    %86 = math.exp %85 : vector<2x32xf32>
    %cst_62 = arith.constant 1.000000e+00 : f32
    %87 = vector.broadcast %cst_62 : f32 to vector<2x32xf32>
    %88 = arith.addf %87, %86 : vector<2x32xf32>
    %cst_63 = arith.constant 1.000000e+00 : f32
    %89 = vector.broadcast %cst_63 : f32 to vector<2x32xf32>
    %90 = arith.divf %89, %88 : vector<2x32xf32>
    %91 = vector.extract_strided_slice %82 {offsets = [0, 32], sizes = [2, 32], strides = [1, 1]} : vector<2x256xf32> to vector<2x32xf32>
    %cst_64 = arith.constant 0.000000e+00 : f32
    %92 = vector.broadcast %cst_64 : f32 to vector<2x32xf32>
    %93 = arith.subf %92, %91 : vector<2x32xf32>
    %94 = math.exp %93 : vector<2x32xf32>
    %cst_65 = arith.constant 1.000000e+00 : f32
    %95 = vector.broadcast %cst_65 : f32 to vector<2x32xf32>
    %96 = arith.addf %95, %94 : vector<2x32xf32>
    %cst_66 = arith.constant 1.000000e+00 : f32
    %97 = vector.broadcast %cst_66 : f32 to vector<2x32xf32>
    %98 = arith.divf %97, %96 : vector<2x32xf32>
    %99 = vector.extract_strided_slice %82 {offsets = [0, 64], sizes = [2, 32], strides = [1, 1]} : vector<2x256xf32> to vector<2x32xf32>
    %100 = math.tanh %99 : vector<2x32xf32>
    %101 = vector.extract_strided_slice %82 {offsets = [0, 96], sizes = [2, 32], strides = [1, 1]} : vector<2x256xf32> to vector<2x32xf32>
    %cst_67 = arith.constant 0.000000e+00 : f32
    %102 = vector.broadcast %cst_67 : f32 to vector<2x32xf32>
    %103 = arith.subf %102, %101 : vector<2x32xf32>
    %104 = math.exp %103 : vector<2x32xf32>
    %cst_68 = arith.constant 1.000000e+00 : f32
    %105 = vector.broadcast %cst_68 : f32 to vector<2x32xf32>
    %106 = arith.addf %105, %104 : vector<2x32xf32>
    %cst_69 = arith.constant 1.000000e+00 : f32
    %107 = vector.broadcast %cst_69 : f32 to vector<2x32xf32>
    %108 = arith.divf %107, %106 : vector<2x32xf32>
    %109 = vector.extract_strided_slice %82 {offsets = [0, 128], sizes = [2, 32], strides = [1, 1]} : vector<2x256xf32> to vector<2x32xf32>
    %cst_70 = arith.constant 0.000000e+00 : f32
    %110 = vector.broadcast %cst_70 : f32 to vector<2x32xf32>
    %111 = arith.subf %110, %109 : vector<2x32xf32>
    %112 = math.exp %111 : vector<2x32xf32>
    %cst_71 = arith.constant 1.000000e+00 : f32
    %113 = vector.broadcast %cst_71 : f32 to vector<2x32xf32>
    %114 = arith.addf %113, %112 : vector<2x32xf32>
    %cst_72 = arith.constant 1.000000e+00 : f32
    %115 = vector.broadcast %cst_72 : f32 to vector<2x32xf32>
    %116 = arith.divf %115, %114 : vector<2x32xf32>
    %117 = vector.extract_strided_slice %82 {offsets = [0, 160], sizes = [2, 32], strides = [1, 1]} : vector<2x256xf32> to vector<2x32xf32>
    %cst_73 = arith.constant 0.000000e+00 : f32
    %118 = vector.broadcast %cst_73 : f32 to vector<2x32xf32>
    %119 = arith.subf %118, %117 : vector<2x32xf32>
    %120 = math.exp %119 : vector<2x32xf32>
    %cst_74 = arith.constant 1.000000e+00 : f32
    %121 = vector.broadcast %cst_74 : f32 to vector<2x32xf32>
    %122 = arith.addf %121, %120 : vector<2x32xf32>
    %cst_75 = arith.constant 1.000000e+00 : f32
    %123 = vector.broadcast %cst_75 : f32 to vector<2x32xf32>
    %124 = arith.divf %123, %122 : vector<2x32xf32>
    %125 = vector.extract_strided_slice %82 {offsets = [0, 192], sizes = [2, 32], strides = [1, 1]} : vector<2x256xf32> to vector<2x32xf32>
    %126 = math.tanh %125 : vector<2x32xf32>
    %127 = vector.extract_strided_slice %82 {offsets = [0, 224], sizes = [2, 32], strides = [1, 1]} : vector<2x256xf32> to vector<2x32xf32>
    %cst_76 = arith.constant 0.000000e+00 : f32
    %128 = vector.broadcast %cst_76 : f32 to vector<2x32xf32>
    %129 = arith.subf %128, %127 : vector<2x32xf32>
    %130 = math.exp %129 : vector<2x32xf32>
    %cst_77 = arith.constant 1.000000e+00 : f32
    %131 = vector.broadcast %cst_77 : f32 to vector<2x32xf32>
    %132 = arith.addf %131, %130 : vector<2x32xf32>
    %cst_78 = arith.constant 1.000000e+00 : f32
    %133 = vector.broadcast %cst_78 : f32 to vector<2x32xf32>
    %134 = arith.divf %133, %132 : vector<2x32xf32>
    %135 = arith.mulf %98, %73 : vector<2x32xf32>
    %136 = arith.mulf %90, %100 : vector<2x32xf32>
    %137 = arith.addf %135, %136 : vector<2x32xf32>
    %138 = math.tanh %137 : vector<2x32xf32>
    %139 = arith.mulf %108, %138 : vector<2x32xf32>
    %140 = arith.mulf %124, %75 : vector<2x32xf32>
    %141 = arith.mulf %116, %126 : vector<2x32xf32>
    %142 = arith.addf %140, %141 : vector<2x32xf32>
    %143 = math.tanh %142 : vector<2x32xf32>
    %144 = arith.mulf %134, %143 : vector<2x32xf32>
    %145 = vector.extract_strided_slice %71 {offsets = [2, 0], sizes = [2, 128], strides = [1, 1]} : vector<20x256xf32> to vector<2x128xf32>
    %146 = vector.extract_strided_slice %71 {offsets = [16, 128], sizes = [2, 128], strides = [1, 1]} : vector<20x256xf32> to vector<2x128xf32>
    %147 = tpu.concatenate %145, %146 in 1 : vector<2x128xf32>, vector<2x128xf32> -> vector<2x256xf32>
    %148 = tpu.concatenate %139, %144 in 1 : vector<2x32xf32>, vector<2x32xf32> -> vector<2x64xf32>
    %c0_79 = arith.constant 0 : index
    %c0_80 = arith.constant 0 : index
    %149 = vector.load %arg11[%c0_79, %c0_80] : memref<64x256xf32, #tpu.memory_space<vmem>>, vector<64x256xf32>
    %cst_81 = arith.constant dense<0.000000e+00> : vector<2x256xf32>
    %150 = tpu.matmul %148, %149, %cst_81 {dimension_numbers = #tpu.dot_dimension_numbers<[1], [0], [0], [1], [0, 0, 1, 1], [], []>} : vector<2x64xf32>, vector<64x256xf32>, vector<2x256xf32> -> vector<2x256xf32>
    %151 = arith.addf %147, %150 : vector<2x256xf32>
    %152 = vector.extract_strided_slice %151 {offsets = [0, 0], sizes = [2, 32], strides = [1, 1]} : vector<2x256xf32> to vector<2x32xf32>
    %cst_82 = arith.constant 0.000000e+00 : f32
    %153 = vector.broadcast %cst_82 : f32 to vector<2x32xf32>
    %154 = arith.subf %153, %152 : vector<2x32xf32>
    %155 = math.exp %154 : vector<2x32xf32>
    %cst_83 = arith.constant 1.000000e+00 : f32
    %156 = vector.broadcast %cst_83 : f32 to vector<2x32xf32>
    %157 = arith.addf %156, %155 : vector<2x32xf32>
    %cst_84 = arith.constant 1.000000e+00 : f32
    %158 = vector.broadcast %cst_84 : f32 to vector<2x32xf32>
    %159 = arith.divf %158, %157 : vector<2x32xf32>
    %160 = vector.extract_strided_slice %151 {offsets = [0, 32], sizes = [2, 32], strides = [1, 1]} : vector<2x256xf32> to vector<2x32xf32>
    %cst_85 = arith.constant 0.000000e+00 : f32
    %161 = vector.broadcast %cst_85 : f32 to vector<2x32xf32>
    %162 = arith.subf %161, %160 : vector<2x32xf32>
    %163 = math.exp %162 : vector<2x32xf32>
    %cst_86 = arith.constant 1.000000e+00 : f32
    %164 = vector.broadcast %cst_86 : f32 to vector<2x32xf32>
    %165 = arith.addf %164, %163 : vector<2x32xf32>
    %cst_87 = arith.constant 1.000000e+00 : f32
    %166 = vector.broadcast %cst_87 : f32 to vector<2x32xf32>
    %167 = arith.divf %166, %165 : vector<2x32xf32>
    %168 = vector.extract_strided_slice %151 {offsets = [0, 64], sizes = [2, 32], strides = [1, 1]} : vector<2x256xf32> to vector<2x32xf32>
    %169 = math.tanh %168 : vector<2x32xf32>
    %170 = vector.extract_strided_slice %151 {offsets = [0, 96], sizes = [2, 32], strides = [1, 1]} : vector<2x256xf32> to vector<2x32xf32>
    %cst_88 = arith.constant 0.000000e+00 : f32
    %171 = vector.broadcast %cst_88 : f32 to vector<2x32xf32>
    %172 = arith.subf %171, %170 : vector<2x32xf32>
    %173 = math.exp %172 : vector<2x32xf32>
    %cst_89 = arith.constant 1.000000e+00 : f32
    %174 = vector.broadcast %cst_89 : f32 to vector<2x32xf32>
    %175 = arith.addf %174, %173 : vector<2x32xf32>
    %cst_90 = arith.constant 1.000000e+00 : f32
    %176 = vector.broadcast %cst_90 : f32 to vector<2x32xf32>
    %177 = arith.divf %176, %175 : vector<2x32xf32>
    %178 = vector.extract_strided_slice %151 {offsets = [0, 128], sizes = [2, 32], strides = [1, 1]} : vector<2x256xf32> to vector<2x32xf32>
    %cst_91 = arith.constant 0.000000e+00 : f32
    %179 = vector.broadcast %cst_91 : f32 to vector<2x32xf32>
    %180 = arith.subf %179, %178 : vector<2x32xf32>
    %181 = math.exp %180 : vector<2x32xf32>
    %cst_92 = arith.constant 1.000000e+00 : f32
    %182 = vector.broadcast %cst_92 : f32 to vector<2x32xf32>
    %183 = arith.addf %182, %181 : vector<2x32xf32>
    %cst_93 = arith.constant 1.000000e+00 : f32
    %184 = vector.broadcast %cst_93 : f32 to vector<2x32xf32>
    %185 = arith.divf %184, %183 : vector<2x32xf32>
    %186 = vector.extract_strided_slice %151 {offsets = [0, 160], sizes = [2, 32], strides = [1, 1]} : vector<2x256xf32> to vector<2x32xf32>
    %cst_94 = arith.constant 0.000000e+00 : f32
    %187 = vector.broadcast %cst_94 : f32 to vector<2x32xf32>
    %188 = arith.subf %187, %186 : vector<2x32xf32>
    %189 = math.exp %188 : vector<2x32xf32>
    %cst_95 = arith.constant 1.000000e+00 : f32
    %190 = vector.broadcast %cst_95 : f32 to vector<2x32xf32>
    %191 = arith.addf %190, %189 : vector<2x32xf32>
    %cst_96 = arith.constant 1.000000e+00 : f32
    %192 = vector.broadcast %cst_96 : f32 to vector<2x32xf32>
    %193 = arith.divf %192, %191 : vector<2x32xf32>
    %194 = vector.extract_strided_slice %151 {offsets = [0, 192], sizes = [2, 32], strides = [1, 1]} : vector<2x256xf32> to vector<2x32xf32>
    %195 = math.tanh %194 : vector<2x32xf32>
    %196 = vector.extract_strided_slice %151 {offsets = [0, 224], sizes = [2, 32], strides = [1, 1]} : vector<2x256xf32> to vector<2x32xf32>
    %cst_97 = arith.constant 0.000000e+00 : f32
    %197 = vector.broadcast %cst_97 : f32 to vector<2x32xf32>
    %198 = arith.subf %197, %196 : vector<2x32xf32>
    %199 = math.exp %198 : vector<2x32xf32>
    %cst_98 = arith.constant 1.000000e+00 : f32
    %200 = vector.broadcast %cst_98 : f32 to vector<2x32xf32>
    %201 = arith.addf %200, %199 : vector<2x32xf32>
    %cst_99 = arith.constant 1.000000e+00 : f32
    %202 = vector.broadcast %cst_99 : f32 to vector<2x32xf32>
    %203 = arith.divf %202, %201 : vector<2x32xf32>
    %204 = arith.mulf %167, %137 : vector<2x32xf32>
    %205 = arith.mulf %159, %169 : vector<2x32xf32>
    %206 = arith.addf %204, %205 : vector<2x32xf32>
    %207 = math.tanh %206 : vector<2x32xf32>
    %208 = arith.mulf %177, %207 : vector<2x32xf32>
    %209 = arith.mulf %193, %142 : vector<2x32xf32>
    %210 = arith.mulf %185, %195 : vector<2x32xf32>
    %211 = arith.addf %209, %210 : vector<2x32xf32>
    %212 = math.tanh %211 : vector<2x32xf32>
    %213 = arith.mulf %203, %212 : vector<2x32xf32>
    %214 = vector.extract_strided_slice %71 {offsets = [4, 0], sizes = [2, 128], strides = [1, 1]} : vector<20x256xf32> to vector<2x128xf32>
    %215 = vector.extract_strided_slice %71 {offsets = [14, 128], sizes = [2, 128], strides = [1, 1]} : vector<20x256xf32> to vector<2x128xf32>
    %216 = tpu.concatenate %214, %215 in 1 : vector<2x128xf32>, vector<2x128xf32> -> vector<2x256xf32>
    %217 = tpu.concatenate %208, %213 in 1 : vector<2x32xf32>, vector<2x32xf32> -> vector<2x64xf32>
    %c0_100 = arith.constant 0 : index
    %c0_101 = arith.constant 0 : index
    %218 = vector.load %arg11[%c0_100, %c0_101] : memref<64x256xf32, #tpu.memory_space<vmem>>, vector<64x256xf32>
    %cst_102 = arith.constant dense<0.000000e+00> : vector<2x256xf32>
    %219 = tpu.matmul %217, %218, %cst_102 {dimension_numbers = #tpu.dot_dimension_numbers<[1], [0], [0], [1], [0, 0, 1, 1], [], []>} : vector<2x64xf32>, vector<64x256xf32>, vector<2x256xf32> -> vector<2x256xf32>
    %220 = arith.addf %216, %219 : vector<2x256xf32>
    %221 = vector.extract_strided_slice %220 {offsets = [0, 0], sizes = [2, 32], strides = [1, 1]} : vector<2x256xf32> to vector<2x32xf32>
    %cst_103 = arith.constant 0.000000e+00 : f32
    %222 = vector.broadcast %cst_103 : f32 to vector<2x32xf32>
    %223 = arith.subf %222, %221 : vector<2x32xf32>
    %224 = math.exp %223 : vector<2x32xf32>
    %cst_104 = arith.constant 1.000000e+00 : f32
    %225 = vector.broadcast %cst_104 : f32 to vector<2x32xf32>
    %226 = arith.addf %225, %224 : vector<2x32xf32>
    %cst_105 = arith.constant 1.000000e+00 : f32
    %227 = vector.broadcast %cst_105 : f32 to vector<2x32xf32>
    %228 = arith.divf %227, %226 : vector<2x32xf32>
    %229 = vector.extract_strided_slice %220 {offsets = [0, 32], sizes = [2, 32], strides = [1, 1]} : vector<2x256xf32> to vector<2x32xf32>
    %cst_106 = arith.constant 0.000000e+00 : f32
    %230 = vector.broadcast %cst_106 : f32 to vector<2x32xf32>
    %231 = arith.subf %230, %229 : vector<2x32xf32>
    %232 = math.exp %231 : vector<2x32xf32>
    %cst_107 = arith.constant 1.000000e+00 : f32
    %233 = vector.broadcast %cst_107 : f32 to vector<2x32xf32>
    %234 = arith.addf %233, %232 : vector<2x32xf32>
    %cst_108 = arith.constant 1.000000e+00 : f32
    %235 = vector.broadcast %cst_108 : f32 to vector<2x32xf32>
    %236 = arith.divf %235, %234 : vector<2x32xf32>
    %237 = vector.extract_strided_slice %220 {offsets = [0, 64], sizes = [2, 32], strides = [1, 1]} : vector<2x256xf32> to vector<2x32xf32>
    %238 = math.tanh %237 : vector<2x32xf32>
    %239 = vector.extract_strided_slice %220 {offsets = [0, 96], sizes = [2, 32], strides = [1, 1]} : vector<2x256xf32> to vector<2x32xf32>
    %cst_109 = arith.constant 0.000000e+00 : f32
    %240 = vector.broadcast %cst_109 : f32 to vector<2x32xf32>
    %241 = arith.subf %240, %239 : vector<2x32xf32>
    %242 = math.exp %241 : vector<2x32xf32>
    %cst_110 = arith.constant 1.000000e+00 : f32
    %243 = vector.broadcast %cst_110 : f32 to vector<2x32xf32>
    %244 = arith.addf %243, %242 : vector<2x32xf32>
    %cst_111 = arith.constant 1.000000e+00 : f32
    %245 = vector.broadcast %cst_111 : f32 to vector<2x32xf32>
    %246 = arith.divf %245, %244 : vector<2x32xf32>
    %247 = vector.extract_strided_slice %220 {offsets = [0, 128], sizes = [2, 32], strides = [1, 1]} : vector<2x256xf32> to vector<2x32xf32>
    %cst_112 = arith.constant 0.000000e+00 : f32
    %248 = vector.broadcast %cst_112 : f32 to vector<2x32xf32>
    %249 = arith.subf %248, %247 : vector<2x32xf32>
    %250 = math.exp %249 : vector<2x32xf32>
    %cst_113 = arith.constant 1.000000e+00 : f32
    %251 = vector.broadcast %cst_113 : f32 to vector<2x32xf32>
    %252 = arith.addf %251, %250 : vector<2x32xf32>
    %cst_114 = arith.constant 1.000000e+00 : f32
    %253 = vector.broadcast %cst_114 : f32 to vector<2x32xf32>
    %254 = arith.divf %253, %252 : vector<2x32xf32>
    %255 = vector.extract_strided_slice %220 {offsets = [0, 160], sizes = [2, 32], strides = [1, 1]} : vector<2x256xf32> to vector<2x32xf32>
    %cst_115 = arith.constant 0.000000e+00 : f32
    %256 = vector.broadcast %cst_115 : f32 to vector<2x32xf32>
    %257 = arith.subf %256, %255 : vector<2x32xf32>
    %258 = math.exp %257 : vector<2x32xf32>
    %cst_116 = arith.constant 1.000000e+00 : f32
    %259 = vector.broadcast %cst_116 : f32 to vector<2x32xf32>
    %260 = arith.addf %259, %258 : vector<2x32xf32>
    %cst_117 = arith.constant 1.000000e+00 : f32
    %261 = vector.broadcast %cst_117 : f32 to vector<2x32xf32>
    %262 = arith.divf %261, %260 : vector<2x32xf32>
    %263 = vector.extract_strided_slice %220 {offsets = [0, 192], sizes = [2, 32], strides = [1, 1]} : vector<2x256xf32> to vector<2x32xf32>
    %264 = math.tanh %263 : vector<2x32xf32>
    %265 = vector.extract_strided_slice %220 {offsets = [0, 224], sizes = [2, 32], strides = [1, 1]} : vector<2x256xf32> to vector<2x32xf32>
    %cst_118 = arith.constant 0.000000e+00 : f32
    %266 = vector.broadcast %cst_118 : f32 to vector<2x32xf32>
    %267 = arith.subf %266, %265 : vector<2x32xf32>
    %268 = math.exp %267 : vector<2x32xf32>
    %cst_119 = arith.constant 1.000000e+00 : f32
    %269 = vector.broadcast %cst_119 : f32 to vector<2x32xf32>
    %270 = arith.addf %269, %268 : vector<2x32xf32>
    %cst_120 = arith.constant 1.000000e+00 : f32
    %271 = vector.broadcast %cst_120 : f32 to vector<2x32xf32>
    %272 = arith.divf %271, %270 : vector<2x32xf32>
    %273 = arith.mulf %236, %206 : vector<2x32xf32>
    %274 = arith.mulf %228, %238 : vector<2x32xf32>
    %275 = arith.addf %273, %274 : vector<2x32xf32>
    %276 = math.tanh %275 : vector<2x32xf32>
    %277 = arith.mulf %246, %276 : vector<2x32xf32>
    %278 = arith.mulf %262, %211 : vector<2x32xf32>
    %279 = arith.mulf %254, %264 : vector<2x32xf32>
    %280 = arith.addf %278, %279 : vector<2x32xf32>
    %281 = math.tanh %280 : vector<2x32xf32>
    %282 = arith.mulf %272, %281 : vector<2x32xf32>
    %283 = vector.extract_strided_slice %71 {offsets = [6, 0], sizes = [2, 128], strides = [1, 1]} : vector<20x256xf32> to vector<2x128xf32>
    %284 = vector.extract_strided_slice %71 {offsets = [12, 128], sizes = [2, 128], strides = [1, 1]} : vector<20x256xf32> to vector<2x128xf32>
    %285 = tpu.concatenate %283, %284 in 1 : vector<2x128xf32>, vector<2x128xf32> -> vector<2x256xf32>
    %286 = tpu.concatenate %277, %282 in 1 : vector<2x32xf32>, vector<2x32xf32> -> vector<2x64xf32>
    %c0_121 = arith.constant 0 : index
    %c0_122 = arith.constant 0 : index
    %287 = vector.load %arg11[%c0_121, %c0_122] : memref<64x256xf32, #tpu.memory_space<vmem>>, vector<64x256xf32>
    %cst_123 = arith.constant dense<0.000000e+00> : vector<2x256xf32>
    %288 = tpu.matmul %286, %287, %cst_123 {dimension_numbers = #tpu.dot_dimension_numbers<[1], [0], [0], [1], [0, 0, 1, 1], [], []>} : vector<2x64xf32>, vector<64x256xf32>, vector<2x256xf32> -> vector<2x256xf32>
    %289 = arith.addf %285, %288 : vector<2x256xf32>
    %290 = vector.extract_strided_slice %289 {offsets = [0, 0], sizes = [2, 32], strides = [1, 1]} : vector<2x256xf32> to vector<2x32xf32>
    %cst_124 = arith.constant 0.000000e+00 : f32
    %291 = vector.broadcast %cst_124 : f32 to vector<2x32xf32>
    %292 = arith.subf %291, %290 : vector<2x32xf32>
    %293 = math.exp %292 : vector<2x32xf32>
    %cst_125 = arith.constant 1.000000e+00 : f32
    %294 = vector.broadcast %cst_125 : f32 to vector<2x32xf32>
    %295 = arith.addf %294, %293 : vector<2x32xf32>
    %cst_126 = arith.constant 1.000000e+00 : f32
    %296 = vector.broadcast %cst_126 : f32 to vector<2x32xf32>
    %297 = arith.divf %296, %295 : vector<2x32xf32>
    %298 = vector.extract_strided_slice %289 {offsets = [0, 32], sizes = [2, 32], strides = [1, 1]} : vector<2x256xf32> to vector<2x32xf32>
    %cst_127 = arith.constant 0.000000e+00 : f32
    %299 = vector.broadcast %cst_127 : f32 to vector<2x32xf32>
    %300 = arith.subf %299, %298 : vector<2x32xf32>
    %301 = math.exp %300 : vector<2x32xf32>
    %cst_128 = arith.constant 1.000000e+00 : f32
    %302 = vector.broadcast %cst_128 : f32 to vector<2x32xf32>
    %303 = arith.addf %302, %301 : vector<2x32xf32>
    %cst_129 = arith.constant 1.000000e+00 : f32
    %304 = vector.broadcast %cst_129 : f32 to vector<2x32xf32>
    %305 = arith.divf %304, %303 : vector<2x32xf32>
    %306 = vector.extract_strided_slice %289 {offsets = [0, 64], sizes = [2, 32], strides = [1, 1]} : vector<2x256xf32> to vector<2x32xf32>
    %307 = math.tanh %306 : vector<2x32xf32>
    %308 = vector.extract_strided_slice %289 {offsets = [0, 96], sizes = [2, 32], strides = [1, 1]} : vector<2x256xf32> to vector<2x32xf32>
    %cst_130 = arith.constant 0.000000e+00 : f32
    %309 = vector.broadcast %cst_130 : f32 to vector<2x32xf32>
    %310 = arith.subf %309, %308 : vector<2x32xf32>
    %311 = math.exp %310 : vector<2x32xf32>
    %cst_131 = arith.constant 1.000000e+00 : f32
    %312 = vector.broadcast %cst_131 : f32 to vector<2x32xf32>
    %313 = arith.addf %312, %311 : vector<2x32xf32>
    %cst_132 = arith.constant 1.000000e+00 : f32
    %314 = vector.broadcast %cst_132 : f32 to vector<2x32xf32>
    %315 = arith.divf %314, %313 : vector<2x32xf32>
    %316 = vector.extract_strided_slice %289 {offsets = [0, 128], sizes = [2, 32], strides = [1, 1]} : vector<2x256xf32> to vector<2x32xf32>
    %cst_133 = arith.constant 0.000000e+00 : f32
    %317 = vector.broadcast %cst_133 : f32 to vector<2x32xf32>
    %318 = arith.subf %317, %316 : vector<2x32xf32>
    %319 = math.exp %318 : vector<2x32xf32>
    %cst_134 = arith.constant 1.000000e+00 : f32
    %320 = vector.broadcast %cst_134 : f32 to vector<2x32xf32>
    %321 = arith.addf %320, %319 : vector<2x32xf32>
    %cst_135 = arith.constant 1.000000e+00 : f32
    %322 = vector.broadcast %cst_135 : f32 to vector<2x32xf32>
    %323 = arith.divf %322, %321 : vector<2x32xf32>
    %324 = vector.extract_strided_slice %289 {offsets = [0, 160], sizes = [2, 32], strides = [1, 1]} : vector<2x256xf32> to vector<2x32xf32>
    %cst_136 = arith.constant 0.000000e+00 : f32
    %325 = vector.broadcast %cst_136 : f32 to vector<2x32xf32>
    %326 = arith.subf %325, %324 : vector<2x32xf32>
    %327 = math.exp %326 : vector<2x32xf32>
    %cst_137 = arith.constant 1.000000e+00 : f32
    %328 = vector.broadcast %cst_137 : f32 to vector<2x32xf32>
    %329 = arith.addf %328, %327 : vector<2x32xf32>
    %cst_138 = arith.constant 1.000000e+00 : f32
    %330 = vector.broadcast %cst_138 : f32 to vector<2x32xf32>
    %331 = arith.divf %330, %329 : vector<2x32xf32>
    %332 = vector.extract_strided_slice %289 {offsets = [0, 192], sizes = [2, 32], strides = [1, 1]} : vector<2x256xf32> to vector<2x32xf32>
    %333 = math.tanh %332 : vector<2x32xf32>
    %334 = vector.extract_strided_slice %289 {offsets = [0, 224], sizes = [2, 32], strides = [1, 1]} : vector<2x256xf32> to vector<2x32xf32>
    %cst_139 = arith.constant 0.000000e+00 : f32
    %335 = vector.broadcast %cst_139 : f32 to vector<2x32xf32>
    %336 = arith.subf %335, %334 : vector<2x32xf32>
    %337 = math.exp %336 : vector<2x32xf32>
    %cst_140 = arith.constant 1.000000e+00 : f32
    %338 = vector.broadcast %cst_140 : f32 to vector<2x32xf32>
    %339 = arith.addf %338, %337 : vector<2x32xf32>
    %cst_141 = arith.constant 1.000000e+00 : f32
    %340 = vector.broadcast %cst_141 : f32 to vector<2x32xf32>
    %341 = arith.divf %340, %339 : vector<2x32xf32>
    %342 = arith.mulf %305, %275 : vector<2x32xf32>
    %343 = arith.mulf %297, %307 : vector<2x32xf32>
    %344 = arith.addf %342, %343 : vector<2x32xf32>
    %345 = math.tanh %344 : vector<2x32xf32>
    %346 = arith.mulf %315, %345 : vector<2x32xf32>
    %347 = arith.mulf %331, %280 : vector<2x32xf32>
    %348 = arith.mulf %323, %333 : vector<2x32xf32>
    %349 = arith.addf %347, %348 : vector<2x32xf32>
    %350 = math.tanh %349 : vector<2x32xf32>
    %351 = arith.mulf %341, %350 : vector<2x32xf32>
    %352 = vector.extract_strided_slice %71 {offsets = [8, 0], sizes = [2, 128], strides = [1, 1]} : vector<20x256xf32> to vector<2x128xf32>
    %353 = vector.extract_strided_slice %71 {offsets = [10, 128], sizes = [2, 128], strides = [1, 1]} : vector<20x256xf32> to vector<2x128xf32>
    %354 = tpu.concatenate %352, %353 in 1 : vector<2x128xf32>, vector<2x128xf32> -> vector<2x256xf32>
    %355 = tpu.concatenate %346, %351 in 1 : vector<2x32xf32>, vector<2x32xf32> -> vector<2x64xf32>
    %c0_142 = arith.constant 0 : index
    %c0_143 = arith.constant 0 : index
    %356 = vector.load %arg11[%c0_142, %c0_143] : memref<64x256xf32, #tpu.memory_space<vmem>>, vector<64x256xf32>
    %cst_144 = arith.constant dense<0.000000e+00> : vector<2x256xf32>
    %357 = tpu.matmul %355, %356, %cst_144 {dimension_numbers = #tpu.dot_dimension_numbers<[1], [0], [0], [1], [0, 0, 1, 1], [], []>} : vector<2x64xf32>, vector<64x256xf32>, vector<2x256xf32> -> vector<2x256xf32>
    %358 = arith.addf %354, %357 : vector<2x256xf32>
    %359 = vector.extract_strided_slice %358 {offsets = [0, 0], sizes = [2, 32], strides = [1, 1]} : vector<2x256xf32> to vector<2x32xf32>
    %cst_145 = arith.constant 0.000000e+00 : f32
    %360 = vector.broadcast %cst_145 : f32 to vector<2x32xf32>
    %361 = arith.subf %360, %359 : vector<2x32xf32>
    %362 = math.exp %361 : vector<2x32xf32>
    %cst_146 = arith.constant 1.000000e+00 : f32
    %363 = vector.broadcast %cst_146 : f32 to vector<2x32xf32>
    %364 = arith.addf %363, %362 : vector<2x32xf32>
    %cst_147 = arith.constant 1.000000e+00 : f32
    %365 = vector.broadcast %cst_147 : f32 to vector<2x32xf32>
    %366 = arith.divf %365, %364 : vector<2x32xf32>
    %367 = vector.extract_strided_slice %358 {offsets = [0, 32], sizes = [2, 32], strides = [1, 1]} : vector<2x256xf32> to vector<2x32xf32>
    %cst_148 = arith.constant 0.000000e+00 : f32
    %368 = vector.broadcast %cst_148 : f32 to vector<2x32xf32>
    %369 = arith.subf %368, %367 : vector<2x32xf32>
    %370 = math.exp %369 : vector<2x32xf32>
    %cst_149 = arith.constant 1.000000e+00 : f32
    %371 = vector.broadcast %cst_149 : f32 to vector<2x32xf32>
    %372 = arith.addf %371, %370 : vector<2x32xf32>
    %cst_150 = arith.constant 1.000000e+00 : f32
    %373 = vector.broadcast %cst_150 : f32 to vector<2x32xf32>
    %374 = arith.divf %373, %372 : vector<2x32xf32>
    %375 = vector.extract_strided_slice %358 {offsets = [0, 64], sizes = [2, 32], strides = [1, 1]} : vector<2x256xf32> to vector<2x32xf32>
    %376 = math.tanh %375 : vector<2x32xf32>
    %377 = vector.extract_strided_slice %358 {offsets = [0, 96], sizes = [2, 32], strides = [1, 1]} : vector<2x256xf32> to vector<2x32xf32>
    %cst_151 = arith.constant 0.000000e+00 : f32
    %378 = vector.broadcast %cst_151 : f32 to vector<2x32xf32>
    %379 = arith.subf %378, %377 : vector<2x32xf32>
    %380 = math.exp %379 : vector<2x32xf32>
    %cst_152 = arith.constant 1.000000e+00 : f32
    %381 = vector.broadcast %cst_152 : f32 to vector<2x32xf32>
    %382 = arith.addf %381, %380 : vector<2x32xf32>
    %cst_153 = arith.constant 1.000000e+00 : f32
    %383 = vector.broadcast %cst_153 : f32 to vector<2x32xf32>
    %384 = arith.divf %383, %382 : vector<2x32xf32>
    %385 = vector.extract_strided_slice %358 {offsets = [0, 128], sizes = [2, 32], strides = [1, 1]} : vector<2x256xf32> to vector<2x32xf32>
    %cst_154 = arith.constant 0.000000e+00 : f32
    %386 = vector.broadcast %cst_154 : f32 to vector<2x32xf32>
    %387 = arith.subf %386, %385 : vector<2x32xf32>
    %388 = math.exp %387 : vector<2x32xf32>
    %cst_155 = arith.constant 1.000000e+00 : f32
    %389 = vector.broadcast %cst_155 : f32 to vector<2x32xf32>
    %390 = arith.addf %389, %388 : vector<2x32xf32>
    %cst_156 = arith.constant 1.000000e+00 : f32
    %391 = vector.broadcast %cst_156 : f32 to vector<2x32xf32>
    %392 = arith.divf %391, %390 : vector<2x32xf32>
    %393 = vector.extract_strided_slice %358 {offsets = [0, 160], sizes = [2, 32], strides = [1, 1]} : vector<2x256xf32> to vector<2x32xf32>
    %cst_157 = arith.constant 0.000000e+00 : f32
    %394 = vector.broadcast %cst_157 : f32 to vector<2x32xf32>
    %395 = arith.subf %394, %393 : vector<2x32xf32>
    %396 = math.exp %395 : vector<2x32xf32>
    %cst_158 = arith.constant 1.000000e+00 : f32
    %397 = vector.broadcast %cst_158 : f32 to vector<2x32xf32>
    %398 = arith.addf %397, %396 : vector<2x32xf32>
    %cst_159 = arith.constant 1.000000e+00 : f32
    %399 = vector.broadcast %cst_159 : f32 to vector<2x32xf32>
    %400 = arith.divf %399, %398 : vector<2x32xf32>
    %401 = vector.extract_strided_slice %358 {offsets = [0, 192], sizes = [2, 32], strides = [1, 1]} : vector<2x256xf32> to vector<2x32xf32>
    %402 = math.tanh %401 : vector<2x32xf32>
    %403 = vector.extract_strided_slice %358 {offsets = [0, 224], sizes = [2, 32], strides = [1, 1]} : vector<2x256xf32> to vector<2x32xf32>
    %cst_160 = arith.constant 0.000000e+00 : f32
    %404 = vector.broadcast %cst_160 : f32 to vector<2x32xf32>
    %405 = arith.subf %404, %403 : vector<2x32xf32>
    %406 = math.exp %405 : vector<2x32xf32>
    %cst_161 = arith.constant 1.000000e+00 : f32
    %407 = vector.broadcast %cst_161 : f32 to vector<2x32xf32>
    %408 = arith.addf %407, %406 : vector<2x32xf32>
    %cst_162 = arith.constant 1.000000e+00 : f32
    %409 = vector.broadcast %cst_162 : f32 to vector<2x32xf32>
    %410 = arith.divf %409, %408 : vector<2x32xf32>
    %411 = arith.mulf %374, %344 : vector<2x32xf32>
    %412 = arith.mulf %366, %376 : vector<2x32xf32>
    %413 = arith.addf %411, %412 : vector<2x32xf32>
    %414 = math.tanh %413 : vector<2x32xf32>
    %415 = arith.mulf %384, %414 : vector<2x32xf32>
    %416 = arith.mulf %400, %349 : vector<2x32xf32>
    %417 = arith.mulf %392, %402 : vector<2x32xf32>
    %418 = arith.addf %416, %417 : vector<2x32xf32>
    %419 = math.tanh %418 : vector<2x32xf32>
    %420 = arith.mulf %410, %419 : vector<2x32xf32>
    %421 = vector.extract_strided_slice %71 {offsets = [10, 0], sizes = [2, 128], strides = [1, 1]} : vector<20x256xf32> to vector<2x128xf32>
    %422 = vector.extract_strided_slice %71 {offsets = [8, 128], sizes = [2, 128], strides = [1, 1]} : vector<20x256xf32> to vector<2x128xf32>
    %423 = tpu.concatenate %421, %422 in 1 : vector<2x128xf32>, vector<2x128xf32> -> vector<2x256xf32>
    %424 = tpu.concatenate %415, %420 in 1 : vector<2x32xf32>, vector<2x32xf32> -> vector<2x64xf32>
    %c0_163 = arith.constant 0 : index
    %c0_164 = arith.constant 0 : index
    %425 = vector.load %arg11[%c0_163, %c0_164] : memref<64x256xf32, #tpu.memory_space<vmem>>, vector<64x256xf32>
    %cst_165 = arith.constant dense<0.000000e+00> : vector<2x256xf32>
    %426 = tpu.matmul %424, %425, %cst_165 {dimension_numbers = #tpu.dot_dimension_numbers<[1], [0], [0], [1], [0, 0, 1, 1], [], []>} : vector<2x64xf32>, vector<64x256xf32>, vector<2x256xf32> -> vector<2x256xf32>
    %427 = arith.addf %423, %426 : vector<2x256xf32>
    %428 = vector.extract_strided_slice %427 {offsets = [0, 0], sizes = [2, 32], strides = [1, 1]} : vector<2x256xf32> to vector<2x32xf32>
    %cst_166 = arith.constant 0.000000e+00 : f32
    %429 = vector.broadcast %cst_166 : f32 to vector<2x32xf32>
    %430 = arith.subf %429, %428 : vector<2x32xf32>
    %431 = math.exp %430 : vector<2x32xf32>
    %cst_167 = arith.constant 1.000000e+00 : f32
    %432 = vector.broadcast %cst_167 : f32 to vector<2x32xf32>
    %433 = arith.addf %432, %431 : vector<2x32xf32>
    %cst_168 = arith.constant 1.000000e+00 : f32
    %434 = vector.broadcast %cst_168 : f32 to vector<2x32xf32>
    %435 = arith.divf %434, %433 : vector<2x32xf32>
    %436 = vector.extract_strided_slice %427 {offsets = [0, 32], sizes = [2, 32], strides = [1, 1]} : vector<2x256xf32> to vector<2x32xf32>
    %cst_169 = arith.constant 0.000000e+00 : f32
    %437 = vector.broadcast %cst_169 : f32 to vector<2x32xf32>
    %438 = arith.subf %437, %436 : vector<2x32xf32>
    %439 = math.exp %438 : vector<2x32xf32>
    %cst_170 = arith.constant 1.000000e+00 : f32
    %440 = vector.broadcast %cst_170 : f32 to vector<2x32xf32>
    %441 = arith.addf %440, %439 : vector<2x32xf32>
    %cst_171 = arith.constant 1.000000e+00 : f32
    %442 = vector.broadcast %cst_171 : f32 to vector<2x32xf32>
    %443 = arith.divf %442, %441 : vector<2x32xf32>
    %444 = vector.extract_strided_slice %427 {offsets = [0, 64], sizes = [2, 32], strides = [1, 1]} : vector<2x256xf32> to vector<2x32xf32>
    %445 = math.tanh %444 : vector<2x32xf32>
    %446 = vector.extract_strided_slice %427 {offsets = [0, 96], sizes = [2, 32], strides = [1, 1]} : vector<2x256xf32> to vector<2x32xf32>
    %cst_172 = arith.constant 0.000000e+00 : f32
    %447 = vector.broadcast %cst_172 : f32 to vector<2x32xf32>
    %448 = arith.subf %447, %446 : vector<2x32xf32>
    %449 = math.exp %448 : vector<2x32xf32>
    %cst_173 = arith.constant 1.000000e+00 : f32
    %450 = vector.broadcast %cst_173 : f32 to vector<2x32xf32>
    %451 = arith.addf %450, %449 : vector<2x32xf32>
    %cst_174 = arith.constant 1.000000e+00 : f32
    %452 = vector.broadcast %cst_174 : f32 to vector<2x32xf32>
    %453 = arith.divf %452, %451 : vector<2x32xf32>
    %454 = vector.extract_strided_slice %427 {offsets = [0, 128], sizes = [2, 32], strides = [1, 1]} : vector<2x256xf32> to vector<2x32xf32>
    %cst_175 = arith.constant 0.000000e+00 : f32
    %455 = vector.broadcast %cst_175 : f32 to vector<2x32xf32>
    %456 = arith.subf %455, %454 : vector<2x32xf32>
    %457 = math.exp %456 : vector<2x32xf32>
    %cst_176 = arith.constant 1.000000e+00 : f32
    %458 = vector.broadcast %cst_176 : f32 to vector<2x32xf32>
    %459 = arith.addf %458, %457 : vector<2x32xf32>
    %cst_177 = arith.constant 1.000000e+00 : f32
    %460 = vector.broadcast %cst_177 : f32 to vector<2x32xf32>
    %461 = arith.divf %460, %459 : vector<2x32xf32>
    %462 = vector.extract_strided_slice %427 {offsets = [0, 160], sizes = [2, 32], strides = [1, 1]} : vector<2x256xf32> to vector<2x32xf32>
    %cst_178 = arith.constant 0.000000e+00 : f32
    %463 = vector.broadcast %cst_178 : f32 to vector<2x32xf32>
    %464 = arith.subf %463, %462 : vector<2x32xf32>
    %465 = math.exp %464 : vector<2x32xf32>
    %cst_179 = arith.constant 1.000000e+00 : f32
    %466 = vector.broadcast %cst_179 : f32 to vector<2x32xf32>
    %467 = arith.addf %466, %465 : vector<2x32xf32>
    %cst_180 = arith.constant 1.000000e+00 : f32
    %468 = vector.broadcast %cst_180 : f32 to vector<2x32xf32>
    %469 = arith.divf %468, %467 : vector<2x32xf32>
    %470 = vector.extract_strided_slice %427 {offsets = [0, 192], sizes = [2, 32], strides = [1, 1]} : vector<2x256xf32> to vector<2x32xf32>
    %471 = math.tanh %470 : vector<2x32xf32>
    %472 = vector.extract_strided_slice %427 {offsets = [0, 224], sizes = [2, 32], strides = [1, 1]} : vector<2x256xf32> to vector<2x32xf32>
    %cst_181 = arith.constant 0.000000e+00 : f32
    %473 = vector.broadcast %cst_181 : f32 to vector<2x32xf32>
    %474 = arith.subf %473, %472 : vector<2x32xf32>
    %475 = math.exp %474 : vector<2x32xf32>
    %cst_182 = arith.constant 1.000000e+00 : f32
    %476 = vector.broadcast %cst_182 : f32 to vector<2x32xf32>
    %477 = arith.addf %476, %475 : vector<2x32xf32>
    %cst_183 = arith.constant 1.000000e+00 : f32
    %478 = vector.broadcast %cst_183 : f32 to vector<2x32xf32>
    %479 = arith.divf %478, %477 : vector<2x32xf32>
    %480 = arith.mulf %443, %413 : vector<2x32xf32>
    %481 = arith.mulf %435, %445 : vector<2x32xf32>
    %482 = arith.addf %480, %481 : vector<2x32xf32>
    %483 = math.tanh %482 : vector<2x32xf32>
    %484 = arith.mulf %453, %483 : vector<2x32xf32>
    %485 = arith.mulf %469, %418 : vector<2x32xf32>
    %486 = arith.mulf %461, %471 : vector<2x32xf32>
    %487 = arith.addf %485, %486 : vector<2x32xf32>
    %488 = math.tanh %487 : vector<2x32xf32>
    %489 = arith.mulf %479, %488 : vector<2x32xf32>
    %490 = vector.extract_strided_slice %71 {offsets = [12, 0], sizes = [2, 128], strides = [1, 1]} : vector<20x256xf32> to vector<2x128xf32>
    %491 = vector.extract_strided_slice %71 {offsets = [6, 128], sizes = [2, 128], strides = [1, 1]} : vector<20x256xf32> to vector<2x128xf32>
    %492 = tpu.concatenate %490, %491 in 1 : vector<2x128xf32>, vector<2x128xf32> -> vector<2x256xf32>
    %493 = tpu.concatenate %484, %489 in 1 : vector<2x32xf32>, vector<2x32xf32> -> vector<2x64xf32>
    %c0_184 = arith.constant 0 : index
    %c0_185 = arith.constant 0 : index
    %494 = vector.load %arg11[%c0_184, %c0_185] : memref<64x256xf32, #tpu.memory_space<vmem>>, vector<64x256xf32>
    %cst_186 = arith.constant dense<0.000000e+00> : vector<2x256xf32>
    %495 = tpu.matmul %493, %494, %cst_186 {dimension_numbers = #tpu.dot_dimension_numbers<[1], [0], [0], [1], [0, 0, 1, 1], [], []>} : vector<2x64xf32>, vector<64x256xf32>, vector<2x256xf32> -> vector<2x256xf32>
    %496 = arith.addf %492, %495 : vector<2x256xf32>
    %497 = vector.extract_strided_slice %496 {offsets = [0, 0], sizes = [2, 32], strides = [1, 1]} : vector<2x256xf32> to vector<2x32xf32>
    %cst_187 = arith.constant 0.000000e+00 : f32
    %498 = vector.broadcast %cst_187 : f32 to vector<2x32xf32>
    %499 = arith.subf %498, %497 : vector<2x32xf32>
    %500 = math.exp %499 : vector<2x32xf32>
    %cst_188 = arith.constant 1.000000e+00 : f32
    %501 = vector.broadcast %cst_188 : f32 to vector<2x32xf32>
    %502 = arith.addf %501, %500 : vector<2x32xf32>
    %cst_189 = arith.constant 1.000000e+00 : f32
    %503 = vector.broadcast %cst_189 : f32 to vector<2x32xf32>
    %504 = arith.divf %503, %502 : vector<2x32xf32>
    %505 = vector.extract_strided_slice %496 {offsets = [0, 32], sizes = [2, 32], strides = [1, 1]} : vector<2x256xf32> to vector<2x32xf32>
    %cst_190 = arith.constant 0.000000e+00 : f32
    %506 = vector.broadcast %cst_190 : f32 to vector<2x32xf32>
    %507 = arith.subf %506, %505 : vector<2x32xf32>
    %508 = math.exp %507 : vector<2x32xf32>
    %cst_191 = arith.constant 1.000000e+00 : f32
    %509 = vector.broadcast %cst_191 : f32 to vector<2x32xf32>
    %510 = arith.addf %509, %508 : vector<2x32xf32>
    %cst_192 = arith.constant 1.000000e+00 : f32
    %511 = vector.broadcast %cst_192 : f32 to vector<2x32xf32>
    %512 = arith.divf %511, %510 : vector<2x32xf32>
    %513 = vector.extract_strided_slice %496 {offsets = [0, 64], sizes = [2, 32], strides = [1, 1]} : vector<2x256xf32> to vector<2x32xf32>
    %514 = math.tanh %513 : vector<2x32xf32>
    %515 = vector.extract_strided_slice %496 {offsets = [0, 96], sizes = [2, 32], strides = [1, 1]} : vector<2x256xf32> to vector<2x32xf32>
    %cst_193 = arith.constant 0.000000e+00 : f32
    %516 = vector.broadcast %cst_193 : f32 to vector<2x32xf32>
    %517 = arith.subf %516, %515 : vector<2x32xf32>
    %518 = math.exp %517 : vector<2x32xf32>
    %cst_194 = arith.constant 1.000000e+00 : f32
    %519 = vector.broadcast %cst_194 : f32 to vector<2x32xf32>
    %520 = arith.addf %519, %518 : vector<2x32xf32>
    %cst_195 = arith.constant 1.000000e+00 : f32
    %521 = vector.broadcast %cst_195 : f32 to vector<2x32xf32>
    %522 = arith.divf %521, %520 : vector<2x32xf32>
    %523 = vector.extract_strided_slice %496 {offsets = [0, 128], sizes = [2, 32], strides = [1, 1]} : vector<2x256xf32> to vector<2x32xf32>
    %cst_196 = arith.constant 0.000000e+00 : f32
    %524 = vector.broadcast %cst_196 : f32 to vector<2x32xf32>
    %525 = arith.subf %524, %523 : vector<2x32xf32>
    %526 = math.exp %525 : vector<2x32xf32>
    %cst_197 = arith.constant 1.000000e+00 : f32
    %527 = vector.broadcast %cst_197 : f32 to vector<2x32xf32>
    %528 = arith.addf %527, %526 : vector<2x32xf32>
    %cst_198 = arith.constant 1.000000e+00 : f32
    %529 = vector.broadcast %cst_198 : f32 to vector<2x32xf32>
    %530 = arith.divf %529, %528 : vector<2x32xf32>
    %531 = vector.extract_strided_slice %496 {offsets = [0, 160], sizes = [2, 32], strides = [1, 1]} : vector<2x256xf32> to vector<2x32xf32>
    %cst_199 = arith.constant 0.000000e+00 : f32
    %532 = vector.broadcast %cst_199 : f32 to vector<2x32xf32>
    %533 = arith.subf %532, %531 : vector<2x32xf32>
    %534 = math.exp %533 : vector<2x32xf32>
    %cst_200 = arith.constant 1.000000e+00 : f32
    %535 = vector.broadcast %cst_200 : f32 to vector<2x32xf32>
    %536 = arith.addf %535, %534 : vector<2x32xf32>
    %cst_201 = arith.constant 1.000000e+00 : f32
    %537 = vector.broadcast %cst_201 : f32 to vector<2x32xf32>
    %538 = arith.divf %537, %536 : vector<2x32xf32>
    %539 = vector.extract_strided_slice %496 {offsets = [0, 192], sizes = [2, 32], strides = [1, 1]} : vector<2x256xf32> to vector<2x32xf32>
    %540 = math.tanh %539 : vector<2x32xf32>
    %541 = vector.extract_strided_slice %496 {offsets = [0, 224], sizes = [2, 32], strides = [1, 1]} : vector<2x256xf32> to vector<2x32xf32>
    %cst_202 = arith.constant 0.000000e+00 : f32
    %542 = vector.broadcast %cst_202 : f32 to vector<2x32xf32>
    %543 = arith.subf %542, %541 : vector<2x32xf32>
    %544 = math.exp %543 : vector<2x32xf32>
    %cst_203 = arith.constant 1.000000e+00 : f32
    %545 = vector.broadcast %cst_203 : f32 to vector<2x32xf32>
    %546 = arith.addf %545, %544 : vector<2x32xf32>
    %cst_204 = arith.constant 1.000000e+00 : f32
    %547 = vector.broadcast %cst_204 : f32 to vector<2x32xf32>
    %548 = arith.divf %547, %546 : vector<2x32xf32>
    %549 = arith.mulf %512, %482 : vector<2x32xf32>
    %550 = arith.mulf %504, %514 : vector<2x32xf32>
    %551 = arith.addf %549, %550 : vector<2x32xf32>
    %552 = math.tanh %551 : vector<2x32xf32>
    %553 = arith.mulf %522, %552 : vector<2x32xf32>
    %554 = arith.mulf %538, %487 : vector<2x32xf32>
    %555 = arith.mulf %530, %540 : vector<2x32xf32>
    %556 = arith.addf %554, %555 : vector<2x32xf32>
    %557 = math.tanh %556 : vector<2x32xf32>
    %558 = arith.mulf %548, %557 : vector<2x32xf32>
    %559 = vector.extract_strided_slice %71 {offsets = [14, 0], sizes = [2, 128], strides = [1, 1]} : vector<20x256xf32> to vector<2x128xf32>
    %560 = vector.extract_strided_slice %71 {offsets = [4, 128], sizes = [2, 128], strides = [1, 1]} : vector<20x256xf32> to vector<2x128xf32>
    %561 = tpu.concatenate %559, %560 in 1 : vector<2x128xf32>, vector<2x128xf32> -> vector<2x256xf32>
    %562 = tpu.concatenate %553, %558 in 1 : vector<2x32xf32>, vector<2x32xf32> -> vector<2x64xf32>
    %c0_205 = arith.constant 0 : index
    %c0_206 = arith.constant 0 : index
    %563 = vector.load %arg11[%c0_205, %c0_206] : memref<64x256xf32, #tpu.memory_space<vmem>>, vector<64x256xf32>
    %cst_207 = arith.constant dense<0.000000e+00> : vector<2x256xf32>
    %564 = tpu.matmul %562, %563, %cst_207 {dimension_numbers = #tpu.dot_dimension_numbers<[1], [0], [0], [1], [0, 0, 1, 1], [], []>} : vector<2x64xf32>, vector<64x256xf32>, vector<2x256xf32> -> vector<2x256xf32>
    %565 = arith.addf %561, %564 : vector<2x256xf32>
    %566 = vector.extract_strided_slice %565 {offsets = [0, 0], sizes = [2, 32], strides = [1, 1]} : vector<2x256xf32> to vector<2x32xf32>
    %cst_208 = arith.constant 0.000000e+00 : f32
    %567 = vector.broadcast %cst_208 : f32 to vector<2x32xf32>
    %568 = arith.subf %567, %566 : vector<2x32xf32>
    %569 = math.exp %568 : vector<2x32xf32>
    %cst_209 = arith.constant 1.000000e+00 : f32
    %570 = vector.broadcast %cst_209 : f32 to vector<2x32xf32>
    %571 = arith.addf %570, %569 : vector<2x32xf32>
    %cst_210 = arith.constant 1.000000e+00 : f32
    %572 = vector.broadcast %cst_210 : f32 to vector<2x32xf32>
    %573 = arith.divf %572, %571 : vector<2x32xf32>
    %574 = vector.extract_strided_slice %565 {offsets = [0, 32], sizes = [2, 32], strides = [1, 1]} : vector<2x256xf32> to vector<2x32xf32>
    %cst_211 = arith.constant 0.000000e+00 : f32
    %575 = vector.broadcast %cst_211 : f32 to vector<2x32xf32>
    %576 = arith.subf %575, %574 : vector<2x32xf32>
    %577 = math.exp %576 : vector<2x32xf32>
    %cst_212 = arith.constant 1.000000e+00 : f32
    %578 = vector.broadcast %cst_212 : f32 to vector<2x32xf32>
    %579 = arith.addf %578, %577 : vector<2x32xf32>
    %cst_213 = arith.constant 1.000000e+00 : f32
    %580 = vector.broadcast %cst_213 : f32 to vector<2x32xf32>
    %581 = arith.divf %580, %579 : vector<2x32xf32>
    %582 = vector.extract_strided_slice %565 {offsets = [0, 64], sizes = [2, 32], strides = [1, 1]} : vector<2x256xf32> to vector<2x32xf32>
    %583 = math.tanh %582 : vector<2x32xf32>
    %584 = vector.extract_strided_slice %565 {offsets = [0, 96], sizes = [2, 32], strides = [1, 1]} : vector<2x256xf32> to vector<2x32xf32>
    %cst_214 = arith.constant 0.000000e+00 : f32
    %585 = vector.broadcast %cst_214 : f32 to vector<2x32xf32>
    %586 = arith.subf %585, %584 : vector<2x32xf32>
    %587 = math.exp %586 : vector<2x32xf32>
    %cst_215 = arith.constant 1.000000e+00 : f32
    %588 = vector.broadcast %cst_215 : f32 to vector<2x32xf32>
    %589 = arith.addf %588, %587 : vector<2x32xf32>
    %cst_216 = arith.constant 1.000000e+00 : f32
    %590 = vector.broadcast %cst_216 : f32 to vector<2x32xf32>
    %591 = arith.divf %590, %589 : vector<2x32xf32>
    %592 = vector.extract_strided_slice %565 {offsets = [0, 128], sizes = [2, 32], strides = [1, 1]} : vector<2x256xf32> to vector<2x32xf32>
    %cst_217 = arith.constant 0.000000e+00 : f32
    %593 = vector.broadcast %cst_217 : f32 to vector<2x32xf32>
    %594 = arith.subf %593, %592 : vector<2x32xf32>
    %595 = math.exp %594 : vector<2x32xf32>
    %cst_218 = arith.constant 1.000000e+00 : f32
    %596 = vector.broadcast %cst_218 : f32 to vector<2x32xf32>
    %597 = arith.addf %596, %595 : vector<2x32xf32>
    %cst_219 = arith.constant 1.000000e+00 : f32
    %598 = vector.broadcast %cst_219 : f32 to vector<2x32xf32>
    %599 = arith.divf %598, %597 : vector<2x32xf32>
    %600 = vector.extract_strided_slice %565 {offsets = [0, 160], sizes = [2, 32], strides = [1, 1]} : vector<2x256xf32> to vector<2x32xf32>
    %cst_220 = arith.constant 0.000000e+00 : f32
    %601 = vector.broadcast %cst_220 : f32 to vector<2x32xf32>
    %602 = arith.subf %601, %600 : vector<2x32xf32>
    %603 = math.exp %602 : vector<2x32xf32>
    %cst_221 = arith.constant 1.000000e+00 : f32
    %604 = vector.broadcast %cst_221 : f32 to vector<2x32xf32>
    %605 = arith.addf %604, %603 : vector<2x32xf32>
    %cst_222 = arith.constant 1.000000e+00 : f32
    %606 = vector.broadcast %cst_222 : f32 to vector<2x32xf32>
    %607 = arith.divf %606, %605 : vector<2x32xf32>
    %608 = vector.extract_strided_slice %565 {offsets = [0, 192], sizes = [2, 32], strides = [1, 1]} : vector<2x256xf32> to vector<2x32xf32>
    %609 = math.tanh %608 : vector<2x32xf32>
    %610 = vector.extract_strided_slice %565 {offsets = [0, 224], sizes = [2, 32], strides = [1, 1]} : vector<2x256xf32> to vector<2x32xf32>
    %cst_223 = arith.constant 0.000000e+00 : f32
    %611 = vector.broadcast %cst_223 : f32 to vector<2x32xf32>
    %612 = arith.subf %611, %610 : vector<2x32xf32>
    %613 = math.exp %612 : vector<2x32xf32>
    %cst_224 = arith.constant 1.000000e+00 : f32
    %614 = vector.broadcast %cst_224 : f32 to vector<2x32xf32>
    %615 = arith.addf %614, %613 : vector<2x32xf32>
    %cst_225 = arith.constant 1.000000e+00 : f32
    %616 = vector.broadcast %cst_225 : f32 to vector<2x32xf32>
    %617 = arith.divf %616, %615 : vector<2x32xf32>
    %618 = arith.mulf %581, %551 : vector<2x32xf32>
    %619 = arith.mulf %573, %583 : vector<2x32xf32>
    %620 = arith.addf %618, %619 : vector<2x32xf32>
    %621 = math.tanh %620 : vector<2x32xf32>
    %622 = arith.mulf %591, %621 : vector<2x32xf32>
    %623 = arith.mulf %607, %556 : vector<2x32xf32>
    %624 = arith.mulf %599, %609 : vector<2x32xf32>
    %625 = arith.addf %623, %624 : vector<2x32xf32>
    %626 = math.tanh %625 : vector<2x32xf32>
    %627 = arith.mulf %617, %626 : vector<2x32xf32>
    %628 = vector.extract_strided_slice %71 {offsets = [16, 0], sizes = [2, 128], strides = [1, 1]} : vector<20x256xf32> to vector<2x128xf32>
    %629 = vector.extract_strided_slice %71 {offsets = [2, 128], sizes = [2, 128], strides = [1, 1]} : vector<20x256xf32> to vector<2x128xf32>
    %630 = tpu.concatenate %628, %629 in 1 : vector<2x128xf32>, vector<2x128xf32> -> vector<2x256xf32>
    %631 = tpu.concatenate %622, %627 in 1 : vector<2x32xf32>, vector<2x32xf32> -> vector<2x64xf32>
    %c0_226 = arith.constant 0 : index
    %c0_227 = arith.constant 0 : index
    %632 = vector.load %arg11[%c0_226, %c0_227] : memref<64x256xf32, #tpu.memory_space<vmem>>, vector<64x256xf32>
    %cst_228 = arith.constant dense<0.000000e+00> : vector<2x256xf32>
    %633 = tpu.matmul %631, %632, %cst_228 {dimension_numbers = #tpu.dot_dimension_numbers<[1], [0], [0], [1], [0, 0, 1, 1], [], []>} : vector<2x64xf32>, vector<64x256xf32>, vector<2x256xf32> -> vector<2x256xf32>
    %634 = arith.addf %630, %633 : vector<2x256xf32>
    %635 = vector.extract_strided_slice %634 {offsets = [0, 0], sizes = [2, 32], strides = [1, 1]} : vector<2x256xf32> to vector<2x32xf32>
    %cst_229 = arith.constant 0.000000e+00 : f32
    %636 = vector.broadcast %cst_229 : f32 to vector<2x32xf32>
    %637 = arith.subf %636, %635 : vector<2x32xf32>
    %638 = math.exp %637 : vector<2x32xf32>
    %cst_230 = arith.constant 1.000000e+00 : f32
    %639 = vector.broadcast %cst_230 : f32 to vector<2x32xf32>
    %640 = arith.addf %639, %638 : vector<2x32xf32>
    %cst_231 = arith.constant 1.000000e+00 : f32
    %641 = vector.broadcast %cst_231 : f32 to vector<2x32xf32>
    %642 = arith.divf %641, %640 : vector<2x32xf32>
    %643 = vector.extract_strided_slice %634 {offsets = [0, 32], sizes = [2, 32], strides = [1, 1]} : vector<2x256xf32> to vector<2x32xf32>
    %cst_232 = arith.constant 0.000000e+00 : f32
    %644 = vector.broadcast %cst_232 : f32 to vector<2x32xf32>
    %645 = arith.subf %644, %643 : vector<2x32xf32>
    %646 = math.exp %645 : vector<2x32xf32>
    %cst_233 = arith.constant 1.000000e+00 : f32
    %647 = vector.broadcast %cst_233 : f32 to vector<2x32xf32>
    %648 = arith.addf %647, %646 : vector<2x32xf32>
    %cst_234 = arith.constant 1.000000e+00 : f32
    %649 = vector.broadcast %cst_234 : f32 to vector<2x32xf32>
    %650 = arith.divf %649, %648 : vector<2x32xf32>
    %651 = vector.extract_strided_slice %634 {offsets = [0, 64], sizes = [2, 32], strides = [1, 1]} : vector<2x256xf32> to vector<2x32xf32>
    %652 = math.tanh %651 : vector<2x32xf32>
    %653 = vector.extract_strided_slice %634 {offsets = [0, 96], sizes = [2, 32], strides = [1, 1]} : vector<2x256xf32> to vector<2x32xf32>
    %cst_235 = arith.constant 0.000000e+00 : f32
    %654 = vector.broadcast %cst_235 : f32 to vector<2x32xf32>
    %655 = arith.subf %654, %653 : vector<2x32xf32>
    %656 = math.exp %655 : vector<2x32xf32>
    %cst_236 = arith.constant 1.000000e+00 : f32
    %657 = vector.broadcast %cst_236 : f32 to vector<2x32xf32>
    %658 = arith.addf %657, %656 : vector<2x32xf32>
    %cst_237 = arith.constant 1.000000e+00 : f32
    %659 = vector.broadcast %cst_237 : f32 to vector<2x32xf32>
    %660 = arith.divf %659, %658 : vector<2x32xf32>
    %661 = vector.extract_strided_slice %634 {offsets = [0, 128], sizes = [2, 32], strides = [1, 1]} : vector<2x256xf32> to vector<2x32xf32>
    %cst_238 = arith.constant 0.000000e+00 : f32
    %662 = vector.broadcast %cst_238 : f32 to vector<2x32xf32>
    %663 = arith.subf %662, %661 : vector<2x32xf32>
    %664 = math.exp %663 : vector<2x32xf32>
    %cst_239 = arith.constant 1.000000e+00 : f32
    %665 = vector.broadcast %cst_239 : f32 to vector<2x32xf32>
    %666 = arith.addf %665, %664 : vector<2x32xf32>
    %cst_240 = arith.constant 1.000000e+00 : f32
    %667 = vector.broadcast %cst_240 : f32 to vector<2x32xf32>
    %668 = arith.divf %667, %666 : vector<2x32xf32>
    %669 = vector.extract_strided_slice %634 {offsets = [0, 160], sizes = [2, 32], strides = [1, 1]} : vector<2x256xf32> to vector<2x32xf32>
    %cst_241 = arith.constant 0.000000e+00 : f32
    %670 = vector.broadcast %cst_241 : f32 to vector<2x32xf32>
    %671 = arith.subf %670, %669 : vector<2x32xf32>
    %672 = math.exp %671 : vector<2x32xf32>
    %cst_242 = arith.constant 1.000000e+00 : f32
    %673 = vector.broadcast %cst_242 : f32 to vector<2x32xf32>
    %674 = arith.addf %673, %672 : vector<2x32xf32>
    %cst_243 = arith.constant 1.000000e+00 : f32
    %675 = vector.broadcast %cst_243 : f32 to vector<2x32xf32>
    %676 = arith.divf %675, %674 : vector<2x32xf32>
    %677 = vector.extract_strided_slice %634 {offsets = [0, 192], sizes = [2, 32], strides = [1, 1]} : vector<2x256xf32> to vector<2x32xf32>
    %678 = math.tanh %677 : vector<2x32xf32>
    %679 = vector.extract_strided_slice %634 {offsets = [0, 224], sizes = [2, 32], strides = [1, 1]} : vector<2x256xf32> to vector<2x32xf32>
    %cst_244 = arith.constant 0.000000e+00 : f32
    %680 = vector.broadcast %cst_244 : f32 to vector<2x32xf32>
    %681 = arith.subf %680, %679 : vector<2x32xf32>
    %682 = math.exp %681 : vector<2x32xf32>
    %cst_245 = arith.constant 1.000000e+00 : f32
    %683 = vector.broadcast %cst_245 : f32 to vector<2x32xf32>
    %684 = arith.addf %683, %682 : vector<2x32xf32>
    %cst_246 = arith.constant 1.000000e+00 : f32
    %685 = vector.broadcast %cst_246 : f32 to vector<2x32xf32>
    %686 = arith.divf %685, %684 : vector<2x32xf32>
    %687 = arith.mulf %650, %620 : vector<2x32xf32>
    %688 = arith.mulf %642, %652 : vector<2x32xf32>
    %689 = arith.addf %687, %688 : vector<2x32xf32>
    %690 = math.tanh %689 : vector<2x32xf32>
    %691 = arith.mulf %660, %690 : vector<2x32xf32>
    %692 = arith.mulf %676, %625 : vector<2x32xf32>
    %693 = arith.mulf %668, %678 : vector<2x32xf32>
    %694 = arith.addf %692, %693 : vector<2x32xf32>
    %695 = math.tanh %694 : vector<2x32xf32>
    %696 = arith.mulf %686, %695 : vector<2x32xf32>
    %697 = vector.extract_strided_slice %71 {offsets = [18, 0], sizes = [2, 128], strides = [1, 1]} : vector<20x256xf32> to vector<2x128xf32>
    %698 = vector.extract_strided_slice %71 {offsets = [0, 128], sizes = [2, 128], strides = [1, 1]} : vector<20x256xf32> to vector<2x128xf32>
    %699 = tpu.concatenate %697, %698 in 1 : vector<2x128xf32>, vector<2x128xf32> -> vector<2x256xf32>
    %700 = tpu.concatenate %691, %696 in 1 : vector<2x32xf32>, vector<2x32xf32> -> vector<2x64xf32>
    %c0_247 = arith.constant 0 : index
    %c0_248 = arith.constant 0 : index
    %701 = vector.load %arg11[%c0_247, %c0_248] : memref<64x256xf32, #tpu.memory_space<vmem>>, vector<64x256xf32>
    %cst_249 = arith.constant dense<0.000000e+00> : vector<2x256xf32>
    %702 = tpu.matmul %700, %701, %cst_249 {dimension_numbers = #tpu.dot_dimension_numbers<[1], [0], [0], [1], [0, 0, 1, 1], [], []>} : vector<2x64xf32>, vector<64x256xf32>, vector<2x256xf32> -> vector<2x256xf32>
    %703 = arith.addf %699, %702 : vector<2x256xf32>
    %704 = vector.extract_strided_slice %703 {offsets = [0, 0], sizes = [2, 32], strides = [1, 1]} : vector<2x256xf32> to vector<2x32xf32>
    %cst_250 = arith.constant 0.000000e+00 : f32
    %705 = vector.broadcast %cst_250 : f32 to vector<2x32xf32>
    %706 = arith.subf %705, %704 : vector<2x32xf32>
    %707 = math.exp %706 : vector<2x32xf32>
    %cst_251 = arith.constant 1.000000e+00 : f32
    %708 = vector.broadcast %cst_251 : f32 to vector<2x32xf32>
    %709 = arith.addf %708, %707 : vector<2x32xf32>
    %cst_252 = arith.constant 1.000000e+00 : f32
    %710 = vector.broadcast %cst_252 : f32 to vector<2x32xf32>
    %711 = arith.divf %710, %709 : vector<2x32xf32>
    %712 = vector.extract_strided_slice %703 {offsets = [0, 32], sizes = [2, 32], strides = [1, 1]} : vector<2x256xf32> to vector<2x32xf32>
    %cst_253 = arith.constant 0.000000e+00 : f32
    %713 = vector.broadcast %cst_253 : f32 to vector<2x32xf32>
    %714 = arith.subf %713, %712 : vector<2x32xf32>
    %715 = math.exp %714 : vector<2x32xf32>
    %cst_254 = arith.constant 1.000000e+00 : f32
    %716 = vector.broadcast %cst_254 : f32 to vector<2x32xf32>
    %717 = arith.addf %716, %715 : vector<2x32xf32>
    %cst_255 = arith.constant 1.000000e+00 : f32
    %718 = vector.broadcast %cst_255 : f32 to vector<2x32xf32>
    %719 = arith.divf %718, %717 : vector<2x32xf32>
    %720 = vector.extract_strided_slice %703 {offsets = [0, 64], sizes = [2, 32], strides = [1, 1]} : vector<2x256xf32> to vector<2x32xf32>
    %721 = math.tanh %720 : vector<2x32xf32>
    %722 = vector.extract_strided_slice %703 {offsets = [0, 96], sizes = [2, 32], strides = [1, 1]} : vector<2x256xf32> to vector<2x32xf32>
    %cst_256 = arith.constant 0.000000e+00 : f32
    %723 = vector.broadcast %cst_256 : f32 to vector<2x32xf32>
    %724 = arith.subf %723, %722 : vector<2x32xf32>
    %725 = math.exp %724 : vector<2x32xf32>
    %cst_257 = arith.constant 1.000000e+00 : f32
    %726 = vector.broadcast %cst_257 : f32 to vector<2x32xf32>
    %727 = arith.addf %726, %725 : vector<2x32xf32>
    %cst_258 = arith.constant 1.000000e+00 : f32
    %728 = vector.broadcast %cst_258 : f32 to vector<2x32xf32>
    %729 = arith.divf %728, %727 : vector<2x32xf32>
    %730 = vector.extract_strided_slice %703 {offsets = [0, 128], sizes = [2, 32], strides = [1, 1]} : vector<2x256xf32> to vector<2x32xf32>
    %cst_259 = arith.constant 0.000000e+00 : f32
    %731 = vector.broadcast %cst_259 : f32 to vector<2x32xf32>
    %732 = arith.subf %731, %730 : vector<2x32xf32>
    %733 = math.exp %732 : vector<2x32xf32>
    %cst_260 = arith.constant 1.000000e+00 : f32
    %734 = vector.broadcast %cst_260 : f32 to vector<2x32xf32>
    %735 = arith.addf %734, %733 : vector<2x32xf32>
    %cst_261 = arith.constant 1.000000e+00 : f32
    %736 = vector.broadcast %cst_261 : f32 to vector<2x32xf32>
    %737 = arith.divf %736, %735 : vector<2x32xf32>
    %738 = vector.extract_strided_slice %703 {offsets = [0, 160], sizes = [2, 32], strides = [1, 1]} : vector<2x256xf32> to vector<2x32xf32>
    %cst_262 = arith.constant 0.000000e+00 : f32
    %739 = vector.broadcast %cst_262 : f32 to vector<2x32xf32>
    %740 = arith.subf %739, %738 : vector<2x32xf32>
    %741 = math.exp %740 : vector<2x32xf32>
    %cst_263 = arith.constant 1.000000e+00 : f32
    %742 = vector.broadcast %cst_263 : f32 to vector<2x32xf32>
    %743 = arith.addf %742, %741 : vector<2x32xf32>
    %cst_264 = arith.constant 1.000000e+00 : f32
    %744 = vector.broadcast %cst_264 : f32 to vector<2x32xf32>
    %745 = arith.divf %744, %743 : vector<2x32xf32>
    %746 = vector.extract_strided_slice %703 {offsets = [0, 192], sizes = [2, 32], strides = [1, 1]} : vector<2x256xf32> to vector<2x32xf32>
    %747 = math.tanh %746 : vector<2x32xf32>
    %748 = vector.extract_strided_slice %703 {offsets = [0, 224], sizes = [2, 32], strides = [1, 1]} : vector<2x256xf32> to vector<2x32xf32>
    %cst_265 = arith.constant 0.000000e+00 : f32
    %749 = vector.broadcast %cst_265 : f32 to vector<2x32xf32>
    %750 = arith.subf %749, %748 : vector<2x32xf32>
    %751 = math.exp %750 : vector<2x32xf32>
    %cst_266 = arith.constant 1.000000e+00 : f32
    %752 = vector.broadcast %cst_266 : f32 to vector<2x32xf32>
    %753 = arith.addf %752, %751 : vector<2x32xf32>
    %cst_267 = arith.constant 1.000000e+00 : f32
    %754 = vector.broadcast %cst_267 : f32 to vector<2x32xf32>
    %755 = arith.divf %754, %753 : vector<2x32xf32>
    %756 = arith.mulf %719, %689 : vector<2x32xf32>
    %757 = arith.mulf %711, %721 : vector<2x32xf32>
    %758 = arith.addf %756, %757 : vector<2x32xf32>
    %759 = math.tanh %758 : vector<2x32xf32>
    %760 = arith.mulf %729, %759 : vector<2x32xf32>
    %761 = arith.mulf %745, %694 : vector<2x32xf32>
    %762 = arith.mulf %737, %747 : vector<2x32xf32>
    %763 = arith.addf %761, %762 : vector<2x32xf32>
    %764 = math.tanh %763 : vector<2x32xf32>
    %765 = arith.mulf %755, %764 : vector<2x32xf32>
    %766 = tpu.concatenate %139, %208, %277, %346, %415, %484, %553, %622, %691, %760 in 0 : vector<2x32xf32>, vector<2x32xf32>, vector<2x32xf32>, vector<2x32xf32>, vector<2x32xf32>, vector<2x32xf32>, vector<2x32xf32>, vector<2x32xf32>, vector<2x32xf32>, vector<2x32xf32> -> vector<20x32xf32>
    %767 = tpu.concatenate %765, %696, %627, %558, %489, %420, %351, %282, %213, %144 in 0 : vector<2x32xf32>, vector<2x32xf32>, vector<2x32xf32>, vector<2x32xf32>, vector<2x32xf32>, vector<2x32xf32>, vector<2x32xf32>, vector<2x32xf32>, vector<2x32xf32>, vector<2x32xf32> -> vector<20x32xf32>
    %768 = tpu.concatenate %766, %767 in 1 : vector<20x32xf32>, vector<20x32xf32> -> vector<20x64xf32>
    %c0_268 = arith.constant 0 : index
    %c0_269 = arith.constant 0 : index
    %769 = vector.load %arg13[%c0_268, %c0_269] : memref<64x256xf32, #tpu.memory_space<vmem>>, vector<64x256xf32>
    %cst_270 = arith.constant dense<0.000000e+00> : vector<20x256xf32>
    %770 = tpu.matmul %768, %769, %cst_270 {dimension_numbers = #tpu.dot_dimension_numbers<[1], [0], [0], [1], [0, 0, 1, 1], [], []>} : vector<20x64xf32>, vector<64x256xf32>, vector<20x256xf32> -> vector<20x256xf32>
    %c0_271 = arith.constant 0 : index
    %c0_272 = arith.constant 0 : index
    %771 = vector.load %arg15[%c0_271, %c0_272] : memref<1x256xf32, #tpu.memory_space<vmem>>, vector<1x256xf32>
    %772 = vector.broadcast %771 : vector<1x256xf32> to vector<20x256xf32>
    %773 = arith.addf %770, %772 : vector<20x256xf32>
    %cst_273 = arith.constant 0.000000e+00 : f32
    %774 = vector.broadcast %cst_273 : f32 to vector<2x32xf32>
    %cst_274 = arith.constant 0.000000e+00 : f32
    %775 = vector.broadcast %cst_274 : f32 to vector<2x32xf32>
    %cst_275 = arith.constant 0.000000e+00 : f32
    %776 = vector.broadcast %cst_275 : f32 to vector<2x32xf32>
    %cst_276 = arith.constant 0.000000e+00 : f32
    %777 = vector.broadcast %cst_276 : f32 to vector<2x32xf32>
    %778 = vector.extract_strided_slice %773 {offsets = [0, 0], sizes = [2, 128], strides = [1, 1]} : vector<20x256xf32> to vector<2x128xf32>
    %779 = vector.extract_strided_slice %773 {offsets = [18, 128], sizes = [2, 128], strides = [1, 1]} : vector<20x256xf32> to vector<2x128xf32>
    %780 = tpu.concatenate %778, %779 in 1 : vector<2x128xf32>, vector<2x128xf32> -> vector<2x256xf32>
    %781 = tpu.concatenate %774, %776 in 1 : vector<2x32xf32>, vector<2x32xf32> -> vector<2x64xf32>
    %c0_277 = arith.constant 0 : index
    %c0_278 = arith.constant 0 : index
    %782 = vector.load %arg14[%c0_277, %c0_278] : memref<64x256xf32, #tpu.memory_space<vmem>>, vector<64x256xf32>
    %cst_279 = arith.constant dense<0.000000e+00> : vector<2x256xf32>
    %783 = tpu.matmul %781, %782, %cst_279 {dimension_numbers = #tpu.dot_dimension_numbers<[1], [0], [0], [1], [0, 0, 1, 1], [], []>} : vector<2x64xf32>, vector<64x256xf32>, vector<2x256xf32> -> vector<2x256xf32>
    %784 = arith.addf %780, %783 : vector<2x256xf32>
    %785 = vector.extract_strided_slice %784 {offsets = [0, 0], sizes = [2, 32], strides = [1, 1]} : vector<2x256xf32> to vector<2x32xf32>
    %cst_280 = arith.constant 0.000000e+00 : f32
    %786 = vector.broadcast %cst_280 : f32 to vector<2x32xf32>
    %787 = arith.subf %786, %785 : vector<2x32xf32>
    %788 = math.exp %787 : vector<2x32xf32>
    %cst_281 = arith.constant 1.000000e+00 : f32
    %789 = vector.broadcast %cst_281 : f32 to vector<2x32xf32>
    %790 = arith.addf %789, %788 : vector<2x32xf32>
    %cst_282 = arith.constant 1.000000e+00 : f32
    %791 = vector.broadcast %cst_282 : f32 to vector<2x32xf32>
    %792 = arith.divf %791, %790 : vector<2x32xf32>
    %793 = vector.extract_strided_slice %784 {offsets = [0, 32], sizes = [2, 32], strides = [1, 1]} : vector<2x256xf32> to vector<2x32xf32>
    %cst_283 = arith.constant 0.000000e+00 : f32
    %794 = vector.broadcast %cst_283 : f32 to vector<2x32xf32>
    %795 = arith.subf %794, %793 : vector<2x32xf32>
    %796 = math.exp %795 : vector<2x32xf32>
    %cst_284 = arith.constant 1.000000e+00 : f32
    %797 = vector.broadcast %cst_284 : f32 to vector<2x32xf32>
    %798 = arith.addf %797, %796 : vector<2x32xf32>
    %cst_285 = arith.constant 1.000000e+00 : f32
    %799 = vector.broadcast %cst_285 : f32 to vector<2x32xf32>
    %800 = arith.divf %799, %798 : vector<2x32xf32>
    %801 = vector.extract_strided_slice %784 {offsets = [0, 64], sizes = [2, 32], strides = [1, 1]} : vector<2x256xf32> to vector<2x32xf32>
    %802 = math.tanh %801 : vector<2x32xf32>
    %803 = vector.extract_strided_slice %784 {offsets = [0, 96], sizes = [2, 32], strides = [1, 1]} : vector<2x256xf32> to vector<2x32xf32>
    %cst_286 = arith.constant 0.000000e+00 : f32
    %804 = vector.broadcast %cst_286 : f32 to vector<2x32xf32>
    %805 = arith.subf %804, %803 : vector<2x32xf32>
    %806 = math.exp %805 : vector<2x32xf32>
    %cst_287 = arith.constant 1.000000e+00 : f32
    %807 = vector.broadcast %cst_287 : f32 to vector<2x32xf32>
    %808 = arith.addf %807, %806 : vector<2x32xf32>
    %cst_288 = arith.constant 1.000000e+00 : f32
    %809 = vector.broadcast %cst_288 : f32 to vector<2x32xf32>
    %810 = arith.divf %809, %808 : vector<2x32xf32>
    %811 = vector.extract_strided_slice %784 {offsets = [0, 128], sizes = [2, 32], strides = [1, 1]} : vector<2x256xf32> to vector<2x32xf32>
    %cst_289 = arith.constant 0.000000e+00 : f32
    %812 = vector.broadcast %cst_289 : f32 to vector<2x32xf32>
    %813 = arith.subf %812, %811 : vector<2x32xf32>
    %814 = math.exp %813 : vector<2x32xf32>
    %cst_290 = arith.constant 1.000000e+00 : f32
    %815 = vector.broadcast %cst_290 : f32 to vector<2x32xf32>
    %816 = arith.addf %815, %814 : vector<2x32xf32>
    %cst_291 = arith.constant 1.000000e+00 : f32
    %817 = vector.broadcast %cst_291 : f32 to vector<2x32xf32>
    %818 = arith.divf %817, %816 : vector<2x32xf32>
    %819 = vector.extract_strided_slice %784 {offsets = [0, 160], sizes = [2, 32], strides = [1, 1]} : vector<2x256xf32> to vector<2x32xf32>
    %cst_292 = arith.constant 0.000000e+00 : f32
    %820 = vector.broadcast %cst_292 : f32 to vector<2x32xf32>
    %821 = arith.subf %820, %819 : vector<2x32xf32>
    %822 = math.exp %821 : vector<2x32xf32>
    %cst_293 = arith.constant 1.000000e+00 : f32
    %823 = vector.broadcast %cst_293 : f32 to vector<2x32xf32>
    %824 = arith.addf %823, %822 : vector<2x32xf32>
    %cst_294 = arith.constant 1.000000e+00 : f32
    %825 = vector.broadcast %cst_294 : f32 to vector<2x32xf32>
    %826 = arith.divf %825, %824 : vector<2x32xf32>
    %827 = vector.extract_strided_slice %784 {offsets = [0, 192], sizes = [2, 32], strides = [1, 1]} : vector<2x256xf32> to vector<2x32xf32>
    %828 = math.tanh %827 : vector<2x32xf32>
    %829 = vector.extract_strided_slice %784 {offsets = [0, 224], sizes = [2, 32], strides = [1, 1]} : vector<2x256xf32> to vector<2x32xf32>
    %cst_295 = arith.constant 0.000000e+00 : f32
    %830 = vector.broadcast %cst_295 : f32 to vector<2x32xf32>
    %831 = arith.subf %830, %829 : vector<2x32xf32>
    %832 = math.exp %831 : vector<2x32xf32>
    %cst_296 = arith.constant 1.000000e+00 : f32
    %833 = vector.broadcast %cst_296 : f32 to vector<2x32xf32>
    %834 = arith.addf %833, %832 : vector<2x32xf32>
    %cst_297 = arith.constant 1.000000e+00 : f32
    %835 = vector.broadcast %cst_297 : f32 to vector<2x32xf32>
    %836 = arith.divf %835, %834 : vector<2x32xf32>
    %837 = arith.mulf %800, %775 : vector<2x32xf32>
    %838 = arith.mulf %792, %802 : vector<2x32xf32>
    %839 = arith.addf %837, %838 : vector<2x32xf32>
    %840 = math.tanh %839 : vector<2x32xf32>
    %841 = arith.mulf %810, %840 : vector<2x32xf32>
    %842 = arith.mulf %826, %777 : vector<2x32xf32>
    %843 = arith.mulf %818, %828 : vector<2x32xf32>
    %844 = arith.addf %842, %843 : vector<2x32xf32>
    %845 = math.tanh %844 : vector<2x32xf32>
    %846 = arith.mulf %836, %845 : vector<2x32xf32>
    %847 = vector.extract_strided_slice %773 {offsets = [2, 0], sizes = [2, 128], strides = [1, 1]} : vector<20x256xf32> to vector<2x128xf32>
    %848 = vector.extract_strided_slice %773 {offsets = [16, 128], sizes = [2, 128], strides = [1, 1]} : vector<20x256xf32> to vector<2x128xf32>
    %849 = tpu.concatenate %847, %848 in 1 : vector<2x128xf32>, vector<2x128xf32> -> vector<2x256xf32>
    %850 = tpu.concatenate %841, %846 in 1 : vector<2x32xf32>, vector<2x32xf32> -> vector<2x64xf32>
    %c0_298 = arith.constant 0 : index
    %c0_299 = arith.constant 0 : index
    %851 = vector.load %arg14[%c0_298, %c0_299] : memref<64x256xf32, #tpu.memory_space<vmem>>, vector<64x256xf32>
    %cst_300 = arith.constant dense<0.000000e+00> : vector<2x256xf32>
    %852 = tpu.matmul %850, %851, %cst_300 {dimension_numbers = #tpu.dot_dimension_numbers<[1], [0], [0], [1], [0, 0, 1, 1], [], []>} : vector<2x64xf32>, vector<64x256xf32>, vector<2x256xf32> -> vector<2x256xf32>
    %853 = arith.addf %849, %852 : vector<2x256xf32>
    %854 = vector.extract_strided_slice %853 {offsets = [0, 0], sizes = [2, 32], strides = [1, 1]} : vector<2x256xf32> to vector<2x32xf32>
    %cst_301 = arith.constant 0.000000e+00 : f32
    %855 = vector.broadcast %cst_301 : f32 to vector<2x32xf32>
    %856 = arith.subf %855, %854 : vector<2x32xf32>
    %857 = math.exp %856 : vector<2x32xf32>
    %cst_302 = arith.constant 1.000000e+00 : f32
    %858 = vector.broadcast %cst_302 : f32 to vector<2x32xf32>
    %859 = arith.addf %858, %857 : vector<2x32xf32>
    %cst_303 = arith.constant 1.000000e+00 : f32
    %860 = vector.broadcast %cst_303 : f32 to vector<2x32xf32>
    %861 = arith.divf %860, %859 : vector<2x32xf32>
    %862 = vector.extract_strided_slice %853 {offsets = [0, 32], sizes = [2, 32], strides = [1, 1]} : vector<2x256xf32> to vector<2x32xf32>
    %cst_304 = arith.constant 0.000000e+00 : f32
    %863 = vector.broadcast %cst_304 : f32 to vector<2x32xf32>
    %864 = arith.subf %863, %862 : vector<2x32xf32>
    %865 = math.exp %864 : vector<2x32xf32>
    %cst_305 = arith.constant 1.000000e+00 : f32
    %866 = vector.broadcast %cst_305 : f32 to vector<2x32xf32>
    %867 = arith.addf %866, %865 : vector<2x32xf32>
    %cst_306 = arith.constant 1.000000e+00 : f32
    %868 = vector.broadcast %cst_306 : f32 to vector<2x32xf32>
    %869 = arith.divf %868, %867 : vector<2x32xf32>
    %870 = vector.extract_strided_slice %853 {offsets = [0, 64], sizes = [2, 32], strides = [1, 1]} : vector<2x256xf32> to vector<2x32xf32>
    %871 = math.tanh %870 : vector<2x32xf32>
    %872 = vector.extract_strided_slice %853 {offsets = [0, 96], sizes = [2, 32], strides = [1, 1]} : vector<2x256xf32> to vector<2x32xf32>
    %cst_307 = arith.constant 0.000000e+00 : f32
    %873 = vector.broadcast %cst_307 : f32 to vector<2x32xf32>
    %874 = arith.subf %873, %872 : vector<2x32xf32>
    %875 = math.exp %874 : vector<2x32xf32>
    %cst_308 = arith.constant 1.000000e+00 : f32
    %876 = vector.broadcast %cst_308 : f32 to vector<2x32xf32>
    %877 = arith.addf %876, %875 : vector<2x32xf32>
    %cst_309 = arith.constant 1.000000e+00 : f32
    %878 = vector.broadcast %cst_309 : f32 to vector<2x32xf32>
    %879 = arith.divf %878, %877 : vector<2x32xf32>
    %880 = vector.extract_strided_slice %853 {offsets = [0, 128], sizes = [2, 32], strides = [1, 1]} : vector<2x256xf32> to vector<2x32xf32>
    %cst_310 = arith.constant 0.000000e+00 : f32
    %881 = vector.broadcast %cst_310 : f32 to vector<2x32xf32>
    %882 = arith.subf %881, %880 : vector<2x32xf32>
    %883 = math.exp %882 : vector<2x32xf32>
    %cst_311 = arith.constant 1.000000e+00 : f32
    %884 = vector.broadcast %cst_311 : f32 to vector<2x32xf32>
    %885 = arith.addf %884, %883 : vector<2x32xf32>
    %cst_312 = arith.constant 1.000000e+00 : f32
    %886 = vector.broadcast %cst_312 : f32 to vector<2x32xf32>
    %887 = arith.divf %886, %885 : vector<2x32xf32>
    %888 = vector.extract_strided_slice %853 {offsets = [0, 160], sizes = [2, 32], strides = [1, 1]} : vector<2x256xf32> to vector<2x32xf32>
    %cst_313 = arith.constant 0.000000e+00 : f32
    %889 = vector.broadcast %cst_313 : f32 to vector<2x32xf32>
    %890 = arith.subf %889, %888 : vector<2x32xf32>
    %891 = math.exp %890 : vector<2x32xf32>
    %cst_314 = arith.constant 1.000000e+00 : f32
    %892 = vector.broadcast %cst_314 : f32 to vector<2x32xf32>
    %893 = arith.addf %892, %891 : vector<2x32xf32>
    %cst_315 = arith.constant 1.000000e+00 : f32
    %894 = vector.broadcast %cst_315 : f32 to vector<2x32xf32>
    %895 = arith.divf %894, %893 : vector<2x32xf32>
    %896 = vector.extract_strided_slice %853 {offsets = [0, 192], sizes = [2, 32], strides = [1, 1]} : vector<2x256xf32> to vector<2x32xf32>
    %897 = math.tanh %896 : vector<2x32xf32>
    %898 = vector.extract_strided_slice %853 {offsets = [0, 224], sizes = [2, 32], strides = [1, 1]} : vector<2x256xf32> to vector<2x32xf32>
    %cst_316 = arith.constant 0.000000e+00 : f32
    %899 = vector.broadcast %cst_316 : f32 to vector<2x32xf32>
    %900 = arith.subf %899, %898 : vector<2x32xf32>
    %901 = math.exp %900 : vector<2x32xf32>
    %cst_317 = arith.constant 1.000000e+00 : f32
    %902 = vector.broadcast %cst_317 : f32 to vector<2x32xf32>
    %903 = arith.addf %902, %901 : vector<2x32xf32>
    %cst_318 = arith.constant 1.000000e+00 : f32
    %904 = vector.broadcast %cst_318 : f32 to vector<2x32xf32>
    %905 = arith.divf %904, %903 : vector<2x32xf32>
    %906 = arith.mulf %869, %839 : vector<2x32xf32>
    %907 = arith.mulf %861, %871 : vector<2x32xf32>
    %908 = arith.addf %906, %907 : vector<2x32xf32>
    %909 = math.tanh %908 : vector<2x32xf32>
    %910 = arith.mulf %879, %909 : vector<2x32xf32>
    %911 = arith.mulf %895, %844 : vector<2x32xf32>
    %912 = arith.mulf %887, %897 : vector<2x32xf32>
    %913 = arith.addf %911, %912 : vector<2x32xf32>
    %914 = math.tanh %913 : vector<2x32xf32>
    %915 = arith.mulf %905, %914 : vector<2x32xf32>
    %916 = vector.extract_strided_slice %773 {offsets = [4, 0], sizes = [2, 128], strides = [1, 1]} : vector<20x256xf32> to vector<2x128xf32>
    %917 = vector.extract_strided_slice %773 {offsets = [14, 128], sizes = [2, 128], strides = [1, 1]} : vector<20x256xf32> to vector<2x128xf32>
    %918 = tpu.concatenate %916, %917 in 1 : vector<2x128xf32>, vector<2x128xf32> -> vector<2x256xf32>
    %919 = tpu.concatenate %910, %915 in 1 : vector<2x32xf32>, vector<2x32xf32> -> vector<2x64xf32>
    %c0_319 = arith.constant 0 : index
    %c0_320 = arith.constant 0 : index
    %920 = vector.load %arg14[%c0_319, %c0_320] : memref<64x256xf32, #tpu.memory_space<vmem>>, vector<64x256xf32>
    %cst_321 = arith.constant dense<0.000000e+00> : vector<2x256xf32>
    %921 = tpu.matmul %919, %920, %cst_321 {dimension_numbers = #tpu.dot_dimension_numbers<[1], [0], [0], [1], [0, 0, 1, 1], [], []>} : vector<2x64xf32>, vector<64x256xf32>, vector<2x256xf32> -> vector<2x256xf32>
    %922 = arith.addf %918, %921 : vector<2x256xf32>
    %923 = vector.extract_strided_slice %922 {offsets = [0, 0], sizes = [2, 32], strides = [1, 1]} : vector<2x256xf32> to vector<2x32xf32>
    %cst_322 = arith.constant 0.000000e+00 : f32
    %924 = vector.broadcast %cst_322 : f32 to vector<2x32xf32>
    %925 = arith.subf %924, %923 : vector<2x32xf32>
    %926 = math.exp %925 : vector<2x32xf32>
    %cst_323 = arith.constant 1.000000e+00 : f32
    %927 = vector.broadcast %cst_323 : f32 to vector<2x32xf32>
    %928 = arith.addf %927, %926 : vector<2x32xf32>
    %cst_324 = arith.constant 1.000000e+00 : f32
    %929 = vector.broadcast %cst_324 : f32 to vector<2x32xf32>
    %930 = arith.divf %929, %928 : vector<2x32xf32>
    %931 = vector.extract_strided_slice %922 {offsets = [0, 32], sizes = [2, 32], strides = [1, 1]} : vector<2x256xf32> to vector<2x32xf32>
    %cst_325 = arith.constant 0.000000e+00 : f32
    %932 = vector.broadcast %cst_325 : f32 to vector<2x32xf32>
    %933 = arith.subf %932, %931 : vector<2x32xf32>
    %934 = math.exp %933 : vector<2x32xf32>
    %cst_326 = arith.constant 1.000000e+00 : f32
    %935 = vector.broadcast %cst_326 : f32 to vector<2x32xf32>
    %936 = arith.addf %935, %934 : vector<2x32xf32>
    %cst_327 = arith.constant 1.000000e+00 : f32
    %937 = vector.broadcast %cst_327 : f32 to vector<2x32xf32>
    %938 = arith.divf %937, %936 : vector<2x32xf32>
    %939 = vector.extract_strided_slice %922 {offsets = [0, 64], sizes = [2, 32], strides = [1, 1]} : vector<2x256xf32> to vector<2x32xf32>
    %940 = math.tanh %939 : vector<2x32xf32>
    %941 = vector.extract_strided_slice %922 {offsets = [0, 96], sizes = [2, 32], strides = [1, 1]} : vector<2x256xf32> to vector<2x32xf32>
    %cst_328 = arith.constant 0.000000e+00 : f32
    %942 = vector.broadcast %cst_328 : f32 to vector<2x32xf32>
    %943 = arith.subf %942, %941 : vector<2x32xf32>
    %944 = math.exp %943 : vector<2x32xf32>
    %cst_329 = arith.constant 1.000000e+00 : f32
    %945 = vector.broadcast %cst_329 : f32 to vector<2x32xf32>
    %946 = arith.addf %945, %944 : vector<2x32xf32>
    %cst_330 = arith.constant 1.000000e+00 : f32
    %947 = vector.broadcast %cst_330 : f32 to vector<2x32xf32>
    %948 = arith.divf %947, %946 : vector<2x32xf32>
    %949 = vector.extract_strided_slice %922 {offsets = [0, 128], sizes = [2, 32], strides = [1, 1]} : vector<2x256xf32> to vector<2x32xf32>
    %cst_331 = arith.constant 0.000000e+00 : f32
    %950 = vector.broadcast %cst_331 : f32 to vector<2x32xf32>
    %951 = arith.subf %950, %949 : vector<2x32xf32>
    %952 = math.exp %951 : vector<2x32xf32>
    %cst_332 = arith.constant 1.000000e+00 : f32
    %953 = vector.broadcast %cst_332 : f32 to vector<2x32xf32>
    %954 = arith.addf %953, %952 : vector<2x32xf32>
    %cst_333 = arith.constant 1.000000e+00 : f32
    %955 = vector.broadcast %cst_333 : f32 to vector<2x32xf32>
    %956 = arith.divf %955, %954 : vector<2x32xf32>
    %957 = vector.extract_strided_slice %922 {offsets = [0, 160], sizes = [2, 32], strides = [1, 1]} : vector<2x256xf32> to vector<2x32xf32>
    %cst_334 = arith.constant 0.000000e+00 : f32
    %958 = vector.broadcast %cst_334 : f32 to vector<2x32xf32>
    %959 = arith.subf %958, %957 : vector<2x32xf32>
    %960 = math.exp %959 : vector<2x32xf32>
    %cst_335 = arith.constant 1.000000e+00 : f32
    %961 = vector.broadcast %cst_335 : f32 to vector<2x32xf32>
    %962 = arith.addf %961, %960 : vector<2x32xf32>
    %cst_336 = arith.constant 1.000000e+00 : f32
    %963 = vector.broadcast %cst_336 : f32 to vector<2x32xf32>
    %964 = arith.divf %963, %962 : vector<2x32xf32>
    %965 = vector.extract_strided_slice %922 {offsets = [0, 192], sizes = [2, 32], strides = [1, 1]} : vector<2x256xf32> to vector<2x32xf32>
    %966 = math.tanh %965 : vector<2x32xf32>
    %967 = vector.extract_strided_slice %922 {offsets = [0, 224], sizes = [2, 32], strides = [1, 1]} : vector<2x256xf32> to vector<2x32xf32>
    %cst_337 = arith.constant 0.000000e+00 : f32
    %968 = vector.broadcast %cst_337 : f32 to vector<2x32xf32>
    %969 = arith.subf %968, %967 : vector<2x32xf32>
    %970 = math.exp %969 : vector<2x32xf32>
    %cst_338 = arith.constant 1.000000e+00 : f32
    %971 = vector.broadcast %cst_338 : f32 to vector<2x32xf32>
    %972 = arith.addf %971, %970 : vector<2x32xf32>
    %cst_339 = arith.constant 1.000000e+00 : f32
    %973 = vector.broadcast %cst_339 : f32 to vector<2x32xf32>
    %974 = arith.divf %973, %972 : vector<2x32xf32>
    %975 = arith.mulf %938, %908 : vector<2x32xf32>
    %976 = arith.mulf %930, %940 : vector<2x32xf32>
    %977 = arith.addf %975, %976 : vector<2x32xf32>
    %978 = math.tanh %977 : vector<2x32xf32>
    %979 = arith.mulf %948, %978 : vector<2x32xf32>
    %980 = arith.mulf %964, %913 : vector<2x32xf32>
    %981 = arith.mulf %956, %966 : vector<2x32xf32>
    %982 = arith.addf %980, %981 : vector<2x32xf32>
    %983 = math.tanh %982 : vector<2x32xf32>
    %984 = arith.mulf %974, %983 : vector<2x32xf32>
    %985 = vector.extract_strided_slice %773 {offsets = [6, 0], sizes = [2, 128], strides = [1, 1]} : vector<20x256xf32> to vector<2x128xf32>
    %986 = vector.extract_strided_slice %773 {offsets = [12, 128], sizes = [2, 128], strides = [1, 1]} : vector<20x256xf32> to vector<2x128xf32>
    %987 = tpu.concatenate %985, %986 in 1 : vector<2x128xf32>, vector<2x128xf32> -> vector<2x256xf32>
    %988 = tpu.concatenate %979, %984 in 1 : vector<2x32xf32>, vector<2x32xf32> -> vector<2x64xf32>
    %c0_340 = arith.constant 0 : index
    %c0_341 = arith.constant 0 : index
    %989 = vector.load %arg14[%c0_340, %c0_341] : memref<64x256xf32, #tpu.memory_space<vmem>>, vector<64x256xf32>
    %cst_342 = arith.constant dense<0.000000e+00> : vector<2x256xf32>
    %990 = tpu.matmul %988, %989, %cst_342 {dimension_numbers = #tpu.dot_dimension_numbers<[1], [0], [0], [1], [0, 0, 1, 1], [], []>} : vector<2x64xf32>, vector<64x256xf32>, vector<2x256xf32> -> vector<2x256xf32>
    %991 = arith.addf %987, %990 : vector<2x256xf32>
    %992 = vector.extract_strided_slice %991 {offsets = [0, 0], sizes = [2, 32], strides = [1, 1]} : vector<2x256xf32> to vector<2x32xf32>
    %cst_343 = arith.constant 0.000000e+00 : f32
    %993 = vector.broadcast %cst_343 : f32 to vector<2x32xf32>
    %994 = arith.subf %993, %992 : vector<2x32xf32>
    %995 = math.exp %994 : vector<2x32xf32>
    %cst_344 = arith.constant 1.000000e+00 : f32
    %996 = vector.broadcast %cst_344 : f32 to vector<2x32xf32>
    %997 = arith.addf %996, %995 : vector<2x32xf32>
    %cst_345 = arith.constant 1.000000e+00 : f32
    %998 = vector.broadcast %cst_345 : f32 to vector<2x32xf32>
    %999 = arith.divf %998, %997 : vector<2x32xf32>
    %1000 = vector.extract_strided_slice %991 {offsets = [0, 32], sizes = [2, 32], strides = [1, 1]} : vector<2x256xf32> to vector<2x32xf32>
    %cst_346 = arith.constant 0.000000e+00 : f32
    %1001 = vector.broadcast %cst_346 : f32 to vector<2x32xf32>
    %1002 = arith.subf %1001, %1000 : vector<2x32xf32>
    %1003 = math.exp %1002 : vector<2x32xf32>
    %cst_347 = arith.constant 1.000000e+00 : f32
    %1004 = vector.broadcast %cst_347 : f32 to vector<2x32xf32>
    %1005 = arith.addf %1004, %1003 : vector<2x32xf32>
    %cst_348 = arith.constant 1.000000e+00 : f32
    %1006 = vector.broadcast %cst_348 : f32 to vector<2x32xf32>
    %1007 = arith.divf %1006, %1005 : vector<2x32xf32>
    %1008 = vector.extract_strided_slice %991 {offsets = [0, 64], sizes = [2, 32], strides = [1, 1]} : vector<2x256xf32> to vector<2x32xf32>
    %1009 = math.tanh %1008 : vector<2x32xf32>
    %1010 = vector.extract_strided_slice %991 {offsets = [0, 96], sizes = [2, 32], strides = [1, 1]} : vector<2x256xf32> to vector<2x32xf32>
    %cst_349 = arith.constant 0.000000e+00 : f32
    %1011 = vector.broadcast %cst_349 : f32 to vector<2x32xf32>
    %1012 = arith.subf %1011, %1010 : vector<2x32xf32>
    %1013 = math.exp %1012 : vector<2x32xf32>
    %cst_350 = arith.constant 1.000000e+00 : f32
    %1014 = vector.broadcast %cst_350 : f32 to vector<2x32xf32>
    %1015 = arith.addf %1014, %1013 : vector<2x32xf32>
    %cst_351 = arith.constant 1.000000e+00 : f32
    %1016 = vector.broadcast %cst_351 : f32 to vector<2x32xf32>
    %1017 = arith.divf %1016, %1015 : vector<2x32xf32>
    %1018 = vector.extract_strided_slice %991 {offsets = [0, 128], sizes = [2, 32], strides = [1, 1]} : vector<2x256xf32> to vector<2x32xf32>
    %cst_352 = arith.constant 0.000000e+00 : f32
    %1019 = vector.broadcast %cst_352 : f32 to vector<2x32xf32>
    %1020 = arith.subf %1019, %1018 : vector<2x32xf32>
    %1021 = math.exp %1020 : vector<2x32xf32>
    %cst_353 = arith.constant 1.000000e+00 : f32
    %1022 = vector.broadcast %cst_353 : f32 to vector<2x32xf32>
    %1023 = arith.addf %1022, %1021 : vector<2x32xf32>
    %cst_354 = arith.constant 1.000000e+00 : f32
    %1024 = vector.broadcast %cst_354 : f32 to vector<2x32xf32>
    %1025 = arith.divf %1024, %1023 : vector<2x32xf32>
    %1026 = vector.extract_strided_slice %991 {offsets = [0, 160], sizes = [2, 32], strides = [1, 1]} : vector<2x256xf32> to vector<2x32xf32>
    %cst_355 = arith.constant 0.000000e+00 : f32
    %1027 = vector.broadcast %cst_355 : f32 to vector<2x32xf32>
    %1028 = arith.subf %1027, %1026 : vector<2x32xf32>
    %1029 = math.exp %1028 : vector<2x32xf32>
    %cst_356 = arith.constant 1.000000e+00 : f32
    %1030 = vector.broadcast %cst_356 : f32 to vector<2x32xf32>
    %1031 = arith.addf %1030, %1029 : vector<2x32xf32>
    %cst_357 = arith.constant 1.000000e+00 : f32
    %1032 = vector.broadcast %cst_357 : f32 to vector<2x32xf32>
    %1033 = arith.divf %1032, %1031 : vector<2x32xf32>
    %1034 = vector.extract_strided_slice %991 {offsets = [0, 192], sizes = [2, 32], strides = [1, 1]} : vector<2x256xf32> to vector<2x32xf32>
    %1035 = math.tanh %1034 : vector<2x32xf32>
    %1036 = vector.extract_strided_slice %991 {offsets = [0, 224], sizes = [2, 32], strides = [1, 1]} : vector<2x256xf32> to vector<2x32xf32>
    %cst_358 = arith.constant 0.000000e+00 : f32
    %1037 = vector.broadcast %cst_358 : f32 to vector<2x32xf32>
    %1038 = arith.subf %1037, %1036 : vector<2x32xf32>
    %1039 = math.exp %1038 : vector<2x32xf32>
    %cst_359 = arith.constant 1.000000e+00 : f32
    %1040 = vector.broadcast %cst_359 : f32 to vector<2x32xf32>
    %1041 = arith.addf %1040, %1039 : vector<2x32xf32>
    %cst_360 = arith.constant 1.000000e+00 : f32
    %1042 = vector.broadcast %cst_360 : f32 to vector<2x32xf32>
    %1043 = arith.divf %1042, %1041 : vector<2x32xf32>
    %1044 = arith.mulf %1007, %977 : vector<2x32xf32>
    %1045 = arith.mulf %999, %1009 : vector<2x32xf32>
    %1046 = arith.addf %1044, %1045 : vector<2x32xf32>
    %1047 = math.tanh %1046 : vector<2x32xf32>
    %1048 = arith.mulf %1017, %1047 : vector<2x32xf32>
    %1049 = arith.mulf %1033, %982 : vector<2x32xf32>
    %1050 = arith.mulf %1025, %1035 : vector<2x32xf32>
    %1051 = arith.addf %1049, %1050 : vector<2x32xf32>
    %1052 = math.tanh %1051 : vector<2x32xf32>
    %1053 = arith.mulf %1043, %1052 : vector<2x32xf32>
    %1054 = vector.extract_strided_slice %773 {offsets = [8, 0], sizes = [2, 128], strides = [1, 1]} : vector<20x256xf32> to vector<2x128xf32>
    %1055 = vector.extract_strided_slice %773 {offsets = [10, 128], sizes = [2, 128], strides = [1, 1]} : vector<20x256xf32> to vector<2x128xf32>
    %1056 = tpu.concatenate %1054, %1055 in 1 : vector<2x128xf32>, vector<2x128xf32> -> vector<2x256xf32>
    %1057 = tpu.concatenate %1048, %1053 in 1 : vector<2x32xf32>, vector<2x32xf32> -> vector<2x64xf32>
    %c0_361 = arith.constant 0 : index
    %c0_362 = arith.constant 0 : index
    %1058 = vector.load %arg14[%c0_361, %c0_362] : memref<64x256xf32, #tpu.memory_space<vmem>>, vector<64x256xf32>
    %cst_363 = arith.constant dense<0.000000e+00> : vector<2x256xf32>
    %1059 = tpu.matmul %1057, %1058, %cst_363 {dimension_numbers = #tpu.dot_dimension_numbers<[1], [0], [0], [1], [0, 0, 1, 1], [], []>} : vector<2x64xf32>, vector<64x256xf32>, vector<2x256xf32> -> vector<2x256xf32>
    %1060 = arith.addf %1056, %1059 : vector<2x256xf32>
    %1061 = vector.extract_strided_slice %1060 {offsets = [0, 0], sizes = [2, 32], strides = [1, 1]} : vector<2x256xf32> to vector<2x32xf32>
    %cst_364 = arith.constant 0.000000e+00 : f32
    %1062 = vector.broadcast %cst_364 : f32 to vector<2x32xf32>
    %1063 = arith.subf %1062, %1061 : vector<2x32xf32>
    %1064 = math.exp %1063 : vector<2x32xf32>
    %cst_365 = arith.constant 1.000000e+00 : f32
    %1065 = vector.broadcast %cst_365 : f32 to vector<2x32xf32>
    %1066 = arith.addf %1065, %1064 : vector<2x32xf32>
    %cst_366 = arith.constant 1.000000e+00 : f32
    %1067 = vector.broadcast %cst_366 : f32 to vector<2x32xf32>
    %1068 = arith.divf %1067, %1066 : vector<2x32xf32>
    %1069 = vector.extract_strided_slice %1060 {offsets = [0, 32], sizes = [2, 32], strides = [1, 1]} : vector<2x256xf32> to vector<2x32xf32>
    %cst_367 = arith.constant 0.000000e+00 : f32
    %1070 = vector.broadcast %cst_367 : f32 to vector<2x32xf32>
    %1071 = arith.subf %1070, %1069 : vector<2x32xf32>
    %1072 = math.exp %1071 : vector<2x32xf32>
    %cst_368 = arith.constant 1.000000e+00 : f32
    %1073 = vector.broadcast %cst_368 : f32 to vector<2x32xf32>
    %1074 = arith.addf %1073, %1072 : vector<2x32xf32>
    %cst_369 = arith.constant 1.000000e+00 : f32
    %1075 = vector.broadcast %cst_369 : f32 to vector<2x32xf32>
    %1076 = arith.divf %1075, %1074 : vector<2x32xf32>
    %1077 = vector.extract_strided_slice %1060 {offsets = [0, 64], sizes = [2, 32], strides = [1, 1]} : vector<2x256xf32> to vector<2x32xf32>
    %1078 = math.tanh %1077 : vector<2x32xf32>
    %1079 = vector.extract_strided_slice %1060 {offsets = [0, 96], sizes = [2, 32], strides = [1, 1]} : vector<2x256xf32> to vector<2x32xf32>
    %cst_370 = arith.constant 0.000000e+00 : f32
    %1080 = vector.broadcast %cst_370 : f32 to vector<2x32xf32>
    %1081 = arith.subf %1080, %1079 : vector<2x32xf32>
    %1082 = math.exp %1081 : vector<2x32xf32>
    %cst_371 = arith.constant 1.000000e+00 : f32
    %1083 = vector.broadcast %cst_371 : f32 to vector<2x32xf32>
    %1084 = arith.addf %1083, %1082 : vector<2x32xf32>
    %cst_372 = arith.constant 1.000000e+00 : f32
    %1085 = vector.broadcast %cst_372 : f32 to vector<2x32xf32>
    %1086 = arith.divf %1085, %1084 : vector<2x32xf32>
    %1087 = vector.extract_strided_slice %1060 {offsets = [0, 128], sizes = [2, 32], strides = [1, 1]} : vector<2x256xf32> to vector<2x32xf32>
    %cst_373 = arith.constant 0.000000e+00 : f32
    %1088 = vector.broadcast %cst_373 : f32 to vector<2x32xf32>
    %1089 = arith.subf %1088, %1087 : vector<2x32xf32>
    %1090 = math.exp %1089 : vector<2x32xf32>
    %cst_374 = arith.constant 1.000000e+00 : f32
    %1091 = vector.broadcast %cst_374 : f32 to vector<2x32xf32>
    %1092 = arith.addf %1091, %1090 : vector<2x32xf32>
    %cst_375 = arith.constant 1.000000e+00 : f32
    %1093 = vector.broadcast %cst_375 : f32 to vector<2x32xf32>
    %1094 = arith.divf %1093, %1092 : vector<2x32xf32>
    %1095 = vector.extract_strided_slice %1060 {offsets = [0, 160], sizes = [2, 32], strides = [1, 1]} : vector<2x256xf32> to vector<2x32xf32>
    %cst_376 = arith.constant 0.000000e+00 : f32
    %1096 = vector.broadcast %cst_376 : f32 to vector<2x32xf32>
    %1097 = arith.subf %1096, %1095 : vector<2x32xf32>
    %1098 = math.exp %1097 : vector<2x32xf32>
    %cst_377 = arith.constant 1.000000e+00 : f32
    %1099 = vector.broadcast %cst_377 : f32 to vector<2x32xf32>
    %1100 = arith.addf %1099, %1098 : vector<2x32xf32>
    %cst_378 = arith.constant 1.000000e+00 : f32
    %1101 = vector.broadcast %cst_378 : f32 to vector<2x32xf32>
    %1102 = arith.divf %1101, %1100 : vector<2x32xf32>
    %1103 = vector.extract_strided_slice %1060 {offsets = [0, 192], sizes = [2, 32], strides = [1, 1]} : vector<2x256xf32> to vector<2x32xf32>
    %1104 = math.tanh %1103 : vector<2x32xf32>
    %1105 = vector.extract_strided_slice %1060 {offsets = [0, 224], sizes = [2, 32], strides = [1, 1]} : vector<2x256xf32> to vector<2x32xf32>
    %cst_379 = arith.constant 0.000000e+00 : f32
    %1106 = vector.broadcast %cst_379 : f32 to vector<2x32xf32>
    %1107 = arith.subf %1106, %1105 : vector<2x32xf32>
    %1108 = math.exp %1107 : vector<2x32xf32>
    %cst_380 = arith.constant 1.000000e+00 : f32
    %1109 = vector.broadcast %cst_380 : f32 to vector<2x32xf32>
    %1110 = arith.addf %1109, %1108 : vector<2x32xf32>
    %cst_381 = arith.constant 1.000000e+00 : f32
    %1111 = vector.broadcast %cst_381 : f32 to vector<2x32xf32>
    %1112 = arith.divf %1111, %1110 : vector<2x32xf32>
    %1113 = arith.mulf %1076, %1046 : vector<2x32xf32>
    %1114 = arith.mulf %1068, %1078 : vector<2x32xf32>
    %1115 = arith.addf %1113, %1114 : vector<2x32xf32>
    %1116 = math.tanh %1115 : vector<2x32xf32>
    %1117 = arith.mulf %1086, %1116 : vector<2x32xf32>
    %1118 = arith.mulf %1102, %1051 : vector<2x32xf32>
    %1119 = arith.mulf %1094, %1104 : vector<2x32xf32>
    %1120 = arith.addf %1118, %1119 : vector<2x32xf32>
    %1121 = math.tanh %1120 : vector<2x32xf32>
    %1122 = arith.mulf %1112, %1121 : vector<2x32xf32>
    %1123 = vector.extract_strided_slice %773 {offsets = [10, 0], sizes = [2, 128], strides = [1, 1]} : vector<20x256xf32> to vector<2x128xf32>
    %1124 = vector.extract_strided_slice %773 {offsets = [8, 128], sizes = [2, 128], strides = [1, 1]} : vector<20x256xf32> to vector<2x128xf32>
    %1125 = tpu.concatenate %1123, %1124 in 1 : vector<2x128xf32>, vector<2x128xf32> -> vector<2x256xf32>
    %1126 = tpu.concatenate %1117, %1122 in 1 : vector<2x32xf32>, vector<2x32xf32> -> vector<2x64xf32>
    %c0_382 = arith.constant 0 : index
    %c0_383 = arith.constant 0 : index
    %1127 = vector.load %arg14[%c0_382, %c0_383] : memref<64x256xf32, #tpu.memory_space<vmem>>, vector<64x256xf32>
    %cst_384 = arith.constant dense<0.000000e+00> : vector<2x256xf32>
    %1128 = tpu.matmul %1126, %1127, %cst_384 {dimension_numbers = #tpu.dot_dimension_numbers<[1], [0], [0], [1], [0, 0, 1, 1], [], []>} : vector<2x64xf32>, vector<64x256xf32>, vector<2x256xf32> -> vector<2x256xf32>
    %1129 = arith.addf %1125, %1128 : vector<2x256xf32>
    %1130 = vector.extract_strided_slice %1129 {offsets = [0, 0], sizes = [2, 32], strides = [1, 1]} : vector<2x256xf32> to vector<2x32xf32>
    %cst_385 = arith.constant 0.000000e+00 : f32
    %1131 = vector.broadcast %cst_385 : f32 to vector<2x32xf32>
    %1132 = arith.subf %1131, %1130 : vector<2x32xf32>
    %1133 = math.exp %1132 : vector<2x32xf32>
    %cst_386 = arith.constant 1.000000e+00 : f32
    %1134 = vector.broadcast %cst_386 : f32 to vector<2x32xf32>
    %1135 = arith.addf %1134, %1133 : vector<2x32xf32>
    %cst_387 = arith.constant 1.000000e+00 : f32
    %1136 = vector.broadcast %cst_387 : f32 to vector<2x32xf32>
    %1137 = arith.divf %1136, %1135 : vector<2x32xf32>
    %1138 = vector.extract_strided_slice %1129 {offsets = [0, 32], sizes = [2, 32], strides = [1, 1]} : vector<2x256xf32> to vector<2x32xf32>
    %cst_388 = arith.constant 0.000000e+00 : f32
    %1139 = vector.broadcast %cst_388 : f32 to vector<2x32xf32>
    %1140 = arith.subf %1139, %1138 : vector<2x32xf32>
    %1141 = math.exp %1140 : vector<2x32xf32>
    %cst_389 = arith.constant 1.000000e+00 : f32
    %1142 = vector.broadcast %cst_389 : f32 to vector<2x32xf32>
    %1143 = arith.addf %1142, %1141 : vector<2x32xf32>
    %cst_390 = arith.constant 1.000000e+00 : f32
    %1144 = vector.broadcast %cst_390 : f32 to vector<2x32xf32>
    %1145 = arith.divf %1144, %1143 : vector<2x32xf32>
    %1146 = vector.extract_strided_slice %1129 {offsets = [0, 64], sizes = [2, 32], strides = [1, 1]} : vector<2x256xf32> to vector<2x32xf32>
    %1147 = math.tanh %1146 : vector<2x32xf32>
    %1148 = vector.extract_strided_slice %1129 {offsets = [0, 96], sizes = [2, 32], strides = [1, 1]} : vector<2x256xf32> to vector<2x32xf32>
    %cst_391 = arith.constant 0.000000e+00 : f32
    %1149 = vector.broadcast %cst_391 : f32 to vector<2x32xf32>
    %1150 = arith.subf %1149, %1148 : vector<2x32xf32>
    %1151 = math.exp %1150 : vector<2x32xf32>
    %cst_392 = arith.constant 1.000000e+00 : f32
    %1152 = vector.broadcast %cst_392 : f32 to vector<2x32xf32>
    %1153 = arith.addf %1152, %1151 : vector<2x32xf32>
    %cst_393 = arith.constant 1.000000e+00 : f32
    %1154 = vector.broadcast %cst_393 : f32 to vector<2x32xf32>
    %1155 = arith.divf %1154, %1153 : vector<2x32xf32>
    %1156 = vector.extract_strided_slice %1129 {offsets = [0, 128], sizes = [2, 32], strides = [1, 1]} : vector<2x256xf32> to vector<2x32xf32>
    %cst_394 = arith.constant 0.000000e+00 : f32
    %1157 = vector.broadcast %cst_394 : f32 to vector<2x32xf32>
    %1158 = arith.subf %1157, %1156 : vector<2x32xf32>
    %1159 = math.exp %1158 : vector<2x32xf32>
    %cst_395 = arith.constant 1.000000e+00 : f32
    %1160 = vector.broadcast %cst_395 : f32 to vector<2x32xf32>
    %1161 = arith.addf %1160, %1159 : vector<2x32xf32>
    %cst_396 = arith.constant 1.000000e+00 : f32
    %1162 = vector.broadcast %cst_396 : f32 to vector<2x32xf32>
    %1163 = arith.divf %1162, %1161 : vector<2x32xf32>
    %1164 = vector.extract_strided_slice %1129 {offsets = [0, 160], sizes = [2, 32], strides = [1, 1]} : vector<2x256xf32> to vector<2x32xf32>
    %cst_397 = arith.constant 0.000000e+00 : f32
    %1165 = vector.broadcast %cst_397 : f32 to vector<2x32xf32>
    %1166 = arith.subf %1165, %1164 : vector<2x32xf32>
    %1167 = math.exp %1166 : vector<2x32xf32>
    %cst_398 = arith.constant 1.000000e+00 : f32
    %1168 = vector.broadcast %cst_398 : f32 to vector<2x32xf32>
    %1169 = arith.addf %1168, %1167 : vector<2x32xf32>
    %cst_399 = arith.constant 1.000000e+00 : f32
    %1170 = vector.broadcast %cst_399 : f32 to vector<2x32xf32>
    %1171 = arith.divf %1170, %1169 : vector<2x32xf32>
    %1172 = vector.extract_strided_slice %1129 {offsets = [0, 192], sizes = [2, 32], strides = [1, 1]} : vector<2x256xf32> to vector<2x32xf32>
    %1173 = math.tanh %1172 : vector<2x32xf32>
    %1174 = vector.extract_strided_slice %1129 {offsets = [0, 224], sizes = [2, 32], strides = [1, 1]} : vector<2x256xf32> to vector<2x32xf32>
    %cst_400 = arith.constant 0.000000e+00 : f32
    %1175 = vector.broadcast %cst_400 : f32 to vector<2x32xf32>
    %1176 = arith.subf %1175, %1174 : vector<2x32xf32>
    %1177 = math.exp %1176 : vector<2x32xf32>
    %cst_401 = arith.constant 1.000000e+00 : f32
    %1178 = vector.broadcast %cst_401 : f32 to vector<2x32xf32>
    %1179 = arith.addf %1178, %1177 : vector<2x32xf32>
    %cst_402 = arith.constant 1.000000e+00 : f32
    %1180 = vector.broadcast %cst_402 : f32 to vector<2x32xf32>
    %1181 = arith.divf %1180, %1179 : vector<2x32xf32>
    %1182 = arith.mulf %1145, %1115 : vector<2x32xf32>
    %1183 = arith.mulf %1137, %1147 : vector<2x32xf32>
    %1184 = arith.addf %1182, %1183 : vector<2x32xf32>
    %1185 = math.tanh %1184 : vector<2x32xf32>
    %1186 = arith.mulf %1155, %1185 : vector<2x32xf32>
    %1187 = arith.mulf %1171, %1120 : vector<2x32xf32>
    %1188 = arith.mulf %1163, %1173 : vector<2x32xf32>
    %1189 = arith.addf %1187, %1188 : vector<2x32xf32>
    %1190 = math.tanh %1189 : vector<2x32xf32>
    %1191 = arith.mulf %1181, %1190 : vector<2x32xf32>
    %1192 = vector.extract_strided_slice %773 {offsets = [12, 0], sizes = [2, 128], strides = [1, 1]} : vector<20x256xf32> to vector<2x128xf32>
    %1193 = vector.extract_strided_slice %773 {offsets = [6, 128], sizes = [2, 128], strides = [1, 1]} : vector<20x256xf32> to vector<2x128xf32>
    %1194 = tpu.concatenate %1192, %1193 in 1 : vector<2x128xf32>, vector<2x128xf32> -> vector<2x256xf32>
    %1195 = tpu.concatenate %1186, %1191 in 1 : vector<2x32xf32>, vector<2x32xf32> -> vector<2x64xf32>
    %c0_403 = arith.constant 0 : index
    %c0_404 = arith.constant 0 : index
    %1196 = vector.load %arg14[%c0_403, %c0_404] : memref<64x256xf32, #tpu.memory_space<vmem>>, vector<64x256xf32>
    %cst_405 = arith.constant dense<0.000000e+00> : vector<2x256xf32>
    %1197 = tpu.matmul %1195, %1196, %cst_405 {dimension_numbers = #tpu.dot_dimension_numbers<[1], [0], [0], [1], [0, 0, 1, 1], [], []>} : vector<2x64xf32>, vector<64x256xf32>, vector<2x256xf32> -> vector<2x256xf32>
    %1198 = arith.addf %1194, %1197 : vector<2x256xf32>
    %1199 = vector.extract_strided_slice %1198 {offsets = [0, 0], sizes = [2, 32], strides = [1, 1]} : vector<2x256xf32> to vector<2x32xf32>
    %cst_406 = arith.constant 0.000000e+00 : f32
    %1200 = vector.broadcast %cst_406 : f32 to vector<2x32xf32>
    %1201 = arith.subf %1200, %1199 : vector<2x32xf32>
    %1202 = math.exp %1201 : vector<2x32xf32>
    %cst_407 = arith.constant 1.000000e+00 : f32
    %1203 = vector.broadcast %cst_407 : f32 to vector<2x32xf32>
    %1204 = arith.addf %1203, %1202 : vector<2x32xf32>
    %cst_408 = arith.constant 1.000000e+00 : f32
    %1205 = vector.broadcast %cst_408 : f32 to vector<2x32xf32>
    %1206 = arith.divf %1205, %1204 : vector<2x32xf32>
    %1207 = vector.extract_strided_slice %1198 {offsets = [0, 32], sizes = [2, 32], strides = [1, 1]} : vector<2x256xf32> to vector<2x32xf32>
    %cst_409 = arith.constant 0.000000e+00 : f32
    %1208 = vector.broadcast %cst_409 : f32 to vector<2x32xf32>
    %1209 = arith.subf %1208, %1207 : vector<2x32xf32>
    %1210 = math.exp %1209 : vector<2x32xf32>
    %cst_410 = arith.constant 1.000000e+00 : f32
    %1211 = vector.broadcast %cst_410 : f32 to vector<2x32xf32>
    %1212 = arith.addf %1211, %1210 : vector<2x32xf32>
    %cst_411 = arith.constant 1.000000e+00 : f32
    %1213 = vector.broadcast %cst_411 : f32 to vector<2x32xf32>
    %1214 = arith.divf %1213, %1212 : vector<2x32xf32>
    %1215 = vector.extract_strided_slice %1198 {offsets = [0, 64], sizes = [2, 32], strides = [1, 1]} : vector<2x256xf32> to vector<2x32xf32>
    %1216 = math.tanh %1215 : vector<2x32xf32>
    %1217 = vector.extract_strided_slice %1198 {offsets = [0, 96], sizes = [2, 32], strides = [1, 1]} : vector<2x256xf32> to vector<2x32xf32>
    %cst_412 = arith.constant 0.000000e+00 : f32
    %1218 = vector.broadcast %cst_412 : f32 to vector<2x32xf32>
    %1219 = arith.subf %1218, %1217 : vector<2x32xf32>
    %1220 = math.exp %1219 : vector<2x32xf32>
    %cst_413 = arith.constant 1.000000e+00 : f32
    %1221 = vector.broadcast %cst_413 : f32 to vector<2x32xf32>
    %1222 = arith.addf %1221, %1220 : vector<2x32xf32>
    %cst_414 = arith.constant 1.000000e+00 : f32
    %1223 = vector.broadcast %cst_414 : f32 to vector<2x32xf32>
    %1224 = arith.divf %1223, %1222 : vector<2x32xf32>
    %1225 = vector.extract_strided_slice %1198 {offsets = [0, 128], sizes = [2, 32], strides = [1, 1]} : vector<2x256xf32> to vector<2x32xf32>
    %cst_415 = arith.constant 0.000000e+00 : f32
    %1226 = vector.broadcast %cst_415 : f32 to vector<2x32xf32>
    %1227 = arith.subf %1226, %1225 : vector<2x32xf32>
    %1228 = math.exp %1227 : vector<2x32xf32>
    %cst_416 = arith.constant 1.000000e+00 : f32
    %1229 = vector.broadcast %cst_416 : f32 to vector<2x32xf32>
    %1230 = arith.addf %1229, %1228 : vector<2x32xf32>
    %cst_417 = arith.constant 1.000000e+00 : f32
    %1231 = vector.broadcast %cst_417 : f32 to vector<2x32xf32>
    %1232 = arith.divf %1231, %1230 : vector<2x32xf32>
    %1233 = vector.extract_strided_slice %1198 {offsets = [0, 160], sizes = [2, 32], strides = [1, 1]} : vector<2x256xf32> to vector<2x32xf32>
    %cst_418 = arith.constant 0.000000e+00 : f32
    %1234 = vector.broadcast %cst_418 : f32 to vector<2x32xf32>
    %1235 = arith.subf %1234, %1233 : vector<2x32xf32>
    %1236 = math.exp %1235 : vector<2x32xf32>
    %cst_419 = arith.constant 1.000000e+00 : f32
    %1237 = vector.broadcast %cst_419 : f32 to vector<2x32xf32>
    %1238 = arith.addf %1237, %1236 : vector<2x32xf32>
    %cst_420 = arith.constant 1.000000e+00 : f32
    %1239 = vector.broadcast %cst_420 : f32 to vector<2x32xf32>
    %1240 = arith.divf %1239, %1238 : vector<2x32xf32>
    %1241 = vector.extract_strided_slice %1198 {offsets = [0, 192], sizes = [2, 32], strides = [1, 1]} : vector<2x256xf32> to vector<2x32xf32>
    %1242 = math.tanh %1241 : vector<2x32xf32>
    %1243 = vector.extract_strided_slice %1198 {offsets = [0, 224], sizes = [2, 32], strides = [1, 1]} : vector<2x256xf32> to vector<2x32xf32>
    %cst_421 = arith.constant 0.000000e+00 : f32
    %1244 = vector.broadcast %cst_421 : f32 to vector<2x32xf32>
    %1245 = arith.subf %1244, %1243 : vector<2x32xf32>
    %1246 = math.exp %1245 : vector<2x32xf32>
    %cst_422 = arith.constant 1.000000e+00 : f32
    %1247 = vector.broadcast %cst_422 : f32 to vector<2x32xf32>
    %1248 = arith.addf %1247, %1246 : vector<2x32xf32>
    %cst_423 = arith.constant 1.000000e+00 : f32
    %1249 = vector.broadcast %cst_423 : f32 to vector<2x32xf32>
    %1250 = arith.divf %1249, %1248 : vector<2x32xf32>
    %1251 = arith.mulf %1214, %1184 : vector<2x32xf32>
    %1252 = arith.mulf %1206, %1216 : vector<2x32xf32>
    %1253 = arith.addf %1251, %1252 : vector<2x32xf32>
    %1254 = math.tanh %1253 : vector<2x32xf32>
    %1255 = arith.mulf %1224, %1254 : vector<2x32xf32>
    %1256 = arith.mulf %1240, %1189 : vector<2x32xf32>
    %1257 = arith.mulf %1232, %1242 : vector<2x32xf32>
    %1258 = arith.addf %1256, %1257 : vector<2x32xf32>
    %1259 = math.tanh %1258 : vector<2x32xf32>
    %1260 = arith.mulf %1250, %1259 : vector<2x32xf32>
    %1261 = vector.extract_strided_slice %773 {offsets = [14, 0], sizes = [2, 128], strides = [1, 1]} : vector<20x256xf32> to vector<2x128xf32>
    %1262 = vector.extract_strided_slice %773 {offsets = [4, 128], sizes = [2, 128], strides = [1, 1]} : vector<20x256xf32> to vector<2x128xf32>
    %1263 = tpu.concatenate %1261, %1262 in 1 : vector<2x128xf32>, vector<2x128xf32> -> vector<2x256xf32>
    %1264 = tpu.concatenate %1255, %1260 in 1 : vector<2x32xf32>, vector<2x32xf32> -> vector<2x64xf32>
    %c0_424 = arith.constant 0 : index
    %c0_425 = arith.constant 0 : index
    %1265 = vector.load %arg14[%c0_424, %c0_425] : memref<64x256xf32, #tpu.memory_space<vmem>>, vector<64x256xf32>
    %cst_426 = arith.constant dense<0.000000e+00> : vector<2x256xf32>
    %1266 = tpu.matmul %1264, %1265, %cst_426 {dimension_numbers = #tpu.dot_dimension_numbers<[1], [0], [0], [1], [0, 0, 1, 1], [], []>} : vector<2x64xf32>, vector<64x256xf32>, vector<2x256xf32> -> vector<2x256xf32>
    %1267 = arith.addf %1263, %1266 : vector<2x256xf32>
    %1268 = vector.extract_strided_slice %1267 {offsets = [0, 0], sizes = [2, 32], strides = [1, 1]} : vector<2x256xf32> to vector<2x32xf32>
    %cst_427 = arith.constant 0.000000e+00 : f32
    %1269 = vector.broadcast %cst_427 : f32 to vector<2x32xf32>
    %1270 = arith.subf %1269, %1268 : vector<2x32xf32>
    %1271 = math.exp %1270 : vector<2x32xf32>
    %cst_428 = arith.constant 1.000000e+00 : f32
    %1272 = vector.broadcast %cst_428 : f32 to vector<2x32xf32>
    %1273 = arith.addf %1272, %1271 : vector<2x32xf32>
    %cst_429 = arith.constant 1.000000e+00 : f32
    %1274 = vector.broadcast %cst_429 : f32 to vector<2x32xf32>
    %1275 = arith.divf %1274, %1273 : vector<2x32xf32>
    %1276 = vector.extract_strided_slice %1267 {offsets = [0, 32], sizes = [2, 32], strides = [1, 1]} : vector<2x256xf32> to vector<2x32xf32>
    %cst_430 = arith.constant 0.000000e+00 : f32
    %1277 = vector.broadcast %cst_430 : f32 to vector<2x32xf32>
    %1278 = arith.subf %1277, %1276 : vector<2x32xf32>
    %1279 = math.exp %1278 : vector<2x32xf32>
    %cst_431 = arith.constant 1.000000e+00 : f32
    %1280 = vector.broadcast %cst_431 : f32 to vector<2x32xf32>
    %1281 = arith.addf %1280, %1279 : vector<2x32xf32>
    %cst_432 = arith.constant 1.000000e+00 : f32
    %1282 = vector.broadcast %cst_432 : f32 to vector<2x32xf32>
    %1283 = arith.divf %1282, %1281 : vector<2x32xf32>
    %1284 = vector.extract_strided_slice %1267 {offsets = [0, 64], sizes = [2, 32], strides = [1, 1]} : vector<2x256xf32> to vector<2x32xf32>
    %1285 = math.tanh %1284 : vector<2x32xf32>
    %1286 = vector.extract_strided_slice %1267 {offsets = [0, 96], sizes = [2, 32], strides = [1, 1]} : vector<2x256xf32> to vector<2x32xf32>
    %cst_433 = arith.constant 0.000000e+00 : f32
    %1287 = vector.broadcast %cst_433 : f32 to vector<2x32xf32>
    %1288 = arith.subf %1287, %1286 : vector<2x32xf32>
    %1289 = math.exp %1288 : vector<2x32xf32>
    %cst_434 = arith.constant 1.000000e+00 : f32
    %1290 = vector.broadcast %cst_434 : f32 to vector<2x32xf32>
    %1291 = arith.addf %1290, %1289 : vector<2x32xf32>
    %cst_435 = arith.constant 1.000000e+00 : f32
    %1292 = vector.broadcast %cst_435 : f32 to vector<2x32xf32>
    %1293 = arith.divf %1292, %1291 : vector<2x32xf32>
    %1294 = vector.extract_strided_slice %1267 {offsets = [0, 128], sizes = [2, 32], strides = [1, 1]} : vector<2x256xf32> to vector<2x32xf32>
    %cst_436 = arith.constant 0.000000e+00 : f32
    %1295 = vector.broadcast %cst_436 : f32 to vector<2x32xf32>
    %1296 = arith.subf %1295, %1294 : vector<2x32xf32>
    %1297 = math.exp %1296 : vector<2x32xf32>
    %cst_437 = arith.constant 1.000000e+00 : f32
    %1298 = vector.broadcast %cst_437 : f32 to vector<2x32xf32>
    %1299 = arith.addf %1298, %1297 : vector<2x32xf32>
    %cst_438 = arith.constant 1.000000e+00 : f32
    %1300 = vector.broadcast %cst_438 : f32 to vector<2x32xf32>
    %1301 = arith.divf %1300, %1299 : vector<2x32xf32>
    %1302 = vector.extract_strided_slice %1267 {offsets = [0, 160], sizes = [2, 32], strides = [1, 1]} : vector<2x256xf32> to vector<2x32xf32>
    %cst_439 = arith.constant 0.000000e+00 : f32
    %1303 = vector.broadcast %cst_439 : f32 to vector<2x32xf32>
    %1304 = arith.subf %1303, %1302 : vector<2x32xf32>
    %1305 = math.exp %1304 : vector<2x32xf32>
    %cst_440 = arith.constant 1.000000e+00 : f32
    %1306 = vector.broadcast %cst_440 : f32 to vector<2x32xf32>
    %1307 = arith.addf %1306, %1305 : vector<2x32xf32>
    %cst_441 = arith.constant 1.000000e+00 : f32
    %1308 = vector.broadcast %cst_441 : f32 to vector<2x32xf32>
    %1309 = arith.divf %1308, %1307 : vector<2x32xf32>
    %1310 = vector.extract_strided_slice %1267 {offsets = [0, 192], sizes = [2, 32], strides = [1, 1]} : vector<2x256xf32> to vector<2x32xf32>
    %1311 = math.tanh %1310 : vector<2x32xf32>
    %1312 = vector.extract_strided_slice %1267 {offsets = [0, 224], sizes = [2, 32], strides = [1, 1]} : vector<2x256xf32> to vector<2x32xf32>
    %cst_442 = arith.constant 0.000000e+00 : f32
    %1313 = vector.broadcast %cst_442 : f32 to vector<2x32xf32>
    %1314 = arith.subf %1313, %1312 : vector<2x32xf32>
    %1315 = math.exp %1314 : vector<2x32xf32>
    %cst_443 = arith.constant 1.000000e+00 : f32
    %1316 = vector.broadcast %cst_443 : f32 to vector<2x32xf32>
    %1317 = arith.addf %1316, %1315 : vector<2x32xf32>
    %cst_444 = arith.constant 1.000000e+00 : f32
    %1318 = vector.broadcast %cst_444 : f32 to vector<2x32xf32>
    %1319 = arith.divf %1318, %1317 : vector<2x32xf32>
    %1320 = arith.mulf %1283, %1253 : vector<2x32xf32>
    %1321 = arith.mulf %1275, %1285 : vector<2x32xf32>
    %1322 = arith.addf %1320, %1321 : vector<2x32xf32>
    %1323 = math.tanh %1322 : vector<2x32xf32>
    %1324 = arith.mulf %1293, %1323 : vector<2x32xf32>
    %1325 = arith.mulf %1309, %1258 : vector<2x32xf32>
    %1326 = arith.mulf %1301, %1311 : vector<2x32xf32>
    %1327 = arith.addf %1325, %1326 : vector<2x32xf32>
    %1328 = math.tanh %1327 : vector<2x32xf32>
    %1329 = arith.mulf %1319, %1328 : vector<2x32xf32>
    %1330 = vector.extract_strided_slice %773 {offsets = [16, 0], sizes = [2, 128], strides = [1, 1]} : vector<20x256xf32> to vector<2x128xf32>
    %1331 = vector.extract_strided_slice %773 {offsets = [2, 128], sizes = [2, 128], strides = [1, 1]} : vector<20x256xf32> to vector<2x128xf32>
    %1332 = tpu.concatenate %1330, %1331 in 1 : vector<2x128xf32>, vector<2x128xf32> -> vector<2x256xf32>
    %1333 = tpu.concatenate %1324, %1329 in 1 : vector<2x32xf32>, vector<2x32xf32> -> vector<2x64xf32>
    %c0_445 = arith.constant 0 : index
    %c0_446 = arith.constant 0 : index
    %1334 = vector.load %arg14[%c0_445, %c0_446] : memref<64x256xf32, #tpu.memory_space<vmem>>, vector<64x256xf32>
    %cst_447 = arith.constant dense<0.000000e+00> : vector<2x256xf32>
    %1335 = tpu.matmul %1333, %1334, %cst_447 {dimension_numbers = #tpu.dot_dimension_numbers<[1], [0], [0], [1], [0, 0, 1, 1], [], []>} : vector<2x64xf32>, vector<64x256xf32>, vector<2x256xf32> -> vector<2x256xf32>
    %1336 = arith.addf %1332, %1335 : vector<2x256xf32>
    %1337 = vector.extract_strided_slice %1336 {offsets = [0, 0], sizes = [2, 32], strides = [1, 1]} : vector<2x256xf32> to vector<2x32xf32>
    %cst_448 = arith.constant 0.000000e+00 : f32
    %1338 = vector.broadcast %cst_448 : f32 to vector<2x32xf32>
    %1339 = arith.subf %1338, %1337 : vector<2x32xf32>
    %1340 = math.exp %1339 : vector<2x32xf32>
    %cst_449 = arith.constant 1.000000e+00 : f32
    %1341 = vector.broadcast %cst_449 : f32 to vector<2x32xf32>
    %1342 = arith.addf %1341, %1340 : vector<2x32xf32>
    %cst_450 = arith.constant 1.000000e+00 : f32
    %1343 = vector.broadcast %cst_450 : f32 to vector<2x32xf32>
    %1344 = arith.divf %1343, %1342 : vector<2x32xf32>
    %1345 = vector.extract_strided_slice %1336 {offsets = [0, 32], sizes = [2, 32], strides = [1, 1]} : vector<2x256xf32> to vector<2x32xf32>
    %cst_451 = arith.constant 0.000000e+00 : f32
    %1346 = vector.broadcast %cst_451 : f32 to vector<2x32xf32>
    %1347 = arith.subf %1346, %1345 : vector<2x32xf32>
    %1348 = math.exp %1347 : vector<2x32xf32>
    %cst_452 = arith.constant 1.000000e+00 : f32
    %1349 = vector.broadcast %cst_452 : f32 to vector<2x32xf32>
    %1350 = arith.addf %1349, %1348 : vector<2x32xf32>
    %cst_453 = arith.constant 1.000000e+00 : f32
    %1351 = vector.broadcast %cst_453 : f32 to vector<2x32xf32>
    %1352 = arith.divf %1351, %1350 : vector<2x32xf32>
    %1353 = vector.extract_strided_slice %1336 {offsets = [0, 64], sizes = [2, 32], strides = [1, 1]} : vector<2x256xf32> to vector<2x32xf32>
    %1354 = math.tanh %1353 : vector<2x32xf32>
    %1355 = vector.extract_strided_slice %1336 {offsets = [0, 96], sizes = [2, 32], strides = [1, 1]} : vector<2x256xf32> to vector<2x32xf32>
    %cst_454 = arith.constant 0.000000e+00 : f32
    %1356 = vector.broadcast %cst_454 : f32 to vector<2x32xf32>
    %1357 = arith.subf %1356, %1355 : vector<2x32xf32>
    %1358 = math.exp %1357 : vector<2x32xf32>
    %cst_455 = arith.constant 1.000000e+00 : f32
    %1359 = vector.broadcast %cst_455 : f32 to vector<2x32xf32>
    %1360 = arith.addf %1359, %1358 : vector<2x32xf32>
    %cst_456 = arith.constant 1.000000e+00 : f32
    %1361 = vector.broadcast %cst_456 : f32 to vector<2x32xf32>
    %1362 = arith.divf %1361, %1360 : vector<2x32xf32>
    %1363 = vector.extract_strided_slice %1336 {offsets = [0, 128], sizes = [2, 32], strides = [1, 1]} : vector<2x256xf32> to vector<2x32xf32>
    %cst_457 = arith.constant 0.000000e+00 : f32
    %1364 = vector.broadcast %cst_457 : f32 to vector<2x32xf32>
    %1365 = arith.subf %1364, %1363 : vector<2x32xf32>
    %1366 = math.exp %1365 : vector<2x32xf32>
    %cst_458 = arith.constant 1.000000e+00 : f32
    %1367 = vector.broadcast %cst_458 : f32 to vector<2x32xf32>
    %1368 = arith.addf %1367, %1366 : vector<2x32xf32>
    %cst_459 = arith.constant 1.000000e+00 : f32
    %1369 = vector.broadcast %cst_459 : f32 to vector<2x32xf32>
    %1370 = arith.divf %1369, %1368 : vector<2x32xf32>
    %1371 = vector.extract_strided_slice %1336 {offsets = [0, 160], sizes = [2, 32], strides = [1, 1]} : vector<2x256xf32> to vector<2x32xf32>
    %cst_460 = arith.constant 0.000000e+00 : f32
    %1372 = vector.broadcast %cst_460 : f32 to vector<2x32xf32>
    %1373 = arith.subf %1372, %1371 : vector<2x32xf32>
    %1374 = math.exp %1373 : vector<2x32xf32>
    %cst_461 = arith.constant 1.000000e+00 : f32
    %1375 = vector.broadcast %cst_461 : f32 to vector<2x32xf32>
    %1376 = arith.addf %1375, %1374 : vector<2x32xf32>
    %cst_462 = arith.constant 1.000000e+00 : f32
    %1377 = vector.broadcast %cst_462 : f32 to vector<2x32xf32>
    %1378 = arith.divf %1377, %1376 : vector<2x32xf32>
    %1379 = vector.extract_strided_slice %1336 {offsets = [0, 192], sizes = [2, 32], strides = [1, 1]} : vector<2x256xf32> to vector<2x32xf32>
    %1380 = math.tanh %1379 : vector<2x32xf32>
    %1381 = vector.extract_strided_slice %1336 {offsets = [0, 224], sizes = [2, 32], strides = [1, 1]} : vector<2x256xf32> to vector<2x32xf32>
    %cst_463 = arith.constant 0.000000e+00 : f32
    %1382 = vector.broadcast %cst_463 : f32 to vector<2x32xf32>
    %1383 = arith.subf %1382, %1381 : vector<2x32xf32>
    %1384 = math.exp %1383 : vector<2x32xf32>
    %cst_464 = arith.constant 1.000000e+00 : f32
    %1385 = vector.broadcast %cst_464 : f32 to vector<2x32xf32>
    %1386 = arith.addf %1385, %1384 : vector<2x32xf32>
    %cst_465 = arith.constant 1.000000e+00 : f32
    %1387 = vector.broadcast %cst_465 : f32 to vector<2x32xf32>
    %1388 = arith.divf %1387, %1386 : vector<2x32xf32>
    %1389 = arith.mulf %1352, %1322 : vector<2x32xf32>
    %1390 = arith.mulf %1344, %1354 : vector<2x32xf32>
    %1391 = arith.addf %1389, %1390 : vector<2x32xf32>
    %1392 = math.tanh %1391 : vector<2x32xf32>
    %1393 = arith.mulf %1362, %1392 : vector<2x32xf32>
    %1394 = arith.mulf %1378, %1327 : vector<2x32xf32>
    %1395 = arith.mulf %1370, %1380 : vector<2x32xf32>
    %1396 = arith.addf %1394, %1395 : vector<2x32xf32>
    %1397 = math.tanh %1396 : vector<2x32xf32>
    %1398 = arith.mulf %1388, %1397 : vector<2x32xf32>
    %1399 = vector.extract_strided_slice %773 {offsets = [18, 0], sizes = [2, 128], strides = [1, 1]} : vector<20x256xf32> to vector<2x128xf32>
    %1400 = vector.extract_strided_slice %773 {offsets = [0, 128], sizes = [2, 128], strides = [1, 1]} : vector<20x256xf32> to vector<2x128xf32>
    %1401 = tpu.concatenate %1399, %1400 in 1 : vector<2x128xf32>, vector<2x128xf32> -> vector<2x256xf32>
    %1402 = tpu.concatenate %1393, %1398 in 1 : vector<2x32xf32>, vector<2x32xf32> -> vector<2x64xf32>
    %c0_466 = arith.constant 0 : index
    %c0_467 = arith.constant 0 : index
    %1403 = vector.load %arg14[%c0_466, %c0_467] : memref<64x256xf32, #tpu.memory_space<vmem>>, vector<64x256xf32>
    %cst_468 = arith.constant dense<0.000000e+00> : vector<2x256xf32>
    %1404 = tpu.matmul %1402, %1403, %cst_468 {dimension_numbers = #tpu.dot_dimension_numbers<[1], [0], [0], [1], [0, 0, 1, 1], [], []>} : vector<2x64xf32>, vector<64x256xf32>, vector<2x256xf32> -> vector<2x256xf32>
    %1405 = arith.addf %1401, %1404 : vector<2x256xf32>
    %1406 = vector.extract_strided_slice %1405 {offsets = [0, 0], sizes = [2, 32], strides = [1, 1]} : vector<2x256xf32> to vector<2x32xf32>
    %cst_469 = arith.constant 0.000000e+00 : f32
    %1407 = vector.broadcast %cst_469 : f32 to vector<2x32xf32>
    %1408 = arith.subf %1407, %1406 : vector<2x32xf32>
    %1409 = math.exp %1408 : vector<2x32xf32>
    %cst_470 = arith.constant 1.000000e+00 : f32
    %1410 = vector.broadcast %cst_470 : f32 to vector<2x32xf32>
    %1411 = arith.addf %1410, %1409 : vector<2x32xf32>
    %cst_471 = arith.constant 1.000000e+00 : f32
    %1412 = vector.broadcast %cst_471 : f32 to vector<2x32xf32>
    %1413 = arith.divf %1412, %1411 : vector<2x32xf32>
    %1414 = vector.extract_strided_slice %1405 {offsets = [0, 32], sizes = [2, 32], strides = [1, 1]} : vector<2x256xf32> to vector<2x32xf32>
    %cst_472 = arith.constant 0.000000e+00 : f32
    %1415 = vector.broadcast %cst_472 : f32 to vector<2x32xf32>
    %1416 = arith.subf %1415, %1414 : vector<2x32xf32>
    %1417 = math.exp %1416 : vector<2x32xf32>
    %cst_473 = arith.constant 1.000000e+00 : f32
    %1418 = vector.broadcast %cst_473 : f32 to vector<2x32xf32>
    %1419 = arith.addf %1418, %1417 : vector<2x32xf32>
    %cst_474 = arith.constant 1.000000e+00 : f32
    %1420 = vector.broadcast %cst_474 : f32 to vector<2x32xf32>
    %1421 = arith.divf %1420, %1419 : vector<2x32xf32>
    %1422 = vector.extract_strided_slice %1405 {offsets = [0, 64], sizes = [2, 32], strides = [1, 1]} : vector<2x256xf32> to vector<2x32xf32>
    %1423 = math.tanh %1422 : vector<2x32xf32>
    %1424 = vector.extract_strided_slice %1405 {offsets = [0, 96], sizes = [2, 32], strides = [1, 1]} : vector<2x256xf32> to vector<2x32xf32>
    %cst_475 = arith.constant 0.000000e+00 : f32
    %1425 = vector.broadcast %cst_475 : f32 to vector<2x32xf32>
    %1426 = arith.subf %1425, %1424 : vector<2x32xf32>
    %1427 = math.exp %1426 : vector<2x32xf32>
    %cst_476 = arith.constant 1.000000e+00 : f32
    %1428 = vector.broadcast %cst_476 : f32 to vector<2x32xf32>
    %1429 = arith.addf %1428, %1427 : vector<2x32xf32>
    %cst_477 = arith.constant 1.000000e+00 : f32
    %1430 = vector.broadcast %cst_477 : f32 to vector<2x32xf32>
    %1431 = arith.divf %1430, %1429 : vector<2x32xf32>
    %1432 = vector.extract_strided_slice %1405 {offsets = [0, 128], sizes = [2, 32], strides = [1, 1]} : vector<2x256xf32> to vector<2x32xf32>
    %cst_478 = arith.constant 0.000000e+00 : f32
    %1433 = vector.broadcast %cst_478 : f32 to vector<2x32xf32>
    %1434 = arith.subf %1433, %1432 : vector<2x32xf32>
    %1435 = math.exp %1434 : vector<2x32xf32>
    %cst_479 = arith.constant 1.000000e+00 : f32
    %1436 = vector.broadcast %cst_479 : f32 to vector<2x32xf32>
    %1437 = arith.addf %1436, %1435 : vector<2x32xf32>
    %cst_480 = arith.constant 1.000000e+00 : f32
    %1438 = vector.broadcast %cst_480 : f32 to vector<2x32xf32>
    %1439 = arith.divf %1438, %1437 : vector<2x32xf32>
    %1440 = vector.extract_strided_slice %1405 {offsets = [0, 160], sizes = [2, 32], strides = [1, 1]} : vector<2x256xf32> to vector<2x32xf32>
    %cst_481 = arith.constant 0.000000e+00 : f32
    %1441 = vector.broadcast %cst_481 : f32 to vector<2x32xf32>
    %1442 = arith.subf %1441, %1440 : vector<2x32xf32>
    %1443 = math.exp %1442 : vector<2x32xf32>
    %cst_482 = arith.constant 1.000000e+00 : f32
    %1444 = vector.broadcast %cst_482 : f32 to vector<2x32xf32>
    %1445 = arith.addf %1444, %1443 : vector<2x32xf32>
    %cst_483 = arith.constant 1.000000e+00 : f32
    %1446 = vector.broadcast %cst_483 : f32 to vector<2x32xf32>
    %1447 = arith.divf %1446, %1445 : vector<2x32xf32>
    %1448 = vector.extract_strided_slice %1405 {offsets = [0, 192], sizes = [2, 32], strides = [1, 1]} : vector<2x256xf32> to vector<2x32xf32>
    %1449 = math.tanh %1448 : vector<2x32xf32>
    %1450 = vector.extract_strided_slice %1405 {offsets = [0, 224], sizes = [2, 32], strides = [1, 1]} : vector<2x256xf32> to vector<2x32xf32>
    %cst_484 = arith.constant 0.000000e+00 : f32
    %1451 = vector.broadcast %cst_484 : f32 to vector<2x32xf32>
    %1452 = arith.subf %1451, %1450 : vector<2x32xf32>
    %1453 = math.exp %1452 : vector<2x32xf32>
    %cst_485 = arith.constant 1.000000e+00 : f32
    %1454 = vector.broadcast %cst_485 : f32 to vector<2x32xf32>
    %1455 = arith.addf %1454, %1453 : vector<2x32xf32>
    %cst_486 = arith.constant 1.000000e+00 : f32
    %1456 = vector.broadcast %cst_486 : f32 to vector<2x32xf32>
    %1457 = arith.divf %1456, %1455 : vector<2x32xf32>
    %1458 = arith.mulf %1421, %1391 : vector<2x32xf32>
    %1459 = arith.mulf %1413, %1423 : vector<2x32xf32>
    %1460 = arith.addf %1458, %1459 : vector<2x32xf32>
    %1461 = math.tanh %1460 : vector<2x32xf32>
    %1462 = arith.mulf %1431, %1461 : vector<2x32xf32>
    %1463 = arith.mulf %1447, %1396 : vector<2x32xf32>
    %1464 = arith.mulf %1439, %1449 : vector<2x32xf32>
    %1465 = arith.addf %1463, %1464 : vector<2x32xf32>
    %1466 = math.tanh %1465 : vector<2x32xf32>
    %1467 = arith.mulf %1457, %1466 : vector<2x32xf32>
    %1468 = tpu.concatenate %841, %910, %979, %1048, %1117, %1186, %1255, %1324, %1393, %1462 in 0 : vector<2x32xf32>, vector<2x32xf32>, vector<2x32xf32>, vector<2x32xf32>, vector<2x32xf32>, vector<2x32xf32>, vector<2x32xf32>, vector<2x32xf32>, vector<2x32xf32>, vector<2x32xf32> -> vector<20x32xf32>
    %1469 = tpu.concatenate %1467, %1398, %1329, %1260, %1191, %1122, %1053, %984, %915, %846 in 0 : vector<2x32xf32>, vector<2x32xf32>, vector<2x32xf32>, vector<2x32xf32>, vector<2x32xf32>, vector<2x32xf32>, vector<2x32xf32>, vector<2x32xf32>, vector<2x32xf32>, vector<2x32xf32> -> vector<20x32xf32>
    %1470 = tpu.concatenate %1468, %1469 in 1 : vector<20x32xf32>, vector<20x32xf32> -> vector<20x64xf32>
    %c0_487 = arith.constant 0 : index
    %c0_488 = arith.constant 0 : index
    %1471 = vector.load %arg16[%c0_487, %c0_488] : memref<64x192xf32, #tpu.memory_space<vmem>>, vector<64x192xf32>
    %cst_489 = arith.constant dense<0.000000e+00> : vector<20x192xf32>
    %1472 = tpu.matmul %1470, %1471, %cst_489 {dimension_numbers = #tpu.dot_dimension_numbers<[1], [0], [0], [1], [0, 0, 1, 1], [], []>} : vector<20x64xf32>, vector<64x192xf32>, vector<20x192xf32> -> vector<20x192xf32>
    %c0_490 = arith.constant 0 : index
    %c0_491 = arith.constant 0 : index
    %1473 = vector.load %arg17[%c0_490, %c0_491] : memref<1x192xf32, #tpu.memory_space<vmem>>, vector<1x192xf32>
    %1474 = vector.broadcast %1473 : vector<1x192xf32> to vector<20x192xf32>
    %1475 = arith.addf %1472, %1474 : vector<20x192xf32>
    %1476 = vector.extract_strided_slice %1475 {offsets = [0, 0], sizes = [20, 64], strides = [1, 1]} : vector<20x192xf32> to vector<20x64xf32>
    %cst_492 = arith.constant 2.500000e-01 : f32
    %1477 = vector.broadcast %cst_492 : f32 to vector<20x64xf32>
    %1478 = arith.mulf %1476, %1477 : vector<20x64xf32>
    %1479 = vector.extract_strided_slice %1475 {offsets = [0, 64], sizes = [20, 64], strides = [1, 1]} : vector<20x192xf32> to vector<20x64xf32>
    %1480 = vector.extract_strided_slice %1475 {offsets = [0, 128], sizes = [20, 64], strides = [1, 1]} : vector<20x192xf32> to vector<20x64xf32>
    %c0_493 = arith.constant 0 : index
    %c0_494 = arith.constant 0 : index
    %1481 = vector.load %arg29[%c0_493, %c0_494] : memref<64x4xf32, #tpu.memory_space<vmem>>, vector<64x4xf32>
    %c0_495 = arith.constant 0 : index
    %c0_496 = arith.constant 0 : index
    %1482 = vector.load %arg30[%c0_495, %c0_496] : memref<4x64xf32, #tpu.memory_space<vmem>>, vector<4x64xf32>
    %c0_497 = arith.constant 0 : index
    %c0_498 = arith.constant 0 : index
    %c0_499 = arith.constant 0 : index
    %1483 = vector.load %arg28[%c0_497, %c0_498, %c0_499] : memref<2x20x20xf32, #tpu.memory_space<vmem>>, vector<1x20x20xf32>
    %1484 = vector.shape_cast %1483 : vector<1x20x20xf32> to vector<20x20xf32>
    %cst_500 = arith.constant dense<0.000000e+00> : vector<20x64xf32>
    %1485 = tpu.matmul %1484, %1479, %cst_500 {dimension_numbers = #tpu.dot_dimension_numbers<[1], [0], [0], [1], [0, 0, 1, 1], [], []>} : vector<20x20xf32>, vector<20x64xf32>, vector<20x64xf32> -> vector<20x64xf32>
    %cst_501 = arith.constant dense<0.000000e+00> : vector<20x64xf32>
    %1486 = tpu.matmul %1484, %1480, %cst_501 {dimension_numbers = #tpu.dot_dimension_numbers<[1], [0], [0], [1], [0, 0, 1, 1], [], []>} : vector<20x20xf32>, vector<20x64xf32>, vector<20x64xf32> -> vector<20x64xf32>
    %1487 = arith.mulf %1478, %1485 : vector<20x64xf32>
    %cst_502 = arith.constant dense<0.000000e+00> : vector<20x4xf32>
    %1488 = tpu.matmul %1487, %1481, %cst_502 {dimension_numbers = #tpu.dot_dimension_numbers<[1], [0], [0], [1], [0, 0, 1, 1], [], []>} : vector<20x64xf32>, vector<64x4xf32>, vector<20x4xf32> -> vector<20x4xf32>
    %c1_503 = arith.constant 1 : index
    %c0_504 = arith.constant 0 : index
    %c0_505 = arith.constant 0 : index
    %1489 = vector.load %arg28[%c1_503, %c0_504, %c0_505] : memref<2x20x20xf32, #tpu.memory_space<vmem>>, vector<1x20x20xf32>
    %1490 = vector.shape_cast %1489 : vector<1x20x20xf32> to vector<20x20xf32>
    %cst_506 = arith.constant dense<0.000000e+00> : vector<20x64xf32>
    %1491 = tpu.matmul %1490, %1479, %cst_506 {dimension_numbers = #tpu.dot_dimension_numbers<[1], [0], [0], [1], [0, 0, 1, 1], [], []>} : vector<20x20xf32>, vector<20x64xf32>, vector<20x64xf32> -> vector<20x64xf32>
    %cst_507 = arith.constant dense<0.000000e+00> : vector<20x64xf32>
    %1492 = tpu.matmul %1490, %1480, %cst_507 {dimension_numbers = #tpu.dot_dimension_numbers<[1], [0], [0], [1], [0, 0, 1, 1], [], []>} : vector<20x20xf32>, vector<20x64xf32>, vector<20x64xf32> -> vector<20x64xf32>
    %1493 = arith.mulf %1478, %1491 : vector<20x64xf32>
    %cst_508 = arith.constant dense<0.000000e+00> : vector<20x4xf32>
    %1494 = tpu.matmul %1493, %1481, %cst_508 {dimension_numbers = #tpu.dot_dimension_numbers<[1], [0], [0], [1], [0, 0, 1, 1], [], []>} : vector<20x64xf32>, vector<64x4xf32>, vector<20x4xf32> -> vector<20x4xf32>
    %1495 = arith.maximumf %1488, %1494 : vector<20x4xf32>
    %1496 = arith.subf %1488, %1495 : vector<20x4xf32>
    %1497 = math.exp %1496 : vector<20x4xf32>
    %1498 = arith.subf %1494, %1495 : vector<20x4xf32>
    %1499 = math.exp %1498 : vector<20x4xf32>
    %1500 = arith.addf %1497, %1499 : vector<20x4xf32>
    %1501 = tpu.reciprocal %1500 {approx = true} : vector<20x4xf32> -> vector<20x4xf32>
    %cst_509 = arith.constant 0.000000e+00 : f32
    %1502 = vector.broadcast %cst_509 : f32 to vector<20x64xf32>
    %1503 = arith.mulf %1497, %1501 : vector<20x4xf32>
    %cst_510 = arith.constant dense<0.000000e+00> : vector<20x64xf32>
    %1504 = tpu.matmul %1503, %1482, %cst_510 {dimension_numbers = #tpu.dot_dimension_numbers<[1], [0], [0], [1], [0, 0, 1, 1], [], []>} : vector<20x4xf32>, vector<4x64xf32>, vector<20x64xf32> -> vector<20x64xf32>
    %1505 = arith.mulf %1504, %1486 : vector<20x64xf32>
    %1506 = arith.addf %1502, %1505 : vector<20x64xf32>
    %1507 = arith.mulf %1499, %1501 : vector<20x4xf32>
    %cst_511 = arith.constant dense<0.000000e+00> : vector<20x64xf32>
    %1508 = tpu.matmul %1507, %1482, %cst_511 {dimension_numbers = #tpu.dot_dimension_numbers<[1], [0], [0], [1], [0, 0, 1, 1], [], []>} : vector<20x4xf32>, vector<4x64xf32>, vector<20x64xf32> -> vector<20x64xf32>
    %1509 = arith.mulf %1508, %1492 : vector<20x64xf32>
    %1510 = arith.addf %1506, %1509 : vector<20x64xf32>
    %c0_512 = arith.constant 0 : index
    %c0_513 = arith.constant 0 : index
    %1511 = vector.load %arg18[%c0_512, %c0_513] : memref<64x64xf32, #tpu.memory_space<vmem>>, vector<64x64xf32>
    %cst_514 = arith.constant dense<0.000000e+00> : vector<20x64xf32>
    %1512 = tpu.matmul %1510, %1511, %cst_514 {dimension_numbers = #tpu.dot_dimension_numbers<[1], [0], [0], [1], [0, 0, 1, 1], [], []>} : vector<20x64xf32>, vector<64x64xf32>, vector<20x64xf32> -> vector<20x64xf32>
    %c0_515 = arith.constant 0 : index
    %c0_516 = arith.constant 0 : index
    %1513 = vector.load %arg19[%c0_515, %c0_516] : memref<1x64xf32, #tpu.memory_space<vmem>>, vector<1x64xf32>
    %1514 = vector.broadcast %1513 : vector<1x64xf32> to vector<20x64xf32>
    %1515 = arith.addf %1512, %1514 : vector<20x64xf32>
    %1516 = arith.addf %1470, %1515 : vector<20x64xf32>
    %cst_517 = arith.constant dense<0.000000e+00> : vector<20xf32>
    %1517 = vector.multi_reduction <add>, %1516, %cst_517 [1] : vector<20x64xf32> to vector<20xf32>
    %1518 = vector.shape_cast %1517 : vector<20xf32> to vector<20x1xf32>
    %cst_518 = arith.constant 6.400000e+01 : f32
    %1519 = vector.broadcast %cst_518 : f32 to vector<20x1xf32>
    %1520 = arith.divf %1518, %1519 : vector<20x1xf32>
    %1521 = vector.broadcast %1520 : vector<20x1xf32> to vector<20x64xf32>
    %1522 = arith.subf %1516, %1521 : vector<20x64xf32>
    %1523 = vector.broadcast %1520 : vector<20x1xf32> to vector<20x64xf32>
    %1524 = arith.subf %1516, %1523 : vector<20x64xf32>
    %1525 = arith.mulf %1522, %1524 : vector<20x64xf32>
    %cst_519 = arith.constant dense<0.000000e+00> : vector<20xf32>
    %1526 = vector.multi_reduction <add>, %1525, %cst_519 [1] : vector<20x64xf32> to vector<20xf32>
    %1527 = vector.shape_cast %1526 : vector<20xf32> to vector<20x1xf32>
    %cst_520 = arith.constant 6.400000e+01 : f32
    %1528 = vector.broadcast %cst_520 : f32 to vector<20x1xf32>
    %1529 = arith.divf %1527, %1528 : vector<20x1xf32>
    %1530 = vector.broadcast %1520 : vector<20x1xf32> to vector<20x64xf32>
    %1531 = arith.subf %1516, %1530 : vector<20x64xf32>
    %cst_521 = arith.constant 9.99999974E-6 : f32
    %1532 = vector.broadcast %cst_521 : f32 to vector<20x1xf32>
    %1533 = arith.addf %1529, %1532 : vector<20x1xf32>
    %1534 = math.rsqrt %1533 : vector<20x1xf32>
    %1535 = vector.broadcast %1534 : vector<20x1xf32> to vector<20x64xf32>
    %1536 = arith.mulf %1531, %1535 : vector<20x64xf32>
    %c0_522 = arith.constant 0 : index
    %c0_523 = arith.constant 0 : index
    %1537 = vector.load %arg20[%c0_522, %c0_523] : memref<1x64xf32, #tpu.memory_space<vmem>>, vector<1x64xf32>
    %1538 = vector.broadcast %1537 : vector<1x64xf32> to vector<20x64xf32>
    %1539 = arith.mulf %1536, %1538 : vector<20x64xf32>
    %c0_524 = arith.constant 0 : index
    %c0_525 = arith.constant 0 : index
    %1540 = vector.load %arg21[%c0_524, %c0_525] : memref<1x64xf32, #tpu.memory_space<vmem>>, vector<1x64xf32>
    %1541 = vector.broadcast %1540 : vector<1x64xf32> to vector<20x64xf32>
    %1542 = arith.addf %1539, %1541 : vector<20x64xf32>
    %c0_526 = arith.constant 0 : index
    %c0_527 = arith.constant 0 : index
    %1543 = vector.load %arg22[%c0_526, %c0_527] : memref<64x512xf32, #tpu.memory_space<vmem>>, vector<64x512xf32>
    %cst_528 = arith.constant dense<0.000000e+00> : vector<20x512xf32>
    %1544 = tpu.matmul %1542, %1543, %cst_528 {dimension_numbers = #tpu.dot_dimension_numbers<[1], [0], [0], [1], [0, 0, 1, 1], [], []>} : vector<20x64xf32>, vector<64x512xf32>, vector<20x512xf32> -> vector<20x512xf32>
    %c0_529 = arith.constant 0 : index
    %c0_530 = arith.constant 0 : index
    %1545 = vector.load %arg23[%c0_529, %c0_530] : memref<1x512xf32, #tpu.memory_space<vmem>>, vector<1x512xf32>
    %1546 = vector.broadcast %1545 : vector<1x512xf32> to vector<20x512xf32>
    %1547 = arith.addf %1544, %1546 : vector<20x512xf32>
    %cst_531 = arith.constant 0.000000e+00 : f32
    %1548 = vector.broadcast %cst_531 : f32 to vector<20x512xf32>
    %1549 = arith.maximumf %1547, %1548 : vector<20x512xf32>
    %c0_532 = arith.constant 0 : index
    %c0_533 = arith.constant 0 : index
    %1550 = vector.load %arg24[%c0_532, %c0_533] : memref<512x64xf32, #tpu.memory_space<vmem>>, vector<512x64xf32>
    %cst_534 = arith.constant dense<0.000000e+00> : vector<20x64xf32>
    %1551 = tpu.matmul %1549, %1550, %cst_534 {dimension_numbers = #tpu.dot_dimension_numbers<[1], [0], [0], [1], [0, 0, 1, 1], [], []>} : vector<20x512xf32>, vector<512x64xf32>, vector<20x64xf32> -> vector<20x64xf32>
    %c0_535 = arith.constant 0 : index
    %c0_536 = arith.constant 0 : index
    %1552 = vector.load %arg25[%c0_535, %c0_536] : memref<1x64xf32, #tpu.memory_space<vmem>>, vector<1x64xf32>
    %1553 = vector.broadcast %1552 : vector<1x64xf32> to vector<20x64xf32>
    %1554 = arith.addf %1551, %1553 : vector<20x64xf32>
    %1555 = arith.addf %1542, %1554 : vector<20x64xf32>
    %cst_537 = arith.constant dense<0.000000e+00> : vector<20xf32>
    %1556 = vector.multi_reduction <add>, %1555, %cst_537 [1] : vector<20x64xf32> to vector<20xf32>
    %1557 = vector.shape_cast %1556 : vector<20xf32> to vector<20x1xf32>
    %cst_538 = arith.constant 6.400000e+01 : f32
    %1558 = vector.broadcast %cst_538 : f32 to vector<20x1xf32>
    %1559 = arith.divf %1557, %1558 : vector<20x1xf32>
    %1560 = vector.broadcast %1559 : vector<20x1xf32> to vector<20x64xf32>
    %1561 = arith.subf %1555, %1560 : vector<20x64xf32>
    %1562 = vector.broadcast %1559 : vector<20x1xf32> to vector<20x64xf32>
    %1563 = arith.subf %1555, %1562 : vector<20x64xf32>
    %1564 = arith.mulf %1561, %1563 : vector<20x64xf32>
    %cst_539 = arith.constant dense<0.000000e+00> : vector<20xf32>
    %1565 = vector.multi_reduction <add>, %1564, %cst_539 [1] : vector<20x64xf32> to vector<20xf32>
    %1566 = vector.shape_cast %1565 : vector<20xf32> to vector<20x1xf32>
    %cst_540 = arith.constant 6.400000e+01 : f32
    %1567 = vector.broadcast %cst_540 : f32 to vector<20x1xf32>
    %1568 = arith.divf %1566, %1567 : vector<20x1xf32>
    %1569 = vector.broadcast %1559 : vector<20x1xf32> to vector<20x64xf32>
    %1570 = arith.subf %1555, %1569 : vector<20x64xf32>
    %cst_541 = arith.constant 9.99999974E-6 : f32
    %1571 = vector.broadcast %cst_541 : f32 to vector<20x1xf32>
    %1572 = arith.addf %1568, %1571 : vector<20x1xf32>
    %1573 = math.rsqrt %1572 : vector<20x1xf32>
    %1574 = vector.broadcast %1573 : vector<20x1xf32> to vector<20x64xf32>
    %1575 = arith.mulf %1570, %1574 : vector<20x64xf32>
    %c0_542 = arith.constant 0 : index
    %c0_543 = arith.constant 0 : index
    %1576 = vector.load %arg26[%c0_542, %c0_543] : memref<1x64xf32, #tpu.memory_space<vmem>>, vector<1x64xf32>
    %1577 = vector.broadcast %1576 : vector<1x64xf32> to vector<20x64xf32>
    %1578 = arith.mulf %1575, %1577 : vector<20x64xf32>
    %c0_544 = arith.constant 0 : index
    %c0_545 = arith.constant 0 : index
    %1579 = vector.load %arg27[%c0_544, %c0_545] : memref<1x64xf32, #tpu.memory_space<vmem>>, vector<1x64xf32>
    %1580 = vector.broadcast %1579 : vector<1x64xf32> to vector<20x64xf32>
    %1581 = arith.addf %1578, %1580 : vector<20x64xf32>
    %c0_546 = arith.constant 0 : index
    %c0_547 = arith.constant 0 : index
    %1582 = vector.load %arg31[%c0_546, %c0_547] : memref<2x20xf32, #tpu.memory_space<vmem>>, vector<2x20xf32>
    %cst_548 = arith.constant dense<0.000000e+00> : vector<2x64xf32>
    %1583 = tpu.matmul %1582, %1581, %cst_548 {dimension_numbers = #tpu.dot_dimension_numbers<[1], [0], [0], [1], [0, 0, 1, 1], [], []>} : vector<2x20xf32>, vector<20x64xf32>, vector<2x64xf32> -> vector<2x64xf32>
    %c0_549 = arith.constant 0 : index
    %c0_550 = arith.constant 0 : index
    %1584 = vector.load %arg32[%c0_549, %c0_550] : memref<20x2xf32, #tpu.memory_space<vmem>>, vector<20x2xf32>
    %cst_551 = arith.constant dense<0.000000e+00> : vector<20x64xf32>
    %1585 = tpu.matmul %1584, %1583, %cst_551 {dimension_numbers = #tpu.dot_dimension_numbers<[1], [0], [0], [1], [0, 0, 1, 1], [], []>} : vector<20x2xf32>, vector<2x64xf32>, vector<20x64xf32> -> vector<20x64xf32>
    %1586 = arith.subf %1581, %1585 : vector<20x64xf32>
    %cst_552 = arith.constant 1.000000e+01 : f32
    %1587 = vector.broadcast %cst_552 : f32 to vector<2x20xf32>
    %1588 = arith.mulf %1582, %1587 : vector<2x20xf32>
    %1589 = arith.mulf %1586, %1586 : vector<20x64xf32>
    %cst_553 = arith.constant dense<0.000000e+00> : vector<2x64xf32>
    %1590 = tpu.matmul %1588, %1589, %cst_553 {dimension_numbers = #tpu.dot_dimension_numbers<[1], [0], [0], [1], [0, 0, 1, 1], [], []>} : vector<2x20xf32>, vector<20x64xf32>, vector<2x64xf32> -> vector<2x64xf32>
    %cst_554 = arith.constant 9.000000e+00 : f32
    %1591 = vector.broadcast %cst_554 : f32 to vector<2x64xf32>
    %1592 = arith.divf %1590, %1591 : vector<2x64xf32>
    %1593 = math.sqrt %1592 : vector<2x64xf32>
    %1594 = tpu.concatenate %1583, %1593 in 1 : vector<2x64xf32>, vector<2x64xf32> -> vector<2x128xf32>
    %c0_555 = arith.constant 0 : index
    %c0_556 = arith.constant 0 : index
    %1595 = vector.load %arg33[%c0_555, %c0_556] : memref<128x9xf32, #tpu.memory_space<vmem>>, vector<128x9xf32>
    %cst_557 = arith.constant dense<0.000000e+00> : vector<2x9xf32>
    %1596 = tpu.matmul %1594, %1595, %cst_557 {dimension_numbers = #tpu.dot_dimension_numbers<[1], [0], [0], [1], [0, 0, 1, 1], [], []>} : vector<2x128xf32>, vector<128x9xf32>, vector<2x9xf32> -> vector<2x9xf32>
    %c0_558 = arith.constant 0 : index
    %c0_559 = arith.constant 0 : index
    %1597 = vector.load %arg34[%c0_558, %c0_559] : memref<1x9xf32, #tpu.memory_space<vmem>>, vector<1x9xf32>
    %1598 = vector.broadcast %1597 : vector<1x9xf32> to vector<2x9xf32>
    %1599 = arith.addf %1596, %1598 : vector<2x9xf32>
    %c0_560 = arith.constant 0 : index
    %c0_561 = arith.constant 0 : index
    %1600 = vector.load %arg35[%c0_560, %c0_561] : memref<2x9xf32, #tpu.memory_space<vmem>>, vector<2x9xf32>
    tpu.vector_store %arg35[%c0_560, %c0_561], %1599 {strides = array<i32>} : memref<2x9xf32, #tpu.memory_space<vmem>>, vector<2x9xf32>,
    return
  }
}

</mosaic_0001>

<bundles_post_ra>
// kernel: forward.1
= control target key start
LH: loop header
LB: loop body
LE: loop exit
PB: predicated region body
PF: predicated region fallthrough
CT: control target
= control target key end

     0   :  { %v9616_v0 = vmov 0.0   ;;  %s9617_s3 = smov 1   ;;  %vm9618_vm0 = vmmov 0   ;;  %vm180_vm1 = vcmask 130048   ;;  %vm767_vm2 = vcmask 1045504   ;;  %s9619_s10 = smov 2   ;;  %s12413_s0 = inlined_call_operand.smem [shape: u32[36], index: -1, kind: input, shape index: {}] }
   0x1   :  { %8550 = vmatprep.subr.mxu0 %v9616_v0  ;;  %s9663_s6 = sld [smem:[%s12413_s0 + %s9617_s3]]   ;;  %8554 = vmatprep.mubr.msk.f32.mxu0 %vm9618_vm0, %v9616_v0  ;;  %vm449_vm3 = vcmask 1046528   ;;  %s9620_s14 = smov 7   ;;  %vm1232_vm4 = vcmask 564224   ;;  %vm1272_vm5 = vcmask 1044480   ;;  %vm1417_vm6 = vcmask 261120  }
   0x2   :  { %s9670_s9 = sld [smem:[%s12413_s0]]   ;;  %9191 = vmatprep.subr.mxu1 %v9616_v0  ;;  %8642 = vmatprep.mubr.msk.f32.mxu1 %vm9618_vm0, %v9616_v0  ;;  %s9621_s18 = smov 3   ;;  %vm2027_vm7 = vcmask 777216   ;;  %vm2568_vm8 = vcmask 1042432   ;;  %vm2558_vm9 = vcmask 351232   ;;  %vm2783_vm10 = vcmask 523264  }
   0x3   :  { %s7893_s13 = sld [smem:[%s12413_s0 + %s9619_s10]]   ;;  %s9622_s22 = smov 8   ;;  %vm4219_vm11 = vcmask 1041408   ;;  %vm4221_vm12 = vcmask 1043456   ;;  %vm6062_vm13 = vcmask 162816   ;;  %vm6624_vm14 = vcmask 31744  }
   0x4   :  { %s10179_s17 = sld [smem:[%s12413_s0 + %s9620_s14]]   ;;  %s9623_s26 = smov 4   ;;  %vm6934_vm15 = vcmask 519168  }
   0x5   :  { %s10279_s21 = sld [smem:[%s12413_s0 + %s9621_s18]]   ;;  %s9624_s30 = smov 5  }
   0x6   :  { %s10564_s25 = sld [smem:[%s12413_s0 + %s9622_s22]]   ;;  %s9625_s4 = smov 10  }
   0x7   :  { %v172_v1 = vld [vmem:[%s9663_s6 + $0x8] sm:$0xff]  ;;  %v171_v2 = vld [vmem:[%s9663_s6] sm:$0xff]  ;;  %v7954_v3 = vld [vmem:[%s9663_s6 + $0x18] sm:$0xff]  ;;  %s7895_s29 = sld [smem:[%s12413_s0 + %s9623_s26]]   ;;  %s9626_s8 = smov 6  }
   0x8   :  { %8551 = vmatpush3.msra.mxu0 %v172_v1  ;;  %v146_v4 = vld [vmem:[%s9670_s9] sm:$0xff]  ;;  %v147_v5 = vld [vmem:[%s9670_s9 + $0x8] sm:$0xff]  ;;  %v148_v6 = vld [vmem:[%s9670_s9 + $0x10] sm:$0xff]  ;;  %9193 = vmatpush3.msra.mxu1 %v7954_v3  ;;  %s10615_s3 = sld [smem:[%s12413_s0 + %s9624_s30]]   ;;  %s9627_s12 = smov 9  }
   0x9   :  { %8552 = vmatprep.subr.mxu0 %v9616_v0  ;;  %v450_v7 = vrot.slane %v146_v4, 1  ;;  %v768_v8 = vrot.slane %v146_v4, 2  ;;  %v451_v9 = vrot.slane %v147_v5, 1  ;;  %v769_v10 = vrot.slane %v147_v5, 2  ;;  %v149_v11 = vld [vmem:[%s9670_s9 + $0x18] sm:$0xff]  ;;  %9192 = vmatprep.subr.mxu1 %v9616_v0  ;;  %v7953_v12 = vld [vmem:[%s9663_s6 + $0x10] sm:$0xff]  ;;  %s10676_s7 = sld [smem:[%s12413_s0 + %s9625_s4]]  }
   0xa   :  { %8553 = vmatpush3.msra.mxu0 %v171_v2  ;;  %v453_v13 = vrot.slane %v148_v6, 1  ;;  %v455_v14 = vrot.slane %v149_v11, 1  ;;  %9194 = vmatpush3.msra.mxu1 %v7953_v12  ;;  %v150_v15 = vld [vmem:[%s9670_s9 + $0x20] sm:$0xff]  ;;  %v9687_v16 = vld [vmem:[%s9670_s9 + $0x28] sm:$0xff]  ;;  %v9701_v21 = vld [vmem:[%s9670_s9 + $0x30] sm:$0xff]  ;;  %v771_v27 = vrot.slane %v148_v6, 2  ;;  %s7897_s11 = sld [smem:[%s12413_s0 + %s9626_s8]]  }
   0xb   :  { %8555 = vmatmul.mubr.msk.f32.vlgmr.msra.gmra.mxu0 %vm180_vm1, %v146_v4  ;;  %v457_v17 = vrot.slane %v150_v15, 1  ;;  %v459_v18 = vrot.slane %v9687_v16, 1  ;;  %8629 = vmatprep.subr.mxu0 %v9616_v0  ;;  %v9693_v19 = vsel %vm449_vm3, %v450_v7, %v451_v9  ;;  %v9696_v20 = vsel %vm767_vm2, %v768_v8, %v769_v10  ;;  %v9716_v26 = vld [vmem:[%s9670_s9 + $0x38] sm:$0xff]  ;;  %v154_v31 = vld [vmem:[%s9670_s9 + $0x40] sm:$0xff]  ;;  %v155_v37 = vld [vmem:[%s9670_s9 + $0x48] sm:$0xff]  ;;  %s10693_s15 = sld [smem:[%s12413_s0 + %s9627_s12]]   ;;  %s9628_s16 = smov 11  }
   0xc   :  { %8557 = vmatprep.mubr.msk.f32.mxu0 %vm9618_vm0, %v9616_v0  ;;  %8630 = vmatpush3.msra.mxu0 %v7954_v3  ;;  %v9704_v22 = vsel %vm449_vm3, %v451_v9, %v453_v13  ;;  %v461_v25 = vrot.slane %v9701_v21, 1  ;;  %v773_v28 = vrot.slane %v149_v11, 2  ;;  %v463_v29 = vrot.slane %v9716_v26, 1  ;;  %v156_v52 = vld [vmem:[%s9670_s9 + $0x50] sm:$0xff]  ;;  %v157_v57 = vld [vmem:[%s9670_s9 + $0x58] sm:$0xff]  ;;  %v158_v62 = vld [vmem:[%s9670_s9 + $0x60] sm:$0xff]  ;;  %s10699_s19 = sld [smem:[%s12413_s0 + %s9628_s16]]  }
   0xd   :  { %v458_v23 = vsel %vm449_vm3, %v455_v14, %v457_v17  ;;  %8631 = vmatprep.subr.mxu0 %v9616_v0  ;;  %1276 = vmatprep.subr.mxu1 %v9616_v0  ;;  %v460_v24 = vsel %vm449_vm3, %v457_v17, %v459_v18  ;;  %v9731_v32 = vsel %vm449_vm3, %v453_v13, %v455_v14  ;;  %v465_v35 = vrot.slane %v154_v31, 1  ;;  %v159_v4 = vld [vmem:[%s9670_s9 + $0x68] sm:$0xff]  ;;  %v160_v9 = vld [vmem:[%s9670_s9 + $0x70] sm:$0xff]  ;;  %v161_v14 = vld [vmem:[%s9670_s9 + $0x78] sm:$0xff]  ;;  %s9629_s20 = smov 12   ;;  %s9630_s24 = smov 64  }
   0xe   :  { %8643 = vmatmul.mubr.msk.f32.vlgmr.msra.gmra.mxu1 %vm180_vm1, %v458_v23  ;;  %8632 = vmatpush3.msra.mxu0 %v7953_v12  ;;  %v462_v30 = vsel %vm449_vm3, %v459_v18, %v461_v25  ;;  %v9734_v33 = vsel %vm767_vm2, %v769_v10, %v771_v27  ;;  %v464_v34 = vsel %vm449_vm3, %v461_v25, %v463_v29  ;;  %v775_v38 = vrot.slane %v150_v15, 2  ;;  %s7903_s23 = sld [smem:[%s12413_s0 + %s9629_s20]]   ;;  %s9632_s26 = smov 13  }
   0xf   :  { %8558 = vmatmul.mubr.msk.f32.gmra.mxu0 %vm180_vm1, %v147_v5  ;;  %8645 = vmatprep.mubr.msk.f32.mxu1 %vm9618_vm0, %v9616_v0  ;;  %v9739_v36 = vsel %vm767_vm2, %v771_v27, %v773_v28  ;;  %v777_v39 = vrot.slane %v9687_v16, 2  ;;  %v779_v40 = vrot.slane %v9701_v21, 2  ;;  %v781_v41 = vrot.slane %v9716_v26, 2  ;;  %v9854_v27 = vld [vmem:[%s9670_s9 + $0x88] sm:$0xff]  ;;  %s9633_s30 = smov 14   ;;  %s9634_s4 = smov 15  }
  0x10   :  { %8560 = vmatprep.mubr.msk.f32.mxu0 %vm9618_vm0, %v9616_v0  ;;  %8708 = vmatprep.subr.mxu0 %v9616_v0  ;;  %v783_v42 = vrot.slane %v154_v31, 2  ;;  %v785_v43 = vrot.slane %v155_v37, 2  ;;  %v9751_v44 = vsel %vm767_vm2, %v773_v28, %v775_v38  ;;  %v466_v50 = vsel %vm449_vm3, %v463_v29, %v465_v35  ;;  %s9635_s8 = smov 16   ;;  %s9636_s12 = smov 17  }
  0x11   :  { %v9754_v45 = vsel %vm767_vm2, %v775_v38, %v777_v39  ;;  %v9757_v46 = vsel %vm767_vm2, %v777_v39, %v779_v40  ;;  %v9760_v47 = vsel %vm767_vm2, %v779_v40, %v781_v41  ;;  %v467_v51 = vrot.slane %v155_v37, 1  ;;  %v9884_v38 = vld [vmem:[%s9670_s9 + $0x98] sm:$0xff]  ;;  %s9637_s16 = smov 28   ;;  %s9638_s20 = smov 29  }
  0x12   :  { %8646 = vmatmul.mubr.msk.f32.gmra.mxu1 %vm180_vm1, %v460_v24  ;;  %v9764_v48 = vsel %vm767_vm2, %v781_v41, %v783_v42  ;;  %v9767_v49 = vsel %vm767_vm2, %v783_v42, %v785_v43  ;;  %v787_v53 = vrot.slane %v156_v52, 2  ;;  %v469_v56 = vrot.slane %v156_v52, 1  ;;  %v9895_v41 = vld [vmem:[%s9670_s9 + $0xa0] sm:$0xff]  ;;  %s9652_s22 = smov 34   ;;  %s9653_s28 = smov 35  }
  0x13   :  { %8561 = vmatmul.mubr.msk.f32.gmra.mxu0 %vm180_vm1, %v148_v6  ;;  %8648 = vmatprep.mubr.msk.f32.mxu1 %vm9618_vm0, %v9616_v0  ;;  %v468_v55 = vsel %vm449_vm3, %v465_v35, %v467_v51  ;;  %v789_v58 = vrot.slane %v157_v57, 2  ;;  %v471_v61 = vrot.slane %v157_v57, 1  ;;  %v791_v63 = vrot.slane %v158_v62, 2  ;;  %s7925_s27 = sld [smem:[%s12413_s0 + %s9652_s22]]  }
  0x14   :  { %8563 = vmatprep.mubr.msk.f32.mxu0 %vm9618_vm0, %v9616_v0  ;;  %v9778_v54 = vsel %vm767_vm2, %v785_v43, %v787_v53  ;;  %v470_v60 = vsel %vm449_vm3, %v467_v51, %v469_v56  ;;  %v473_v3 = vrot.slane %v158_v62, 1  ;;  %v793_v5 = vrot.slane %v159_v4, 2  ;;  %s7926_s1 = sld [smem:[%s12413_s0 + %s9653_s28]]  }
  0x15   :  { %v9790_v59 = vsel %vm767_vm2, %v787_v53, %v789_v58  ;;  %v9802_v1 = vsel %vm767_vm2, %v789_v58, %v791_v63  ;;  %v472_v2 = vsel %vm449_vm3, %v469_v56, %v471_v61  ;;  %v475_v8 = vrot.slane %v159_v4, 1  ;;  %v9917_v53 = vld [vmem:[%s9670_s9 + $0xb0] sm:$0xff] }
  0x16   :  { %8649 = vmatmul.mubr.msk.f32.gmra.mxu1 %vm180_vm1, %v462_v30  ;;  %v9814_v6 = vsel %vm767_vm2, %v791_v63, %v793_v5  ;;  %v474_v7 = vsel %vm449_vm3, %v471_v61, %v473_v3  ;;  %v795_v10 = vrot.slane %v160_v9, 2  ;;  %v477_v13 = vrot.slane %v160_v9, 1  ;;  %v9941_v61 = vld [vmem:[%s9670_s9 + $0xc0] sm:$0xff] }
  0x17   :  { %8564 = vmatmul.mubr.msk.f32.gmra.mxu0 %vm180_vm1, %v149_v11  ;;  %8651 = vmatprep.mubr.msk.f32.mxu1 %vm9618_vm0, %v9616_v0  ;;  %v476_v12 = vsel %vm449_vm3, %v473_v3, %v475_v8  ;;  %v479_v18 = vrot.slane %v161_v14, 1  ;;  %v801_v28 = vrot.slane %v9854_v27, 2  ;;  %v487_v40 = vrot.slane %v9884_v38, 1  ;;  %v7981_v3 = vld [vmem:[%s9663_s6 + $0x28] sm:$0xff] }
  0x18   :  { %8566 = vmatprep.mubr.msk.f32.mxu0 %vm9618_vm0, %v9616_v0  ;;  %v9825_v11 = vsel %vm767_vm2, %v793_v5, %v795_v10  ;;  %v478_v17 = vsel %vm449_vm3, %v475_v8, %v477_v13  ;;  %v489_v43 = vrot.slane %v9895_v41, 1  ;;  %v493_v56 = vrot.slane %v9917_v53, 1 }
  0x19   :  { %v480_v25 = vsel %vm449_vm3, %v477_v13, %v479_v18  ;;  %v497_v63 = vrot.slane %v9941_v61, 1 }
  0x1a   :  { %8652 = vmatmul.mubr.msk.f32.gmra.mxu1 %vm180_vm1, %v464_v34  ;;  %v9873_v34 = vld [vmem:[%s9670_s9 + $0x90] sm:$0xff]  ;;  %v490_v51 = vsel %vm449_vm3, %v487_v40, %v489_v43 }
  0x1b   :  { %8567 = vmatmul.mubr.msk.f32.gmra.mxu0 %vm180_vm1, %v150_v15  ;;  %8654 = vmatprep.mubr.msk.f32.mxu1 %vm9618_vm0, %v9616_v0  ;;  %v797_v15 = vrot.slane %v161_v14, 2 }
  0x1c   :  { %8569 = vmatprep.mubr.msk.f32.mxu0 %vm9618_vm0, %v9616_v0 }
  0x1e   :  { %8655 = vmatmul.mubr.msk.f32.gmra.mxu1 %vm180_vm1, %v466_v50  ;;  %v9906_v50 = vld [vmem:[%s9670_s9 + $0xa8] sm:$0xff] }
  0x1f   :  { %8570 = vmatmul.mubr.msk.f32.gmra.mxu0 %vm180_vm1, %v9687_v16  ;;  %8657 = vmatprep.mubr.msk.f32.mxu1 %vm9618_vm0, %v9616_v0  ;;  %v9836_v16 = vsel %vm767_vm2, %v795_v10, %v797_v15 }
  0x20   :  { %8572 = vmatprep.mubr.msk.f32.mxu0 %vm9618_vm0, %v9616_v0 }
  0x22   :  { %8658 = vmatmul.mubr.msk.f32.gmra.mxu1 %vm180_vm1, %v468_v55 }
  0x23   :  { %8573 = vmatmul.mubr.msk.f32.gmra.mxu0 %vm180_vm1, %v9701_v21  ;;  %8660 = vmatprep.mubr.msk.f32.mxu1 %vm9618_vm0, %v9616_v0  ;;  %v162_v21 = vld [vmem:[%s9670_s9 + $0x80] sm:$0xff] }
  0x24   :  { %8575 = vmatprep.mubr.msk.f32.mxu0 %vm9618_vm0, %v9616_v0  ;;  %v799_v23 = vrot.slane %v162_v21, 2 }
  0x26   :  { %8661 = vmatmul.mubr.msk.f32.gmra.mxu1 %vm180_vm1, %v470_v60  ;;  %v9847_v24 = vsel %vm767_vm2, %v797_v15, %v799_v23  ;;  %v9863_v29 = vsel %vm767_vm2, %v799_v23, %v801_v28  ;;  %v10106_v15 = vld [vmem:[%s7893_s13] ss:$0 sm:$0xff] }
  0x27   :  { %8576 = vmatmul.mubr.msk.f32.gmra.mxu0 %vm180_vm1, %v9716_v26  ;;  %8663 = vmatprep.mubr.msk.f32.mxu1 %vm9618_vm0, %v9616_v0  ;;  %v481_v26 = vrot.slane %v162_v21, 1 }
  0x28   :  { %8578 = vmatprep.mubr.msk.f32.mxu0 %vm9618_vm0, %v9616_v0 }
  0x29   :  { %v482_v30 = vsel %vm449_vm3, %v479_v18, %v481_v26 }
  0x2a   :  { %8664 = vmatmul.mubr.msk.f32.gmra.mxu1 %vm180_vm1, %v472_v2 }
  0x2b   :  { %8579 = vmatmul.mubr.msk.f32.gmra.mxu0 %vm180_vm1, %v154_v31  ;;  %8666 = vmatprep.mubr.msk.f32.mxu1 %vm9618_vm0, %v9616_v0  ;;  %v483_v31 = vrot.slane %v9854_v27, 1 }
  0x2c   :  { %8581 = vmatprep.mubr.msk.f32.mxu0 %vm9618_vm0, %v9616_v0 }
  0x2d   :  { %v484_v35 = vsel %vm449_vm3, %v481_v26, %v483_v31 }
  0x2e   :  { %8667 = vmatmul.mubr.msk.f32.gmra.mxu1 %vm180_vm1, %v474_v7 }
  0x2f   :  { %8582 = vmatmul.mubr.msk.f32.gmra.mxu0 %vm180_vm1, %v155_v37  ;;  %8669 = vmatprep.mubr.msk.f32.mxu1 %vm9618_vm0, %v9616_v0  ;;  %v485_v37 = vrot.slane %v9873_v34, 1 }
  0x30   :  { %8584 = vmatprep.mubr.msk.f32.mxu0 %vm9618_vm0, %v9616_v0 }
  0x31   :  { %v486_v39 = vsel %vm449_vm3, %v483_v31, %v485_v37  ;;  %v488_v42 = vsel %vm449_vm3, %v485_v37, %v487_v40 }
  0x32   :  { %8670 = vmatmul.mubr.msk.f32.gmra.mxu1 %vm180_vm1, %v476_v12 }
  0x33   :  { %8585 = vmatmul.mubr.msk.f32.gmra.mxu0 %vm180_vm1, %v156_v52  ;;  %8672 = vmatprep.mubr.msk.f32.mxu1 %vm9618_vm0, %v9616_v0  ;;  %v491_v52 = vrot.slane %v9906_v50, 1 }
  0x34   :  { %8587 = vmatprep.mubr.msk.f32.mxu0 %vm9618_vm0, %v9616_v0 }
  0x35   :  { %v492_v55 = vsel %vm449_vm3, %v489_v43, %v491_v52  ;;  %v494_v58 = vsel %vm449_vm3, %v491_v52, %v493_v56 }
  0x36   :  { %8673 = vmatmul.mubr.msk.f32.gmra.mxu1 %vm180_vm1, %v478_v17 }
  0x37   :  { %8588 = vmatmul.mubr.msk.f32.gmra.mxu0 %vm180_vm1, %v157_v57  ;;  %8675 = vmatprep.mubr.msk.f32.mxu1 %vm9618_vm0, %v9616_v0  ;;  %v9929_v57 = vld [vmem:[%s9670_s9 + $0xb8] sm:$0xff] }
  0x38   :  { %8590 = vmatprep.mubr.msk.f32.mxu0 %vm9618_vm0, %v9616_v0  ;;  %v495_v60 = vrot.slane %v9929_v57, 1 }
  0x3a   :  { %8676 = vmatmul.mubr.msk.f32.gmra.mxu1 %vm180_vm1, %v480_v25  ;;  %v498_v2 = vsel %vm449_vm3, %v495_v60, %v497_v63 }
  0x3b   :  { %8591 = vmatmul.mubr.msk.f32.gmra.mxu0 %vm180_vm1, %v158_v62  ;;  %8678 = vmatprep.mubr.msk.f32.mxu1 %vm9618_vm0, %v9616_v0  ;;  %v496_v62 = vsel %vm449_vm3, %v493_v56, %v495_v60 }
  0x3c   :  { %8593 = vmatprep.mubr.msk.f32.mxu0 %vm9618_vm0, %v9616_v0 }
  0x3e   :  { %8679 = vmatmul.mubr.msk.f32.gmra.mxu1 %vm180_vm1, %v482_v30 }
  0x3f   :  { %8594 = vmatmul.mubr.msk.f32.gmra.mxu0 %vm180_vm1, %v159_v4  ;;  %8681 = vmatprep.mubr.msk.f32.mxu1 %vm9618_vm0, %v9616_v0  ;;  %v7980_v4 = vld [vmem:[%s9663_s6 + $0x20] sm:$0xff] }
  0x40   :  { %8596 = vmatprep.mubr.msk.f32.mxu0 %vm9618_vm0, %v9616_v0 }
  0x42   :  { %8682 = vmatmul.mubr.msk.f32.gmra.mxu1 %vm180_vm1, %v484_v35 }
  0x43   :  { %8597 = vmatmul.mubr.msk.f32.gmra.mxu0 %vm180_vm1, %v160_v9  ;;  %8684 = vmatprep.mubr.msk.f32.mxu1 %vm9618_vm0, %v9616_v0 }
  0x44   :  { %8599 = vmatprep.mubr.msk.f32.mxu0 %vm9618_vm0, %v9616_v0 }
  0x46   :  { %8685 = vmatmul.mubr.msk.f32.gmra.mxu1 %vm180_vm1, %v486_v39 }
  0x47   :  { %8600 = vmatmul.mubr.msk.f32.gmra.mxu0 %vm180_vm1, %v161_v14  ;;  %8687 = vmatprep.mubr.msk.f32.mxu1 %vm9618_vm0, %v9616_v0 }
  0x48   :  { %8602 = vmatprep.mubr.msk.f32.mxu0 %vm9618_vm0, %v9616_v0 }
  0x4a   :  { %8688 = vmatmul.mubr.msk.f32.gmra.mxu1 %vm180_vm1, %v488_v42 }
  0x4b   :  { %8603 = vmatmul.mubr.msk.f32.gmra.mxu0 %vm180_vm1, %v162_v21  ;;  %8690 = vmatprep.mubr.msk.f32.mxu1 %vm9618_vm0, %v9616_v0 }
  0x4c   :  { %8605 = vmatprep.mubr.msk.f32.mxu0 %vm9618_vm0, %v9616_v0 }
  0x4e   :  { %8691 = vmatmul.mubr.msk.f32.gmra.mxu1 %vm180_vm1, %v490_v51 }
  0x4f   :  { %8606 = vmatmul.mubr.msk.f32.gmra.mxu0 %vm180_vm1, %v9854_v27  ;;  %8693 = vmatprep.mubr.msk.f32.mxu1 %vm9618_vm0, %v9616_v0 }
  0x50   :  { %8608 = vmatprep.mubr.msk.f32.mxu0 %vm9618_vm0, %v9616_v0 }
  0x52   :  { %8694 = vmatmul.mubr.msk.f32.gmra.mxu1 %vm180_vm1, %v492_v55 }
  0x53   :  { %8609 = vmatmul.mubr.msk.f32.gmra.mxu0 %vm180_vm1, %v9873_v34  ;;  %8696 = vmatprep.mubr.msk.f32.mxu1 %vm9618_vm0, %v9616_v0 }
  0x54   :  { %8611 = vmatprep.mubr.msk.f32.mxu0 %vm9618_vm0, %v9616_v0 }
  0x56   :  { %8697 = vmatmul.mubr.msk.f32.gmra.mxu1 %vm180_vm1, %v494_v58 }
  0x57   :  { %8612 = vmatmul.mubr.msk.f32.gmra.mxu0 %vm180_vm1, %v9884_v38  ;;  %8699 = vmatprep.mubr.msk.f32.mxu1 %vm9618_vm0, %v9616_v0 }
  0x58   :  { %8614 = vmatprep.mubr.msk.f32.mxu0 %vm9618_vm0, %v9616_v0 }
  0x5a   :  { %8700 = vmatmul.mubr.msk.f32.gmra.mxu1 %vm180_vm1, %v496_v62 }
  0x5b   :  { %8615 = vmatmul.mubr.msk.f32.gmra.mxu0 %vm180_vm1, %v9895_v41  ;;  %8702 = vmatprep.mubr.msk.f32.mxu1 %vm9618_vm0, %v9616_v0 }
  0x5c   :  { %8617 = vmatprep.mubr.msk.f32.mxu0 %vm9618_vm0, %v9616_v0 }
  0x5e   :  { %8703 = vmatmul.mubr.msk.f32.gmra.mxu1 %vm180_vm1, %v498_v2 }
  0x5f   :  { %8618 = vmatmul.mubr.msk.f32.gmra.mxu0 %vm180_vm1, %v9906_v50  ;;  %8705 = vmatprep.mubr.msk.f32.mxu1 %vm9618_vm0, %v9616_v0 }
  0x60   :  { %8620 = vmatprep.mubr.msk.f32.mxu0 %vm9618_vm0, %v9616_v0 }
  0x62   :  { %8706 = vmatmul.mubr.msk.f32.gmra.mxu1 %vm180_vm1, %v497_v63 }
  0x63   :  { %8621 = vmatmul.mubr.msk.f32.gmra.mxu0 %vm180_vm1, %v9917_v53 }
  0x64   :  { %8623 = vmatprep.mubr.msk.f32.mxu0 %vm9618_vm0, %v9616_v0 }
  0x67   :  { %8624 = vmatmul.mubr.msk.f32.gmra.mxu0 %vm180_vm1, %v9929_v57 }
  0x68   :  { %8626 = vmatprep.mubr.msk.f32.mxu0 %vm9618_vm0, %v9616_v0 }
  0x6b   :  { %8627 = vmatmul.mubr.msk.f32.gmra.mxu0 %vm180_vm1, %v9941_v61 }
  0x6c   :  { %8633 = vmatprep.mubr.msk.f32.mxu0 %vm9618_vm0, %v9616_v0 }
  0x6f   :  { %8634 = vmatmul.mubr.msk.f32.vlgmr.msra.gmra.mxu0 %vm180_vm1, %v9693_v19  ;;  %v803_v19 = vrot.slane %v9873_v34, 2 }
  0x70   :  { %8636 = vmatprep.mubr.msk.f32.mxu0 %vm9618_vm0, %v9616_v0  ;;  %8709 = vmatpush3.msra.mxu0 %v7981_v3 }
  0x71   :  { %8710 = vmatprep.subr.mxu0 %v9616_v0 }
  0x72   :  { %8711 = vmatpush3.msra.mxu0 %v7980_v4 }
  0x73   :  { %8637 = vmatmul.mubr.msk.f32.gmra.mxu0 %vm180_vm1, %v9704_v22  ;;  %v805_v22 = vrot.slane %v9884_v38, 2 }
  0x74   :  { %8639 = vmatprep.mubr.msk.f32.mxu0 %vm9618_vm0, %v9616_v0 }
  0x77   :  { %8640 = vmatmul.mubr.msk.f32.gmra.mxu0 %vm180_vm1, %v9731_v32  ;;  %v806_v32 = vsel %vm767_vm2, %v803_v19, %v805_v22 }
  0x78   :  { %8712 = vmatprep.mubr.msk.f32.mxu0 %vm9618_vm0, %v9616_v0 }
  0x7b   :  { %8713 = vmatmul.mubr.msk.f32.vlgmr.msra.gmra.mxu0 %vm180_vm1, %v9696_v20  ;;  %v804_v20 = vsel %vm767_vm2, %v801_v28, %v803_v19 }
  0x7c   :  { %8715 = vmatprep.mubr.msk.f32.mxu0 %vm9618_vm0, %v9616_v0 }
  0x7f   :  { %8716 = vmatmul.mubr.msk.f32.gmra.mxu0 %vm180_vm1, %v9734_v33  ;;  %v807_v33 = vrot.slane %v9895_v41, 2 }
  0x80   :  { %8718 = vmatprep.mubr.msk.f32.mxu0 %vm9618_vm0, %v9616_v0 }
  0x83   :  { %8719 = vmatmul.mubr.msk.f32.gmra.mxu0 %vm180_vm1, %v9739_v36  ;;  %v808_v36 = vsel %vm767_vm2, %v805_v22, %v807_v33 }
  0x84   :  { %8721 = vmatprep.mubr.msk.f32.mxu0 %vm9618_vm0, %v9616_v0 }
  0x87   :  { %8722 = vmatmul.mubr.msk.f32.gmra.mxu0 %vm180_vm1, %v9751_v44  ;;  %v809_v44 = vrot.slane %v9906_v50, 2 }
  0x88   :  { %8724 = vmatprep.mubr.msk.f32.mxu0 %vm9618_vm0, %v9616_v0 }
  0x8b   :  { %8725 = vmatmul.mubr.msk.f32.gmra.mxu0 %vm180_vm1, %v9754_v45  ;;  %v810_v45 = vsel %vm767_vm2, %v807_v33, %v809_v44 }
  0x8c   :  { %8727 = vmatprep.mubr.msk.f32.mxu0 %vm9618_vm0, %v9616_v0 }
  0x8f   :  { %8728 = vmatmul.mubr.msk.f32.gmra.mxu0 %vm180_vm1, %v9757_v46  ;;  %v811_v46 = vrot.slane %v9917_v53, 2 }
  0x90   :  { %8730 = vmatprep.mubr.msk.f32.mxu0 %vm9618_vm0, %v9616_v0 }
  0x93   :  { %8731 = vmatmul.mubr.msk.f32.gmra.mxu0 %vm180_vm1, %v9760_v47 }
  0x94   :  { %8733 = vmatprep.mubr.msk.f32.mxu0 %vm9618_vm0, %v9616_v0 }
  0x97   :  { %8734 = vmatmul.mubr.msk.f32.gmra.mxu0 %vm180_vm1, %v9764_v48  ;;  %v812_v48 = vsel %vm767_vm2, %v809_v44, %v811_v46 }
  0x98   :  { %8736 = vmatprep.mubr.msk.f32.mxu0 %vm9618_vm0, %v9616_v0 }
  0x9b   :  { %8737 = vmatmul.mubr.msk.f32.gmra.mxu0 %vm180_vm1, %v9767_v49  ;;  %v813_v49 = vrot.slane %v9929_v57, 2 }
  0x9c   :  { %8739 = vmatprep.mubr.msk.f32.mxu0 %vm9618_vm0, %v9616_v0 }
  0x9d   :  { %v814_v5 = vsel %vm767_vm2, %v811_v46, %v813_v49 }
  0x9f   :  { %8740 = vmatmul.mubr.msk.f32.gmra.mxu0 %vm180_vm1, %v9778_v54 }
  0xa0   :  { %8742 = vmatprep.mubr.msk.f32.mxu0 %vm9618_vm0, %v9616_v0 }
  0xa3   :  { %8743 = vmatmul.mubr.msk.f32.gmra.mxu0 %vm180_vm1, %v9790_v59 }
  0xa4   :  { %8745 = vmatprep.mubr.msk.f32.mxu0 %vm9618_vm0, %v9616_v0 }
  0xa7   :  { %8746 = vmatmul.mubr.msk.f32.gmra.mxu0 %vm180_vm1, %v9802_v1 }
  0xa8   :  { %8748 = vmatprep.mubr.msk.f32.mxu0 %vm9618_vm0, %v9616_v0 }
  0xab   :  { %8749 = vmatmul.mubr.msk.f32.gmra.mxu0 %vm180_vm1, %v9814_v6  ;;  %v815_v6 = vrot.slane %v9941_v61, 2 }
  0xac   :  { %8751 = vmatprep.mubr.msk.f32.mxu0 %vm9618_vm0, %v9616_v0 }
  0xaf   :  { %8752 = vmatmul.mubr.msk.f32.gmra.mxu0 %vm180_vm1, %v9825_v11  ;;  %v816_v11 = vsel %vm767_vm2, %v813_v49, %v815_v6 }
  0xb0   :  { %8754 = vmatprep.mubr.msk.f32.mxu0 %vm9618_vm0, %v9616_v0 }
  0xb3   :  { %8755 = vmatmul.mubr.msk.f32.gmra.mxu0 %vm180_vm1, %v9836_v16 }
  0xb4   :  { %8757 = vmatprep.mubr.msk.f32.mxu0 %vm9618_vm0, %v9616_v0 }
  0xb7   :  { %8758 = vmatmul.mubr.msk.f32.gmra.mxu0 %vm180_vm1, %v9847_v24 }
  0xb8   :  { %8760 = vmatprep.mubr.msk.f32.mxu0 %vm9618_vm0, %v9616_v0 }
  0xbb   :  { %8761 = vmatmul.mubr.msk.f32.gmra.mxu0 %vm180_vm1, %v9863_v29 }
  0xbc   :  { %8763 = vmatprep.mubr.msk.f32.mxu0 %vm9618_vm0, %v9616_v0 }
  0xbf   :  { %8764 = vmatmul.mubr.msk.f32.gmra.mxu0 %vm180_vm1, %v804_v20 }
  0xc0   :  { %8766 = vmatprep.mubr.msk.f32.mxu0 %vm9618_vm0, %v9616_v0 }
  0xc3   :  { %8767 = vmatmul.mubr.msk.f32.gmra.mxu0 %vm180_vm1, %v806_v32 }
  0xc4   :  { %8769 = vmatprep.mubr.msk.f32.mxu0 %vm9618_vm0, %v9616_v0 }
  0xc7   :  { %8770 = vmatmul.mubr.msk.f32.gmra.mxu0 %vm180_vm1, %v808_v36 }
  0xc8   :  { %8772 = vmatprep.mubr.msk.f32.mxu0 %vm9618_vm0, %v9616_v0 }
  0xcb   :  { %v10083_v47 = vpop.f32.mrf.mxu0  ;;  %8773 = vmatmul.mubr.msk.f32.gmra.mxu0 %vm180_vm1, %v810_v45 }
  0xcc   :  { %8775 = vmatprep.mubr.msk.f32.mxu0 %vm9618_vm0, %v9616_v0 }
  0xcd   :  { %v8556_v54 = vpop.f32.mrf.mxu0 }
  0xce   :  { %v630_v59 = vpop.f32.mrf.mxu1 }
  0xcf   :  { %v10093_v1 = vpop.f32.mrf.mxu0  ;;  %8776 = vmatmul.mubr.msk.f32.gmra.mxu0 %vm180_vm1, %v812_v48 }
  0xd0   :  { %8778 = vmatprep.mubr.msk.f32.mxu0 %vm9618_vm0, %v9616_v0  ;;  %v8644_v7 = vpop.f32.mrf.mxu1 }
  0xd1   :  { %v8559_v8 = vpop.f32.mrf.mxu0 }
  0xd2   :  { %v635_v9 = vpop.f32.mrf.mxu1 }
  0xd3   :  { %v10100_v10 = vpop.f32.mrf.mxu0  ;;  %8779 = vmatmul.mubr.msk.f32.gmra.mxu0 %vm180_vm1, %v814_v5 }
  0xd4   :  { %8781 = vmatprep.mubr.msk.f32.mxu0 %vm9618_vm0, %v9616_v0  ;;  %v8647_v12 = vpop.f32.mrf.mxu1 }
  0xd5   :  { %v8562_v13 = vpop.f32.mrf.mxu0 }
  0xd6   :  { %v640_v14 = vpop.f32.mrf.mxu1 }
  0xd7   :  { %v337_v16 = vpop.f32.mrf.mxu0  ;;  %8782 = vmatmul.mubr.msk.f32.gmra.mxu0 %vm180_vm1, %v816_v11 }
  0xd8   :  { %v338_v17 = vadd.f32 %v10106_v15, %v337_v16  ;;  %8784 = vmatprep.mubr.msk.f32.mxu0 %vm9618_vm0, %v9616_v0  ;;  %v8650_v18 = vpop.f32.mrf.mxu1 }
  0xd9   :  { %v8565_v21 = vpop.f32.mrf.mxu0 }
  0xda   :  { %v10112_v23 = vadd.f32 %v630_v59, %v338_v17  ;;  %v645_v24 = vpop.f32.mrf.mxu1 }
  0xdb   :  { %v342_v25 = vpop.f32.mrf.mxu0  ;;  %8785 = vmatmul.mubr.msk.f32.gmra.mxu0 %vm180_vm1, %v815_v6  ;;  %vm7603_vm1 = vcmask 15360  }
  0xdc   :  { %v343_v26 = vadd.f32 %v10106_v15, %v342_v25  ;;  %v8653_v27 = vpop.f32.mrf.mxu1 }
  0xdd   :  { %v8568_v28 = vpop.f32.mrf.mxu0 }
  0xde   :  { %v10116_v29 = vadd.f32 %v635_v9, %v343_v26  ;;  %v650_v30 = vpop.f32.mrf.mxu1 }
  0xdf   :  { %v347_v31 = vpop.f32.mrf.mxu0 }
  0xe0   :  { %v348_v34 = vadd.f32 %v10106_v15, %v347_v31  ;;  %v8656_v35 = vpop.f32.mrf.mxu1 }
  0xe1   :  { %v8571_v37 = vpop.f32.mrf.mxu0 }
  0xe2   :  { %v10119_v38 = vadd.f32 %v640_v14, %v348_v34  ;;  %v655_v39 = vpop.f32.mrf.mxu1 }
  0xe3   :  { %v352_v40 = vpop.f32.mrf.mxu0 }
  0xe4   :  { %v353_v41 = vadd.f32 %v10106_v15, %v352_v40  ;;  %v8659_v42 = vpop.f32.mrf.mxu1 }
  0xe5   :  { %v8574_v43 = vpop.f32.mrf.mxu0 }
  0xe6   :  { %v10122_v50 = vadd.f32 %v645_v24, %v353_v41  ;;  %v660_v51 = vpop.f32.mrf.mxu1 }
  0xe7   :  { %v357_v52 = vpop.f32.mrf.mxu0 }
  0xe8   :  { %v358_v53 = vadd.f32 %v10106_v15, %v357_v52  ;;  %v8662_v55 = vpop.f32.mrf.mxu1 }
  0xe9   :  { %v8577_v56 = vpop.f32.mrf.mxu0 }
  0xea   :  { %v10125_v57 = vadd.f32 %v650_v30, %v358_v53  ;;  %v665_v58 = vpop.f32.mrf.mxu1 }
  0xeb   :  { %v362_v60 = vpop.f32.mrf.mxu0 }
  0xec   :  { %v363_v61 = vadd.f32 %v10106_v15, %v362_v60  ;;  %v8665_v62 = vpop.f32.mrf.mxu1 }
  0xed   :  { %v8580_v63 = vpop.f32.mrf.mxu0 }
  0xee   :  { %v10128_v2 = vadd.f32 %v655_v39, %v363_v61  ;;  %v670_v3 = vpop.f32.mrf.mxu1 }
  0xef   :  { %v367_v4 = vpop.f32.mrf.mxu0 }
  0xf0   :  { %v368_v19 = vadd.f32 %v10106_v15, %v367_v4  ;;  %v8668_v20 = vpop.f32.mrf.mxu1 }
  0xf1   :  { %v8583_v22 = vpop.f32.mrf.mxu0 }
  0xf2   :  { %v10131_v32 = vadd.f32 %v660_v51, %v368_v19  ;;  %v675_v33 = vpop.f32.mrf.mxu1 }
  0xf3   :  { %v372_v36 = vpop.f32.mrf.mxu0 }
  0xf4   :  { %v373_v44 = vadd.f32 %v10106_v15, %v372_v36  ;;  %v8671_v45 = vpop.f32.mrf.mxu1 }
  0xf5   :  { %v8586_v46 = vpop.f32.mrf.mxu0 }
  0xf6   :  { %v10134_v48 = vadd.f32 %v665_v58, %v373_v44  ;;  %v680_v49 = vpop.f32.mrf.mxu1 }
  0xf7   :  { %v377_v54 = vpop.f32.mrf.mxu0 }
  0xf8   :  { %v378_v59 = vadd.f32 %v10106_v15, %v377_v54  ;;  %v8674_v5 = vpop.f32.mrf.mxu1 }
  0xf9   :  { %v8589_v6 = vpop.f32.mrf.mxu0 }
  0xfa   :  { %v10137_v7 = vadd.f32 %v670_v3, %v378_v59  ;;  %v685_v8 = vpop.f32.mrf.mxu1 }
  0xfb   :  { %v382_v9 = vpop.f32.mrf.mxu0 }
  0xfc   :  { %v383_v11 = vadd.f32 %v10106_v15, %v382_v9  ;;  %v8677_v12 = vpop.f32.mrf.mxu1 }
  0xfd   :  { %v8592_v13 = vpop.f32.mrf.mxu0 }
  0xfe   :  { %v10140_v14 = vadd.f32 %v675_v33, %v383_v11  ;;  %v690_v16 = vpop.f32.mrf.mxu1 }
  0xff   :  { %v387_v17 = vpop.f32.mrf.mxu0 }
 0x100   :  { %v388_v18 = vadd.f32 %v10106_v15, %v387_v17  ;;  %v8680_v21 = vpop.f32.mrf.mxu1 }
 0x101   :  { %v8595_v24 = vpop.f32.mrf.mxu0 }
 0x102   :  { %v10143_v25 = vadd.f32 %v680_v49, %v388_v18  ;;  %v695_v26 = vpop.f32.mrf.mxu1 }
 0x103   :  { %v392_v27 = vpop.f32.mrf.mxu0 }
 0x104   :  { %v393_v28 = vadd.f32 %v10106_v15, %v392_v27  ;;  %v8683_v30 = vpop.f32.mrf.mxu1 }
 0x105   :  { %v8598_v31 = vpop.f32.mrf.mxu0 }
 0x106   :  { %v10146_v34 = vadd.f32 %v685_v8, %v393_v28  ;;  %v700_v35 = vpop.f32.mrf.mxu1 }
 0x107   :  { %v397_v37 = vpop.f32.mrf.mxu0 }
 0x108   :  { %v398_v39 = vadd.f32 %v10106_v15, %v397_v37  ;;  %v8686_v40 = vpop.f32.mrf.mxu1 }
 0x109   :  { %v8601_v41 = vpop.f32.mrf.mxu0 }
 0x10a   :  { %v10149_v42 = vadd.f32 %v690_v16, %v398_v39  ;;  %v705_v43 = vpop.f32.mrf.mxu1 }
 0x10b   :  { %v402_v51 = vpop.f32.mrf.mxu0 }
 0x10c   :  { %v403_v52 = vadd.f32 %v10106_v15, %v402_v51  ;;  %v8689_v53 = vpop.f32.mrf.mxu1 }
 0x10d   :  { %v8604_v55 = vpop.f32.mrf.mxu0  ;;  %v323_v53 = vadd.f32 %v10106_v15, %v10083_v47 }
 0x10e   :  { %v10152_v56 = vadd.f32 %v695_v26, %v403_v52  ;;  %v710_v58 = vpop.f32.mrf.mxu1 }
 0x10f   :  { %v407_v60 = vpop.f32.mrf.mxu0 }
 0x110   :  { %v408_v61 = vadd.f32 %v10106_v15, %v407_v60  ;;  %v8692_v62 = vpop.f32.mrf.mxu1 }
 0x111   :  { %v8607_v63 = vpop.f32.mrf.mxu0  ;;  %v328_v62 = vadd.f32 %v10106_v15, %v10093_v1 }
 0x112   :  { %v10155_v3 = vadd.f32 %v700_v35, %v408_v61  ;;  %v715_v4 = vpop.f32.mrf.mxu1  ;;  %v1207_v63 = vld [vmem:[%s10179_s17 + $0x8] sm:$0xff] }
 0x113   :  { %v412_v19 = vpop.f32.mrf.mxu0  ;;  %8008 = vmatprep.mubr.msk.f32.mxu1 %vm1232_vm4, %v1207_v63 }
 0x114   :  { %v413_v20 = vadd.f32 %v10106_v15, %v412_v19  ;;  %v8695_v22 = vpop.f32.mrf.mxu1 }
 0x115   :  { %v8610_v33 = vpop.f32.mrf.mxu0  ;;  %v333_v22 = vadd.f32 %v10106_v15, %v10100_v10 }
 0x116   :  { %v10158_v36 = vadd.f32 %v705_v43, %v413_v20  ;;  %v720_v44 = vpop.f32.mrf.mxu1 }
 0x117   :  { %v417_v45 = vpop.f32.mrf.mxu0 }
 0x118   :  { %v418_v46 = vadd.f32 %v10106_v15, %v417_v45  ;;  %v8698_v49 = vpop.f32.mrf.mxu1 }
 0x119   :  { %v8613_v54 = vpop.f32.mrf.mxu0 }
 0x11a   :  { %v10161_v59 = vadd.f32 %v710_v58, %v418_v46  ;;  %v725_v5 = vpop.f32.mrf.mxu1 }
 0x11b   :  { %v422_v6 = vpop.f32.mrf.mxu0 }
 0x11c   :  { %v423_v8 = vadd.f32 %v10106_v15, %v422_v6  ;;  %v8701_v9 = vpop.f32.mrf.mxu1 }
 0x11d   :  { %v8616_v11 = vpop.f32.mrf.mxu0 }
 0x11e   :  { %v10164_v12 = vadd.f32 %v715_v4, %v423_v8  ;;  %v730_v13 = vpop.f32.mrf.mxu1 }
 0x11f   :  { %v427_v16 = vpop.f32.mrf.mxu0 }
 0x120   :  { %v428_v17 = vadd.f32 %v10106_v15, %v427_v16  ;;  %v8704_v18 = vpop.f32.mrf.mxu1 }
 0x121   :  { %v8619_v21 = vpop.f32.mrf.mxu0 }
 0x122   :  { %v10167_v24 = vadd.f32 %v720_v44, %v428_v17  ;;  %v735_v26 = vpop.f32.mrf.mxu1 }
 0x123   :  { %v432_v27 = vpop.f32.mrf.mxu0 }
 0x124   :  { %v433_v28 = vadd.f32 %v10106_v15, %v432_v27  ;;  %v8707_v30 = vpop.f32.mrf.mxu1 }
 0x125   :  { %v8622_v31 = vpop.f32.mrf.mxu0 }
 0x126   :  { %v10170_v35 = vadd.f32 %v725_v5, %v433_v28 }
 0x127   :  { %v437_v37 = vpop.f32.mrf.mxu0 }
 0x128   :  { %v438_v39 = vadd.f32 %v10106_v15, %v437_v37 }
 0x129   :  { %v8625_v40 = vpop.f32.mrf.mxu0 }
 0x12a   :  { %v10173_v41 = vadd.f32 %v730_v13, %v438_v39 }
 0x12b   :  { %v442_v43 = vpop.f32.mrf.mxu0 }
 0x12c   :  { %v443_v51 = vadd.f32 %v10106_v15, %v442_v43 }
 0x12d   :  { %v8628_v52 = vpop.f32.mrf.mxu0 }
 0x12e   :  { %v10183_v55 = vadd.f32 %v735_v26, %v443_v51 }
 0x12f   :  { %v615_v58 = vpop.f32.mrf.mxu0 }
 0x130   :  { %v739_v60 = vadd.f32 %v615_v58, %v323_v53 }
 0x131   :  { %v8635_v61 = vpop.f32.mrf.mxu0 }
 0x133   :  { %v620_v4 = vpop.f32.mrf.mxu0 }
 0x134   :  { %v740_v19 = vadd.f32 %v620_v4, %v328_v62 }
 0x135   :  { %v8638_v20 = vpop.f32.mrf.mxu0 }
 0x137   :  { %v625_v33 = vpop.f32.mrf.mxu0 }
 0x138   :  { %v741_v47 = vadd.f32 %v625_v33, %v333_v22 }
 0x139   :  { %v8641_v44 = vpop.f32.mrf.mxu0 }
 0x13b   :  { %v933_v45 = vpop.f32.mrf.mxu0 }
 0x13c   :  { %v10191_v46 = vadd.f32 %v933_v45, %v739_v60 }
 0x13d   :  { %v8714_v49 = vpop.f32.mrf.mxu0 }
 0x13e   :  { %v1107_v6 = vrot.slane %v10191_v46, 1 }
 0x13f   :  { %v938_v54 = vpop.f32.mrf.mxu0 }
 0x140   :  { %v10193_v5 = vadd.f32 %v938_v54, %v740_v19 }
 0x141   :  { %v8717_v1 = vpop.f32.mrf.mxu0 }
 0x142   :  { %v1108_v8 = vrot.slane %v10193_v5, 1 }
 0x143   :  { %v943_v9 = vpop.f32.mrf.mxu0 }
 0x144   :  { %v10198_v11 = vsel %vm449_vm3, %v1107_v6, %v1108_v8  ;;  %v10200_v10 = vadd.f32 %v943_v9, %v741_v47 }
 0x145   :  { %v8720_v15 = vpop.f32.mrf.mxu0  ;;  %v1181_v13 = vmax.f32 %v10191_v46, %v10198_v11  ;;  %v1206_v46 = vld [vmem:[%s10179_s17] sm:$0xff]  ;;  %v1208_v11 = vld [vmem:[%s10179_s17 + $0x10] sm:$0xff] }
 0x146   :  { %v1110_v16 = vrot.slane %v10200_v10, 1 }
 0x147   :  { %v948_v17 = vpop.f32.mrf.mxu0 }
 0x148   :  { %v10206_v18 = vsel %vm449_vm3, %v1108_v8, %v1110_v16  ;;  %v10209_v21 = vadd.f32 %v948_v17, %v10112_v23 }
 0x149   :  { %v8723_v26 = vpop.f32.mrf.mxu0  ;;  %v1182_v27 = vmax.f32 %v10193_v5, %v10206_v18  ;;  %v1209_v5 = vld [vmem:[%s10179_s17 + $0x18] sm:$0xff] }
 0x14a   :  { %v1112_v28 = vrot.slane %v10209_v21, 1  ;;  %v1213_v18 = vld [vmem:[%s10179_s17 + $0x38] sm:$0xff] }
 0x14b   :  { %v953_v30 = vpop.f32.mrf.mxu0 }
 0x14c   :  { %v10215_v31 = vsel %vm449_vm3, %v1110_v16, %v1112_v28  ;;  %v10218_v37 = vadd.f32 %v953_v30, %v10116_v29 }
 0x14d   :  { %v8726_v39 = vpop.f32.mrf.mxu0  ;;  %v1183_v40 = vmax.f32 %v10200_v10, %v10215_v31  ;;  %v1211_v10 = vld [vmem:[%s10179_s17 + $0x28] sm:$0xff] }
 0x14e   :  { %v1114_v23 = vrot.slane %v10218_v37, 1  ;;  %v1215_v31 = vld [vmem:[%s10179_s17 + $0x48] sm:$0xff] }
 0x14f   :  { %v958_v43 = vpop.f32.mrf.mxu0 }
 0x150   :  { %v10224_v51 = vsel %vm449_vm3, %v1112_v28, %v1114_v23  ;;  %v10227_v52 = vadd.f32 %v958_v43, %v10119_v38 }
 0x151   :  { %v8729_v53 = vpop.f32.mrf.mxu0  ;;  %v1184_v58 = vmax.f32 %v10209_v21, %v10224_v51 }
 0x152   :  { %v1116_v29 = vrot.slane %v10227_v52, 1 }
 0x153   :  { %v963_v60 = vpop.f32.mrf.mxu0 }
 0x154   :  { %v10233_v61 = vsel %vm449_vm3, %v1114_v23, %v1116_v29  ;;  %v10236_v62 = vadd.f32 %v963_v60, %v10122_v50 }
 0x155   :  { %v8732_v63 = vpop.f32.mrf.mxu0  ;;  %v1185_v4 = vmax.f32 %v10218_v37, %v10233_v61 }
 0x156   :  { %v1118_v38 = vrot.slane %v10236_v62, 1 }
 0x157   :  { %v968_v19 = vpop.f32.mrf.mxu0 }
 0x158   :  { %v10242_v20 = vsel %vm449_vm3, %v1116_v29, %v1118_v38  ;;  %v10245_v22 = vadd.f32 %v968_v19, %v10125_v57 }
 0x159   :  { %v8735_v33 = vpop.f32.mrf.mxu0  ;;  %v1186_v47 = vmax.f32 %v10227_v52, %v10242_v20  ;;  %v1216_v20 = vld [vmem:[%s10179_s17 + $0x50] sm:$0xff] }
 0x15a   :  { %v1120_v50 = vrot.slane %v10245_v22, 1 }
 0x15b   :  { %v973_v44 = vpop.f32.mrf.mxu0 }
 0x15c   :  { %v10251_v45 = vsel %vm449_vm3, %v1118_v38, %v1120_v50  ;;  %v10254_v49 = vadd.f32 %v973_v44, %v10128_v2  ;;  %v8053_v38 = vld [vmem:[%s10279_s21 + $0x58] sm:$0xff] }
 0x15d   :  { %v8738_v54 = vpop.f32.mrf.mxu0  ;;  %v1187_v1 = vmax.f32 %v10236_v62, %v10251_v45  ;;  %8839 = vmatprep.subr.mxu0 %v8053_v38 }
 0x15e   :  { %v1122_v57 = vrot.slane %v10254_v49, 1  ;;  %8840 = vmatpush3.msra.mxu0 %v8053_v38 }
 0x15f   :  { %v978_v6 = vpop.f32.mrf.mxu0 }
 0x160   :  { %v10260_v8 = vsel %vm449_vm3, %v1120_v50, %v1122_v57  ;;  %v10263_v9 = vadd.f32 %v978_v6, %v10131_v32 }
 0x161   :  { %v8741_v15 = vpop.f32.mrf.mxu0  ;;  %v1188_v16 = vmax.f32 %v10245_v22, %v10260_v8 }
 0x162   :  { %v1124_v2 = vrot.slane %v10263_v9, 1 }
 0x163   :  { %v983_v17 = vpop.f32.mrf.mxu0 }
 0x164   :  { %v10269_v26 = vsel %vm449_vm3, %v1122_v57, %v1124_v2  ;;  %v10272_v28 = vadd.f32 %v983_v17, %v10134_v48 }
 0x165   :  { %v8744_v30 = vpop.f32.mrf.mxu0  ;;  %v1189_v39 = vmax.f32 %v10254_v49, %v10269_v26 }
 0x166   :  { %v1126_v32 = vrot.slane %v10272_v28, 1 }
 0x167   :  { %v988_v23 = vpop.f32.mrf.mxu0 }
 0x168   :  { %v10283_v43 = vsel %vm449_vm3, %v1124_v2, %v1126_v32  ;;  %v10286_v48 = vadd.f32 %v988_v23, %v10137_v7 }
 0x169   :  { %v8747_v53 = vpop.f32.mrf.mxu0  ;;  %v1190_v29 = vmax.f32 %v10263_v9, %v10283_v43 }
 0x16a   :  { %v1128_v60 = vrot.slane %v10286_v48, 1 }
 0x16b   :  { %v993_v63 = vpop.f32.mrf.mxu0 }
 0x16c   :  { %v10293_v19 = vsel %vm449_vm3, %v1126_v32, %v1128_v60  ;;  %v1069_v33 = vadd.f32 %v993_v63, %v10140_v14 }
 0x16d   :  { %v8750_v50 = vpop.f32.mrf.mxu0  ;;  %v1191_v44 = vmax.f32 %v10272_v28, %v10293_v19 }
 0x16e   :  { %v1130_v7 = vrot.slane %v1069_v33, 1 }
 0x16f   :  { %v998_v54 = vpop.f32.mrf.mxu0 }
 0x170   :  { %v1131_v57 = vsel %vm449_vm3, %v1128_v60, %v1130_v7  ;;  %v1070_v6 = vadd.f32 %v998_v54, %v10143_v25 }
 0x171   :  { %v8753_v15 = vpop.f32.mrf.mxu0  ;;  %v1192_v2 = vmax.f32 %v10286_v48, %v1131_v57 }
 0x172   :  { %v1132_v17 = vrot.slane %v1070_v6, 1 }
 0x173   :  { %v1003_v30 = vpop.f32.mrf.mxu0 }
 0x174   :  { %v1133_v32 = vsel %vm449_vm3, %v1130_v7, %v1132_v17  ;;  %v1071_v14 = vadd.f32 %v1003_v30, %v10146_v34 }
 0x175   :  { %v8756_v23 = vpop.f32.mrf.mxu0  ;;  %v1193_v53 = vmax.f32 %v1069_v33, %v1133_v32 }
 0x176   :  { %v1134_v63 = vrot.slane %v1071_v14, 1 }
 0x177   :  { %v1008_v28 = vpop.f32.mrf.mxu0 }
 0x178   :  { %v1135_v38 = vsel %vm449_vm3, %v1132_v17, %v1134_v63  ;;  %v1072_v19 = vadd.f32 %v1008_v28, %v10149_v42 }
 0x179   :  { %v8759_v60 = vpop.f32.mrf.mxu0  ;;  %v1194_v50 = vmax.f32 %v1070_v6, %v1135_v38 }
 0x17a   :  { %v1136_v25 = vrot.slane %v1072_v19, 1 }
 0x17b   :  { %v1013_v54 = vpop.f32.mrf.mxu0 }
 0x17c   :  { %v1137_v48 = vsel %vm449_vm3, %v1134_v63, %v1136_v25  ;;  %v10307_v57 = vadd.f32 %v1013_v54, %v10152_v56 }
 0x17d   :  { %v8762_v7 = vpop.f32.mrf.mxu0  ;;  %v1195_v15 = vmax.f32 %v1071_v14, %v1137_v48 }
 0x17e   :  { %v1138_v34 = vrot.slane %v10307_v57, 1 }
 0x17f   :  { %v1018_v33 = vpop.f32.mrf.mxu0 }
 0x180   :  { %v1139_v30 = vsel %vm449_vm3, %v1136_v25, %v1138_v34  ;;  %v10312_v17 = vadd.f32 %v1018_v33, %v10155_v3 }
 0x181   :  { %v8765_v42 = vpop.f32.mrf.mxu0  ;;  %v1196_v32 = vmax.f32 %v1072_v19, %v1139_v30 }
 0x182   :  { %v1140_v6 = vrot.slane %v10312_v17, 1 }
 0x183   :  { %v1023_v23 = vpop.f32.mrf.mxu0  ;;  %1277 = vmatpush1.msra.mxu1 %v1196_v32  ;;  %v1222_v32 = vld [vmem:[%s10179_s17 + $0x80] sm:$0xff] }
 0x184   :  { %v10316_v63 = vsel %vm449_vm3, %v1138_v34, %v1140_v6  ;;  %v10319_v56 = vadd.f32 %v1023_v23, %v10158_v36  ;;  %1278 = vmatprep.subr.mxu1 %v9616_v0  ;;  %v1224_v23 = vld [vmem:[%s10179_s17 + $0x90] sm:$0xff] }
 0x185   :  { %v8768_v14 = vpop.f32.mrf.mxu0  ;;  %1279 = vmatpush1.msra.mxu1 %v1195_v15  ;;  %v1197_v3 = vmax.f32 %v10307_v57, %v10316_v63  ;;  %v1220_v57 = vld [vmem:[%s10179_s17 + $0x70] sm:$0xff]  ;;  %v1227_v63 = vld [vmem:[%s10179_s17 + $0xa8] sm:$0xff] }
 0x186   :  { %v1142_v28 = vrot.slane %v10319_v56, 1  ;;  %1280 = vmatprep.subr.mxu1 %v9616_v0  ;;  %v1229_v14 = vld [vmem:[%s10179_s17 + $0xb8] sm:$0xff] }
 0x187   :  { %v1028_v38 = vpop.f32.mrf.mxu0  ;;  %1281 = vmatpush1.msra.mxu1 %v1194_v50 }
 0x188   :  { %v10327_v19 = vsel %vm449_vm3, %v1140_v6, %v1142_v28  ;;  %v10330_v60 = vadd.f32 %v1028_v38, %v10161_v59  ;;  %1282 = vmatprep.subr.mxu1 %v9616_v0  ;;  %v1225_v6 = vld [vmem:[%s10179_s17 + $0x98] sm:$0xff]  ;;  %v1230_v38 = vld [vmem:[%s10179_s17 + $0xc0] sm:$0x3] }
 0x189   :  { %v8771_v36 = vpop.f32.mrf.mxu0  ;;  %1283 = vmatpush1.msra.mxu1 %v1193_v53  ;;  %v1198_v25 = vmax.f32 %v10312_v17, %v10327_v19  ;;  %v1223_v17 = vld [vmem:[%s10179_s17 + $0x88] sm:$0xff]  ;;  %v1409_v19 = vld [vmem:[%s10279_s21 + $0x18] sm:$0xff] }
 0x18a   :  { %v1144_v54 = vrot.slane %v10330_v60, 1  ;;  %1284 = vmatprep.subr.mxu1 %v9616_v0  ;;  %v1407_v36 = vld [vmem:[%s10279_s21 + $0x8] sm:$0xff] }
 0x18b   :  { %v1033_v48 = vpop.f32.mrf.mxu0  ;;  %1285 = vmatpush1.msra.mxu1 %v1192_v2 }
 0x18c   :  { %v10338_v50 = vsel %vm449_vm3, %v1142_v28, %v1144_v54  ;;  %v10341_v7 = vadd.f32 %v1033_v48, %v10164_v12  ;;  %1286 = vmatprep.subr.mxu1 %v9616_v0  ;;  %v1231_v28 = vld [vmem:[%s10179_s17 + $0xc8] sm:$0x3] }
 0x18d   :  { %v8774_v59 = vpop.f32.mrf.mxu0  ;;  %1287 = vmatpush1.msra.mxu1 %v1191_v44  ;;  %v1199_v53 = vmax.f32 %v10319_v56, %v10338_v50  ;;  %v1226_v56 = vld [vmem:[%s10179_s17 + $0xa0] sm:$0xff]  ;;  %v8051_v48 = vld [vmem:[%s10279_s21 + $0x48] sm:$0xff] }
 0x18e   :  { %v1146_v15 = vrot.slane %v10341_v7, 1  ;;  %1288 = vmatprep.subr.mxu1 %v9616_v0  ;;  %v8050_v50 = vld [vmem:[%s10279_s21 + $0x40] sm:$0xff] }
 0x18f   :  { %v1038_v34 = vpop.f32.mrf.mxu0  ;;  %1289 = vmatpush1.msra.mxu1 %v1190_v29  ;;  %v1221_v29 = vld [vmem:[%s10179_s17 + $0x78] sm:$0xff] }
 0x190   :  { %v1147_v2 = vsel %vm449_vm3, %v1144_v54, %v1146_v15  ;;  %v1078_v12 = vadd.f32 %v1038_v34, %v10167_v24  ;;  %1290 = vmatprep.subr.mxu1 %v9616_v0  ;;  %v8052_v54 = vld [vmem:[%s10279_s21 + $0x50] sm:$0xff] }
 0x191   :  { %v8777_v33 = vpop.f32.mrf.mxu0  ;;  %1291 = vmatpush1.msra.mxu1 %v1189_v39  ;;  %v1200_v44 = vmax.f32 %v10330_v60, %v1147_v2  ;;  %v1408_v60 = vld [vmem:[%s10279_s21 + $0x10] sm:$0xff]  ;;  %8841 = vmatprep.subr.mxu0 %v8052_v54 }
 0x192   :  { %v1148_v30 = vrot.slane %v1078_v12, 1  ;;  %1292 = vmatprep.subr.mxu1 %v9616_v0  ;;  %8842 = vmatpush3.msra.mxu0 %v8052_v54  ;;  %v8036_v34 = vld [vmem:[%s10279_s21 + $0x30] sm:$0xff] }
 0x193   :  { %v1043_v42 = vpop.f32.mrf.mxu0  ;;  %1293 = vmatpush1.msra.mxu1 %v1188_v16  ;;  %v1218_v16 = vld [vmem:[%s10179_s17 + $0x60] sm:$0xff]  ;;  %8843 = vmatprep.subr.mxu0 %v8051_v48 }
 0x194   :  { %v1149_v9 = vsel %vm449_vm3, %v1146_v15, %v1148_v30  ;;  %v1079_v24 = vadd.f32 %v1043_v42, %v10170_v35  ;;  %1294 = vmatprep.subr.mxu1 %v9616_v0  ;;  %8844 = vmatpush3.msra.mxu0 %v8051_v48 }
 0x195   :  { %v8780_v43 = vpop.f32.mrf.mxu0  ;;  %1295 = vmatpush1.msra.mxu1 %v1187_v1  ;;  %v1201_v49 = vmax.f32 %v10341_v7, %v1149_v9  ;;  %8845 = vmatprep.subr.mxu0 %v8050_v50  ;;  %v8037_v7 = vld [vmem:[%s10279_s21 + $0x38] sm:$0xff]  ;;  %v8034_v9 = vld [vmem:[%s10279_s21 + $0x20] sm:$0xff] }
 0x196   :  { %v1150_v26 = vrot.slane %v1079_v24, 1  ;;  %1296 = vmatprep.subr.mxu1 %v9616_v0  ;;  %8846 = vmatpush3.msra.mxu0 %v8050_v50 }
 0x197   :  { %v1048_v39 = vpop.f32.mrf.mxu0  ;;  %1297 = vmatpush1.msra.mxu1 %v1186_v47  ;;  %v1219_v47 = vld [vmem:[%s10179_s17 + $0x68] sm:$0xff] }
 0x198   :  { %v1151_v22 = vsel %vm449_vm3, %v1148_v30, %v1150_v26  ;;  %v1080_v35 = vadd.f32 %v1048_v39, %v10173_v41  ;;  %1298 = vmatprep.subr.mxu1 %v9616_v0 }
 0x199   :  { %v8783_v8 = vpop.f32.mrf.mxu0  ;;  %1299 = vmatpush1.msra.mxu1 %v1185_v4  ;;  %v1202_v62 = vmax.f32 %v1078_v12, %v1151_v22 }
 0x19a   :  { %v1152_v45 = vrot.slane %v1080_v35, 1  ;;  %1300 = vmatprep.subr.mxu1 %v9616_v0 }
 0x19b   :  { %v1053_v1 = vpop.f32.mrf.mxu0  ;;  %1301 = vmatpush1.msra.mxu1 %v1184_v58  ;;  %v1217_v58 = vld [vmem:[%s10179_s17 + $0x58] sm:$0xff] }
 0x19c   :  { %v1153_v52 = vsel %vm449_vm3, %v1150_v26, %v1152_v45  ;;  %v1081_v41 = vadd.f32 %v1053_v1, %v10183_v55  ;;  %1302 = vmatprep.subr.mxu1 %v9616_v0 }
 0x19d   :  { %1303 = vmatpush1.msra.mxu1 %v1183_v40  ;;  %v1203_v37 = vmax.f32 %v1079_v24, %v1153_v52  ;;  %v8786_v61 = vpop.f32.mrf.mxu0  ;;  %v1214_v40 = vld [vmem:[%s10179_s17 + $0x40] sm:$0xff] }
 0x19e   :  { %v1154_v4 = vrot.slane %v1081_v41, 1  ;;  %1304 = vmatprep.subr.mxu1 %v9616_v0 }
 0x19f   :  { %1305 = vmatpush1.msra.mxu1 %v1182_v27  ;;  %v1212_v27 = vld [vmem:[%s10179_s17 + $0x30] sm:$0xff] }
 0x1a0   :  { %v1155_v21 = vsel %vm449_vm3, %v1152_v45, %v1154_v4  ;;  %v1205_v51 = vmax.f32 %v1081_v41, %v1154_v4  ;;  %1306 = vmatprep.subr.mxu1 %v9616_v0 }
 0x1a1   :  { %1307 = vmatpush1.msra.mxu1 %v1181_v13  ;;  %v1204_v55 = vmax.f32 %v1080_v35, %v1155_v21  ;;  %v1210_v13 = vld [vmem:[%s10179_s17 + $0x20] sm:$0xff] }
 0x1a2   :  { %1322 = vmatprep.subr.mxu1 %v9616_v0 }
 0x1a3   :  { %8007 = vmatpush2.msk.msra.mxu1 %vm1272_vm5, %v1205_v51 }
 0x1a4   :  { %1324 = vmatprep.subr.mxu1 %v9616_v0 }
 0x1a5   :  { %1325 = vmatpush2.msra.mxu1 %v1204_v55 }
 0x1a6   :  { %1326 = vmatprep.subr.mxu1 %v9616_v0 }
 0x1a7   :  { %1327 = vmatpush2.msra.mxu1 %v1203_v37 }
 0x1a8   :  { %1328 = vmatprep.subr.mxu1 %v9616_v0 }
 0x1a9   :  { %1329 = vmatpush2.msra.mxu1 %v1202_v62 }
 0x1aa   :  { %1330 = vmatprep.subr.mxu1 %v9616_v0 }
 0x1ab   :  { %1331 = vmatpush2.msra.mxu1 %v1201_v49 }
 0x1ac   :  { %1332 = vmatprep.subr.mxu1 %v9616_v0 }
 0x1ad   :  { %1333 = vmatpush2.msra.mxu1 %v1200_v44  ;;  %v8035_v44 = vld [vmem:[%s10279_s21 + $0x28] sm:$0xff] }
 0x1ae   :  { %1334 = vmatprep.subr.mxu1 %v9616_v0 }
 0x1af   :  { %1335 = vmatpush2.msra.mxu1 %v1199_v53 }
 0x1b0   :  { %1336 = vmatprep.subr.mxu1 %v9616_v0 }
 0x1b1   :  { %1337 = vmatpush2.msra.mxu1 %v1198_v25  ;;  %v1406_v25 = vld [vmem:[%s10279_s21] sm:$0xff] }
 0x1b2   :  { %1338 = vmatprep.subr.mxu1 %v9616_v0 }
 0x1b3   :  { %1339 = vmatpush2.msra.mxu1 %v1197_v3  ;;  %v1228_v3 = vld [vmem:[%s10179_s17 + $0xb0] sm:$0xff] }
 0x1b4   :  { %1341 = vmatmul.mubr.f32.vlgmr.msra.gmra.mxu1 %v1206_v46  ;;  %8787 = vmatprep.subr.mxu1 %v1409_v19 }
 0x1b5   :  { %8009 = vmatprep.mubr.msk.f32.mxu1 %vm1232_vm4, %v1209_v5  ;;  %8788 = vmatpush3.msra.mxu1 %v1409_v19 }
 0x1b6   :  { %8789 = vmatprep.subr.mxu1 %v1408_v60 }
 0x1b7   :  { %8790 = vmatpush3.msra.mxu1 %v1408_v60 }
 0x1b8   :  { %1346 = vmatmul.mubr.f32.gmra.mxu1 %v1208_v11  ;;  %8791 = vmatprep.subr.mxu1 %v1407_v36 }
 0x1b9   :  { %8010 = vmatprep.mubr.msk.f32.mxu1 %vm1232_vm4, %v1211_v10  ;;  %8792 = vmatpush3.msra.mxu1 %v1407_v36 }
 0x1ba   :  { %8793 = vmatprep.subr.mxu1 %v1406_v25 }
 0x1bb   :  { %8794 = vmatpush3.msra.mxu1 %v1406_v25 }
 0x1bc   :  { %1351 = vmatmul.mubr.f32.gmra.mxu1 %v1210_v13  ;;  %8813 = vmatprep.subr.mxu1 %v8037_v7 }
 0x1bd   :  { %8011 = vmatprep.mubr.msk.f32.mxu1 %vm1232_vm4, %v1213_v18 }
 0x1c0   :  { %1356 = vmatmul.mubr.f32.gmra.mxu1 %v1212_v27 }
 0x1c1   :  { %8012 = vmatprep.mubr.msk.f32.mxu1 %vm1232_vm4, %v1215_v31 }
 0x1c4   :  { %1361 = vmatmul.mubr.f32.gmra.mxu1 %v1214_v40 }
 0x1c5   :  { %8013 = vmatprep.mubr.msk.f32.mxu1 %vm1232_vm4, %v1217_v58 }
 0x1c8   :  { %1366 = vmatmul.mubr.f32.gmra.mxu1 %v1216_v20 }
 0x1c9   :  { %8014 = vmatprep.mubr.msk.f32.mxu1 %vm1232_vm4, %v1219_v47 }
 0x1cc   :  { %1371 = vmatmul.mubr.f32.gmra.mxu1 %v1218_v16 }
 0x1cd   :  { %8015 = vmatprep.mubr.msk.f32.mxu1 %vm1232_vm4, %v1221_v29 }
 0x1d0   :  { %1376 = vmatmul.mubr.f32.gmra.mxu1 %v1220_v57 }
 0x1d1   :  { %8016 = vmatprep.mubr.msk.f32.mxu1 %vm1232_vm4, %v1223_v17 }
 0x1d4   :  { %1381 = vmatmul.mubr.f32.gmra.mxu1 %v1222_v32 }
 0x1d5   :  { %8017 = vmatprep.mubr.msk.f32.mxu1 %vm1232_vm4, %v1225_v6 }
 0x1d8   :  { %1386 = vmatmul.mubr.f32.gmra.mxu1 %v1224_v23 }
 0x1d9   :  { %8018 = vmatprep.mubr.msk.f32.mxu1 %vm1232_vm4, %v1227_v63 }
 0x1dc   :  { %1391 = vmatmul.mubr.f32.gmra.mxu1 %v1226_v56 }
 0x1dd   :  { %8019 = vmatprep.mubr.msk.f32.mxu1 %vm1232_vm4, %v1229_v14 }
 0x1e0   :  { %1396 = vmatmul.mubr.f32.gmra.mxu1 %v1228_v3 }
 0x1e1   :  { %8020 = vmatprep.mubr.msk.f32.mxu1 %vm1232_vm4, %v1231_v28 }
 0x1e4   :  { %1401 = vmatmul.mubr.f32.gmra.mxu1 %v1230_v38 }
 0x274   :  { %v10458_v59 = vpop.f32.mrf.mxu1 }
 0x275   :  { %8795 = vmatprep.mubr.msk.f32.mxu1 %vm1417_vm6, %v10458_v59  ;;  %v1776_v2 = vrot.slane %v10458_v59, 2  ;;  %v1585_v32 = vrot.slane %v10458_v59, 1 }
 0x276   :  { %v1344_v53 = vpop.f32.mrf.mxu1 }
 0x278   :  { %v10462_v15 = vpop.f32.mrf.mxu1 }
 0x279   :  { %v1777_v12 = vrot.slane %v10462_v15, 2  ;;  %8796 = vmatmul.mubr.msk.f32.vlgmr.msra.gmra.mxu1 %vm1417_vm6, %v10462_v15  ;;  %v1586_v29 = vrot.slane %v10462_v15, 1 }
 0x27a   :  { %v1349_v33 = vpop.f32.mrf.mxu1  ;;  %8814 = vmatpush3.msra.mxu1 %v8037_v7 }
 0x27b   :  { %v1778_v30 = vsel %vm767_vm2, %v1776_v2, %v1777_v12  ;;  %8815 = vmatprep.subr.mxu1 %v8036_v34  ;;  %v1587_v3 = vsel %vm449_vm3, %v1585_v32, %v1586_v29  ;;  %v8021_v32 = vld [vmem:[%s7895_s29] ss:$0 sm:$0xff]  ;;  %s11278_s29 = sld [smem:[%s12413_s0 + %s9632_s26]]   ;;  %s9639_s26 = smov 30  }
 0x27c   :  { %v10471_v42 = vpop.f32.mrf.mxu1  ;;  %8847 = vmatprep.mubr.msk.f32.mxu0 %vm1417_vm6, %v1778_v30  ;;  %8816 = vmatpush3.msra.mxu1 %v8036_v34 }
 0x27d   :  { %v1779_v24 = vrot.slane %v10471_v42, 2  ;;  %8798 = vmatprep.mubr.msk.f32.mxu1 %vm1417_vm6, %v10471_v42  ;;  %8817 = vmatprep.subr.mxu1 %v8035_v44  ;;  %v1588_v23 = vrot.slane %v10471_v42, 1 }
 0x27e   :  { %v1354_v43 = vpop.f32.mrf.mxu1  ;;  %8818 = vmatpush3.msra.mxu1 %v8035_v44 }
 0x27f   :  { %v1780_v49 = vsel %vm767_vm2, %v1777_v12, %v1779_v24  ;;  %8819 = vmatprep.subr.mxu1 %v8034_v9  ;;  %v1589_v19 = vsel %vm449_vm3, %v1586_v29, %v1588_v23 }
 0x280   :  { %v10479_v26 = vpop.f32.mrf.mxu1  ;;  %8848 = vmatmul.mubr.msk.f32.vlgmr.msra.gmra.mxu0 %vm1417_vm6, %v1780_v49  ;;  %8820 = vmatpush3.msra.mxu1 %v8034_v9 }
 0x281   :  { %v1781_v39 = vrot.slane %v10479_v26, 2  ;;  %8799 = vmatmul.mubr.msk.f32.gmra.mxu1 %vm1417_vm6, %v10479_v26  ;;  %v1590_v56 = vrot.slane %v10479_v26, 1 }
 0x282   :  { %v1359_v22 = vpop.f32.mrf.mxu1 }
 0x283   :  { %v1782_v35 = vsel %vm767_vm2, %v1779_v24, %v1781_v39  ;;  %v1591_v54 = vsel %vm449_vm3, %v1588_v23, %v1590_v56  ;;  %v2021_v22 = vld [vmem:[%s10564_s25] sm:$0xff] }
 0x284   :  { %v10486_v8 = vpop.f32.mrf.mxu1  ;;  %8850 = vmatprep.mubr.msk.f32.mxu0 %vm1417_vm6, %v1782_v35 }
 0x285   :  { %v1783_v62 = vrot.slane %v10486_v8, 2  ;;  %8801 = vmatprep.mubr.msk.f32.mxu1 %vm1417_vm6, %v10486_v8  ;;  %v1592_v60 = vrot.slane %v10486_v8, 1 }
 0x286   :  { %v1364_v45 = vpop.f32.mrf.mxu1 }
 0x287   :  { %v1784_v1 = vsel %vm767_vm2, %v1781_v39, %v1783_v62  ;;  %v1593_v53 = vsel %vm449_vm3, %v1590_v56, %v1592_v60 }
 0x288   :  { %v10493_v52 = vpop.f32.mrf.mxu1  ;;  %8851 = vmatmul.mubr.msk.f32.gmra.mxu0 %vm1417_vm6, %v1784_v1 }
 0x289   :  { %v1785_v41 = vrot.slane %v10493_v52, 2  ;;  %8802 = vmatmul.mubr.msk.f32.gmra.mxu1 %vm1417_vm6, %v10493_v52  ;;  %v1594_v25 = vrot.slane %v10493_v52, 1 }
 0x28a   :  { %v1369_v37 = vpop.f32.mrf.mxu1 }
 0x28b   :  { %v1786_v61 = vsel %vm767_vm2, %v1783_v62, %v1785_v41  ;;  %v1595_v34 = vsel %vm449_vm3, %v1592_v60, %v1594_v25 }
 0x28c   :  { %v10500_v4 = vpop.f32.mrf.mxu1  ;;  %8853 = vmatprep.mubr.msk.f32.mxu0 %vm1417_vm6, %v1786_v61 }
 0x28d   :  { %v1787_v21 = vrot.slane %v10500_v4, 2  ;;  %8804 = vmatprep.mubr.msk.f32.mxu1 %vm1417_vm6, %v10500_v4  ;;  %v1596_v59 = vrot.slane %v10500_v4, 1 }
 0x28e   :  { %v1374_v51 = vpop.f32.mrf.mxu1 }
 0x28f   :  { %v1788_v55 = vsel %vm767_vm2, %v1785_v41, %v1787_v21  ;;  %v1597_v12 = vsel %vm449_vm3, %v1594_v25, %v1596_v59 }
 0x290   :  { %v10507_v46 = vpop.f32.mrf.mxu1  ;;  %8854 = vmatmul.mubr.msk.f32.gmra.mxu0 %vm1417_vm6, %v1788_v55 }
 0x291   :  { %v1789_v5 = vrot.slane %v10507_v46, 2  ;;  %8805 = vmatmul.mubr.msk.f32.gmra.mxu1 %vm1417_vm6, %v10507_v46  ;;  %v1598_v15 = vrot.slane %v10507_v46, 1 }
 0x292   :  { %v1379_v11 = vpop.f32.mrf.mxu1 }
 0x293   :  { %v1790_v10 = vsel %vm767_vm2, %v1787_v21, %v1789_v5  ;;  %v1599_v44 = vsel %vm449_vm3, %v1596_v59, %v1598_v15 }
 0x294   :  { %v1382_v13 = vpop.f32.mrf.mxu1  ;;  %8856 = vmatprep.mubr.msk.f32.mxu0 %vm1417_vm6, %v1790_v10 }
 0x295   :  { %v1791_v18 = vrot.slane %v1382_v13, 2  ;;  %8807 = vmatprep.mubr.msk.f32.mxu1 %vm1417_vm6, %v1382_v13  ;;  %v1600_v2 = vrot.slane %v1382_v13, 1 }
 0x296   :  { %v1384_v27 = vpop.f32.mrf.mxu1 }
 0x297   :  { %v1792_v31 = vsel %vm767_vm2, %v1789_v5, %v1791_v18  ;;  %v1601_v42 = vsel %vm449_vm3, %v1598_v15, %v1600_v2 }
 0x298   :  { %v1387_v40 = vpop.f32.mrf.mxu1  ;;  %8857 = vmatmul.mubr.msk.f32.gmra.mxu0 %vm1417_vm6, %v1792_v31 }
 0x299   :  { %v1793_v58 = vrot.slane %v1387_v40, 2  ;;  %8808 = vmatmul.mubr.msk.f32.gmra.mxu1 %vm1417_vm6, %v1387_v40  ;;  %v1602_v33 = vrot.slane %v1387_v40, 1 }
 0x29a   :  { %v1389_v20 = vpop.f32.mrf.mxu1 }
 0x29b   :  { %v1794_v47 = vsel %vm767_vm2, %v1791_v18, %v1793_v58  ;;  %v1603_v24 = vsel %vm449_vm3, %v1600_v2, %v1602_v33 }
 0x29c   :  { %v1392_v16 = vpop.f32.mrf.mxu1  ;;  %8859 = vmatprep.mubr.msk.f32.mxu0 %vm1417_vm6, %v1794_v47 }
 0x29d   :  { %v1795_v57 = vrot.slane %v1392_v16, 2  ;;  %8810 = vmatprep.mubr.msk.f32.mxu1 %vm1417_vm6, %v1392_v16  ;;  %v1604_v30 = vrot.slane %v1392_v16, 1 }
 0x29e   :  { %v1394_v17 = vpop.f32.mrf.mxu1 }
 0x29f   :  { %v1796_v6 = vsel %vm767_vm2, %v1793_v58, %v1795_v57  ;;  %v1605_v49 = vsel %vm449_vm3, %v1602_v33, %v1604_v30 }
 0x2a0   :  { %v1397_v63 = vpop.f32.mrf.mxu1  ;;  %8860 = vmatmul.mubr.msk.f32.gmra.mxu0 %vm1417_vm6, %v1796_v6 }
 0x2a1   :  { %v1797_v14 = vrot.slane %v1397_v63, 2  ;;  %8811 = vmatmul.mubr.msk.f32.gmra.mxu1 %vm1417_vm6, %v1397_v63  ;;  %v1606_v9 = vrot.slane %v1397_v63, 1 }
 0x2a2   :  { %8821 = vmatprep.mubr.msk.f32.mxu1 %vm1417_vm6, %v1587_v3  ;;  %v1399_v28 = vpop.f32.mrf.mxu1 }
 0x2a3   :  { %v1798_v38 = vsel %vm767_vm2, %v1795_v57, %v1797_v14  ;;  %v1607_v26 = vsel %vm449_vm3, %v1604_v30, %v1606_v9 }
 0x2a4   :  { %v1402_v36 = vpop.f32.mrf.mxu1  ;;  %8862 = vmatprep.mubr.msk.f32.mxu0 %vm1417_vm6, %v1798_v38 }
 0x2a5   :  { %8822 = vmatmul.mubr.msk.f32.vlgmr.msra.gmra.mxu1 %vm1417_vm6, %v1589_v19  ;;  %v1799_v48 = vrot.slane %v1402_v36, 2  ;;  %v1608_v43 = vrot.slane %v1402_v36, 1 }
 0x2a6   :  { %8824 = vmatprep.mubr.msk.f32.mxu1 %vm1417_vm6, %v1591_v54  ;;  %v1404_v50 = vpop.f32.mrf.mxu1 }
 0x2a7   :  { %v1800_v7 = vsel %vm767_vm2, %v1797_v14, %v1799_v48  ;;  %v1609_v39 = vsel %vm449_vm3, %v1606_v9, %v1608_v43 }
 0x2a8   :  { %8863 = vmatmul.mubr.msk.f32.gmra.mxu0 %vm1417_vm6, %v1800_v7 }
 0x2a9   :  { %8825 = vmatmul.mubr.msk.f32.gmra.mxu1 %vm1417_vm6, %v1593_v53 }
 0x2aa   :  { %8827 = vmatprep.mubr.msk.f32.mxu1 %vm1417_vm6, %v1595_v34 }
 0x2ad   :  { %8828 = vmatmul.mubr.msk.f32.gmra.mxu1 %vm1417_vm6, %v1597_v12 }
 0x2ae   :  { %8830 = vmatprep.mubr.msk.f32.mxu1 %vm1417_vm6, %v1599_v44 }
 0x2b1   :  { %8831 = vmatmul.mubr.msk.f32.gmra.mxu1 %vm1417_vm6, %v1601_v42 }
 0x2b2   :  { %8833 = vmatprep.mubr.msk.f32.mxu1 %vm1417_vm6, %v1603_v24 }
 0x2b5   :  { %8834 = vmatmul.mubr.msk.f32.gmra.mxu1 %vm1417_vm6, %v1605_v49 }
 0x2b6   :  { %8836 = vmatprep.mubr.msk.f32.mxu1 %vm1417_vm6, %v1607_v26 }
 0x2b9   :  { %8837 = vmatmul.mubr.msk.f32.gmra.mxu1 %vm1417_vm6, %v1609_v39 }
 0x2ba   :  { %8889 = vmatprep.mubr.msk.f32.mxu1 %vm2027_vm7, %v2021_v22 }
 0x339   :  { %v10568_v35 = vpop.f32.mrf.mxu1 }
 0x33b   :  { %v10570_v8 = vpop.f32.mrf.mxu1 }
 0x340   :  { %v10576_v61 = vpop.f32.mrf.mxu0 }
 0x341   :  { %v10572_v62 = vpop.f32.mrf.mxu1 }
 0x342   :  { %v10578_v21 = vpop.f32.mrf.mxu0 }
 0x343   :  { %v10574_v45 = vpop.f32.mrf.mxu1 }
 0x348   :  { %v10580_v46 = vpop.f32.mrf.mxu0 }
 0x349   :  { %v8803_v1 = vpop.f32.mrf.mxu1 }
 0x34a   :  { %v10582_v11 = vpop.f32.mrf.mxu0  ;;  %v1546_v12 = vadd.f32 %v8803_v1, %v8021_v32 }
 0x34b   :  { %v1540_v52 = vpop.f32.mrf.mxu1 }
 0x34c   :  { %v1541_v33 = vadd.f32 %v8021_v32, %v1540_v52 }
 0x350   :  { %v8855_v18 = vpop.f32.mrf.mxu0 }
 0x351   :  { %v8806_v41 = vpop.f32.mrf.mxu1 }
 0x352   :  { %v1911_v40 = vpop.f32.mrf.mxu0  ;;  %v1556_v19 = vadd.f32 %v8806_v41, %v8021_v32 }
 0x353   :  { %v1550_v37 = vpop.f32.mrf.mxu1 }
 0x354   :  { %v1551_v60 = vadd.f32 %v8021_v32, %v1550_v37  ;;  %v1536_v37 = vadd.f32 %v10572_v62, %v8021_v32  ;;  %v1526_v62 = vadd.f32 %v10568_v35, %v8021_v32 }
 0x358   :  { %v8858_v20 = vpop.f32.mrf.mxu0 }
 0x359   :  { %v8809_v4 = vpop.f32.mrf.mxu1 }
 0x35a   :  { %v1921_v29 = vpop.f32.mrf.mxu0  ;;  %v1566_v23 = vadd.f32 %v8809_v4, %v8021_v32  ;;  %v1531_v4 = vadd.f32 %v8021_v32, %v10574_v45  ;;  %v1521_v45 = vadd.f32 %v8021_v32, %v10570_v8 }
 0x35b   :  { %v1560_v51 = vpop.f32.mrf.mxu1 }
 0x35c   :  { %v1561_v63 = vadd.f32 %v8021_v32, %v1560_v51 }
 0x360   :  { %v8861_v17 = vpop.f32.mrf.mxu0 }
 0x361   :  { %v8812_v55 = vpop.f32.mrf.mxu1 }
 0x362   :  { %v1931_v14 = vpop.f32.mrf.mxu0  ;;  %v1576_v3 = vadd.f32 %v8812_v55, %v8021_v32 }
 0x363   :  { %v1570_v5 = vpop.f32.mrf.mxu1 }
 0x364   :  { %v1571_v54 = vadd.f32 %v8021_v32, %v1570_v5 }
 0x365   :  { %v10584_v10 = vpop.f32.mrf.mxu1 }
 0x367   :  { %v10586_v13 = vpop.f32.mrf.mxu1 }
 0x368   :  { %v8864_v25 = vpop.f32.mrf.mxu0 }
 0x369   :  { %v8826_v27 = vpop.f32.mrf.mxu1 }
 0x36a   :  { %v1941_v44 = vpop.f32.mrf.mxu0  ;;  %v1762_v52 = vadd.f32 %v8826_v27, %v1536_v37  ;;  %v1760_v27 = vadd.f32 %v10584_v10, %v1526_v62 }
 0x36b   :  { %v1710_v31 = vpop.f32.mrf.mxu1 }
 0x36c   :  { %v1761_v55 = vadd.f32 %v1710_v31, %v1531_v4  ;;  %v1953_v31 = vadd.f32 %v10580_v46, %v1762_v52  ;;  %v1951_v10 = vadd.f32 %v10576_v61, %v1760_v27  ;;  %v8091_v4 = vld [vmem:[%s10615_s3 + $0x48] sm:$0xff] }
 0x36d   :  { %v8829_v58 = vpop.f32.mrf.mxu1 }
 0x36e   :  { %v1764_v9 = vadd.f32 %v8829_v58, %v1546_v12  ;;  %v2026_v12 = vld [vmem:[%s10564_s25 + $0x28] sm:$0x3f] }
 0x36f   :  { %v1720_v47 = vpop.f32.mrf.mxu1 }
 0x370   :  { %v1763_v24 = vadd.f32 %v1720_v47, %v1541_v33  ;;  %v1955_v5 = vadd.f32 %v8855_v18, %v1764_v9  ;;  %v1759_v18 = vadd.f32 %v10586_v13, %v1521_v45  ;;  %v1979_v13 = vrot.slane %v1953_v31, 1  ;;  %v2145_v33 = vld [vmem:[%s10615_s3 + $0x8] sm:$0xff] }
 0x371   :  { %v8832_v16 = vpop.f32.mrf.mxu1  ;;  %v8081_v9 = vld [vmem:[%s10615_s3 + $0x28] sm:$0xff] }
 0x372   :  { %v1766_v50 = vadd.f32 %v8832_v16, %v1556_v19  ;;  %v1950_v46 = vadd.f32 %v10578_v21, %v1759_v18  ;;  %v1975_v19 = vrot.slane %v1951_v10, 1 }
 0x373   :  { %v1730_v57 = vpop.f32.mrf.mxu1 }
 0x374   :  { %v1765_v7 = vadd.f32 %v1730_v57, %v1551_v60  ;;  %v1957_v43 = vadd.f32 %v8858_v20, %v1766_v50  ;;  %v1954_v20 = vadd.f32 %v1911_v40, %v1763_v24  ;;  %v1974_v60 = vrot.slane %v1950_v46, 1  ;;  %v8093_v24 = vld [vmem:[%s10615_s3 + $0x58] sm:$0xff] }
 0x375   :  { %v8835_v6 = vpop.f32.mrf.mxu1 }
 0x376   :  { %v1768_v28 = vadd.f32 %v8835_v6, %v1566_v23  ;;  %v1956_v49 = vadd.f32 %v1921_v29, %v1765_v7  ;;  %v1987_v47 = vrot.slane %v1957_v43, 1  ;;  %v1952_v6 = vadd.f32 %v10582_v11, %v1761_v55  ;;  %v2022_v7 = vld [vmem:[%s10564_s25 + $0x8] sm:$0xff]  ;;  %v8090_v55 = vld [vmem:[%s10615_s3 + $0x40] sm:$0xff] }
 0x377   :  { %v1740_v56 = vpop.f32.mrf.mxu1  ;;  %v1983_v23 = vrot.slane %v1955_v5, 1 }
 0x378   :  { %v1767_v38 = vadd.f32 %v1740_v56, %v1561_v63  ;;  %v1959_v53 = vadd.f32 %v8861_v17, %v1768_v28  ;;  %v1985_v16 = vrot.slane %v1956_v49, 1  ;;  %v1981_v63 = vrot.slane %v1954_v20, 1 }
 0x379   :  { %v8838_v36 = vpop.f32.mrf.mxu1 }
 0x37a   :  { %v1770_v48 = vadd.f32 %v8838_v36, %v1576_v3  ;;  %v1958_v15 = vadd.f32 %v1931_v14, %v1767_v38  ;;  %v1991_v26 = vrot.slane %v1959_v53, 1  ;;  %v1988_v35 = vsel %vm449_vm3, %v1985_v16, %v1987_v47 }
 0x37b   :  { %v1750_v59 = vpop.f32.mrf.mxu1  ;;  %v1986_v32 = vsel %vm449_vm3, %v1983_v23, %v1985_v16  ;;  %v2015_v56 = vmax.f32 %v1956_v49, %v1988_v35  ;;  %v1977_v14 = vrot.slane %v1952_v6, 1  ;;  %v1984_v11 = vsel %vm449_vm3, %v1981_v63, %v1983_v23 }
 0x37c   :  { %v1769_v34 = vadd.f32 %v1750_v59, %v1571_v54  ;;  %v1961_v2 = vadd.f32 %v8864_v25, %v1770_v48  ;;  %v1989_v39 = vrot.slane %v1958_v15, 1  ;;  %v2014_v3 = vmax.f32 %v1955_v5, %v1986_v32  ;;  %v2147_v59 = vld [vmem:[%s10615_s3 + $0x18] sm:$0xff] }
 0x37d   :  { %v1982_v28 = vsel %vm449_vm3, %v1979_v13, %v1981_v63  ;;  %v2013_v38 = vmax.f32 %v1954_v20, %v1984_v11  ;;  %v1980_v61 = vsel %vm449_vm3, %v1977_v14, %v1979_v13  ;;  %v1978_v36 = vsel %vm449_vm3, %v1975_v19, %v1977_v14  ;;  %v2656_v13 = vld [vmem:[%s10676_s7 + $0x20] sm:$0xff]  ;;  %v2655_v14 = vld [vmem:[%s10676_s7 + $0x18] sm:$0xff]  ;;  %v2654_v11 = vld [vmem:[%s10676_s7 + $0x10] sm:$0xff] }
 0x37e   :  { %v1995_v30 = vrot.slane %v1961_v2, 1  ;;  %v1960_v42 = vadd.f32 %v1941_v44, %v1769_v34  ;;  %v1992_v29 = vsel %vm449_vm3, %v1989_v39, %v1991_v26  ;;  %v1990_v17 = vsel %vm449_vm3, %v1987_v47, %v1989_v39  ;;  %v2024_v34 = vld [vmem:[%s10564_s25 + $0x18] sm:$0xff]  ;;  %v2144_v44 = vld [vmem:[%s10615_s3] sm:$0xff] }
 0x37f   :  { %v2017_v40 = vmax.f32 %v1958_v15, %v1992_v29  ;;  %v2016_v8 = vmax.f32 %v1957_v43, %v1990_v17  ;;  %v2012_v21 = vmax.f32 %v1953_v31, %v1982_v28  ;;  %v2011_v25 = vmax.f32 %v1952_v6, %v1980_v61  ;;  %v2146_v15 = vld [vmem:[%s10615_s3 + $0x10] sm:$0xff]  ;;  %v8080_v43 = vld [vmem:[%s10615_s3 + $0x20] sm:$0xff] }
 0x380   :  { %v2020_v22 = vmax.f32 %v1961_v2, %v1995_v30  ;;  %v1993_v41 = vrot.slane %v1960_v42, 1  ;;  %v1976_v54 = vsel %vm449_vm3, %v1974_v60, %v1975_v19  ;;  %v2010_v48 = vmax.f32 %v1951_v10, %v1978_v36  ;;  %v2025_v2 = vld [vmem:[%s10564_s25 + $0x20] sm:$0xff]  ;;  %v2659_v10 = vld [vmem:[%s10676_s7 + $0x38] sm:$0xff] }
 0x381   :  { %v2009_v50 = vmax.f32 %v1950_v46, %v1976_v54  ;;  %v2657_v46 = vld [vmem:[%s10676_s7 + $0x28] sm:$0xff] }
 0x382   :  { %v1996_v51 = vsel %vm449_vm3, %v1993_v41, %v1995_v30  ;;  %8865 = vmatprep.subr.msk.mxu1 %vm449_vm3, %v2020_v22  ;;  %v1994_v1 = vsel %vm449_vm3, %v1991_v26, %v1993_v41  ;;  %v8083_v30 = vld [vmem:[%s10615_s3 + $0x38] sm:$0xff]  ;;  %v8092_v41 = vld [vmem:[%s10615_s3 + $0x50] sm:$0xff] }
 0x383   :  { %v2019_v58 = vmax.f32 %v1960_v42, %v1996_v51  ;;  %8866 = vmatpush3.msk.msra.mxu1 %vm449_vm3, %v2020_v22  ;;  %v2018_v57 = vmax.f32 %v1959_v53, %v1994_v1  ;;  %v2023_v53 = vld [vmem:[%s10564_s25 + $0x10] sm:$0xff]  ;;  %8915 = vmatprep.subr.mxu0 %v8083_v30  ;;  %s9631_s25 = smov 32  }
 0x384   :  { %8916 = vmatpush3.msra.mxu0 %v8083_v30  ;;  %v8082_v42 = vld [vmem:[%s10615_s3 + $0x30] sm:$0xff]  ;;  %s11285_s3 = sld [smem:[%s12413_s0 + %s9633_s30]]   ;;  %s9640_s30 = smov 18  }
 0x385   :  { %8867 = vmatprep.subr.mxu1 %v2019_v58  ;;  %8917 = vmatprep.subr.mxu0 %v8082_v42  ;;  %s7923_s18 = sld [smem:[%s12413_s0 + %s9631_s25]]  }
 0x386   :  { %8868 = vmatpush3.msra.mxu1 %v2019_v58  ;;  %8918 = vmatpush3.msra.mxu0 %v8082_v42 }
 0x387   :  { %8869 = vmatprep.subr.mxu1 %v2018_v57  ;;  %8919 = vmatprep.subr.mxu0 %v8081_v9 }
 0x388   :  { %8870 = vmatpush3.msra.mxu1 %v2018_v57  ;;  %8920 = vmatpush3.msra.mxu0 %v8081_v9 }
 0x389   :  { %8871 = vmatprep.subr.mxu1 %v2017_v40  ;;  %8921 = vmatprep.subr.mxu0 %v8080_v43 }
 0x38a   :  { %8872 = vmatpush3.msra.mxu1 %v2017_v40  ;;  %8922 = vmatpush3.msra.mxu0 %v8080_v43 }
 0x38b   :  { %8873 = vmatprep.subr.mxu1 %v2016_v8  ;;  %8949 = vmatprep.subr.mxu0 %v9616_v0 }
 0x38c   :  { %8874 = vmatpush3.msra.mxu1 %v2016_v8 }
 0x38d   :  { %8875 = vmatprep.subr.mxu1 %v2015_v56 }
 0x38e   :  { %8876 = vmatpush3.msra.mxu1 %v2015_v56  ;;  %v2658_v56 = vld [vmem:[%s10676_s7 + $0x30] sm:$0xff] }
 0x38f   :  { %8877 = vmatprep.subr.mxu1 %v2014_v3 }
 0x390   :  { %8878 = vmatpush3.msra.mxu1 %v2014_v3  ;;  %v2653_v3 = vld [vmem:[%s10676_s7 + $0x8] sm:$0xff] }
 0x391   :  { %8879 = vmatprep.subr.mxu1 %v2013_v38 }
 0x392   :  { %8880 = vmatpush3.msra.mxu1 %v2013_v38 }
 0x393   :  { %8881 = vmatprep.subr.mxu1 %v2012_v21 }
 0x394   :  { %8882 = vmatpush3.msra.mxu1 %v2012_v21 }
 0x395   :  { %8883 = vmatprep.subr.mxu1 %v2011_v25 }
 0x396   :  { %8884 = vmatpush3.msra.mxu1 %v2011_v25 }
 0x397   :  { %8885 = vmatprep.subr.mxu1 %v2010_v48 }
 0x398   :  { %8886 = vmatpush3.msra.mxu1 %v2010_v48 }
 0x399   :  { %8887 = vmatprep.subr.mxu1 %v2009_v50 }
 0x39a   :  { %8888 = vmatpush3.msra.mxu1 %v2009_v50 }
 0x39b   :  { %8890 = vmatmul.mubr.msk.f32.vlgmr.msra.gmra.mxu1 %vm2027_vm7, %v2022_v7  ;;  %8898 = vmatprep.subr.mxu1 %v2147_v59 }
 0x39c   :  { %8892 = vmatprep.mubr.msk.f32.mxu1 %vm2027_vm7, %v2023_v53  ;;  %8899 = vmatpush3.msra.mxu1 %v2147_v59  ;;  %v8073_v53 = vld [vmem:[%s7897_s11] ss:$0 sm:$0xff]  ;;  %s11868_s11 = sld [smem:[%s12413_s0 + %s9635_s8]]   ;;  %s9642_s8 = smov 22  }
 0x39d   :  { %8900 = vmatprep.subr.mxu1 %v2146_v15 }
 0x39e   :  { %8901 = vmatpush3.msra.mxu1 %v2146_v15 }
 0x39f   :  { %8893 = vmatmul.mubr.msk.f32.gmra.mxu1 %vm2027_vm7, %v2024_v34  ;;  %8902 = vmatprep.subr.mxu1 %v2145_v33 }
 0x3a0   :  { %8895 = vmatprep.mubr.msk.f32.mxu1 %vm2027_vm7, %v2025_v2  ;;  %8903 = vmatpush3.msra.mxu1 %v2145_v33 }
 0x3a1   :  { %8904 = vmatprep.subr.mxu1 %v2144_v44 }
 0x3a2   :  { %8905 = vmatpush3.msra.mxu1 %v2144_v44 }
 0x3a3   :  { %8896 = vmatmul.mubr.msk.f32.gmra.mxu1 %vm2027_vm7, %v2026_v12  ;;  %8932 = vmatprep.subr.mxu1 %v8093_v24 }
 0x45b   :  { %v8891_v49 = vpop.f32.mrf.mxu1 }
 0x45c   :  { %v2274_v39 = vrot.slane %v8891_v49, 1  ;;  %v2403_v16 = vrot.slane %v8891_v49, 2 }
 0x45d   :  { %v2115_v26 = vpop.f32.mrf.mxu1 }
 0x45e   :  { %v2273_v22 = vrot.slane %v2115_v26, 1  ;;  %8906 = vmatprep.mubr.msk.f32.mxu1 %vm1417_vm6, %v2115_v26  ;;  %v2402_v5 = vrot.slane %v2115_v26, 2 }
 0x45f   :  { %v8894_v37 = vpop.f32.mrf.mxu1  ;;  %8907 = vmatmul.mubr.msk.f32.vlgmr.msra.gmra.mxu1 %vm1417_vm6, %v8891_v49 }
 0x460   :  { %8933 = vmatpush3.msra.mxu1 %v8093_v24  ;;  %v2275_v51 = vsel %vm449_vm3, %v2273_v22, %v2274_v39  ;;  %v2278_v58 = vrot.slane %v8894_v37, 1  ;;  %v2404_v27 = vsel %vm767_vm2, %v2402_v5, %v2403_v16  ;;  %v2407_v40 = vrot.slane %v8894_v37, 2 }
 0x461   :  { %v2125_v1 = vpop.f32.mrf.mxu1  ;;  %8934 = vmatprep.subr.mxu1 %v8092_v41  ;;  %8923 = vmatprep.mubr.msk.f32.mxu0 %vm1417_vm6, %v2275_v51 }
 0x462   :  { %v2276_v52 = vrot.slane %v2125_v1, 1  ;;  %8909 = vmatprep.mubr.msk.f32.mxu1 %vm1417_vm6, %v2125_v1  ;;  %8935 = vmatpush3.msra.mxu1 %v8092_v41  ;;  %v2405_v45 = vrot.slane %v2125_v1, 2 }
 0x463   :  { %v8897_v20 = vpop.f32.mrf.mxu1  ;;  %8910 = vmatmul.mubr.msk.f32.gmra.mxu1 %vm1417_vm6, %v8894_v37  ;;  %8936 = vmatprep.subr.mxu1 %v8091_v4 }
 0x464   :  { %v2277_v47 = vsel %vm449_vm3, %v2274_v39, %v2276_v52  ;;  %8937 = vmatpush3.msra.mxu1 %v8091_v4  ;;  %v2279_v62 = vsel %vm449_vm3, %v2276_v52, %v2278_v58  ;;  %v2282_v57 = vrot.slane %v8897_v20, 1  ;;  %v2406_v6 = vsel %vm767_vm2, %v2403_v16, %v2405_v45 }
 0x465   :  { %v2135_v29 = vpop.f32.mrf.mxu1  ;;  %8924 = vmatmul.mubr.msk.f32.vlgmr.msra.gmra.mxu0 %vm1417_vm6, %v2277_v47  ;;  %8938 = vmatprep.subr.mxu1 %v8090_v55  ;;  %v2408_v63 = vsel %vm767_vm2, %v2405_v45, %v2407_v40  ;;  %v2411_v35 = vrot.slane %v8897_v20, 2 }
 0x466   :  { %v2280_v17 = vrot.slane %v2135_v29, 1  ;;  %8912 = vmatprep.mubr.msk.f32.mxu1 %vm1417_vm6, %v2135_v29  ;;  %8939 = vmatpush3.msra.mxu1 %v8090_v55  ;;  %v2409_v23 = vrot.slane %v2135_v29, 2 }
 0x467   :  { %8913 = vmatmul.mubr.msk.f32.gmra.mxu1 %vm1417_vm6, %v8897_v20  ;;  %8926 = vmatprep.mubr.msk.f32.mxu0 %vm1417_vm6, %v2279_v62 }
 0x468   :  { %8940 = vmatprep.mubr.msk.f32.mxu1 %vm1417_vm6, %v2404_v27  ;;  %v2281_v18 = vsel %vm449_vm3, %v2278_v58, %v2280_v17  ;;  %v2283_v31 = vsel %vm449_vm3, %v2280_v17, %v2282_v57  ;;  %v2410_v8 = vsel %vm767_vm2, %v2407_v40, %v2409_v23  ;;  %v2412_v32 = vsel %vm767_vm2, %v2409_v23, %v2411_v35 }
 0x469   :  { %8927 = vmatmul.mubr.msk.f32.gmra.mxu0 %vm1417_vm6, %v2281_v18  ;;  %2705 = vmatprep.subr.mxu1 %v2659_v10  ;;  %v10713_v10 = vld [vmem:[%s10699_s19 + $0x70] sm:$0xff] }
 0x46a   :  { %8929 = vmatprep.mubr.msk.f32.mxu0 %vm1417_vm6, %v2283_v31 }
 0x46b   :  { %8941 = vmatmul.mubr.msk.f32.vlgmr.msra.gmra.mxu1 %vm1417_vm6, %v2406_v6 }
 0x46c   :  { %8943 = vmatprep.mubr.msk.f32.mxu1 %vm1417_vm6, %v2408_v63  ;;  %2706 = vmatpush1.msra.mxu1 %v2658_v56  ;;  %v10716_v56 = vld [vmem:[%s10699_s19 + $0x68] sm:$0xff] }
 0x46d   :  { %8930 = vmatmul.mubr.msk.f32.gmra.mxu0 %vm1417_vm6, %v2282_v57  ;;  %2707 = vmatprep.subr.mxu1 %v2657_v46  ;;  %v10721_v46 = vld [vmem:[%s10699_s19 + $0x60] sm:$0xff] }
 0x46e   :  { %8961 = vmatprep.mubr.msk.f32.mxu0 %vm9618_vm0, %v9616_v0  ;;  %2708 = vmatpush1.msra.mxu1 %v2656_v13  ;;  %v2556_v13 = vld [vmem:[%s10693_s15 + $0x8] sm:$0xff] }
 0x46f   :  { %8944 = vmatmul.mubr.msk.f32.gmra.mxu1 %vm1417_vm6, %v2410_v8  ;;  %2709 = vmatprep.subr.mxu1 %v2655_v14  ;;  %v2555_v8 = vld [vmem:[%s10693_s15] sm:$0xff]  ;;  %v10728_v14 = vld [vmem:[%s10699_s19 + $0x58] sm:$0xff] }
 0x470   :  { %8946 = vmatprep.mubr.msk.f32.mxu1 %vm1417_vm6, %v2412_v32  ;;  %2710 = vmatpush1.msra.mxu1 %v2654_v11  ;;  %v10709_v32 = vld [vmem:[%s10699_s19 + $0x78] sm:$0xff]  ;;  %v10732_v11 = vld [vmem:[%s10699_s19 + $0x50] sm:$0xff] }
 0x471   :  { %2711 = vmatprep.subr.mxu1 %v2653_v3  ;;  %v10736_v3 = vld [vmem:[%s10699_s19 + $0x48] sm:$0xff] }
 0x473   :  { %8947 = vmatmul.mubr.msk.f32.gmra.mxu1 %vm1417_vm6, %v2411_v35 }
 0x474   :  { %2745 = vmatprep.mubr.f32.mxu1 %v9616_v0 }
 0x51f   :  { %v8908_v28 = vpop.f32.mrf.mxu1 }
 0x520   :  { %v2245_v43 = vadd.f32 %v8908_v28, %v8073_v53  ;;  %v10741_v28 = vld [vmem:[%s10699_s19 + $0x40] sm:$0xff] }
 0x521   :  { %v2239_v38 = vpop.f32.mrf.mxu1 }
 0x522   :  { %v2240_v49 = vadd.f32 %v8073_v53, %v2239_v38  ;;  %v2557_v38 = vld [vmem:[%s10693_s15 + $0x10] sm:$0xf]  ;;  %s7908_s15 = sld [smem:[%s12413_s0 + %s9636_s12]]   ;;  %s9643_s12 = smov 24  }
 0x523   :  { %v8911_v19 = vpop.f32.mrf.mxu1 }
 0x524   :  { %v2255_v34 = vadd.f32 %v8911_v19, %v8073_v53  ;;  %v10748_v19 = vld [vmem:[%s10699_s19 + $0x38] sm:$0xff] }
 0x525   :  { %v2249_v60 = vpop.f32.mrf.mxu1  ;;  %v8925_v61 = vpop.f32.mrf.mxu0 }
 0x526   :  { %v2250_v2 = vadd.f32 %v8073_v53, %v2249_v60  ;;  %v2392_v4 = vadd.f32 %v8925_v61, %v2245_v43  ;;  %v10752_v60 = vld [vmem:[%s10699_s19 + $0x30] sm:$0xff]  ;;  %v10756_v61 = vld [vmem:[%s10699_s19 + $0x28] sm:$0xff] }
 0x527   :  { %v8914_v21 = vpop.f32.mrf.mxu1  ;;  %v2362_v36 = vpop.f32.mrf.mxu0 }
 0x528   :  { %v2265_v12 = vadd.f32 %v8914_v21, %v8073_v53  ;;  %v2391_v51 = vadd.f32 %v2362_v36, %v2240_v49  ;;  %v10761_v21 = vld [vmem:[%s10699_s19 + $0x20] sm:$0xff]  ;;  %v10765_v36 = vld [vmem:[%s10699_s19 + $0x18] sm:$0xff] }
 0x529   :  { %v2259_v25 = vpop.f32.mrf.mxu1  ;;  %v8928_v54 = vpop.f32.mrf.mxu0 }
 0x52a   :  { %v2260_v30 = vadd.f32 %v8073_v53, %v2259_v25  ;;  %v2394_v42 = vadd.f32 %v8928_v54, %v2255_v34  ;;  %v2652_v25 = vld [vmem:[%s10676_s7] sm:$0xff]  ;;  %v10773_v54 = vld [vmem:[%s10699_s19 + $0x10] sm:$0xff]  ;;  %s7906_s7 = sld [smem:[%s12413_s0 + %s9634_s4]]   ;;  %s9641_s4 = smov 19  }
 0x52b   :  { %v8942_v48 = vpop.f32.mrf.mxu1  ;;  %v2372_v50 = vpop.f32.mrf.mxu0  ;;  %2712 = vmatpush1.msra.mxu1 %v2652_v25 }
 0x52c   :  { %v2393_v9 = vadd.f32 %v2372_v50, %v2250_v2  ;;  %v2521_v5 = vadd.f32 %v8942_v48, %v2392_v4  ;;  %v10777_v48 = vld [vmem:[%s10699_s19 + $0x8] sm:$0xff]  ;;  %v10781_v50 = vld [vmem:[%s10699_s19] sm:$0xff]  ;;  %2938 = vmatprep.subr.mxu1 %v10709_v32 }
 0x52d   :  { %v2491_v7 = vpop.f32.mrf.mxu1  ;;  %v8931_v59 = vpop.f32.mrf.mxu0 }
 0x52e   :  { %v2396_v24 = vadd.f32 %v8931_v59, %v2265_v12  ;;  %v2520_v58 = vadd.f32 %v2491_v7, %v2391_v51  ;;  %v2533_v17 = vrot.slane %v2521_v5, 1  ;;  %v2662_v12 = vlaneseq }
 0x52f   :  { %v8945_v15 = vpop.f32.mrf.mxu1  ;;  %v2382_v44 = vpop.f32.mrf.mxu0 }
 0x530   :  { %v2523_v39 = vadd.f32 %v8945_v15, %v2394_v42  ;;  %v2395_v41 = vadd.f32 %v2382_v44, %v2260_v30  ;;  %v2532_v27 = vrot.slane %v2520_v58, 1  ;;  %v2660_v30 = vld [vmem:[%s7903_s23] sm:$0x3]  ;;  %s11974_s23 = sld [smem:[%s12413_s0 + %s9638_s20]]   ;;  %s9645_s20 = smov 21  }
 0x531   :  { %v2501_v33 = vpop.f32.mrf.mxu1 }
 0x532   :  { %v2522_v22 = vadd.f32 %v2501_v33, %v2393_v9  ;;  %v2537_v20 = vrot.slane %v2523_v39, 1  ;;  %v2534_v23 = vsel %vm449_vm3, %v2532_v27, %v2533_v17  ;;  %v10829_v33 = vshrl.u32 %v2662_v12, 7 }
 0x533   :  { %v8948_v26 = vpop.f32.mrf.mxu1  ;;  %v2549_v35 = vmax.f32 %v2520_v58, %v2534_v23 }
 0x534   :  { %v2525_v37 = vadd.f32 %v8948_v26, %v2396_v24  ;;  %v2535_v47 = vrot.slane %v2522_v22, 1  ;;  %v10832_v44 = vsub.s32 0, %v10829_v33  ;;  %v10835_v42 = vsub.s32 1, %v10829_v33 }
 0x535   :  { %v2511_v1 = vpop.f32.mrf.mxu1 }
 0x536   :  { %v2541_v52 = vrot.slane %v2525_v37, 1  ;;  %v2524_v55 = vadd.f32 %v2511_v1, %v2395_v41  ;;  %v2538_v18 = vsel %vm449_vm3, %v2535_v47, %v2537_v20  ;;  %v2536_v40 = vsel %vm449_vm3, %v2533_v17, %v2535_v47 }
 0x537   :  { %v2551_v6 = vmax.f32 %v2522_v22, %v2538_v18  ;;  %v2550_v63 = vmax.f32 %v2521_v5, %v2536_v40  ;;  %v2665_v9 = vrot.slane %v2660_v30, %v10832_v44  ;;  %v2669_v24 = vrot.slane %v2660_v30, %v10835_v42 }
 0x538   :  { %v2554_v16 = vmax.f32 %v2525_v37, %v2541_v52  ;;  %v2539_v29 = vrot.slane %v2524_v55, 1 }
 0x53a   :  { %v2540_v62 = vsel %vm449_vm3, %v2537_v20, %v2539_v29  ;;  %v2542_v45 = vsel %vm449_vm3, %v2539_v29, %v2541_v52  ;;  %8950 = vmatpush3.msk.msra.mxu0 %vm2568_vm8, %v2554_v16  ;;  %vm7886_vm3 = vcmask 66560  }
 0x53b   :  { %v2553_v57 = vmax.f32 %v2524_v55, %v2542_v45  ;;  %8951 = vmatprep.subr.mxu0 %v9616_v0  ;;  %v2552_v31 = vmax.f32 %v2523_v39, %v2540_v62 }
 0x53d   :  { %8952 = vmatpush3.msra.mxu0 %v2553_v57 }
 0x53e   :  { %8953 = vmatprep.subr.mxu0 %v9616_v0 }
 0x53f   :  { %8954 = vmatpush3.msra.mxu0 %v2552_v31 }
 0x540   :  { %8955 = vmatprep.subr.mxu0 %v9616_v0 }
 0x541   :  { %8956 = vmatpush3.msra.mxu0 %v2551_v6 }
 0x542   :  { %8957 = vmatprep.subr.mxu0 %v9616_v0 }
 0x543   :  { %8958 = vmatpush3.msra.mxu0 %v2550_v63 }
 0x544   :  { %8959 = vmatprep.subr.mxu0 %v9616_v0 }
 0x545   :  { %8960 = vmatpush3.msra.mxu0 %v2549_v35 }
 0x546   :  { %8962 = vmatmul.mubr.msk.f32.vlgmr.msra.gmra.mxu0 %vm2558_vm9, %v2555_v8  ;;  %2803 = vmatprep.subr.mxu0 %v10709_v32 }
 0x547   :  { %8964 = vmatprep.mubr.msk.f32.mxu0 %vm9618_vm0, %v9616_v0  ;;  %2804 = vmatpush1.msra.mxu0 %v10713_v10 }
 0x548   :  { %2805 = vmatprep.subr.mxu0 %v10716_v56 }
 0x549   :  { %2806 = vmatpush1.msra.mxu0 %v10721_v46 }
 0x54a   :  { %8965 = vmatmul.mubr.msk.f32.gmra.mxu0 %vm2558_vm9, %v2556_v13  ;;  %2807 = vmatprep.subr.mxu0 %v10728_v14 }
 0x54b   :  { %8967 = vmatprep.mubr.msk.f32.mxu0 %vm9618_vm0, %v9616_v0  ;;  %2808 = vmatpush1.msra.mxu0 %v10732_v11 }
 0x54c   :  { %2809 = vmatprep.subr.mxu0 %v10736_v3 }
 0x54d   :  { %2810 = vmatpush1.msra.mxu0 %v10741_v28 }
 0x54e   :  { %8968 = vmatmul.mubr.msk.f32.gmra.mxu0 %vm2558_vm9, %v2557_v38  ;;  %2811 = vmatprep.subr.mxu0 %v10748_v19 }
 0x54f   :  { %2812 = vmatpush1.msra.mxu0 %v10752_v60  ;;  %2851 = vmatprep.mubr.f32.mxu0 %v9616_v0 }
 0x550   :  { %2813 = vmatprep.subr.mxu0 %v10756_v61 }
 0x551   :  { %2814 = vmatpush1.msra.mxu0 %v10761_v21 }
 0x552   :  { %2815 = vmatprep.subr.mxu0 %v10765_v36 }
 0x553   :  { %2816 = vmatpush1.msra.mxu0 %v10773_v54 }
 0x554   :  { %2817 = vmatprep.subr.mxu0 %v10777_v48 }
 0x555   :  { %2818 = vmatpush1.msra.mxu0 %v10781_v50 }
 0x556   :  { %2852 = vmatmul.mubr.f32.vlgmr.msra.gmra.mxu0 %v9616_v0  ;;  %3087 = vmatprep.subr.mxu0 %v10709_v32 }
 0x557   :  { %3088 = vmatpush1.msra.mxu0 %v10713_v10  ;;  %3135 = vmatprep.mubr.f32.mxu0 %v9616_v0 }
 0x558   :  { %3089 = vmatprep.subr.mxu0 %v10716_v56 }
 0x559   :  { %3090 = vmatpush1.msra.mxu0 %v10721_v46 }
 0x55a   :  { %3091 = vmatprep.subr.mxu0 %v10728_v14 }
 0x55b   :  { %3092 = vmatpush1.msra.mxu0 %v10732_v11 }
 0x55c   :  { %3093 = vmatprep.subr.mxu0 %v10736_v3 }
 0x55d   :  { %3094 = vmatpush1.msra.mxu0 %v10741_v28 }
 0x55e   :  { %3095 = vmatprep.subr.mxu0 %v10748_v19 }
 0x55f   :  { %3096 = vmatpush1.msra.mxu0 %v10752_v60 }
 0x560   :  { %3097 = vmatprep.subr.mxu0 %v10756_v61 }
 0x561   :  { %3098 = vmatpush1.msra.mxu0 %v10761_v21 }
 0x562   :  { %3099 = vmatprep.subr.mxu0 %v10765_v36 }
 0x563   :  { %3100 = vmatpush1.msra.mxu0 %v10773_v54 }
 0x564   :  { %3101 = vmatprep.subr.mxu0 %v10777_v48 }
 0x565   :  { %3102 = vmatpush1.msra.mxu0 %v10781_v50 }
 0x566   :  { %3381 = vmatprep.subr.mxu0 %v10709_v32 }
 0x606   :  { %v2638_v7 = vpop.f32.mrf.mxu0 }
 0x607   :  { %8104 = vmatmul.mubr.msk.f32.vlgmr.msra.gmra.mxu1 %vm1417_vm6, %v2638_v7 }
 0x608   :  { %v8963_v59 = vpop.f32.mrf.mxu0  ;;  %2751 = vmatprep.mubr.f32.mxu1 %v9616_v0  ;;  %2939 = vmatpush1.msra.mxu1 %v10713_v10 }
 0x609   :  { %2940 = vmatprep.subr.mxu1 %v10716_v56 }
 0x60a   :  { %v2643_v53 = vpop.f32.mrf.mxu0  ;;  %2941 = vmatpush1.msra.mxu1 %v10721_v46 }
 0x60b   :  { %8105 = vmatmul.mubr.msk.f32.gmra.mxu1 %vm1417_vm6, %v2643_v53  ;;  %2942 = vmatprep.subr.mxu1 %v10728_v14 }
 0x60c   :  { %v8966_v15 = vpop.f32.mrf.mxu0  ;;  %2757 = vmatprep.mubr.f32.mxu1 %v9616_v0  ;;  %2943 = vmatpush1.msra.mxu1 %v10732_v11 }
 0x60d   :  { %2944 = vmatprep.subr.mxu1 %v10736_v3 }
 0x60e   :  { %v2648_v34 = vpop.f32.mrf.mxu0  ;;  %2945 = vmatpush1.msra.mxu1 %v10741_v28 }
 0x60f   :  { %8106 = vmatmul.mubr.msk.f32.gmra.mxu1 %vm1417_vm6, %v2648_v34  ;;  %2946 = vmatprep.subr.mxu1 %v10748_v19 }
 0x610   :  { %v8969_v2 = vpop.f32.mrf.mxu0  ;;  %2947 = vmatpush1.msra.mxu1 %v10752_v60  ;;  %2986 = vmatprep.mubr.f32.mxu1 %v9616_v0 }
 0x611   :  { %2948 = vmatprep.subr.mxu1 %v10756_v61 }
 0x612   :  { %2949 = vmatpush1.msra.mxu1 %v10761_v21 }
 0x613   :  { %2950 = vmatprep.subr.mxu1 %v10765_v36 }
 0x614   :  { %2951 = vmatpush1.msra.mxu1 %v10773_v54 }
 0x615   :  { %2952 = vmatprep.subr.mxu1 %v10777_v48 }
 0x616   :  { %2953 = vmatpush1.msra.mxu1 %v10781_v50  ;;  %v2853_v49 = vpop.f32.mrf.mxu0 }
 0x617   :  { %3235 = vmatprep.subr.mxu1 %v10709_v32 }
 0x618   :  { %v2855_v47 = vpop.f32.mrf.mxu0 }
 0x6c7   :  { %v2747_v43 = vpop.f32.mrf.mxu1 }
 0x6c8   :  { %v10839_v26 = vadd.f32 %v2747_v43, %v2665_v9 }
 0x6c9   :  { %v2749_v39 = vpop.f32.mrf.mxu1 }
 0x6ca   :  { %v10841_v22 = vadd.f32 %v2749_v39, %v2669_v24  ;;  %v2858_v41 = vadd.f32 %v2853_v49, %v10839_v26 }
 0x6cb   :  { %v2753_v37 = vpop.f32.mrf.mxu1 }
 0x6cc   :  { %9233 = vtanh.f32 %v2858_v41  ;;  %v10844_v4 = vadd.f32 %v2753_v37, %v2665_v9  ;;  %v2860_v45 = vsub.f32 0.0, %v2858_v41 }
 0x6cd   :  { %v2755_v51 = vpop.f32.mrf.mxu1 }
 0x6ce   :  { %v10846_v1 = vadd.f32 %v2755_v51, %v2669_v24  ;;  %v2861_v57 = vmul.f32 1.442695, %v2860_v45 }
 0x6cf   :  { %v2759_v52 = vpop.f32.mrf.mxu1 }
 0x6d0   :  { %v10848_v55 = vadd.f32 %v2759_v52, %v2665_v9 }
 0x6d1   :  { %v2761_v5 = vpop.f32.mrf.mxu1 }
 0x6d2   :  { %v10850_v58 = vadd.f32 %v2761_v5, %v2669_v24 }
 0x6d4   :  { %v2765_v20 = vrot.slane %v10850_v58, 2  ;;  %v2908_v5 = vrot.slane %v10850_v58, 6 }
 0x6d6   :  { %v2859_v16 = vadd.f32 %v2855_v47, %v2765_v20 }
 0x6d8   :  { %9235 = vtanh.f32 %v2859_v16  ;;  %v2867_v17 = vsub.f32 0.0, %v2859_v16 }
 0x6d9   :  { %v9234_v29 = vpop.eup %9233  ;;  %9237 = vpow2.f32 %v2861_v57 }
 0x6da   :  { %2876 = vrot.lane.b32.xlu0 %v9234_v29, %s9630_s24  ;;  %v2868_v27 = vmul.f32 1.442695, %v2867_v17 }
 0x6dc   :  { %9239 = vpow2.f32 %v2868_v27 }
 0x6e5   :  { %v9236_v62 = vpop.eup %9235 }
 0x6e6   :  { %2893 = vrot.lane.b32.xlu0 %v9236_v62, %s9630_s24  ;;  %v9238_v18 = vpop.eup %9237 }
 0x6e7   :  { %v2863_v31 = vadd.f32 1.0, %v9238_v18 }
 0x6e9   :  { %9241 = vrcp.f32 %v2863_v31  ;;  %v9240_v40 = vpop.eup %9239 }
 0x6ea   :  { %v2870_v6 = vadd.f32 1.0, %v9240_v40 }
 0x6ec   :  { %9243 = vrcp.f32 %v2870_v6 }
 0x6f6   :  { %v9242_v23 = vpop.eup %9241 }
 0x6f7   :  { %v2874_v25 = vmul.f32 0.0, %v9242_v23 }
 0x6f9   :  { %v9244_v8 = vpop.eup %9243 }
 0x6fa   :  { %v2891_v53 = vmul.f32 0.0, %v9244_v8 }
 0x74c   :  { %v2877_v63 = vpop.permute.xlu0 %2876 }
 0x74d   :  { %v2879_v35 = vmul.f32 %v9242_v23, %v2877_v63 }
 0x74f   :  { %2881 = vrot.lane.b32.xlu1 %v2879_v35, %s9631_s25 }
 0x758   :  { %v2894_v13 = vpop.permute.xlu0 %2893 }
 0x759   :  { %v2896_v38 = vmul.f32 %v9244_v8, %v2894_v13 }
 0x75b   :  { %2898 = vrot.lane.b32.xlu1 %v2896_v38, %s9631_s25 }
 0x7c1   :  { %v2882_v7 = vpop.permute.xlu1 %2881 }
 0x7c2   :  { %v10857_v59 = vadd.f32 %v2882_v7, %v2874_v25 }
 0x7c4   :  { %9245 = vtanh.f32 %v10857_v59  ;;  %v3016_v38 = vrot.slane %v10857_v59, 6 }
 0x7cd   :  { %v2899_v15 = vpop.permute.xlu1 %2898 }
 0x7ce   :  { %v10860_v34 = vadd.f32 %v2899_v15, %v2891_v53 }
 0x7d0   :  { %9247 = vtanh.f32 %v10860_v34  ;;  %v3036_v25 = vrot.slane %v10860_v34, 6 }
 0x7d1   :  { %v9246_v2 = vpop.eup %9245 }
 0x7d2   :  { %2887 = vrot.lane.b32.xlu0 %v9246_v2, %s9630_s24 }
 0x7dd   :  { %v9248_v12 = vpop.eup %9247 }
 0x7de   :  { %2904 = vrot.lane.b32.xlu1 %v9248_v12, %s9630_s24 }
 0x844   :  { %v2888_v30 = vpop.permute.xlu0 %2887 }
 0x845   :  { %v10865_v9 = vmul.f32 %v9242_v23, %v2888_v30 }
 0x847   :  { %2911 = vrot.lane.b32.xlu0 %v10865_v9, %s9631_s25 }
 0x850   :  { %v2905_v24 = vpop.permute.xlu1 %2904 }
 0x851   :  { %v10869_v43 = vmul.f32 %v9244_v8, %v2905_v24 }
 0x853   :  { %2915 = vrot.lane.b32.xlu1 %v10869_v43, %s9630_s24 }
 0x8b9   :  { %v2912_v49 = vpop.permute.xlu0 %2911 }
 0x8c5   :  { %v2916_v39 = vpop.permute.xlu1 %2915 }
 0x8c6   :  { %v2918_v41 = vsel %vm1417_vm6, %v2912_v49, %v2916_v39 }
 0x8c7   :  { %8107 = vmatmul.mubr.msk.f32.vlgmr.msra.gmra.mxu1 %vm2783_vm10, %v2918_v41 }
 0x8c8   :  { %3236 = vmatpush1.msra.mxu1 %v10713_v10  ;;  %3283 = vmatprep.mubr.f32.mxu1 %v9616_v0 }
 0x8c9   :  { %3237 = vmatprep.subr.mxu1 %v10716_v56 }
 0x8ca   :  { %3238 = vmatpush1.msra.mxu1 %v10721_v46 }
 0x8cb   :  { %3239 = vmatprep.subr.mxu1 %v10728_v14 }
 0x8cc   :  { %3240 = vmatpush1.msra.mxu1 %v10732_v11 }
 0x8cd   :  { %3241 = vmatprep.subr.mxu1 %v10736_v3 }
 0x8ce   :  { %3242 = vmatpush1.msra.mxu1 %v10741_v28 }
 0x8cf   :  { %3243 = vmatprep.subr.mxu1 %v10748_v19 }
 0x8d0   :  { %3244 = vmatpush1.msra.mxu1 %v10752_v60 }
 0x8d1   :  { %3245 = vmatprep.subr.mxu1 %v10756_v61 }
 0x8d2   :  { %3246 = vmatpush1.msra.mxu1 %v10761_v21 }
 0x8d3   :  { %3247 = vmatprep.subr.mxu1 %v10765_v36 }
 0x8d4   :  { %3248 = vmatpush1.msra.mxu1 %v10773_v54 }
 0x8d5   :  { %3249 = vmatprep.subr.mxu1 %v10777_v48 }
 0x8d6   :  { %3250 = vmatpush1.msra.mxu1 %v10781_v50 }
 0x8d7   :  { %3520 = vmatprep.subr.mxu1 %v10709_v32 }
 0x987   :  { %v2988_v37 = vpop.f32.mrf.mxu1 }
 0x988   :  { %v2995_v51 = vrot.slane %v2988_v37, 6  ;;  %v4247_v37 = vrot.slane %v10869_v43, 6 }
 0x989   :  { %v2990_v52 = vpop.f32.mrf.mxu1 }
 0x98a   :  { %v2999_v20 = vadd.f32 %v2995_v51, %v10839_v26  ;;  %v2996_v47 = vrot.slane %v2990_v52, 6 }
 0x98c   :  { %9249 = vtanh.f32 %v2999_v20  ;;  %v3000_v16 = vadd.f32 %v2996_v47, %v2908_v5  ;;  %v3001_v45 = vsub.f32 0.0, %v2999_v20 }
 0x98e   :  { %9251 = vtanh.f32 %v3000_v16  ;;  %v3008_v57 = vsub.f32 0.0, %v3000_v16  ;;  %v3002_v17 = vmul.f32 1.442695, %v3001_v45  ;;  %v3056_v45 = vrot.slane %v10846_v1, 2 }
 0x990   :  { %v3009_v27 = vmul.f32 1.442695, %v3008_v57  ;;  %9253 = vpow2.f32 %v3002_v17 }
 0x992   :  { %9255 = vpow2.f32 %v3009_v27 }
 0x999   :  { %v9250_v29 = vpop.eup %9249 }
 0x99a   :  { %3020 = vrot.lane.b32.xlu0 %v9250_v29, %s9630_s24 }
 0x99b   :  { %v9252_v62 = vpop.eup %9251 }
 0x99c   :  { %3040 = vrot.lane.b32.xlu1 %v9252_v62, %s9630_s24 }
 0x99d   :  { %v9254_v18 = vpop.eup %9253 }
 0x99e   :  { %v3004_v31 = vadd.f32 1.0, %v9254_v18 }
 0x99f   :  { %v9256_v58 = vpop.eup %9255 }
 0x9a0   :  { %v3011_v40 = vadd.f32 1.0, %v9256_v58  ;;  %9257 = vrcp.f32 %v3004_v31 }
 0x9a2   :  { %9259 = vrcp.f32 %v3011_v40 }
 0x9ad   :  { %v9258_v6 = vpop.eup %9257 }
 0x9ae   :  { %v3018_v7 = vmul.f32 %v9258_v6, %v3016_v38 }
 0x9af   :  { %v9260_v35 = vpop.eup %9259 }
 0x9b0   :  { %v3038_v2 = vmul.f32 %v9260_v35, %v3036_v25 }
 0xa0c   :  { %v3021_v23 = vpop.permute.xlu0 %3020 }
 0xa0d   :  { %v3023_v63 = vmul.f32 %v9258_v6, %v3021_v23 }
 0xa0e   :  { %v3041_v8 = vpop.permute.xlu1 %3040 }
 0xa0f   :  { %v3043_v13 = vmul.f32 %v9260_v35, %v3041_v8  ;;  %3025 = vrot.lane.b32.xlu0 %v3023_v63, %s9631_s25 }
 0xa11   :  { %3045 = vrot.lane.b32.xlu1 %v3043_v13, %s9631_s25 }
 0xa81   :  { %v3026_v53 = vpop.permute.xlu0 %3025 }
 0xa82   :  { %v10900_v15 = vadd.f32 %v3026_v53, %v3018_v7 }
 0xa83   :  { %v3046_v12 = vpop.permute.xlu1 %3045 }
 0xa84   :  { %9261 = vtanh.f32 %v10900_v15  ;;  %v10903_v30 = vadd.f32 %v3046_v12, %v3038_v2 }
 0xa86   :  { %9263 = vtanh.f32 %v10903_v30 }
 0xa91   :  { %v9262_v24 = vpop.eup %9261 }
 0xa92   :  { %3031 = vrot.lane.b32.xlu0 %v9262_v24, %s9630_s24  ;;  %v3165_v24 = vrot.slane %v10900_v15, 6 }
 0xa93   :  { %v9264_v49 = vpop.eup %9263 }
 0xa94   :  { %3051 = vrot.lane.b32.xlu1 %v9264_v49, %s9630_s24  ;;  %v3185_v49 = vrot.slane %v10903_v30, 6 }
 0xb04   :  { %v3032_v59 = vpop.permute.xlu0 %3031 }
 0xb05   :  { %v10908_v34 = vmul.f32 %v9258_v6, %v3032_v59 }
 0xb06   :  { %v3052_v39 = vpop.permute.xlu1 %3051 }
 0xb07   :  { %v3054_v41 = vmul.f32 %v9260_v35, %v3052_v39  ;;  %3059 = vrot.lane.b32.xlu0 %v10908_v34, %s9631_s25 }
 0xb09   :  { %v4245_v51 = vrot.slane %v3054_v41, 2  ;;  %3063 = vrot.lane.b32.xlu1 %v3054_v41, %s9630_s24 }
 0xb0b   :  { %v10915_v52 = vsel %vm4219_vm11, %v4245_v51, %v4247_v37 }
 0xb79   :  { %v3060_v5 = vpop.permute.xlu0 %3059 }
 0xb7b   :  { %v3064_v20 = vpop.permute.xlu1 %3063 }
 0xb7c   :  { %v3066_v47 = vsel %vm1417_vm6, %v3060_v5, %v3064_v20 }
 0xb7d   :  { %v3068_v16 = vrot.slane %v3066_v47, 2 }
 0xb7f   :  { %8108 = vmatmul.mubr.msk.f32.vlgmr.msra.gmra.mxu0 %vm2783_vm10, %v3068_v16 }
 0xb80   :  { %3382 = vmatpush1.msra.mxu0 %v10713_v10  ;;  %3429 = vmatprep.mubr.f32.mxu0 %v9616_v0 }
 0xb81   :  { %3383 = vmatprep.subr.mxu0 %v10716_v56 }
 0xb82   :  { %3384 = vmatpush1.msra.mxu0 %v10721_v46 }
 0xb83   :  { %3385 = vmatprep.subr.mxu0 %v10728_v14 }
 0xb84   :  { %3386 = vmatpush1.msra.mxu0 %v10732_v11 }
 0xb85   :  { %3387 = vmatprep.subr.mxu0 %v10736_v3 }
 0xb86   :  { %3388 = vmatpush1.msra.mxu0 %v10741_v28 }
 0xb87   :  { %3389 = vmatprep.subr.mxu0 %v10748_v19 }
 0xb88   :  { %3390 = vmatpush1.msra.mxu0 %v10752_v60 }
 0xb89   :  { %3391 = vmatprep.subr.mxu0 %v10756_v61 }
 0xb8a   :  { %3392 = vmatpush1.msra.mxu0 %v10761_v21 }
 0xb8b   :  { %3393 = vmatprep.subr.mxu0 %v10765_v36 }
 0xb8c   :  { %3394 = vmatpush1.msra.mxu0 %v10773_v54 }
 0xb8d   :  { %3395 = vmatprep.subr.mxu0 %v10777_v48 }
 0xb8e   :  { %3396 = vmatpush1.msra.mxu0 %v10781_v50 }
 0xb8f   :  { %3669 = vmatprep.subr.mxu0 %v10709_v32 }
 0xc3f   :  { %v3137_v43 = vpop.f32.mrf.mxu0 }
 0xc40   :  { %v3144_v29 = vrot.slane %v3137_v43, 4  ;;  %v4220_v43 = vsel %vm4219_vm11, %v10865_v9, %v10908_v34 }
 0xc41   :  { %v3139_v62 = vpop.f32.mrf.mxu0 }
 0xc42   :  { %v3148_v57 = vadd.f32 %v3144_v29, %v10839_v26  ;;  %v3145_v17 = vrot.slane %v3139_v62, 4 }
 0xc44   :  { %9265 = vtanh.f32 %v3148_v57  ;;  %v3149_v27 = vadd.f32 %v3145_v17, %v3056_v45  ;;  %v3150_v31 = vsub.f32 0.0, %v3148_v57 }
 0xc46   :  { %9267 = vtanh.f32 %v3149_v27  ;;  %v3157_v40 = vsub.f32 0.0, %v3149_v27  ;;  %v3151_v6 = vmul.f32 1.442695, %v3150_v31  ;;  %v3204_v31 = vrot.slane %v10846_v1, 6 }
 0xc48   :  { %v3158_v23 = vmul.f32 1.442695, %v3157_v40  ;;  %9269 = vpow2.f32 %v3151_v6 }
 0xc4a   :  { %9271 = vpow2.f32 %v3158_v23 }
 0xc51   :  { %v9266_v18 = vpop.eup %9265 }
 0xc52   :  { %3169 = vrot.lane.b32.xlu0 %v9266_v18, %s9630_s24 }
 0xc53   :  { %v9268_v58 = vpop.eup %9267 }
 0xc54   :  { %3189 = vrot.lane.b32.xlu1 %v9268_v58, %s9630_s24 }
 0xc55   :  { %v9270_v63 = vpop.eup %9269 }
 0xc56   :  { %v3153_v8 = vadd.f32 1.0, %v9270_v63 }
 0xc57   :  { %v9272_v35 = vpop.eup %9271 }
 0xc58   :  { %v3160_v13 = vadd.f32 1.0, %v9272_v35  ;;  %9273 = vrcp.f32 %v3153_v8 }
 0xc5a   :  { %9275 = vrcp.f32 %v3160_v13 }
 0xc65   :  { %v9274_v38 = vpop.eup %9273 }
 0xc66   :  { %v3167_v59 = vmul.f32 %v9274_v38, %v3165_v24 }
 0xc67   :  { %v9276_v53 = vpop.eup %9275 }
 0xc68   :  { %v3187_v37 = vmul.f32 %v9276_v53, %v3185_v49 }
 0xcc4   :  { %v3170_v25 = vpop.permute.xlu0 %3169 }
 0xcc5   :  { %v3172_v7 = vmul.f32 %v9274_v38, %v3170_v25 }
 0xcc6   :  { %v3190_v2 = vpop.permute.xlu1 %3189 }
 0xcc7   :  { %v3192_v12 = vmul.f32 %v9276_v53, %v3190_v2  ;;  %3174 = vrot.lane.b32.xlu0 %v3172_v7, %s9631_s25 }
 0xcc9   :  { %3194 = vrot.lane.b32.xlu1 %v3192_v12, %s9631_s25 }
 0xd39   :  { %v3175_v39 = vpop.permute.xlu0 %3174 }
 0xd3a   :  { %v10946_v41 = vadd.f32 %v3175_v39, %v3167_v59 }
 0xd3b   :  { %v3195_v51 = vpop.permute.xlu1 %3194 }
 0xd3c   :  { %9277 = vtanh.f32 %v10946_v41  ;;  %v10949_v5 = vadd.f32 %v3195_v51, %v3187_v37  ;;  %v3313_v51 = vrot.slane %v10946_v41, 6 }
 0xd3e   :  { %9279 = vtanh.f32 %v10949_v5 }
 0xd49   :  { %v9278_v20 = vpop.eup %9277 }
 0xd4a   :  { %3180 = vrot.lane.b32.xlu0 %v9278_v20, %s9630_s24  ;;  %v3333_v20 = vrot.slane %v10949_v5, 6 }
 0xd4b   :  { %v9280_v47 = vpop.eup %9279 }
 0xd4c   :  { %3200 = vrot.lane.b32.xlu1 %v9280_v47, %s9630_s24 }
 0xdbc   :  { %v3181_v15 = vpop.permute.xlu0 %3180 }
 0xdbd   :  { %v3183_v30 = vmul.f32 %v9274_v38, %v3181_v15 }
 0xdbe   :  { %v3201_v16 = vpop.permute.xlu1 %3200 }
 0xdbf   :  { %v10957_v29 = vmul.f32 %v9276_v53, %v3201_v16  ;;  %3207 = vrot.lane.b32.xlu0 %v3183_v30, %s9631_s25  ;;  %v10961_v62 = vsel %vm4221_vm12, %v4220_v43, %v3183_v30 }
 0xdc1   :  { %3211 = vrot.lane.b32.xlu1 %v10957_v29, %s9630_s24 }
 0xe31   :  { %v3208_v57 = vpop.permute.xlu0 %3207 }
 0xe33   :  { %v3212_v17 = vpop.permute.xlu1 %3211 }
 0xe34   :  { %v3214_v27 = vsel %vm1417_vm6, %v3208_v57, %v3212_v17 }
 0xe35   :  { %v3216_v18 = vrot.slane %v3214_v27, 4 }
 0xe37   :  { %8109 = vmatmul.mubr.msk.f32.vlgmr.msra.gmra.mxu1 %vm2783_vm10, %v3216_v18 }
 0xe38   :  { %3521 = vmatpush1.msra.mxu1 %v10713_v10  ;;  %3568 = vmatprep.mubr.f32.mxu1 %v9616_v0 }
 0xe39   :  { %3522 = vmatprep.subr.mxu1 %v10716_v56 }
 0xe3a   :  { %3523 = vmatpush1.msra.mxu1 %v10721_v46 }
 0xe3b   :  { %3524 = vmatprep.subr.mxu1 %v10728_v14 }
 0xe3c   :  { %3525 = vmatpush1.msra.mxu1 %v10732_v11 }
 0xe3d   :  { %3526 = vmatprep.subr.mxu1 %v10736_v3 }
 0xe3e   :  { %3527 = vmatpush1.msra.mxu1 %v10741_v28 }
 0xe3f   :  { %3528 = vmatprep.subr.mxu1 %v10748_v19 }
 0xe40   :  { %3529 = vmatpush1.msra.mxu1 %v10752_v60 }
 0xe41   :  { %3530 = vmatprep.subr.mxu1 %v10756_v61 }
 0xe42   :  { %3531 = vmatpush1.msra.mxu1 %v10761_v21 }
 0xe43   :  { %3532 = vmatprep.subr.mxu1 %v10765_v36 }
 0xe44   :  { %3533 = vmatpush1.msra.mxu1 %v10773_v54 }
 0xe45   :  { %3534 = vmatprep.subr.mxu1 %v10777_v48 }
 0xe46   :  { %3535 = vmatpush1.msra.mxu1 %v10781_v50 }
 0xe47   :  { %3817 = vmatprep.subr.mxu1 %v10709_v32 }
 0xef7   :  { %v3285_v9 = vpop.f32.mrf.mxu1 }
 0xef8   :  { %v3292_v34 = vrot.slane %v3285_v9, 2 }
 0xef9   :  { %v3287_v58 = vpop.f32.mrf.mxu1 }
 0xefa   :  { %v3296_v40 = vadd.f32 %v3292_v34, %v10839_v26  ;;  %v3293_v6 = vrot.slane %v3287_v58, 2 }
 0xefc   :  { %9281 = vtanh.f32 %v3296_v40  ;;  %v3297_v23 = vadd.f32 %v3293_v6, %v3204_v31  ;;  %v3298_v8 = vsub.f32 0.0, %v3296_v40 }
 0xefe   :  { %9283 = vtanh.f32 %v3297_v23  ;;  %v3305_v13 = vsub.f32 0.0, %v3297_v23  ;;  %v3299_v38 = vmul.f32 1.442695, %v3298_v8 }
 0xf00   :  { %v3306_v25 = vmul.f32 1.442695, %v3305_v13  ;;  %9285 = vpow2.f32 %v3299_v38 }
 0xf02   :  { %9287 = vpow2.f32 %v3306_v25 }
 0xf09   :  { %v9282_v63 = vpop.eup %9281 }
 0xf0a   :  { %3317 = vrot.lane.b32.xlu0 %v9282_v63, %s9630_s24 }
 0xf0b   :  { %v9284_v35 = vpop.eup %9283 }
 0xf0c   :  { %3337 = vrot.lane.b32.xlu1 %v9284_v35, %s9630_s24 }
 0xf0d   :  { %v9286_v7 = vpop.eup %9285 }
 0xf0e   :  { %v3301_v53 = vadd.f32 1.0, %v9286_v7 }
 0xf0f   :  { %v9288_v26 = vpop.eup %9287 }
 0xf10   :  { %v3308_v2 = vadd.f32 1.0, %v9288_v26  ;;  %9289 = vrcp.f32 %v3301_v53 }
 0xf12   :  { %9291 = vrcp.f32 %v3308_v2 }
 0xf1d   :  { %v9290_v12 = vpop.eup %9289 }
 0xf1e   :  { %v3315_v47 = vmul.f32 %v9290_v12, %v3313_v51 }
 0xf1f   :  { %v9292_v59 = vpop.eup %9291 }
 0xf20   :  { %v3335_v16 = vmul.f32 %v9292_v59, %v3333_v20 }
 0xf7c   :  { %v3318_v24 = vpop.permute.xlu0 %3317 }
 0xf7d   :  { %v3320_v49 = vmul.f32 %v9290_v12, %v3318_v24 }
 0xf7e   :  { %v3338_v39 = vpop.permute.xlu1 %3337 }
 0xf7f   :  { %v3340_v37 = vmul.f32 %v9292_v59, %v3338_v39  ;;  %3322 = vrot.lane.b32.xlu0 %v3320_v49, %s9631_s25 }
 0xf81   :  { %3342 = vrot.lane.b32.xlu1 %v3340_v37, %s9631_s25 }
 0xff1   :  { %v3323_v15 = vpop.permute.xlu0 %3322 }
 0xff2   :  { %v10994_v30 = vadd.f32 %v3323_v15, %v3315_v47 }
 0xff3   :  { %v3343_v43 = vpop.permute.xlu1 %3342 }
 0xff4   :  { %9293 = vtanh.f32 %v10994_v30  ;;  %v10997_v57 = vadd.f32 %v3343_v43, %v3335_v16  ;;  %v3453_v47 = vrot.slane %v10994_v30, 6 }
 0xff6   :  { %9295 = vtanh.f32 %v10997_v57  ;;  %v3473_v15 = vrot.slane %v10997_v57, 6 }
0x1001   :  { %v9294_v17 = vpop.eup %9293 }
0x1002   :  { %3328 = vrot.lane.b32.xlu0 %v9294_v17, %s9630_s24 }
0x1003   :  { %v9296_v27 = vpop.eup %9295 }
0x1004   :  { %3348 = vrot.lane.b32.xlu1 %v9296_v27, %s9630_s24 }
0x1074   :  { %v3329_v41 = vpop.permute.xlu0 %3328 }
0x1075   :  { %v3331_v5 = vmul.f32 %v9290_v12, %v3329_v41 }
0x1076   :  { %v3349_v18 = vpop.permute.xlu1 %3348 }
0x1077   :  { %v11002_v9 = vmul.f32 %v9292_v59, %v3349_v18  ;;  %3353 = vrot.lane.b32.xlu0 %v3331_v5, %s9631_s25  ;;  %v11007_v34 = vsel %vm767_vm2, %v10961_v62, %v3331_v5 }
0x1079   :  { %3357 = vrot.lane.b32.xlu1 %v11002_v9, %s9630_s24 }
0x10e9   :  { %v3354_v58 = vpop.permute.xlu0 %3353 }
0x10eb   :  { %v3358_v40 = vpop.permute.xlu1 %3357 }
0x10ec   :  { %v3360_v6 = vsel %vm1417_vm6, %v3354_v58, %v3358_v40 }
0x10ed   :  { %v3362_v23 = vrot.slane %v3360_v6, 6 }
0x10ef   :  { %8110 = vmatmul.mubr.msk.f32.vlgmr.msra.gmra.mxu0 %vm2783_vm10, %v3362_v23 }
0x10f0   :  { %3670 = vmatpush1.msra.mxu0 %v10713_v10  ;;  %3717 = vmatprep.mubr.f32.mxu0 %v9616_v0 }
0x10f1   :  { %3671 = vmatprep.subr.mxu0 %v10716_v56 }
0x10f2   :  { %3672 = vmatpush1.msra.mxu0 %v10721_v46 }
0x10f3   :  { %3673 = vmatprep.subr.mxu0 %v10728_v14 }
0x10f4   :  { %3674 = vmatpush1.msra.mxu0 %v10732_v11 }
0x10f5   :  { %3675 = vmatprep.subr.mxu0 %v10736_v3 }
0x10f6   :  { %3676 = vmatpush1.msra.mxu0 %v10741_v28 }
0x10f7   :  { %3677 = vmatprep.subr.mxu0 %v10748_v19 }
0x10f8   :  { %3678 = vmatpush1.msra.mxu0 %v10752_v60 }
0x10f9   :  { %3679 = vmatprep.subr.mxu0 %v10756_v61 }
0x10fa   :  { %3680 = vmatpush1.msra.mxu0 %v10761_v21 }
0x10fb   :  { %3681 = vmatprep.subr.mxu0 %v10765_v36 }
0x10fc   :  { %3682 = vmatpush1.msra.mxu0 %v10773_v54 }
0x10fd   :  { %3683 = vmatprep.subr.mxu0 %v10777_v48 }
0x10fe   :  { %3684 = vmatpush1.msra.mxu0 %v10781_v50 }
0x10ff   :  { %3963 = vmatprep.subr.mxu0 %v10709_v32 }
0x11af   :  { %v3431_v62 = vpop.f32.mrf.mxu0 }
0x11b0   :  { %v3436_v63 = vadd.f32 %v3431_v62, %v10844_v4 }
0x11b1   :  { %v3433_v35 = vpop.f32.mrf.mxu0 }
0x11b2   :  { %9297 = vtanh.f32 %v3436_v63  ;;  %v3437_v8 = vadd.f32 %v3433_v35, %v3056_v45  ;;  %v3438_v25 = vsub.f32 0.0, %v3436_v63 }
0x11b4   :  { %9299 = vtanh.f32 %v3437_v8  ;;  %v3445_v7 = vsub.f32 0.0, %v3437_v8  ;;  %v3439_v26 = vmul.f32 1.442695, %v3438_v25 }
0x11b6   :  { %v3446_v53 = vmul.f32 1.442695, %v3445_v7  ;;  %9301 = vpow2.f32 %v3439_v26 }
0x11b8   :  { %9303 = vpow2.f32 %v3446_v53 }
0x11bf   :  { %v9298_v13 = vpop.eup %9297 }
0x11c0   :  { %3457 = vrot.lane.b32.xlu0 %v9298_v13, %s9630_s24 }
0x11c1   :  { %v9300_v38 = vpop.eup %9299 }
0x11c2   :  { %3477 = vrot.lane.b32.xlu1 %v9300_v38, %s9630_s24 }
0x11c3   :  { %v9302_v2 = vpop.eup %9301 }
0x11c4   :  { %v3441_v24 = vadd.f32 1.0, %v9302_v2 }
0x11c5   :  { %v9304_v12 = vpop.eup %9303 }
0x11c6   :  { %v3448_v49 = vadd.f32 1.0, %v9304_v12  ;;  %9305 = vrcp.f32 %v3441_v24 }
0x11c8   :  { %9307 = vrcp.f32 %v3448_v49 }
0x11d3   :  { %v9306_v45 = vpop.eup %9305 }
0x11d4   :  { %v3455_v16 = vmul.f32 %v9306_v45, %v3453_v47 }
0x11d5   :  { %v9308_v37 = vpop.eup %9307 }
0x11d6   :  { %v3475_v27 = vmul.f32 %v9308_v37, %v3473_v15 }
0x1232   :  { %v3458_v59 = vpop.permute.xlu0 %3457 }
0x1233   :  { %v3460_v39 = vmul.f32 %v9306_v45, %v3458_v59 }
0x1234   :  { %v3478_v51 = vpop.permute.xlu1 %3477 }
0x1235   :  { %v3480_v20 = vmul.f32 %v9308_v37, %v3478_v51  ;;  %3462 = vrot.lane.b32.xlu0 %v3460_v39, %s9631_s25 }
0x1237   :  { %3482 = vrot.lane.b32.xlu1 %v3480_v20, %s9631_s25 }
0x12a7   :  { %v3463_v43 = vpop.permute.xlu0 %3462 }
0x12a8   :  { %v11039_v17 = vadd.f32 %v3463_v43, %v3455_v16  ;;  %v4241_v16 = vrot.slane %v11002_v9, 2  ;;  %v4243_v43 = vrot.slane %v10957_v29, 6  ;;  %v11107_v29 = vld [vmem:[%s10699_s19 + $0x70] sm:$0xff]  ;;  %v11112_v9 = vld [vmem:[%s10699_s19 + $0x68] sm:$0xff] }
0x12a9   :  { %v3483_v41 = vpop.permute.xlu1 %3482 }
0x12aa   :  { %9309 = vtanh.f32 %v11039_v17  ;;  %v11042_v5 = vadd.f32 %v3483_v41, %v3475_v27  ;;  %v3598_v25 = vrot.slane %v11039_v17, 6 }
0x12ac   :  { %9311 = vtanh.f32 %v11042_v5  ;;  %v3618_v7 = vrot.slane %v11042_v5, 6 }
0x12b7   :  { %v9310_v18 = vpop.eup %9309 }
0x12b8   :  { %3468 = vrot.lane.b32.xlu0 %v9310_v18, %s9630_s24 }
0x12b9   :  { %v9312_v58 = vpop.eup %9311 }
0x12ba   :  { %3488 = vrot.lane.b32.xlu1 %v9312_v58, %s9630_s24 }
0x132a   :  { %v3469_v30 = vpop.permute.xlu0 %3468 }
0x132b   :  { %v11047_v57 = vmul.f32 %v9306_v45, %v3469_v30 }
0x132c   :  { %v3489_v40 = vpop.permute.xlu1 %3488 }
0x132d   :  { %v11049_v6 = vmul.f32 %v9308_v37, %v3489_v40  ;;  %3493 = vrot.lane.b32.xlu0 %v11047_v57, %s9631_s25  ;;  %v11116_v40 = vld [vmem:[%s10699_s19 + $0x60] sm:$0xff] }
0x132f   :  { %3497 = vrot.lane.b32.xlu1 %v11049_v6, %s9630_s24  ;;  %v4239_v47 = vrot.slane %v11049_v6, 6  ;;  %v11120_v6 = vld [vmem:[%s10699_s19 + $0x58] sm:$0xff] }
0x139f   :  { %v3494_v23 = vpop.permute.xlu0 %3493 }
0x13a1   :  { %v3498_v62 = vpop.permute.xlu1 %3497 }
0x13a2   :  { %v3500_v63 = vsel %vm1417_vm6, %v3494_v23, %v3498_v62  ;;  %v11124_v23 = vld [vmem:[%s10699_s19 + $0x50] sm:$0xff]  ;;  %v11128_v62 = vld [vmem:[%s10699_s19 + $0x48] sm:$0xff] }
0x13a3   :  { %8111 = vmatmul.mubr.msk.f32.vlgmr.msra.gmra.mxu1 %vm2783_vm10, %v3500_v63  ;;  %v11132_v63 = vld [vmem:[%s10699_s19 + $0x40] sm:$0xff] }
0x13a4   :  { %3818 = vmatpush1.msra.mxu1 %v10713_v10  ;;  %3865 = vmatprep.mubr.f32.mxu1 %v9616_v0 }
0x13a5   :  { %3819 = vmatprep.subr.mxu1 %v10716_v56 }
0x13a6   :  { %3820 = vmatpush1.msra.mxu1 %v10721_v46 }
0x13a7   :  { %3821 = vmatprep.subr.mxu1 %v10728_v14 }
0x13a8   :  { %3822 = vmatpush1.msra.mxu1 %v10732_v11 }
0x13a9   :  { %3823 = vmatprep.subr.mxu1 %v10736_v3 }
0x13aa   :  { %3824 = vmatpush1.msra.mxu1 %v10741_v28 }
0x13ab   :  { %3825 = vmatprep.subr.mxu1 %v10748_v19 }
0x13ac   :  { %3826 = vmatpush1.msra.mxu1 %v10752_v60 }
0x13ad   :  { %3827 = vmatprep.subr.mxu1 %v10756_v61 }
0x13ae   :  { %3828 = vmatpush1.msra.mxu1 %v10761_v21 }
0x13af   :  { %3829 = vmatprep.subr.mxu1 %v10765_v36 }
0x13b0   :  { %3830 = vmatpush1.msra.mxu1 %v10773_v54 }
0x13b1   :  { %3831 = vmatprep.subr.mxu1 %v10777_v48 }
0x13b2   :  { %3832 = vmatpush1.msra.mxu1 %v10781_v50 }
0x13b3   :  { %4102 = vmatprep.subr.mxu1 %v10709_v32 }
0x1463   :  { %v3570_v10 = vpop.f32.mrf.mxu1 }
0x1464   :  { %v3577_v56 = vrot.slane %v3570_v10, 6  ;;  %v11136_v10 = vld [vmem:[%s10699_s19 + $0x38] sm:$0xff] }
0x1465   :  { %v3572_v46 = vpop.f32.mrf.mxu1 }
0x1466   :  { %v3581_v14 = vadd.f32 %v3577_v56, %v10844_v4  ;;  %v3578_v11 = vrot.slane %v3572_v46, 6  ;;  %v11140_v56 = vld [vmem:[%s10699_s19 + $0x30] sm:$0xff]  ;;  %v11144_v46 = vld [vmem:[%s10699_s19 + $0x28] sm:$0xff] }
0x1468   :  { %9313 = vtanh.f32 %v3581_v14  ;;  %v3582_v3 = vadd.f32 %v3578_v11, %v3204_v31  ;;  %v3583_v60 = vsub.f32 0.0, %v3581_v14  ;;  %v11148_v14 = vld [vmem:[%s10699_s19 + $0x20] sm:$0xff]  ;;  %v11152_v11 = vld [vmem:[%s10699_s19 + $0x18] sm:$0xff] }
0x146a   :  { %9315 = vtanh.f32 %v3582_v3  ;;  %v3590_v61 = vsub.f32 0.0, %v3582_v3  ;;  %v3584_v32 = vmul.f32 1.442695, %v3583_v60  ;;  %v11156_v3 = vld [vmem:[%s10699_s19 + $0x10] sm:$0xff] }
0x146c   :  { %v3591_v21 = vmul.f32 1.442695, %v3590_v61  ;;  %9317 = vpow2.f32 %v3584_v32 }
0x146e   :  { %9319 = vpow2.f32 %v3591_v21  ;;  %v3638_v21 = vrot.slane %v10841_v22, 2 }
0x1475   :  { %v9314_v28 = vpop.eup %9313 }
0x1476   :  { %3602 = vrot.lane.b32.xlu0 %v9314_v28, %s9630_s24  ;;  %v11160_v28 = vld [vmem:[%s10699_s19 + $0x8] sm:$0xff] }
0x1477   :  { %v9316_v19 = vpop.eup %9315 }
0x1478   :  { %3622 = vrot.lane.b32.xlu1 %v9316_v19, %s9630_s24  ;;  %v11164_v19 = vld [vmem:[%s10699_s19] sm:$0xff]  ;;  %s11935_s19 = sld [smem:[%s12413_s0 + %s9637_s16]]   ;;  %s9644_s16 = smov 20  }
0x1479   :  { %v9318_v36 = vpop.eup %9317 }
0x147a   :  { %v3586_v48 = vadd.f32 1.0, %v9318_v36 }
0x147b   :  { %v9320_v54 = vpop.eup %9319 }
0x147c   :  { %v3593_v50 = vadd.f32 1.0, %v9320_v54  ;;  %9321 = vrcp.f32 %v3586_v48 }
0x147e   :  { %9323 = vrcp.f32 %v3593_v50 }
0x1489   :  { %v9322_v1 = vpop.eup %9321 }
0x148a   :  { %v3600_v26 = vmul.f32 %v9322_v1, %v3598_v25 }
0x148b   :  { %v9324_v8 = vpop.eup %9323 }
0x148c   :  { %v3620_v12 = vmul.f32 %v9324_v8, %v3618_v7 }
0x14e8   :  { %v3603_v31 = vpop.permute.xlu0 %3602 }
0x14e9   :  { %v3605_v35 = vmul.f32 %v9322_v1, %v3603_v31 }
0x14ea   :  { %v3623_v13 = vpop.permute.xlu1 %3622 }
0x14eb   :  { %v3625_v38 = vmul.f32 %v9324_v8, %v3623_v13  ;;  %3607 = vrot.lane.b32.xlu0 %v3605_v35, %s9631_s25 }
0x14ed   :  { %3627 = vrot.lane.b32.xlu1 %v3625_v38, %s9631_s25 }
0x155d   :  { %v3608_v53 = vpop.permute.xlu0 %3607 }
0x155e   :  { %v11083_v2 = vadd.f32 %v3608_v53, %v3600_v26 }
0x155f   :  { %v3628_v24 = vpop.permute.xlu1 %3627 }
0x1560   :  { %9325 = vtanh.f32 %v11083_v2  ;;  %v11086_v49 = vadd.f32 %v3628_v24, %v3620_v12 }
0x1562   :  { %9327 = vtanh.f32 %v11086_v49 }
0x156d   :  { %v9326_v45 = vpop.eup %9325 }
0x156e   :  { %3613 = vrot.lane.b32.xlu0 %v9326_v45, %s9630_s24 }
0x156f   :  { %v9328_v59 = vpop.eup %9327 }
0x1570   :  { %3633 = vrot.lane.b32.xlu1 %v9328_v59, %s9630_s24 }
0x15e0   :  { %v3614_v39 = vpop.permute.xlu0 %3613 }
0x15e1   :  { %v11091_v37 = vmul.f32 %v9322_v1, %v3614_v39 }
0x15e2   :  { %v3634_v51 = vpop.permute.xlu1 %3633 }
0x15e3   :  { %v3636_v20 = vmul.f32 %v9324_v8, %v3634_v51  ;;  %3641 = vrot.lane.b32.xlu0 %v11091_v37, %s9631_s25  ;;  %v3747_v51 = vrot.slane %v11083_v2, 6 }
0x15e5   :  { %v4237_v15 = vrot.slane %v3636_v20, 2  ;;  %3645 = vrot.lane.b32.xlu1 %v3636_v20, %s9630_s24  ;;  %v3767_v20 = vrot.slane %v11086_v49, 6 }
0x15e7   :  { %v4252_v17 = vsel %vm4219_vm11, %v4237_v15, %v4239_v47 }
0x15e8   :  { %v4253_v27 = vsel %vm4221_vm12, %v4252_v17, %v4241_v16 }
0x15e9   :  { %v11102_v41 = vsel %vm767_vm2, %v4253_v27, %v4243_v43 }
0x1655   :  { %v3642_v5 = vpop.permute.xlu0 %3641 }
0x1657   :  { %v3646_v18 = vpop.permute.xlu1 %3645 }
0x1658   :  { %v3648_v58 = vsel %vm1417_vm6, %v3642_v5, %v3646_v18 }
0x1659   :  { %v3650_v30 = vrot.slane %v3648_v58, 2 }
0x165b   :  { %8112 = vmatmul.mubr.msk.f32.vlgmr.msra.gmra.mxu0 %vm2783_vm10, %v3650_v30  ;;  %v4224_v30 = vsel %vm4219_vm11, %v11047_v57, %v11091_v37 }
0x165c   :  { %3964 = vmatpush1.msra.mxu0 %v11107_v29  ;;  %4011 = vmatprep.mubr.f32.mxu0 %v9616_v0 }
0x165d   :  { %3965 = vmatprep.subr.mxu0 %v11112_v9 }
0x165e   :  { %3966 = vmatpush1.msra.mxu0 %v11116_v40 }
0x165f   :  { %3967 = vmatprep.subr.mxu0 %v11120_v6 }
0x1660   :  { %3968 = vmatpush1.msra.mxu0 %v11124_v23 }
0x1661   :  { %3969 = vmatprep.subr.mxu0 %v11128_v62 }
0x1662   :  { %3970 = vmatpush1.msra.mxu0 %v11132_v63 }
0x1663   :  { %3971 = vmatprep.subr.mxu0 %v11136_v10 }
0x1664   :  { %3972 = vmatpush1.msra.mxu0 %v11140_v56 }
0x1665   :  { %3973 = vmatprep.subr.mxu0 %v11144_v46 }
0x1666   :  { %3974 = vmatpush1.msra.mxu0 %v11148_v14 }
0x1667   :  { %3975 = vmatprep.subr.mxu0 %v11152_v11 }
0x1668   :  { %3976 = vmatpush1.msra.mxu0 %v11156_v3 }
0x1669   :  { %3977 = vmatprep.subr.mxu0 %v11160_v28 }
0x166a   :  { %3978 = vmatpush1.msra.mxu0 %v11164_v19 }
0x171b   :  { %v3719_v60 = vpop.f32.mrf.mxu0 }
0x171c   :  { %v3726_v61 = vrot.slane %v3719_v60, 4 }
0x171d   :  { %v3721_v32 = vpop.f32.mrf.mxu0 }
0x171e   :  { %v3730_v36 = vadd.f32 %v3726_v61, %v10844_v4  ;;  %v3727_v54 = vrot.slane %v3721_v32, 4 }
0x1720   :  { %9329 = vtanh.f32 %v3730_v36  ;;  %v3731_v48 = vadd.f32 %v3727_v54, %v3638_v21  ;;  %v3732_v31 = vsub.f32 0.0, %v3730_v36 }
0x1722   :  { %9331 = vtanh.f32 %v3731_v48  ;;  %v3739_v35 = vsub.f32 0.0, %v3731_v48  ;;  %v3733_v8 = vmul.f32 1.442695, %v3732_v31 }
0x1724   :  { %v3740_v13 = vmul.f32 1.442695, %v3739_v35  ;;  %9333 = vpow2.f32 %v3733_v8 }
0x1726   :  { %9335 = vpow2.f32 %v3740_v13 }
0x172d   :  { %v9330_v50 = vpop.eup %9329 }
0x172e   :  { %3751 = vrot.lane.b32.xlu0 %v9330_v50, %s9630_s24 }
0x172f   :  { %v9332_v1 = vpop.eup %9331 }
0x1730   :  { %3771 = vrot.lane.b32.xlu1 %v9332_v1, %s9630_s24 }
0x1731   :  { %v9334_v38 = vpop.eup %9333 }
0x1732   :  { %v3735_v7 = vadd.f32 1.0, %v9334_v38 }
0x1733   :  { %v9336_v25 = vpop.eup %9335 }
0x1734   :  { %v3742_v26 = vadd.f32 1.0, %v9336_v25  ;;  %9337 = vrcp.f32 %v3735_v7 }
0x1736   :  { %9339 = vrcp.f32 %v3742_v26 }
0x1741   :  { %v9338_v53 = vpop.eup %9337 }
0x1742   :  { %v3749_v47 = vmul.f32 %v9338_v53, %v3747_v51 }
0x1743   :  { %v9340_v45 = vpop.eup %9339 }
0x1744   :  { %v3769_v43 = vmul.f32 %v9340_v45, %v3767_v20 }
0x17a0   :  { %v3752_v12 = vpop.permute.xlu0 %3751 }
0x17a1   :  { %v3754_v24 = vmul.f32 %v9338_v53, %v3752_v12 }
0x17a2   :  { %v3772_v59 = vpop.permute.xlu1 %3771 }
0x17a3   :  { %v3774_v39 = vmul.f32 %v9340_v45, %v3772_v59  ;;  %3756 = vrot.lane.b32.xlu0 %v3754_v24, %s9631_s25 }
0x17a5   :  { %3776 = vrot.lane.b32.xlu1 %v3774_v39, %s9631_s25 }
0x1815   :  { %v3757_v15 = vpop.permute.xlu0 %3756 }
0x1816   :  { %v11177_v16 = vadd.f32 %v3757_v15, %v3749_v47 }
0x1817   :  { %v3777_v17 = vpop.permute.xlu1 %3776 }
0x1818   :  { %9341 = vtanh.f32 %v11177_v16  ;;  %v11180_v27 = vadd.f32 %v3777_v17, %v3769_v43  ;;  %v3895_v13 = vrot.slane %v11177_v16, 6 }
0x181a   :  { %9343 = vtanh.f32 %v11180_v27  ;;  %v3915_v38 = vrot.slane %v11180_v27, 6 }
0x1825   :  { %v9342_v5 = vpop.eup %9341 }
0x1826   :  { %3762 = vrot.lane.b32.xlu0 %v9342_v5, %s9630_s24 }
0x1827   :  { %v9344_v18 = vpop.eup %9343 }
0x1828   :  { %3782 = vrot.lane.b32.xlu1 %v9344_v18, %s9630_s24 }
0x1898   :  { %v3763_v2 = vpop.permute.xlu0 %3762 }
0x1899   :  { %v3765_v49 = vmul.f32 %v9338_v53, %v3763_v2 }
0x189a   :  { %v3783_v58 = vpop.permute.xlu1 %3782 }
0x189b   :  { %v11188_v60 = vmul.f32 %v9340_v45, %v3783_v58  ;;  %3789 = vrot.lane.b32.xlu0 %v3765_v49, %s9631_s25  ;;  %v11192_v61 = vsel %vm4221_vm12, %v4224_v30, %v3765_v49 }
0x189d   :  { %3793 = vrot.lane.b32.xlu1 %v11188_v60, %s9630_s24 }
0x190d   :  { %v3790_v32 = vpop.permute.xlu0 %3789 }
0x190f   :  { %v3794_v36 = vpop.permute.xlu1 %3793 }
0x1910   :  { %v3796_v54 = vsel %vm1417_vm6, %v3790_v32, %v3794_v36 }
0x1911   :  { %v3798_v48 = vrot.slane %v3796_v54, 4 }
0x1913   :  { %8113 = vmatmul.mubr.msk.f32.vlgmr.msra.gmra.mxu1 %vm2783_vm10, %v3798_v48 }
0x1914   :  { %4103 = vmatpush1.msra.mxu1 %v11107_v29  ;;  %4150 = vmatprep.mubr.f32.mxu1 %v9616_v0 }
0x1915   :  { %4104 = vmatprep.subr.mxu1 %v11112_v9  ;;  %v3786_v9 = vrot.slane %v10841_v22, 6 }
0x1916   :  { %4105 = vmatpush1.msra.mxu1 %v11116_v40 }
0x1917   :  { %4106 = vmatprep.subr.mxu1 %v11120_v6 }
0x1918   :  { %4107 = vmatpush1.msra.mxu1 %v11124_v23 }
0x1919   :  { %4108 = vmatprep.subr.mxu1 %v11128_v62 }
0x191a   :  { %4109 = vmatpush1.msra.mxu1 %v11132_v63 }
0x191b   :  { %4110 = vmatprep.subr.mxu1 %v11136_v10 }
0x191c   :  { %4111 = vmatpush1.msra.mxu1 %v11140_v56 }
0x191d   :  { %4112 = vmatprep.subr.mxu1 %v11144_v46 }
0x191e   :  { %4113 = vmatpush1.msra.mxu1 %v11148_v14 }
0x191f   :  { %4114 = vmatprep.subr.mxu1 %v11152_v11 }
0x1920   :  { %4115 = vmatpush1.msra.mxu1 %v11156_v3 }
0x1921   :  { %4116 = vmatprep.subr.mxu1 %v11160_v28 }
0x1922   :  { %4117 = vmatpush1.msra.mxu1 %v11164_v19 }
0x19d3   :  { %v3867_v57 = vpop.f32.mrf.mxu1 }
0x19d4   :  { %v3874_v37 = vrot.slane %v3867_v57, 2 }
0x19d5   :  { %v3869_v29 = vpop.f32.mrf.mxu1 }
0x19d6   :  { %v3878_v40 = vadd.f32 %v3874_v37, %v10844_v4  ;;  %v3875_v6 = vrot.slane %v3869_v29, 2 }
0x19d8   :  { %9345 = vtanh.f32 %v3878_v40  ;;  %v3879_v23 = vadd.f32 %v3875_v6, %v3786_v9  ;;  %v3880_v10 = vsub.f32 0.0, %v3878_v40 }
0x19da   :  { %9347 = vtanh.f32 %v3879_v23  ;;  %v3887_v56 = vsub.f32 0.0, %v3879_v23  ;;  %v3881_v46 = vmul.f32 1.442695, %v3880_v10 }
0x19dc   :  { %v3888_v14 = vmul.f32 1.442695, %v3887_v56  ;;  %9349 = vpow2.f32 %v3881_v46 }
0x19de   :  { %9351 = vpow2.f32 %v3888_v14 }
0x19e5   :  { %v9346_v62 = vpop.eup %9345 }
0x19e6   :  { %3899 = vrot.lane.b32.xlu0 %v9346_v62, %s9630_s24 }
0x19e7   :  { %v9348_v63 = vpop.eup %9347 }
0x19e8   :  { %3919 = vrot.lane.b32.xlu1 %v9348_v63, %s9630_s24 }
0x19e9   :  { %v9350_v11 = vpop.eup %9349 }
0x19ea   :  { %v3883_v3 = vadd.f32 1.0, %v9350_v11 }
0x19eb   :  { %v9352_v4 = vpop.eup %9351 }
0x19ec   :  { %v3890_v28 = vadd.f32 1.0, %v9352_v4  ;;  %9353 = vrcp.f32 %v3883_v3 }
0x19ee   :  { %9355 = vrcp.f32 %v3890_v28 }
0x19f9   :  { %v9354_v19 = vpop.eup %9353 }
0x19fa   :  { %v3897_v25 = vmul.f32 %v9354_v19, %v3895_v13 }
0x19fb   :  { %v9356_v31 = vpop.eup %9355 }
0x19fc   :  { %v3917_v53 = vmul.f32 %v9356_v31, %v3915_v38 }
0x1a58   :  { %v3900_v50 = vpop.permute.xlu0 %3899 }
0x1a59   :  { %v3902_v1 = vmul.f32 %v9354_v19, %v3900_v50 }
0x1a5a   :  { %v3920_v35 = vpop.permute.xlu1 %3919 }
0x1a5b   :  { %v3922_v8 = vmul.f32 %v9356_v31, %v3920_v35  ;;  %3904 = vrot.lane.b32.xlu0 %v3902_v1, %s9631_s25 }
0x1a5d   :  { %3924 = vrot.lane.b32.xlu1 %v3922_v8, %s9631_s25 }
0x1acd   :  { %v3905_v7 = vpop.permute.xlu0 %3904 }
0x1ace   :  { %v3907_v26 = vadd.f32 %v3905_v7, %v3897_v25 }
0x1acf   :  { %v3925_v12 = vpop.permute.xlu1 %3924 }
0x1ad0   :  { %9357 = vtanh.f32 %v3907_v26  ;;  %v3927_v24 = vadd.f32 %v3925_v12, %v3917_v53  ;;  %v4035_v10 = vrot.slane %v3907_v26, 6 }
0x1ad2   :  { %9359 = vtanh.f32 %v3927_v24  ;;  %v4055_v56 = vrot.slane %v3927_v24, 6 }
0x1add   :  { %v9358_v45 = vpop.eup %9357 }
0x1ade   :  { %3910 = vrot.lane.b32.xlu0 %v9358_v45, %s9630_s24 }
0x1adf   :  { %v9360_v59 = vpop.eup %9359 }
0x1ae0   :  { %3930 = vrot.lane.b32.xlu1 %v9360_v59, %s9630_s24 }
0x1b50   :  { %v3911_v39 = vpop.permute.xlu0 %3910 }
0x1b51   :  { %v3913_v51 = vmul.f32 %v9354_v19, %v3911_v39 }
0x1b52   :  { %v3931_v20 = vpop.permute.xlu1 %3930 }
0x1b53   :  { %v11226_v47 = vmul.f32 %v9356_v31, %v3931_v20  ;;  %3935 = vrot.lane.b32.xlu0 %v3913_v51, %s9631_s25  ;;  %v11231_v15 = vsel %vm767_vm2, %v11192_v61, %v3913_v51 }
0x1b55   :  { %3939 = vrot.lane.b32.xlu1 %v11226_v47, %s9630_s24 }
0x1bc5   :  { %v3936_v16 = vpop.permute.xlu0 %3935 }
0x1bc7   :  { %v3940_v43 = vpop.permute.xlu1 %3939 }
0x1bc8   :  { %v3942_v17 = vsel %vm1417_vm6, %v3936_v16, %v3940_v43 }
0x1bc9   :  { %v3944_v27 = vrot.slane %v3942_v17, 6 }
0x1bcb   :  { %8114 = vmatmul.mubr.msk.f32.vlgmr.msra.gmra.mxu0 %vm2783_vm10, %v3944_v27 }
0x1bcc   :  { %4384 = vmatprep.mubr.f32.mxu0 %v9616_v0 }
0x1c8b   :  { %v4013_v5 = vpop.f32.mrf.mxu0 }
0x1c8c   :  { %v4018_v18 = vadd.f32 %v4013_v5, %v10848_v55 }
0x1c8d   :  { %v4015_v2 = vpop.f32.mrf.mxu0 }
0x1c8e   :  { %9361 = vtanh.f32 %v4018_v18  ;;  %v4019_v49 = vadd.f32 %v4015_v2, %v3638_v21  ;;  %v4020_v61 = vsub.f32 0.0, %v4018_v18 }
0x1c90   :  { %9363 = vtanh.f32 %v4019_v49  ;;  %v4027_v32 = vsub.f32 0.0, %v4019_v49  ;;  %v4021_v36 = vmul.f32 1.442695, %v4020_v61 }
0x1c92   :  { %v4028_v54 = vmul.f32 1.442695, %v4027_v32  ;;  %9365 = vpow2.f32 %v4021_v36 }
0x1c94   :  { %9367 = vpow2.f32 %v4028_v54 }
0x1c9b   :  { %v9362_v58 = vpop.eup %9361 }
0x1c9c   :  { %4039 = vrot.lane.b32.xlu0 %v9362_v58, %s9630_s24 }
0x1c9d   :  { %v9364_v30 = vpop.eup %9363 }
0x1c9e   :  { %4059 = vrot.lane.b32.xlu1 %v9364_v30, %s9630_s24 }
0x1c9f   :  { %v9366_v48 = vpop.eup %9365 }
0x1ca0   :  { %v4023_v37 = vadd.f32 1.0, %v9366_v48 }
0x1ca1   :  { %v9368_v57 = vpop.eup %9367 }
0x1ca2   :  { %v4030_v29 = vadd.f32 1.0, %v9368_v57  ;;  %9369 = vrcp.f32 %v4023_v37 }
0x1ca4   :  { %9371 = vrcp.f32 %v4030_v29 }
0x1caf   :  { %v9370_v21 = vpop.eup %9369 }
0x1cb0   :  { %v4037_v46 = vmul.f32 %v9370_v21, %v4035_v10  ;;  %v4294_v10 = vld [vmem:[%s11278_s29 + $0x58] sm:$0xff] }
0x1cb1   :  { %v9372_v23 = vpop.eup %9371 }
0x1cb2   :  { %v4057_v4 = vmul.f32 %v9372_v23, %v4055_v56  ;;  %v11302_v56 = vld [vmem:[%s11285_s3 + $0x68] sm:$0xff] }
0x1d0e   :  { %v4040_v40 = vpop.permute.xlu0 %4039 }
0x1d0f   :  { %v4042_v6 = vmul.f32 %v9370_v21, %v4040_v40  ;;  %v4298_v40 = vld [vmem:[%s11278_s29 + $0x78] sm:$0xff] }
0x1d10   :  { %v4060_v62 = vpop.permute.xlu1 %4059  ;;  %4336 = vmatprep.subr.mxu0 %v4298_v40 }
0x1d11   :  { %v4062_v63 = vmul.f32 %v9372_v23, %v4060_v62  ;;  %4044 = vrot.lane.b32.xlu0 %v4042_v6, %s9631_s25  ;;  %v4297_v6 = vld [vmem:[%s11278_s29 + $0x70] sm:$0xff]  ;;  %v4295_v62 = vld [vmem:[%s11278_s29 + $0x60] sm:$0xff] }
0x1d12   :  { %4337 = vmatpush1.msra.mxu0 %v4297_v6 }
0x1d13   :  { %4064 = vrot.lane.b32.xlu1 %v4062_v63, %s9631_s25  ;;  %v11297_v63 = vld [vmem:[%s11285_s3 + $0x70] sm:$0xff] }
0x1d83   :  { %v4045_v14 = vpop.permute.xlu0 %4044 }
0x1d84   :  { %v4047_v11 = vadd.f32 %v4045_v14, %v4037_v46  ;;  %v11307_v46 = vld [vmem:[%s11285_s3 + $0x60] sm:$0xff]  ;;  %v11310_v14 = vld [vmem:[%s11285_s3 + $0x58] sm:$0xff] }
0x1d85   :  { %v4065_v3 = vpop.permute.xlu1 %4064 }
0x1d86   :  { %9373 = vtanh.f32 %v4047_v11  ;;  %v4067_v28 = vadd.f32 %v4065_v3, %v4057_v4  ;;  %v4180_v30 = vrot.slane %v4047_v11, 6  ;;  %v4292_v11 = vld [vmem:[%s11278_s29 + $0x48] sm:$0xff]  ;;  %v11315_v4 = vld [vmem:[%s11285_s3 + $0x50] sm:$0xff]  ;;  %v4291_v3 = vld [vmem:[%s11278_s29 + $0x40] sm:$0xff] }
0x1d88   :  { %9375 = vtanh.f32 %v4067_v28  ;;  %v4200_v61 = vrot.slane %v4067_v28, 6  ;;  %v11320_v28 = vld [vmem:[%s11285_s3 + $0x48] sm:$0xff] }
0x1d93   :  { %v9374_v19 = vpop.eup %9373 }
0x1d94   :  { %4050 = vrot.lane.b32.xlu0 %v9374_v19, %s9630_s24  ;;  %v4290_v19 = vld [vmem:[%s11278_s29 + $0x38] sm:$0xff] }
0x1d95   :  { %v9376_v50 = vpop.eup %9375 }
0x1d96   :  { %4070 = vrot.lane.b32.xlu1 %v9376_v50, %s9630_s24  ;;  %v4289_v50 = vld [vmem:[%s11278_s29 + $0x30] sm:$0xff] }
0x1e06   :  { %v4051_v1 = vpop.permute.xlu0 %4050 }
0x1e07   :  { %v11247_v31 = vmul.f32 %v9370_v21, %v4051_v1  ;;  %v11328_v1 = vld [vmem:[%s11285_s3 + $0x40] sm:$0xff] }
0x1e08   :  { %v4071_v35 = vpop.permute.xlu1 %4070 }
0x1e09   :  { %v11249_v8 = vmul.f32 %v9372_v23, %v4071_v35  ;;  %4075 = vrot.lane.b32.xlu0 %v11247_v31, %s9631_s25  ;;  %v4296_v23 = vld [vmem:[%s11278_s29 + $0x68] sm:$0xff] }
0x1e0a   :  { %4338 = vmatprep.subr.mxu0 %v4296_v23  ;;  %v4288_v35 = vld [vmem:[%s11278_s29 + $0x28] sm:$0xff] }
0x1e0b   :  { %4079 = vrot.lane.b32.xlu1 %v11249_v8, %s9630_s24  ;;  %4339 = vmatpush1.msra.mxu0 %v4295_v62 }
0x1e0c   :  { %4340 = vmatprep.subr.mxu0 %v4294_v10 }
0x1e7b   :  { %v4076_v13 = vpop.permute.xlu0 %4075 }
0x1e7d   :  { %v4080_v38 = vpop.permute.xlu1 %4079 }
0x1e7e   :  { %v4082_v25 = vsel %vm1417_vm6, %v4076_v13, %v4080_v38  ;;  %v11333_v13 = vld [vmem:[%s11285_s3 + $0x38] sm:$0xff]  ;;  %v4287_v38 = vld [vmem:[%s11278_s29 + $0x20] sm:$0xff] }
0x1e7f   :  { %8115 = vmatmul.mubr.msk.f32.vlgmr.msra.gmra.mxu1 %vm2783_vm10, %v4082_v25  ;;  %v11337_v25 = vld [vmem:[%s11285_s3 + $0x30] sm:$0xff] }
0x1e80   :  { %4486 = vmatprep.mubr.f32.mxu1 %v9616_v0 }
0x1f3f   :  { %v4152_v7 = vpop.f32.mrf.mxu1 }
0x1f40   :  { %v4159_v26 = vrot.slane %v4152_v7, 6  ;;  %v4286_v7 = vld [vmem:[%s11278_s29 + $0x18] sm:$0xff] }
0x1f41   :  { %v4154_v53 = vpop.f32.mrf.mxu1 }
0x1f42   :  { %v4163_v12 = vadd.f32 %v4159_v26, %v10848_v55  ;;  %v4160_v24 = vrot.slane %v4154_v53, 6  ;;  %v11342_v26 = vld [vmem:[%s11285_s3 + $0x28] sm:$0xff]  ;;  %v4285_v53 = vld [vmem:[%s11278_s29 + $0x10] sm:$0xff] }
0x1f44   :  { %9377 = vtanh.f32 %v4163_v12  ;;  %v4164_v45 = vadd.f32 %v4160_v24, %v3786_v9  ;;  %v4165_v51 = vsub.f32 0.0, %v4163_v12  ;;  %v11347_v12 = vld [vmem:[%s11285_s3 + $0x20] sm:$0xff]  ;;  %v4284_v24 = vld [vmem:[%s11278_s29 + $0x8] sm:$0xff] }
0x1f46   :  { %9379 = vtanh.f32 %v4164_v45  ;;  %v4172_v20 = vsub.f32 0.0, %v4164_v45  ;;  %v4166_v16 = vmul.f32 1.442695, %v4165_v51  ;;  %v11351_v45 = vld [vmem:[%s11285_s3 + $0x18] sm:$0xff]  ;;  %v11362_v51 = vld [vmem:[%s11285_s3 + $0x8] sm:$0xff] }
0x1f48   :  { %v4173_v43 = vmul.f32 1.442695, %v4172_v20  ;;  %9381 = vpow2.f32 %v4166_v16  ;;  %v11365_v20 = vld [vmem:[%s11285_s3] sm:$0xff] }
0x1f4a   :  { %9383 = vpow2.f32 %v4173_v43 }
0x1f51   :  { %v9378_v59 = vpop.eup %9377 }
0x1f52   :  { %4184 = vrot.lane.b32.xlu1 %v9378_v59, %s9630_s24  ;;  %v4283_v59 = vld [vmem:[%s11278_s29] sm:$0xff] }
0x1f53   :  { %v9380_v39 = vpop.eup %9379 }
0x1f54   :  { %4204 = vrot.lane.b32.xlu0 %v9380_v39, %s9630_s24  ;;  %v11358_v39 = vld [vmem:[%s11285_s3 + $0x10] sm:$0xff] }
0x1f55   :  { %v9382_v17 = vpop.eup %9381 }
0x1f56   :  { %v4168_v27 = vadd.f32 1.0, %v9382_v17 }
0x1f57   :  { %v9384_v55 = vpop.eup %9383 }
0x1f58   :  { %v4175_v5 = vadd.f32 1.0, %v9384_v55  ;;  %9385 = vrcp.f32 %v4168_v27 }
0x1f5a   :  { %9387 = vrcp.f32 %v4175_v5  ;;  %v4231_v5 = vrot.slane %v11249_v8, 6 }
0x1f65   :  { %v11263_v22 = vpop.eup %9385 }
0x1f66   :  { %v4182_v32 = vmul.f32 %v11263_v22, %v4180_v30 }
0x1f67   :  { %v11266_v2 = vpop.eup %9387 }
0x1f68   :  { %v4202_v48 = vmul.f32 %v11266_v2, %v4200_v61 }
0x1fc4   :  { %v4185_v9 = vpop.permute.xlu1 %4184 }
0x1fc5   :  { %v4187_v18 = vmul.f32 %v11263_v22, %v4185_v9  ;;  %v4233_v9 = vrot.slane %v11226_v47, 2 }
0x1fc6   :  { %v4205_v49 = vpop.permute.xlu0 %4204 }
0x1fc7   :  { %v4207_v58 = vmul.f32 %v11266_v2, %v4205_v49  ;;  %4189 = vrot.lane.b32.xlu1 %v4187_v18, %s9631_s25  ;;  %v4235_v18 = vrot.slane %v11188_v60, 6 }
0x1fc9   :  { %4209 = vrot.lane.b32.xlu0 %v4207_v58, %s9631_s25 }
0x2039   :  { %v4190_v36 = vpop.permute.xlu1 %4189 }
0x203a   :  { %v4192_v54 = vadd.f32 %v4190_v36, %v4182_v32  ;;  %v4299_v36 = vld [vmem:[%s7906_s7] sm:$0x3]  ;;  %s7910_s7 = sld [smem:[%s12413_s0 + %s9641_s4]]   ;;  %s9648_s4 = smov 26  }
0x203b   :  { %v4210_v57 = vpop.permute.xlu0 %4209 }
0x203c   :  { %9389 = vtanh.f32 %v4192_v54  ;;  %v4212_v37 = vadd.f32 %v4210_v57, %v4202_v48  ;;  %v4304_v54 = vrot.slane %v4299_v36, %v10832_v44  ;;  %v4308_v48 = vrot.slane %v4299_v36, %v10835_v42 }
0x203e   :  { %9391 = vtanh.f32 %v4212_v37 }
0x2049   :  { %v9390_v29 = vpop.eup %9389 }
0x204a   :  { %4195 = vrot.lane.b32.xlu1 %v9390_v29, %s9630_s24 }
0x204b   :  { %v9392_v21 = vpop.eup %9391 }
0x204c   :  { %4215 = vrot.lane.b32.xlu0 %v9392_v21, %s9630_s24 }
0x2050   :  { %4259 = vrot.lane.b32.xlu0 %v11007_v34, %s9631_s25  ;;  %v11293_v34 = vld [vmem:[%s11285_s3 + $0x78] sm:$0xff] }
0x2051   :  { %4438 = vmatprep.subr.mxu1 %v11293_v34 }
0x2052   :  { %4439 = vmatpush1.msra.mxu1 %v11297_v63 }
0x2053   :  { %4440 = vmatprep.subr.mxu1 %v11302_v56 }
0x2054   :  { %4261 = vrot.lane.b32.xlu0 %v11231_v15, %s9631_s25  ;;  %v4293_v15 = vld [vmem:[%s11278_s29 + $0x50] sm:$0xff]  ;;  %4441 = vmatpush1.msra.mxu1 %v11307_v46  ;;  %s7921_s29 = sld [smem:[%s12413_s0 + %s9639_s26]]   ;;  %s9646_s26 = smov 23  }
0x2055   :  { %4341 = vmatpush1.msra.mxu0 %v4293_v15  ;;  %4442 = vmatprep.subr.mxu1 %v11310_v14 }
0x2056   :  { %4342 = vmatprep.subr.mxu0 %v4292_v11  ;;  %4443 = vmatpush1.msra.mxu1 %v11315_v4 }
0x2057   :  { %4343 = vmatpush1.msra.mxu0 %v4291_v3  ;;  %4444 = vmatprep.subr.mxu1 %v11320_v28 }
0x2058   :  { %4344 = vmatprep.subr.mxu0 %v4290_v19  ;;  %4445 = vmatpush1.msra.mxu1 %v11328_v1 }
0x2059   :  { %4345 = vmatpush1.msra.mxu0 %v4289_v50  ;;  %4446 = vmatprep.subr.mxu1 %v11333_v13 }
0x205a   :  { %4346 = vmatprep.subr.mxu0 %v4288_v35  ;;  %4447 = vmatpush1.msra.mxu1 %v11337_v25 }
0x205b   :  { %4347 = vmatpush1.msra.mxu0 %v4287_v38  ;;  %4448 = vmatprep.subr.mxu1 %v11342_v26 }
0x205c   :  { %4348 = vmatprep.subr.mxu0 %v4286_v7  ;;  %4449 = vmatpush1.msra.mxu1 %v11347_v12 }
0x205d   :  { %4349 = vmatpush1.msra.mxu0 %v4285_v53  ;;  %4450 = vmatprep.subr.mxu1 %v11351_v45 }
0x205e   :  { %4350 = vmatprep.subr.mxu0 %v4284_v24  ;;  %4451 = vmatpush1.msra.mxu1 %v11358_v39 }
0x205f   :  { %4351 = vmatpush1.msra.mxu0 %v4283_v59  ;;  %4452 = vmatprep.subr.mxu1 %v11362_v51 }
0x2060   :  { %4573 = vmatprep.subr.mxu0 %v11293_v34  ;;  %4453 = vmatpush1.msra.mxu1 %v11365_v20 }
0x2061   :  { %4487 = vmatmul.mubr.f32.vlgmr.msra.gmra.mxu1 %v9616_v0  ;;  %4722 = vmatprep.subr.mxu1 %v11293_v34 }
0x2062   :  { %4723 = vmatpush1.msra.mxu1 %v11297_v63  ;;  %4770 = vmatprep.mubr.f32.mxu1 %v9616_v0 }
0x2063   :  { %4724 = vmatprep.subr.mxu1 %v11302_v56 }
0x2064   :  { %4725 = vmatpush1.msra.mxu1 %v11307_v46 }
0x2065   :  { %4726 = vmatprep.subr.mxu1 %v11310_v14 }
0x2066   :  { %4727 = vmatpush1.msra.mxu1 %v11315_v4 }
0x2067   :  { %4728 = vmatprep.subr.mxu1 %v11320_v28 }
0x2068   :  { %4729 = vmatpush1.msra.mxu1 %v11328_v1 }
0x2069   :  { %4730 = vmatprep.subr.mxu1 %v11333_v13 }
0x206a   :  { %4731 = vmatpush1.msra.mxu1 %v11337_v25 }
0x206b   :  { %4732 = vmatprep.subr.mxu1 %v11342_v26 }
0x206c   :  { %4733 = vmatpush1.msra.mxu1 %v11347_v12 }
0x206d   :  { %4734 = vmatprep.subr.mxu1 %v11351_v45 }
0x206e   :  { %4735 = vmatpush1.msra.mxu1 %v11358_v39 }
0x206f   :  { %4736 = vmatprep.subr.mxu1 %v11362_v51 }
0x2070   :  { %4737 = vmatpush1.msra.mxu1 %v11365_v20 }
0x2071   :  { %5016 = vmatprep.subr.mxu1 %v11293_v34 }
0x20bc   :  { %v4196_v16 = vpop.permute.xlu1 %4195 }
0x20bd   :  { %v4198_v43 = vmul.f32 %v11263_v22, %v4196_v16 }
0x20be   :  { %v4216_v17 = vpop.permute.xlu0 %4215 }
0x20bf   :  { %v4218_v55 = vmul.f32 %v11266_v2, %v4216_v17  ;;  %v4227_v27 = vsel %vm4219_vm11, %v11247_v31, %v4198_v43 }
0x20c0   :  { %4263 = vrot.lane.b32.xlu0 %v4227_v27, %s9631_s25 }
0x20c1   :  { %v4229_v22 = vrot.slane %v4218_v55, 2 }
0x20c2   :  { %v4260_v60 = vpop.permute.xlu0 %4259 }
0x20c3   :  { %v4249_v2 = vsel %vm4219_vm11, %v4229_v22, %v4231_v5 }
0x20c4   :  { %v4250_v31 = vsel %vm4221_vm12, %v4249_v2, %v4233_v9 }
0x20c5   :  { %v4251_v49 = vsel %vm767_vm2, %v4250_v31, %v4235_v18 }
0x20c6   :  { %4271 = vrot.lane.b32.xlu1 %v4251_v49, %s9630_s24 }
0x20ca   :  { %4273 = vrot.lane.b32.xlu1 %v11102_v41, %s9630_s24  ;;  %v4262_v41 = vpop.permute.xlu0 %4261 }
0x20ce   :  { %4275 = vrot.lane.b32.xlu1 %v10915_v52, %s9630_s24 }
0x2121   :  { %v4488_v37 = vpop.f32.mrf.mxu1 }
0x2123   :  { %v4490_v38 = vpop.f32.mrf.mxu1 }
0x2132   :  { %v4264_v52 = vpop.permute.xlu0 %4263 }
0x2138   :  { %v4272_v47 = vpop.permute.xlu1 %4271 }
0x2139   :  { %v4280_v8 = vsel %vm1417_vm6, %v4260_v60, %v4272_v47 }
0x213a   :  { %8116 = vmatmul.mubr.msk.f32.vlgmr.msra.gmra.mxu0 %vm2783_vm10, %v4280_v8 }
0x213b   :  { %4390 = vmatprep.mubr.f32.mxu0 %v9616_v0  ;;  %4574 = vmatpush1.msra.mxu0 %v11297_v63 }
0x213c   :  { %v4274_v58 = vpop.permute.xlu1 %4273  ;;  %4575 = vmatprep.subr.mxu0 %v11302_v56 }
0x213d   :  { %v4281_v30 = vsel %vm1417_vm6, %v4262_v41, %v4274_v58  ;;  %4576 = vmatpush1.msra.mxu0 %v11307_v46 }
0x213e   :  { %8117 = vmatmul.mubr.msk.f32.gmra.mxu0 %vm2783_vm10, %v4281_v30  ;;  %4577 = vmatprep.subr.mxu0 %v11310_v14 }
0x213f   :  { %4396 = vmatprep.mubr.f32.mxu0 %v9616_v0  ;;  %4578 = vmatpush1.msra.mxu0 %v11315_v4 }
0x2140   :  { %v4276_v61 = vpop.permute.xlu1 %4275  ;;  %4579 = vmatprep.subr.mxu0 %v11320_v28 }
0x2141   :  { %v4282_v32 = vsel %vm1417_vm6, %v4264_v52, %v4276_v61  ;;  %4580 = vmatpush1.msra.mxu0 %v11328_v1 }
0x2142   :  { %8118 = vmatmul.mubr.msk.f32.gmra.mxu0 %vm2783_vm10, %v4282_v32  ;;  %4581 = vmatprep.subr.mxu0 %v11333_v13 }
0x2143   :  { %4582 = vmatpush1.msra.mxu0 %v11337_v25  ;;  %4621 = vmatprep.mubr.f32.mxu0 %v9616_v0 }
0x2144   :  { %4583 = vmatprep.subr.mxu0 %v11342_v26 }
0x2145   :  { %4584 = vmatpush1.msra.mxu0 %v11347_v12 }
0x2146   :  { %4585 = vmatprep.subr.mxu0 %v11351_v45 }
0x2147   :  { %4586 = vmatpush1.msra.mxu0 %v11358_v39 }
0x2148   :  { %4587 = vmatprep.subr.mxu0 %v11362_v51 }
0x2149   :  { %4588 = vmatpush1.msra.mxu0 %v11365_v20 }
0x214a   :  { %4870 = vmatprep.subr.mxu0 %v11293_v34 }
0x21fa   :  { %v4386_v57 = vpop.f32.mrf.mxu0 }
0x21fb   :  { %v11435_v29 = vadd.f32 %v4386_v57, %v4304_v54 }
0x21fc   :  { %v4388_v21 = vpop.f32.mrf.mxu0 }
0x21fd   :  { %v11437_v40 = vadd.f32 %v4388_v21, %v4308_v48  ;;  %v4493_v6 = vadd.f32 %v4488_v37, %v11435_v29 }
0x21fe   :  { %v4392_v23 = vpop.f32.mrf.mxu0 }
0x21ff   :  { %9393 = vtanh.f32 %v4493_v6  ;;  %v11440_v62 = vadd.f32 %v4392_v23, %v4304_v54  ;;  %v4495_v59 = vsub.f32 0.0, %v4493_v6 }
0x2200   :  { %v4394_v10 = vpop.f32.mrf.mxu0 }
0x2201   :  { %v11442_v15 = vadd.f32 %v4394_v10, %v4308_v48  ;;  %v4496_v16 = vmul.f32 1.442695, %v4495_v59 }
0x2202   :  { %v4398_v11 = vpop.f32.mrf.mxu0 }
0x2203   :  { %v11444_v3 = vadd.f32 %v4398_v11, %v4304_v54 }
0x2204   :  { %v4400_v19 = vpop.f32.mrf.mxu0 }
0x2205   :  { %v11446_v50 = vadd.f32 %v4400_v19, %v4308_v48 }
0x2207   :  { %v4404_v35 = vrot.slane %v11446_v50, 2  ;;  %v4543_v19 = vrot.slane %v11446_v50, 6 }
0x2209   :  { %v4494_v7 = vadd.f32 %v4490_v38, %v4404_v35 }
0x220b   :  { %9395 = vtanh.f32 %v4494_v7  ;;  %v4502_v43 = vsub.f32 0.0, %v4494_v7 }
0x220c   :  { %v9394_v53 = vpop.eup %9393  ;;  %9397 = vpow2.f32 %v4496_v16 }
0x220d   :  { %4511 = vrot.lane.b32.xlu0 %v9394_v53, %s9630_s24  ;;  %v4503_v17 = vmul.f32 1.442695, %v4502_v43 }
0x220f   :  { %9399 = vpow2.f32 %v4503_v17 }
0x2218   :  { %v9396_v24 = vpop.eup %9395 }
0x2219   :  { %4528 = vrot.lane.b32.xlu1 %v9396_v24, %s9630_s24  ;;  %v9398_v55 = vpop.eup %9397 }
0x221a   :  { %v4498_v27 = vadd.f32 1.0, %v9398_v55 }
0x221c   :  { %9401 = vrcp.f32 %v4498_v27  ;;  %v9400_v5 = vpop.eup %9399 }
0x221d   :  { %v4505_v22 = vadd.f32 1.0, %v9400_v5 }
0x221f   :  { %9403 = vrcp.f32 %v4505_v22 }
0x2229   :  { %v9402_v9 = vpop.eup %9401 }
0x222a   :  { %v4509_v47 = vmul.f32 0.0, %v9402_v9 }
0x222c   :  { %v9404_v31 = vpop.eup %9403 }
0x222d   :  { %v4526_v58 = vmul.f32 0.0, %v9404_v31 }
0x227f   :  { %v4512_v18 = vpop.permute.xlu0 %4511 }
0x2280   :  { %v4514_v2 = vmul.f32 %v9402_v9, %v4512_v18 }
0x2282   :  { %4516 = vrot.lane.b32.xlu0 %v4514_v2, %s9631_s25 }
0x228b   :  { %v4529_v49 = vpop.permute.xlu1 %4528 }
0x228c   :  { %v4531_v60 = vmul.f32 %v9404_v31, %v4529_v49 }
0x228e   :  { %4533 = vrot.lane.b32.xlu1 %v4531_v60, %s9631_s25 }
0x22f4   :  { %v4517_v8 = vpop.permute.xlu0 %4516 }
0x22f5   :  { %v11453_v41 = vadd.f32 %v4517_v8, %v4509_v47 }
0x22f7   :  { %9405 = vtanh.f32 %v11453_v41  ;;  %v4651_v60 = vrot.slane %v11453_v41, 6 }
0x2300   :  { %v4534_v30 = vpop.permute.xlu1 %4533 }
0x2301   :  { %v11456_v52 = vadd.f32 %v4534_v30, %v4526_v58 }
0x2303   :  { %9407 = vtanh.f32 %v11456_v52  ;;  %v4671_v47 = vrot.slane %v11456_v52, 6 }
0x2304   :  { %v9406_v61 = vpop.eup %9405 }
0x2305   :  { %4522 = vrot.lane.b32.xlu0 %v9406_v61, %s9630_s24 }
0x2310   :  { %v9408_v32 = vpop.eup %9407 }
0x2311   :  { %4539 = vrot.lane.b32.xlu1 %v9408_v32, %s9630_s24 }
0x2377   :  { %v4523_v36 = vpop.permute.xlu0 %4522 }
0x2378   :  { %v11461_v54 = vmul.f32 %v9402_v9, %v4523_v36 }
0x237a   :  { %4546 = vrot.lane.b32.xlu0 %v11461_v54, %s9631_s25 }
0x2383   :  { %v4540_v48 = vpop.permute.xlu1 %4539 }
0x2384   :  { %v11465_v57 = vmul.f32 %v9404_v31, %v4540_v48 }
0x2386   :  { %4550 = vrot.lane.b32.xlu1 %v11465_v57, %s9630_s24 }
0x23ec   :  { %v4547_v37 = vpop.permute.xlu0 %4546 }
0x23f8   :  { %v4551_v21 = vpop.permute.xlu1 %4550 }
0x23f9   :  { %v4553_v6 = vsel %vm1417_vm6, %v4547_v37, %v4551_v21 }
0x23fa   :  { %8119 = vmatmul.mubr.msk.f32.vlgmr.msra.gmra.mxu0 %vm2783_vm10, %v4553_v6 }
0x23fb   :  { %4871 = vmatpush1.msra.mxu0 %v11297_v63  ;;  %4918 = vmatprep.mubr.f32.mxu0 %v9616_v0 }
0x23fc   :  { %4872 = vmatprep.subr.mxu0 %v11302_v56 }
0x23fd   :  { %4873 = vmatpush1.msra.mxu0 %v11307_v46 }
0x23fe   :  { %4874 = vmatprep.subr.mxu0 %v11310_v14 }
0x23ff   :  { %4875 = vmatpush1.msra.mxu0 %v11315_v4 }
0x2400   :  { %4876 = vmatprep.subr.mxu0 %v11320_v28 }
0x2401   :  { %4877 = vmatpush1.msra.mxu0 %v11328_v1 }
0x2402   :  { %4878 = vmatprep.subr.mxu0 %v11333_v13 }
0x2403   :  { %4879 = vmatpush1.msra.mxu0 %v11337_v25 }
0x2404   :  { %4880 = vmatprep.subr.mxu0 %v11342_v26 }
0x2405   :  { %4881 = vmatpush1.msra.mxu0 %v11347_v12 }
0x2406   :  { %4882 = vmatprep.subr.mxu0 %v11351_v45 }
0x2407   :  { %4883 = vmatpush1.msra.mxu0 %v11358_v39 }
0x2408   :  { %4884 = vmatprep.subr.mxu0 %v11362_v51 }
0x2409   :  { %4885 = vmatpush1.msra.mxu0 %v11365_v20 }
0x240a   :  { %5155 = vmatprep.subr.mxu0 %v11293_v34 }
0x24ba   :  { %v4623_v23 = vpop.f32.mrf.mxu0 }
0x24bb   :  { %v4630_v10 = vrot.slane %v4623_v23, 6  ;;  %v5880_v23 = vrot.slane %v11465_v57, 6 }
0x24bc   :  { %v4625_v11 = vpop.f32.mrf.mxu0 }
0x24bd   :  { %v4634_v35 = vadd.f32 %v4630_v10, %v11435_v29  ;;  %v4631_v38 = vrot.slane %v4625_v11, 6 }
0x24bf   :  { %9409 = vtanh.f32 %v4634_v35  ;;  %v4635_v7 = vadd.f32 %v4631_v38, %v4543_v19  ;;  %v4636_v59 = vsub.f32 0.0, %v4634_v35 }
0x24c1   :  { %9411 = vtanh.f32 %v4635_v7  ;;  %v4643_v16 = vsub.f32 0.0, %v4635_v7  ;;  %v4637_v43 = vmul.f32 1.442695, %v4636_v59  ;;  %v4691_v59 = vrot.slane %v11442_v15, 2 }
0x24c3   :  { %v4644_v17 = vmul.f32 1.442695, %v4643_v16  ;;  %9413 = vpow2.f32 %v4637_v43 }
0x24c5   :  { %9415 = vpow2.f32 %v4644_v17 }
0x24cc   :  { %v9410_v53 = vpop.eup %9409 }
0x24cd   :  { %4655 = vrot.lane.b32.xlu0 %v9410_v53, %s9630_s24 }
0x24ce   :  { %v9412_v24 = vpop.eup %9411 }
0x24cf   :  { %4675 = vrot.lane.b32.xlu1 %v9412_v24, %s9630_s24 }
0x24d0   :  { %v9414_v55 = vpop.eup %9413 }
0x24d1   :  { %v4639_v27 = vadd.f32 1.0, %v9414_v55 }
0x24d2   :  { %v9416_v50 = vpop.eup %9415 }
0x24d3   :  { %v4646_v5 = vadd.f32 1.0, %v9416_v50  ;;  %9417 = vrcp.f32 %v4639_v27 }
0x24d5   :  { %9419 = vrcp.f32 %v4646_v5 }
0x24e0   :  { %v9418_v22 = vpop.eup %9417 }
0x24e1   :  { %v4653_v8 = vmul.f32 %v9418_v22, %v4651_v60 }
0x24e2   :  { %v9420_v2 = vpop.eup %9419 }
0x24e3   :  { %v4673_v61 = vmul.f32 %v9420_v2, %v4671_v47 }
0x253f   :  { %v4656_v9 = vpop.permute.xlu0 %4655 }
0x2540   :  { %v4658_v18 = vmul.f32 %v9418_v22, %v4656_v9 }
0x2541   :  { %v4676_v31 = vpop.permute.xlu1 %4675 }
0x2542   :  { %v4678_v49 = vmul.f32 %v9420_v2, %v4676_v31  ;;  %4660 = vrot.lane.b32.xlu0 %v4658_v18, %s9631_s25 }
0x2544   :  { %4680 = vrot.lane.b32.xlu1 %v4678_v49, %s9631_s25 }
0x25b4   :  { %v4661_v58 = vpop.permute.xlu0 %4660 }
0x25b5   :  { %v11496_v30 = vadd.f32 %v4661_v58, %v4653_v8 }
0x25b6   :  { %v4681_v32 = vpop.permute.xlu1 %4680 }
0x25b7   :  { %9421 = vtanh.f32 %v11496_v30  ;;  %v11499_v36 = vadd.f32 %v4681_v32, %v4673_v61 }
0x25b9   :  { %9423 = vtanh.f32 %v11499_v36 }
0x25c4   :  { %v9422_v48 = vpop.eup %9421 }
0x25c5   :  { %4666 = vrot.lane.b32.xlu0 %v9422_v48, %s9630_s24  ;;  %v4800_v48 = vrot.slane %v11496_v30, 6 }
0x25c6   :  { %v9424_v37 = vpop.eup %9423 }
0x25c7   :  { %4686 = vrot.lane.b32.xlu1 %v9424_v37, %s9630_s24  ;;  %v4820_v37 = vrot.slane %v11499_v36, 6 }
0x2637   :  { %v4667_v41 = vpop.permute.xlu0 %4666 }
0x2638   :  { %v11504_v52 = vmul.f32 %v9418_v22, %v4667_v41 }
0x2639   :  { %v4687_v21 = vpop.permute.xlu1 %4686 }
0x263a   :  { %v4689_v6 = vmul.f32 %v9420_v2, %v4687_v21  ;;  %4694 = vrot.lane.b32.xlu0 %v11504_v52, %s9631_s25 }
0x263c   :  { %v5878_v10 = vrot.slane %v4689_v6, 2  ;;  %4698 = vrot.lane.b32.xlu1 %v4689_v6, %s9630_s24 }
0x263e   :  { %v11511_v11 = vsel %vm4219_vm11, %v5878_v10, %v5880_v23 }
0x26ac   :  { %v4695_v19 = vpop.permute.xlu0 %4694 }
0x26ae   :  { %v4699_v35 = vpop.permute.xlu1 %4698 }
0x26af   :  { %v4701_v38 = vsel %vm1417_vm6, %v4695_v19, %v4699_v35 }
0x26b0   :  { %v4703_v7 = vrot.slane %v4701_v38, 2 }
0x26b2   :  { %8120 = vmatmul.mubr.msk.f32.vlgmr.msra.gmra.mxu1 %vm2783_vm10, %v4703_v7  ;;  %v5854_v7 = vsel %vm4219_vm11, %v11461_v54, %v11504_v52 }
0x26b3   :  { %5017 = vmatpush1.msra.mxu1 %v11297_v63  ;;  %5064 = vmatprep.mubr.f32.mxu1 %v9616_v0 }
0x26b4   :  { %5018 = vmatprep.subr.mxu1 %v11302_v56 }
0x26b5   :  { %5019 = vmatpush1.msra.mxu1 %v11307_v46 }
0x26b6   :  { %5020 = vmatprep.subr.mxu1 %v11310_v14 }
0x26b7   :  { %5021 = vmatpush1.msra.mxu1 %v11315_v4 }
0x26b8   :  { %5022 = vmatprep.subr.mxu1 %v11320_v28 }
0x26b9   :  { %5023 = vmatpush1.msra.mxu1 %v11328_v1 }
0x26ba   :  { %5024 = vmatprep.subr.mxu1 %v11333_v13 }
0x26bb   :  { %5025 = vmatpush1.msra.mxu1 %v11337_v25 }
0x26bc   :  { %5026 = vmatprep.subr.mxu1 %v11342_v26 }
0x26bd   :  { %5027 = vmatpush1.msra.mxu1 %v11347_v12 }
0x26be   :  { %5028 = vmatprep.subr.mxu1 %v11351_v45 }
0x26bf   :  { %5029 = vmatpush1.msra.mxu1 %v11358_v39 }
0x26c0   :  { %5030 = vmatprep.subr.mxu1 %v11362_v51 }
0x26c1   :  { %5031 = vmatpush1.msra.mxu1 %v11365_v20 }
0x26c2   :  { %5304 = vmatprep.subr.mxu1 %v11293_v34 }
0x2772   :  { %v4772_v57 = vpop.f32.mrf.mxu1 }
0x2773   :  { %v4779_v53 = vrot.slane %v4772_v57, 4 }
0x2774   :  { %v4774_v24 = vpop.f32.mrf.mxu1 }
0x2775   :  { %v4783_v16 = vadd.f32 %v4779_v53, %v11435_v29  ;;  %v4780_v43 = vrot.slane %v4774_v24, 4 }
0x2777   :  { %9425 = vtanh.f32 %v4783_v16  ;;  %v4784_v17 = vadd.f32 %v4780_v43, %v4691_v59  ;;  %v4785_v27 = vsub.f32 0.0, %v4783_v16 }
0x2779   :  { %9427 = vtanh.f32 %v4784_v17  ;;  %v4792_v5 = vsub.f32 0.0, %v4784_v17  ;;  %v4786_v22 = vmul.f32 1.442695, %v4785_v27  ;;  %v4839_v27 = vrot.slane %v11442_v15, 6 }
0x277b   :  { %v4793_v9 = vmul.f32 1.442695, %v4792_v5  ;;  %9429 = vpow2.f32 %v4786_v22 }
0x277d   :  { %9431 = vpow2.f32 %v4793_v9 }
0x2784   :  { %v9426_v55 = vpop.eup %9425 }
0x2785   :  { %4804 = vrot.lane.b32.xlu0 %v9426_v55, %s9630_s24 }
0x2786   :  { %v9428_v50 = vpop.eup %9427 }
0x2787   :  { %4824 = vrot.lane.b32.xlu1 %v9428_v50, %s9630_s24 }
0x2788   :  { %v9430_v18 = vpop.eup %9429 }
0x2789   :  { %v4788_v31 = vadd.f32 1.0, %v9430_v18 }
0x278a   :  { %v9432_v2 = vpop.eup %9431 }
0x278b   :  { %v4795_v49 = vadd.f32 1.0, %v9432_v2  ;;  %9433 = vrcp.f32 %v4788_v31 }
0x278d   :  { %9435 = vrcp.f32 %v4795_v49 }
0x2798   :  { %v9434_v60 = vpop.eup %9433 }
0x2799   :  { %v4802_v41 = vmul.f32 %v9434_v60, %v4800_v48 }
0x279a   :  { %v9436_v58 = vpop.eup %9435 }
0x279b   :  { %v4822_v23 = vmul.f32 %v9436_v58, %v4820_v37 }
0x27f7   :  { %v4805_v47 = vpop.permute.xlu0 %4804 }
0x27f8   :  { %v4807_v8 = vmul.f32 %v9434_v60, %v4805_v47 }
0x27f9   :  { %v4825_v61 = vpop.permute.xlu1 %4824 }
0x27fa   :  { %v4827_v32 = vmul.f32 %v9436_v58, %v4825_v61  ;;  %4809 = vrot.lane.b32.xlu0 %v4807_v8, %s9631_s25 }
0x27fc   :  { %4829 = vrot.lane.b32.xlu1 %v4827_v32, %s9631_s25 }
0x286c   :  { %v4810_v21 = vpop.permute.xlu0 %4809 }
0x286d   :  { %v11542_v6 = vadd.f32 %v4810_v21, %v4802_v41 }
0x286e   :  { %v4830_v10 = vpop.permute.xlu1 %4829 }
0x286f   :  { %9437 = vtanh.f32 %v11542_v6  ;;  %v11545_v19 = vadd.f32 %v4830_v10, %v4822_v23  ;;  %v4948_v10 = vrot.slane %v11542_v6, 6 }
0x2871   :  { %9439 = vtanh.f32 %v11545_v19 }
0x287c   :  { %v9438_v35 = vpop.eup %9437 }
0x287d   :  { %4815 = vrot.lane.b32.xlu0 %v9438_v35, %s9630_s24  ;;  %v4968_v35 = vrot.slane %v11545_v19, 6 }
0x287e   :  { %v9440_v38 = vpop.eup %9439 }
0x287f   :  { %4835 = vrot.lane.b32.xlu1 %v9440_v38, %s9630_s24 }
0x28ef   :  { %v4816_v30 = vpop.permute.xlu0 %4815 }
0x28f0   :  { %v4818_v36 = vmul.f32 %v9434_v60, %v4816_v30 }
0x28f1   :  { %v4836_v57 = vpop.permute.xlu1 %4835 }
0x28f2   :  { %v11554_v53 = vsel %vm4221_vm12, %v5854_v7, %v4818_v36  ;;  %v11556_v24 = vmul.f32 %v9436_v58, %v4836_v57  ;;  %4842 = vrot.lane.b32.xlu0 %v4818_v36, %s9631_s25 }
0x28f4   :  { %4846 = vrot.lane.b32.xlu1 %v11556_v24, %s9630_s24 }
0x2964   :  { %v4843_v16 = vpop.permute.xlu0 %4842 }
0x2966   :  { %v4847_v43 = vpop.permute.xlu1 %4846 }
0x2967   :  { %v4849_v17 = vsel %vm1417_vm6, %v4843_v16, %v4847_v43 }
0x2968   :  { %v4851_v55 = vrot.slane %v4849_v17, 4 }
0x296a   :  { %8121 = vmatmul.mubr.msk.f32.vlgmr.msra.gmra.mxu0 %vm2783_vm10, %v4851_v55 }
0x296b   :  { %5156 = vmatpush1.msra.mxu0 %v11297_v63  ;;  %5203 = vmatprep.mubr.f32.mxu0 %v9616_v0 }
0x296c   :  { %5157 = vmatprep.subr.mxu0 %v11302_v56 }
0x296d   :  { %5158 = vmatpush1.msra.mxu0 %v11307_v46 }
0x296e   :  { %5159 = vmatprep.subr.mxu0 %v11310_v14 }
0x296f   :  { %5160 = vmatpush1.msra.mxu0 %v11315_v4 }
0x2970   :  { %5161 = vmatprep.subr.mxu0 %v11320_v28 }
0x2971   :  { %5162 = vmatpush1.msra.mxu0 %v11328_v1 }
0x2972   :  { %5163 = vmatprep.subr.mxu0 %v11333_v13 }
0x2973   :  { %5164 = vmatpush1.msra.mxu0 %v11337_v25 }
0x2974   :  { %5165 = vmatprep.subr.mxu0 %v11342_v26 }
0x2975   :  { %5166 = vmatpush1.msra.mxu0 %v11347_v12 }
0x2976   :  { %5167 = vmatprep.subr.mxu0 %v11351_v45 }
0x2977   :  { %5168 = vmatpush1.msra.mxu0 %v11358_v39 }
0x2978   :  { %5169 = vmatprep.subr.mxu0 %v11362_v51 }
0x2979   :  { %5170 = vmatpush1.msra.mxu0 %v11365_v20 }
0x297a   :  { %5452 = vmatprep.subr.mxu0 %v11293_v34 }
0x2a2a   :  { %v4920_v54 = vpop.f32.mrf.mxu0 }
0x2a2b   :  { %v4927_v52 = vrot.slane %v4920_v54, 2 }
0x2a2c   :  { %v4922_v50 = vpop.f32.mrf.mxu0 }
0x2a2d   :  { %v4931_v5 = vadd.f32 %v4927_v52, %v11435_v29  ;;  %v4928_v22 = vrot.slane %v4922_v50, 2 }
0x2a2f   :  { %9441 = vtanh.f32 %v4931_v5  ;;  %v4932_v9 = vadd.f32 %v4928_v22, %v4839_v27  ;;  %v4933_v31 = vsub.f32 0.0, %v4931_v5 }
0x2a31   :  { %9443 = vtanh.f32 %v4932_v9  ;;  %v4940_v49 = vsub.f32 0.0, %v4932_v9  ;;  %v4934_v60 = vmul.f32 1.442695, %v4933_v31 }
0x2a33   :  { %v4941_v47 = vmul.f32 1.442695, %v4940_v49  ;;  %9445 = vpow2.f32 %v4934_v60 }
0x2a35   :  { %9447 = vpow2.f32 %v4941_v47 }
0x2a3c   :  { %v9442_v18 = vpop.eup %9441 }
0x2a3d   :  { %4952 = vrot.lane.b32.xlu0 %v9442_v18, %s9630_s24 }
0x2a3e   :  { %v9444_v2 = vpop.eup %9443 }
0x2a3f   :  { %4972 = vrot.lane.b32.xlu1 %v9444_v2, %s9630_s24 }
0x2a40   :  { %v9446_v8 = vpop.eup %9445 }
0x2a41   :  { %v4936_v58 = vadd.f32 1.0, %v9446_v8 }
0x2a42   :  { %v9448_v29 = vpop.eup %9447 }
0x2a43   :  { %v4943_v61 = vadd.f32 1.0, %v9448_v29  ;;  %9449 = vrcp.f32 %v4936_v58 }
0x2a45   :  { %9451 = vrcp.f32 %v4943_v61 }
0x2a50   :  { %v9450_v32 = vpop.eup %9449 }
0x2a51   :  { %v4950_v38 = vmul.f32 %v9450_v32, %v4948_v10 }
0x2a52   :  { %v9452_v41 = vpop.eup %9451 }
0x2a53   :  { %v4970_v7 = vmul.f32 %v9452_v41, %v4968_v35 }
0x2aaf   :  { %v4953_v48 = vpop.permute.xlu0 %4952 }
0x2ab0   :  { %v4955_v37 = vmul.f32 %v9450_v32, %v4953_v48 }
0x2ab1   :  { %v4973_v21 = vpop.permute.xlu1 %4972 }
0x2ab2   :  { %v4975_v23 = vmul.f32 %v9452_v41, %v4973_v21  ;;  %4957 = vrot.lane.b32.xlu0 %v4955_v37, %s9631_s25 }
0x2ab4   :  { %4977 = vrot.lane.b32.xlu1 %v4975_v23, %s9631_s25 }
0x2b24   :  { %v4958_v30 = vpop.permute.xlu0 %4957 }
0x2b25   :  { %v11590_v36 = vadd.f32 %v4958_v30, %v4950_v38 }
0x2b26   :  { %v4978_v57 = vpop.permute.xlu1 %4977 }
0x2b27   :  { %9453 = vtanh.f32 %v11590_v36  ;;  %v11593_v16 = vadd.f32 %v4978_v57, %v4970_v7  ;;  %v5088_v35 = vrot.slane %v11590_v36, 6 }
0x2b29   :  { %9455 = vtanh.f32 %v11593_v16  ;;  %v5108_v38 = vrot.slane %v11593_v16, 6 }
0x2b34   :  { %v9454_v43 = vpop.eup %9453 }
0x2b35   :  { %4963 = vrot.lane.b32.xlu0 %v9454_v43, %s9630_s24 }
0x2b36   :  { %v9456_v17 = vpop.eup %9455 }
0x2b37   :  { %4983 = vrot.lane.b32.xlu1 %v9456_v17, %s9630_s24 }
0x2ba7   :  { %v4964_v6 = vpop.permute.xlu0 %4963 }
0x2ba8   :  { %v4966_v19 = vmul.f32 %v9450_v32, %v4964_v6 }
0x2ba9   :  { %v4984_v55 = vpop.permute.xlu1 %4983 }
0x2baa   :  { %v11598_v54 = vmul.f32 %v9452_v41, %v4984_v55  ;;  %4988 = vrot.lane.b32.xlu0 %v4966_v19, %s9631_s25  ;;  %v11603_v52 = vsel %vm767_vm2, %v11554_v53, %v4966_v19 }
0x2bac   :  { %4992 = vrot.lane.b32.xlu1 %v11598_v54, %s9630_s24 }
0x2c1c   :  { %v4989_v50 = vpop.permute.xlu0 %4988 }
0x2c1e   :  { %v4993_v5 = vpop.permute.xlu1 %4992 }
0x2c1f   :  { %v4995_v22 = vsel %vm1417_vm6, %v4989_v50, %v4993_v5 }
0x2c20   :  { %v4997_v9 = vrot.slane %v4995_v22, 6 }
0x2c22   :  { %8122 = vmatmul.mubr.msk.f32.vlgmr.msra.gmra.mxu1 %vm2783_vm10, %v4997_v9 }
0x2c23   :  { %5305 = vmatpush1.msra.mxu1 %v11297_v63  ;;  %5352 = vmatprep.mubr.f32.mxu1 %v9616_v0 }
0x2c24   :  { %5306 = vmatprep.subr.mxu1 %v11302_v56 }
0x2c25   :  { %5307 = vmatpush1.msra.mxu1 %v11307_v46 }
0x2c26   :  { %5308 = vmatprep.subr.mxu1 %v11310_v14 }
0x2c27   :  { %5309 = vmatpush1.msra.mxu1 %v11315_v4 }
0x2c28   :  { %5310 = vmatprep.subr.mxu1 %v11320_v28 }
0x2c29   :  { %5311 = vmatpush1.msra.mxu1 %v11328_v1 }
0x2c2a   :  { %5312 = vmatprep.subr.mxu1 %v11333_v13 }
0x2c2b   :  { %5313 = vmatpush1.msra.mxu1 %v11337_v25 }
0x2c2c   :  { %5314 = vmatprep.subr.mxu1 %v11342_v26 }
0x2c2d   :  { %5315 = vmatpush1.msra.mxu1 %v11347_v12 }
0x2c2e   :  { %5316 = vmatprep.subr.mxu1 %v11351_v45 }
0x2c2f   :  { %5317 = vmatpush1.msra.mxu1 %v11358_v39 }
0x2c30   :  { %5318 = vmatprep.subr.mxu1 %v11362_v51 }
0x2c31   :  { %5319 = vmatpush1.msra.mxu1 %v11365_v20 }
0x2c32   :  { %5598 = vmatprep.subr.mxu1 %v11293_v34 }
0x2ce2   :  { %v5066_v53 = vpop.f32.mrf.mxu1 }
0x2ce3   :  { %v5071_v18 = vadd.f32 %v5066_v53, %v11440_v62 }
0x2ce4   :  { %v5068_v2 = vpop.f32.mrf.mxu1 }
0x2ce5   :  { %9457 = vtanh.f32 %v5071_v18  ;;  %v5072_v31 = vadd.f32 %v5068_v2, %v4691_v59  ;;  %v5073_v47 = vsub.f32 0.0, %v5071_v18 }
0x2ce7   :  { %9459 = vtanh.f32 %v5072_v31  ;;  %v5080_v8 = vsub.f32 0.0, %v5072_v31  ;;  %v5074_v29 = vmul.f32 1.442695, %v5073_v47 }
0x2ce9   :  { %v5081_v58 = vmul.f32 1.442695, %v5080_v8  ;;  %9461 = vpow2.f32 %v5074_v29 }
0x2ceb   :  { %9463 = vpow2.f32 %v5081_v58 }
0x2cf2   :  { %v9458_v49 = vpop.eup %9457 }
0x2cf3   :  { %5092 = vrot.lane.b32.xlu0 %v9458_v49, %s9630_s24 }
0x2cf4   :  { %v9460_v60 = vpop.eup %9459 }
0x2cf5   :  { %5112 = vrot.lane.b32.xlu1 %v9460_v60, %s9630_s24 }
0x2cf6   :  { %v9462_v34 = vpop.eup %9461 }
0x2cf7   :  { %v5076_v32 = vadd.f32 1.0, %v9462_v34 }
0x2cf8   :  { %v9464_v61 = vpop.eup %9463 }
0x2cf9   :  { %v5083_v48 = vadd.f32 1.0, %v9464_v61  ;;  %9465 = vrcp.f32 %v5076_v32 }
0x2cfb   :  { %9467 = vrcp.f32 %v5083_v48 }
0x2d06   :  { %v9466_v59 = vpop.eup %9465 }
0x2d07   :  { %v5090_v30 = vmul.f32 %v9466_v59, %v5088_v35 }
0x2d08   :  { %v9468_v21 = vpop.eup %9467 }
0x2d09   :  { %v5110_v43 = vmul.f32 %v9468_v21, %v5108_v38 }
0x2d65   :  { %v5093_v37 = vpop.permute.xlu0 %5092 }
0x2d66   :  { %v5095_v41 = vmul.f32 %v9466_v59, %v5093_v37 }
0x2d67   :  { %v5113_v23 = vpop.permute.xlu1 %5112 }
0x2d68   :  { %v5115_v10 = vmul.f32 %v9468_v21, %v5113_v23  ;;  %5097 = vrot.lane.b32.xlu0 %v5095_v41, %s9631_s25 }
0x2d6a   :  { %5117 = vrot.lane.b32.xlu1 %v5115_v10, %s9631_s25 }
0x2dda   :  { %v5098_v7 = vpop.permute.xlu0 %5097 }
0x2ddb   :  { %v11635_v57 = vadd.f32 %v5098_v7, %v5090_v30  ;;  %v5874_v7 = vrot.slane %v11598_v54, 2  ;;  %v11708_v54 = vld [vmem:[%s11285_s3 + $0x68] sm:$0xff] }
0x2ddc   :  { %v5118_v17 = vpop.permute.xlu1 %5117 }
0x2ddd   :  { %9469 = vtanh.f32 %v11635_v57  ;;  %v11638_v6 = vadd.f32 %v5118_v17, %v5110_v43  ;;  %v5233_v8 = vrot.slane %v11635_v57, 6  ;;  %v5876_v57 = vrot.slane %v11556_v24, 6  ;;  %v11703_v24 = vld [vmem:[%s11285_s3 + $0x70] sm:$0xff] }
0x2ddf   :  { %9471 = vtanh.f32 %v11638_v6  ;;  %v5253_v29 = vrot.slane %v11638_v6, 6 }
0x2dea   :  { %v9470_v19 = vpop.eup %9469 }
0x2deb   :  { %5103 = vrot.lane.b32.xlu0 %v9470_v19, %s9630_s24 }
0x2dec   :  { %v9472_v55 = vpop.eup %9471 }
0x2ded   :  { %5123 = vrot.lane.b32.xlu1 %v9472_v55, %s9630_s24 }
0x2e5d   :  { %v5104_v36 = vpop.permute.xlu0 %5103 }
0x2e5e   :  { %v11643_v16 = vmul.f32 %v9466_v59, %v5104_v36 }
0x2e5f   :  { %v5124_v50 = vpop.permute.xlu1 %5123 }
0x2e60   :  { %v11645_v5 = vmul.f32 %v9468_v21, %v5124_v50  ;;  %5128 = vrot.lane.b32.xlu0 %v11643_v16, %s9631_s25 }
0x2e62   :  { %5132 = vrot.lane.b32.xlu1 %v11645_v5, %s9630_s24  ;;  %v5872_v38 = vrot.slane %v11645_v5, 6  ;;  %v11712_v5 = vld [vmem:[%s11285_s3 + $0x60] sm:$0xff] }
0x2ed2   :  { %v5129_v22 = vpop.permute.xlu0 %5128 }
0x2ed4   :  { %v5133_v9 = vpop.permute.xlu1 %5132 }
0x2ed5   :  { %v5135_v53 = vsel %vm1417_vm6, %v5129_v22, %v5133_v9  ;;  %v11716_v22 = vld [vmem:[%s11285_s3 + $0x58] sm:$0xff]  ;;  %v11720_v9 = vld [vmem:[%s11285_s3 + $0x50] sm:$0xff] }
0x2ed6   :  { %8123 = vmatmul.mubr.msk.f32.vlgmr.msra.gmra.mxu0 %vm2783_vm10, %v5135_v53  ;;  %v11724_v53 = vld [vmem:[%s11285_s3 + $0x48] sm:$0xff] }
0x2ed7   :  { %5453 = vmatpush1.msra.mxu0 %v11297_v63  ;;  %5500 = vmatprep.mubr.f32.mxu0 %v9616_v0  ;;  %v9600_v63 = vld [vmem:[%s11285_s3 + $0x78] sm:$0xff] }
0x2ed8   :  { %5454 = vmatprep.subr.mxu0 %v11302_v56 }
0x2ed9   :  { %5455 = vmatpush1.msra.mxu0 %v11307_v46 }
0x2eda   :  { %5456 = vmatprep.subr.mxu0 %v11310_v14 }
0x2edb   :  { %5457 = vmatpush1.msra.mxu0 %v11315_v4 }
0x2edc   :  { %5458 = vmatprep.subr.mxu0 %v11320_v28 }
0x2edd   :  { %5459 = vmatpush1.msra.mxu0 %v11328_v1 }
0x2ede   :  { %5460 = vmatprep.subr.mxu0 %v11333_v13 }
0x2edf   :  { %5461 = vmatpush1.msra.mxu0 %v11337_v25 }
0x2ee0   :  { %5462 = vmatprep.subr.mxu0 %v11342_v26 }
0x2ee1   :  { %5463 = vmatpush1.msra.mxu0 %v11347_v12 }
0x2ee2   :  { %5464 = vmatprep.subr.mxu0 %v11351_v45 }
0x2ee3   :  { %5465 = vmatpush1.msra.mxu0 %v11358_v39 }
0x2ee4   :  { %5466 = vmatprep.subr.mxu0 %v11362_v51 }
0x2ee5   :  { %5467 = vmatpush1.msra.mxu0 %v11365_v20 }
0x2ee6   :  { %5737 = vmatprep.subr.mxu0 %v9600_v63  ;;  %v11728_v63 = vld [vmem:[%s11285_s3 + $0x40] sm:$0xff] }
0x2f96   :  { %v5205_v56 = vpop.f32.mrf.mxu0 }
0x2f97   :  { %v5212_v46 = vrot.slane %v5205_v56, 6  ;;  %v11732_v56 = vld [vmem:[%s11285_s3 + $0x38] sm:$0xff] }
0x2f98   :  { %v5207_v14 = vpop.f32.mrf.mxu0 }
0x2f99   :  { %v5216_v4 = vadd.f32 %v5212_v46, %v11440_v62  ;;  %v5213_v28 = vrot.slane %v5207_v14, 6  ;;  %v11736_v46 = vld [vmem:[%s11285_s3 + $0x30] sm:$0xff]  ;;  %v11740_v14 = vld [vmem:[%s11285_s3 + $0x28] sm:$0xff] }
0x2f9b   :  { %9473 = vtanh.f32 %v5216_v4  ;;  %v5217_v1 = vadd.f32 %v5213_v28, %v4839_v27  ;;  %v5218_v26 = vsub.f32 0.0, %v5216_v4  ;;  %v11744_v4 = vld [vmem:[%s11285_s3 + $0x20] sm:$0xff]  ;;  %v11748_v28 = vld [vmem:[%s11285_s3 + $0x18] sm:$0xff] }
0x2f9d   :  { %9475 = vtanh.f32 %v5217_v1  ;;  %v5225_v12 = vsub.f32 0.0, %v5217_v1  ;;  %v5219_v45 = vmul.f32 1.442695, %v5218_v26  ;;  %v11752_v1 = vld [vmem:[%s11285_s3 + $0x10] sm:$0xff] }
0x2f9f   :  { %v5226_v39 = vmul.f32 1.442695, %v5225_v12  ;;  %9477 = vpow2.f32 %v5219_v45 }
0x2fa1   :  { %9479 = vpow2.f32 %v5226_v39  ;;  %v5273_v39 = vrot.slane %v11437_v40, 2 }
0x2fa8   :  { %v9474_v13 = vpop.eup %9473 }
0x2fa9   :  { %5237 = vrot.lane.b32.xlu0 %v9474_v13, %s9630_s24  ;;  %v11756_v13 = vld [vmem:[%s11285_s3 + $0x8] sm:$0xff] }
0x2faa   :  { %v9476_v25 = vpop.eup %9475 }
0x2fab   :  { %5257 = vrot.lane.b32.xlu1 %v9476_v25, %s9630_s24  ;;  %v11760_v25 = vld [vmem:[%s11285_s3] sm:$0xff]  ;;  %s12099_s3 = sld [smem:[%s12413_s0 + %s9640_s30]]   ;;  %s9647_s30 = smov 25  }
0x2fac   :  { %v9478_v51 = vpop.eup %9477 }
0x2fad   :  { %v5221_v18 = vadd.f32 1.0, %v9478_v51 }
0x2fae   :  { %v9480_v20 = vpop.eup %9479 }
0x2faf   :  { %v5228_v2 = vadd.f32 1.0, %v9480_v20  ;;  %9481 = vrcp.f32 %v5221_v18 }
0x2fb1   :  { %9483 = vrcp.f32 %v5228_v2 }
0x2fbc   :  { %v9482_v15 = vpop.eup %9481 }
0x2fbd   :  { %v5235_v58 = vmul.f32 %v9482_v15, %v5233_v8 }
0x2fbe   :  { %v9484_v49 = vpop.eup %9483 }
0x2fbf   :  { %v5255_v32 = vmul.f32 %v9484_v49, %v5253_v29 }
0x301b   :  { %v5238_v27 = vpop.permute.xlu0 %5237 }
0x301c   :  { %v5240_v31 = vmul.f32 %v9482_v15, %v5238_v27 }
0x301d   :  { %v5258_v60 = vpop.permute.xlu1 %5257 }
0x301e   :  { %v5260_v47 = vmul.f32 %v9484_v49, %v5258_v60  ;;  %5242 = vrot.lane.b32.xlu0 %v5240_v31, %s9631_s25 }
0x3020   :  { %5262 = vrot.lane.b32.xlu1 %v5260_v47, %s9631_s25 }
0x3090   :  { %v5243_v34 = vpop.permute.xlu0 %5242 }
0x3091   :  { %v11679_v61 = vadd.f32 %v5243_v34, %v5235_v58 }
0x3092   :  { %v5263_v48 = vpop.permute.xlu1 %5262 }
0x3093   :  { %9485 = vtanh.f32 %v11679_v61  ;;  %v11682_v59 = vadd.f32 %v5263_v48, %v5255_v32 }
0x3095   :  { %9487 = vtanh.f32 %v11682_v59 }
0x30a0   :  { %v9486_v37 = vpop.eup %9485 }
0x30a1   :  { %5248 = vrot.lane.b32.xlu0 %v9486_v37, %s9630_s24 }
0x30a2   :  { %v9488_v41 = vpop.eup %9487 }
0x30a3   :  { %5268 = vrot.lane.b32.xlu1 %v9488_v41, %s9630_s24 }
0x3113   :  { %v5249_v21 = vpop.permute.xlu0 %5248 }
0x3114   :  { %v11687_v23 = vmul.f32 %v9482_v15, %v5249_v21 }
0x3115   :  { %v5269_v10 = vpop.permute.xlu1 %5268 }
0x3116   :  { %v5271_v35 = vmul.f32 %v9484_v49, %v5269_v10  ;;  %5276 = vrot.lane.b32.xlu0 %v11687_v23, %s9631_s25  ;;  %v5382_v10 = vrot.slane %v11679_v61, 6 }
0x3118   :  { %v5870_v30 = vrot.slane %v5271_v35, 2  ;;  %5280 = vrot.lane.b32.xlu1 %v5271_v35, %s9630_s24  ;;  %v5402_v35 = vrot.slane %v11682_v59, 6 }
0x311a   :  { %v5885_v43 = vsel %vm4219_vm11, %v5870_v30, %v5872_v38 }
0x311b   :  { %v5886_v17 = vsel %vm4221_vm12, %v5885_v43, %v5874_v7 }
0x311c   :  { %v11698_v6 = vsel %vm767_vm2, %v5886_v17, %v5876_v57 }
0x3188   :  { %v5277_v19 = vpop.permute.xlu0 %5276 }
0x318a   :  { %v5281_v55 = vpop.permute.xlu1 %5280 }
0x318b   :  { %v5283_v36 = vsel %vm1417_vm6, %v5277_v19, %v5281_v55 }
0x318c   :  { %v5285_v50 = vrot.slane %v5283_v36, 2  ;;  %v5857_v36 = vsel %vm4219_vm11, %v11643_v16, %v11687_v23 }
0x318e   :  { %8124 = vmatmul.mubr.msk.f32.vlgmr.msra.gmra.mxu1 %vm2783_vm10, %v5285_v50 }
0x318f   :  { %5599 = vmatpush1.msra.mxu1 %v11703_v24  ;;  %5646 = vmatprep.mubr.f32.mxu1 %v9616_v0 }
0x3190   :  { %5600 = vmatprep.subr.mxu1 %v11708_v54 }
0x3191   :  { %5601 = vmatpush1.msra.mxu1 %v11712_v5 }
0x3192   :  { %5602 = vmatprep.subr.mxu1 %v11716_v22 }
0x3193   :  { %5603 = vmatpush1.msra.mxu1 %v11720_v9 }
0x3194   :  { %5604 = vmatprep.subr.mxu1 %v11724_v53 }
0x3195   :  { %5605 = vmatpush1.msra.mxu1 %v11728_v63 }
0x3196   :  { %5606 = vmatprep.subr.mxu1 %v11732_v56 }
0x3197   :  { %5607 = vmatpush1.msra.mxu1 %v11736_v46 }
0x3198   :  { %5608 = vmatprep.subr.mxu1 %v11740_v14 }
0x3199   :  { %5609 = vmatpush1.msra.mxu1 %v11744_v4 }
0x319a   :  { %5610 = vmatprep.subr.mxu1 %v11748_v28 }
0x319b   :  { %5611 = vmatpush1.msra.mxu1 %v11752_v1 }
0x319c   :  { %5612 = vmatprep.subr.mxu1 %v11756_v13 }
0x319d   :  { %5613 = vmatpush1.msra.mxu1 %v11760_v25 }
0x324e   :  { %v5354_v26 = vpop.f32.mrf.mxu1 }
0x324f   :  { %v5361_v12 = vrot.slane %v5354_v26, 4 }
0x3250   :  { %v5356_v45 = vpop.f32.mrf.mxu1 }
0x3251   :  { %v5365_v51 = vadd.f32 %v5361_v12, %v11440_v62  ;;  %v5362_v20 = vrot.slane %v5356_v45, 4 }
0x3253   :  { %9489 = vtanh.f32 %v5365_v51  ;;  %v5366_v18 = vadd.f32 %v5362_v20, %v5273_v39  ;;  %v5367_v27 = vsub.f32 0.0, %v5365_v51 }
0x3255   :  { %9491 = vtanh.f32 %v5366_v18  ;;  %v5374_v31 = vsub.f32 0.0, %v5366_v18  ;;  %v5368_v49 = vmul.f32 1.442695, %v5367_v27 }
0x3257   :  { %v5375_v60 = vmul.f32 1.442695, %v5374_v31  ;;  %9493 = vpow2.f32 %v5368_v49 }
0x3259   :  { %9495 = vpow2.f32 %v5375_v60 }
0x3260   :  { %v9490_v2 = vpop.eup %9489 }
0x3261   :  { %5386 = vrot.lane.b32.xlu0 %v9490_v2, %s9630_s24 }
0x3262   :  { %v9492_v15 = vpop.eup %9491 }
0x3263   :  { %5406 = vrot.lane.b32.xlu1 %v9492_v15, %s9630_s24 }
0x3264   :  { %v9494_v47 = vpop.eup %9493 }
0x3265   :  { %v5370_v29 = vadd.f32 1.0, %v9494_v47 }
0x3266   :  { %v9496_v8 = vpop.eup %9495 }
0x3267   :  { %v5377_v58 = vadd.f32 1.0, %v9496_v8  ;;  %9497 = vrcp.f32 %v5370_v29 }
0x3269   :  { %9499 = vrcp.f32 %v5377_v58 }
0x3274   :  { %v9498_v34 = vpop.eup %9497 }
0x3275   :  { %v5384_v38 = vmul.f32 %v9498_v34, %v5382_v10 }
0x3276   :  { %v9500_v37 = vpop.eup %9499 }
0x3277   :  { %v5404_v57 = vmul.f32 %v9500_v37, %v5402_v35 }
0x32d3   :  { %v5387_v32 = vpop.permute.xlu0 %5386 }
0x32d4   :  { %v5389_v48 = vmul.f32 %v9498_v34, %v5387_v32 }
0x32d5   :  { %v5407_v41 = vpop.permute.xlu1 %5406 }
0x32d6   :  { %v5409_v21 = vmul.f32 %v9500_v37, %v5407_v41  ;;  %5391 = vrot.lane.b32.xlu0 %v5389_v48, %s9631_s25 }
0x32d8   :  { %5411 = vrot.lane.b32.xlu1 %v5409_v21, %s9631_s25 }
0x3348   :  { %v5392_v30 = vpop.permute.xlu0 %5391 }
0x3349   :  { %v11773_v7 = vadd.f32 %v5392_v30, %v5384_v38 }
0x334a   :  { %v5412_v43 = vpop.permute.xlu1 %5411 }
0x334b   :  { %9501 = vtanh.f32 %v11773_v7  ;;  %v11776_v17 = vadd.f32 %v5412_v43, %v5404_v57  ;;  %v5530_v60 = vrot.slane %v11773_v7, 6 }
0x334d   :  { %9503 = vtanh.f32 %v11776_v17  ;;  %v5550_v47 = vrot.slane %v11776_v17, 6 }
0x3358   :  { %v9502_v19 = vpop.eup %9501 }
0x3359   :  { %5397 = vrot.lane.b32.xlu0 %v9502_v19, %s9630_s24 }
0x335a   :  { %v9504_v55 = vpop.eup %9503 }
0x335b   :  { %5417 = vrot.lane.b32.xlu1 %v9504_v55, %s9630_s24 }
0x33cb   :  { %v5398_v61 = vpop.permute.xlu0 %5397 }
0x33cc   :  { %v5400_v59 = vmul.f32 %v9498_v34, %v5398_v61 }
0x33cd   :  { %v5418_v50 = vpop.permute.xlu1 %5417 }
0x33ce   :  { %v11785_v26 = vsel %vm4221_vm12, %v5857_v36, %v5400_v59  ;;  %v11787_v12 = vmul.f32 %v9500_v37, %v5418_v50  ;;  %5424 = vrot.lane.b32.xlu0 %v5400_v59, %s9631_s25 }
0x33d0   :  { %5428 = vrot.lane.b32.xlu1 %v11787_v12, %s9630_s24 }
0x3440   :  { %v5425_v45 = vpop.permute.xlu0 %5424 }
0x3442   :  { %v5429_v51 = vpop.permute.xlu1 %5428 }
0x3443   :  { %v5431_v20 = vsel %vm1417_vm6, %v5425_v45, %v5429_v51 }
0x3444   :  { %v5433_v18 = vrot.slane %v5431_v20, 4 }
0x3446   :  { %8125 = vmatmul.mubr.msk.f32.vlgmr.msra.gmra.mxu0 %vm2783_vm10, %v5433_v18 }
0x3447   :  { %5738 = vmatpush1.msra.mxu0 %v11703_v24  ;;  %5785 = vmatprep.mubr.f32.mxu0 %v9616_v0 }
0x3448   :  { %5739 = vmatprep.subr.mxu0 %v11708_v54  ;;  %v5421_v54 = vrot.slane %v11437_v40, 6 }
0x3449   :  { %5740 = vmatpush1.msra.mxu0 %v11712_v5 }
0x344a   :  { %5741 = vmatprep.subr.mxu0 %v11716_v22 }
0x344b   :  { %5742 = vmatpush1.msra.mxu0 %v11720_v9 }
0x344c   :  { %5743 = vmatprep.subr.mxu0 %v11724_v53 }
0x344d   :  { %5744 = vmatpush1.msra.mxu0 %v11728_v63 }
0x344e   :  { %5745 = vmatprep.subr.mxu0 %v11732_v56 }
0x344f   :  { %5746 = vmatpush1.msra.mxu0 %v11736_v46 }
0x3450   :  { %5747 = vmatprep.subr.mxu0 %v11740_v14 }
0x3451   :  { %5748 = vmatpush1.msra.mxu0 %v11744_v4 }
0x3452   :  { %5749 = vmatprep.subr.mxu0 %v11748_v28 }
0x3453   :  { %5750 = vmatpush1.msra.mxu0 %v11752_v1 }
0x3454   :  { %5751 = vmatprep.subr.mxu0 %v11756_v13 }
0x3455   :  { %5752 = vmatpush1.msra.mxu0 %v11760_v25 }
0x3456   :  { %8970 = vmatprep.subr.mxu0 %v9616_v0 }
0x3506   :  { %v5502_v16 = vpop.f32.mrf.mxu0 }
0x3507   :  { %v5509_v23 = vrot.slane %v5502_v16, 2 }
0x3508   :  { %v5504_v24 = vpop.f32.mrf.mxu0 }
0x3509   :  { %v5513_v5 = vadd.f32 %v5509_v23, %v11440_v62  ;;  %v5510_v22 = vrot.slane %v5504_v24, 2 }
0x350b   :  { %9505 = vtanh.f32 %v5513_v5  ;;  %v5514_v9 = vadd.f32 %v5510_v22, %v5421_v54  ;;  %v5515_v56 = vsub.f32 0.0, %v5513_v5 }
0x350d   :  { %9507 = vtanh.f32 %v5514_v9  ;;  %v5522_v46 = vsub.f32 0.0, %v5514_v9  ;;  %v5516_v14 = vmul.f32 1.442695, %v5515_v56 }
0x350f   :  { %v5523_v4 = vmul.f32 1.442695, %v5522_v46  ;;  %9509 = vpow2.f32 %v5516_v14 }
0x3511   :  { %9511 = vpow2.f32 %v5523_v4 }
0x3518   :  { %v9506_v53 = vpop.eup %9505 }
0x3519   :  { %5534 = vrot.lane.b32.xlu0 %v9506_v53, %s9630_s24 }
0x351a   :  { %v9508_v63 = vpop.eup %9507 }
0x351b   :  { %5554 = vrot.lane.b32.xlu1 %v9508_v63, %s9630_s24 }
0x351c   :  { %v9510_v28 = vpop.eup %9509 }
0x351d   :  { %v5518_v1 = vadd.f32 1.0, %v9510_v28 }
0x351e   :  { %v9512_v62 = vpop.eup %9511 }
0x351f   :  { %v5525_v13 = vadd.f32 1.0, %v9512_v62  ;;  %9513 = vrcp.f32 %v5518_v1 }
0x3521   :  { %9515 = vrcp.f32 %v5525_v13 }
0x352c   :  { %v9514_v25 = vpop.eup %9513 }
0x352d   :  { %v5532_v8 = vmul.f32 %v9514_v25, %v5530_v60 }
0x352e   :  { %v9516_v27 = vpop.eup %9515 }
0x352f   :  { %v5552_v34 = vmul.f32 %v9516_v27, %v5550_v47 }
0x358b   :  { %v5535_v2 = vpop.permute.xlu0 %5534 }
0x358c   :  { %v5537_v15 = vmul.f32 %v9514_v25, %v5535_v2 }
0x358d   :  { %v5555_v31 = vpop.permute.xlu1 %5554 }
0x358e   :  { %v5557_v49 = vmul.f32 %v9516_v27, %v5555_v31  ;;  %5539 = vrot.lane.b32.xlu0 %v5537_v15, %s9631_s25 }
0x3590   :  { %5559 = vrot.lane.b32.xlu1 %v5557_v49, %s9631_s25 }
0x3600   :  { %v5540_v29 = vpop.permute.xlu0 %5539 }
0x3601   :  { %v5542_v58 = vadd.f32 %v5540_v29, %v5532_v8 }
0x3602   :  { %v5560_v32 = vpop.permute.xlu1 %5559 }
0x3603   :  { %9517 = vtanh.f32 %v5542_v58  ;;  %v5562_v48 = vadd.f32 %v5560_v32, %v5552_v34  ;;  %v5670_v56 = vrot.slane %v5542_v58, 6 }
0x3605   :  { %9519 = vtanh.f32 %v5562_v48  ;;  %v5690_v46 = vrot.slane %v5562_v48, 6 }
0x3610   :  { %v9518_v37 = vpop.eup %9517 }
0x3611   :  { %5545 = vrot.lane.b32.xlu0 %v9518_v37, %s9630_s24 }
0x3612   :  { %v9520_v41 = vpop.eup %9519 }
0x3613   :  { %5565 = vrot.lane.b32.xlu1 %v9520_v41, %s9630_s24 }
0x3683   :  { %v5546_v21 = vpop.permute.xlu0 %5545 }
0x3684   :  { %v5548_v10 = vmul.f32 %v9514_v25, %v5546_v21 }
0x3685   :  { %v5566_v35 = vpop.permute.xlu1 %5565 }
0x3686   :  { %v11823_v38 = vmul.f32 %v9516_v27, %v5566_v35  ;;  %5570 = vrot.lane.b32.xlu0 %v5548_v10, %s9631_s25  ;;  %v11828_v30 = vsel %vm767_vm2, %v11785_v26, %v5548_v10 }
0x3688   :  { %5574 = vrot.lane.b32.xlu1 %v11823_v38, %s9630_s24 }
0x36f8   :  { %v5571_v7 = vpop.permute.xlu0 %5570 }
0x36fa   :  { %v5575_v57 = vpop.permute.xlu1 %5574 }
0x36fb   :  { %v5577_v43 = vsel %vm1417_vm6, %v5571_v7, %v5575_v57 }
0x36fc   :  { %v5579_v17 = vrot.slane %v5577_v43, 6 }
0x36fe   :  { %8126 = vmatmul.mubr.msk.f32.vlgmr.msra.gmra.mxu1 %vm2783_vm10, %v5579_v17 }
0x36ff   :  { %6017 = vmatprep.mubr.f32.mxu1 %v9616_v0 }
0x37be   :  { %v5648_v19 = vpop.f32.mrf.mxu1 }
0x37bf   :  { %v5653_v55 = vadd.f32 %v5648_v19, %v11444_v3 }
0x37c0   :  { %v5650_v61 = vpop.f32.mrf.mxu1 }
0x37c1   :  { %9521 = vtanh.f32 %v5653_v55  ;;  %v5654_v59 = vadd.f32 %v5650_v61, %v5273_v39  ;;  %v5655_v26 = vsub.f32 0.0, %v5653_v55 }
0x37c3   :  { %9523 = vtanh.f32 %v5654_v59  ;;  %v5662_v45 = vsub.f32 0.0, %v5654_v59  ;;  %v5656_v51 = vmul.f32 1.442695, %v5655_v26 }
0x37c5   :  { %v5663_v20 = vmul.f32 1.442695, %v5662_v45  ;;  %9525 = vpow2.f32 %v5656_v51 }
0x37c7   :  { %9527 = vpow2.f32 %v5663_v20 }
0x37ce   :  { %v9522_v36 = vpop.eup %9521 }
0x37cf   :  { %5674 = vrot.lane.b32.xlu0 %v9522_v36, %s9630_s24 }
0x37d0   :  { %v9524_v50 = vpop.eup %9523 }
0x37d1   :  { %5694 = vrot.lane.b32.xlu1 %v9524_v50, %s9630_s24 }
0x37d2   :  { %v9526_v18 = vpop.eup %9525 }
0x37d3   :  { %v5658_v23 = vadd.f32 1.0, %v9526_v18 }
0x37d4   :  { %v9528_v16 = vpop.eup %9527 }
0x37d5   :  { %v5665_v24 = vadd.f32 1.0, %v9528_v16  ;;  %9529 = vrcp.f32 %v5658_v23 }
0x37d7   :  { %9531 = vrcp.f32 %v5665_v24 }
0x37e2   :  { %v9530_v39 = vpop.eup %9529 }
0x37e3   :  { %v5672_v14 = vmul.f32 %v9530_v39, %v5670_v56  ;;  %v5926_v56 = vld [vmem:[%s11868_s11 + $0x50] sm:$0xff] }
0x37e4   :  { %v9532_v9 = vpop.eup %9531 }
0x37e5   :  { %v5692_v62 = vmul.f32 %v9532_v9, %v5690_v46  ;;  %v5924_v46 = vld [vmem:[%s11868_s11 + $0x40] sm:$0xff] }
0x3841   :  { %v5675_v5 = vpop.permute.xlu0 %5674 }
0x3842   :  { %v5677_v22 = vmul.f32 %v9530_v39, %v5675_v5  ;;  %v5931_v5 = vld [vmem:[%s11868_s11 + $0x78] sm:$0xff] }
0x3843   :  { %v5695_v53 = vpop.permute.xlu1 %5694  ;;  %5969 = vmatprep.subr.mxu1 %v5931_v5  ;;  %v11994_v5 = vld [vmem:[%s11935_s19 + $0x20] sm:$0xff] }
0x3844   :  { %v5697_v63 = vmul.f32 %v9532_v9, %v5695_v53  ;;  %5679 = vrot.lane.b32.xlu0 %v5677_v22, %s9631_s25  ;;  %v5930_v22 = vld [vmem:[%s11868_s11 + $0x70] sm:$0xff]  ;;  %v5928_v53 = vld [vmem:[%s11868_s11 + $0x60] sm:$0xff] }
0x3845   :  { %5970 = vmatpush1.msra.mxu1 %v5930_v22  ;;  %v6045_v22 = vld [vmem:[%s11974_s23 + $0x30] sm:$0xff] }
0x3846   :  { %5699 = vrot.lane.b32.xlu1 %v5697_v63, %s9631_s25  ;;  %v5927_v63 = vld [vmem:[%s11868_s11 + $0x58] sm:$0xff] }
0x38b6   :  { %v5680_v4 = vpop.permute.xlu0 %5679 }
0x38b7   :  { %v5682_v28 = vadd.f32 %v5680_v4, %v5672_v14  ;;  %v5922_v14 = vld [vmem:[%s11868_s11 + $0x30] sm:$0xff]  ;;  %v5921_v4 = vld [vmem:[%s11868_s11 + $0x28] sm:$0xff] }
0x38b8   :  { %v5700_v1 = vpop.permute.xlu1 %5699 }
0x38b9   :  { %9533 = vtanh.f32 %v5682_v28  ;;  %v5702_v13 = vadd.f32 %v5700_v1, %v5692_v62  ;;  %v5815_v50 = vrot.slane %v5682_v28, 6  ;;  %v5920_v28 = vld [vmem:[%s11868_s11 + $0x20] sm:$0xff]  ;;  %v5919_v62 = vld [vmem:[%s11868_s11 + $0x18] sm:$0xff]  ;;  %v5918_v1 = vld [vmem:[%s11868_s11 + $0x10] sm:$0xff] }
0x38bb   :  { %9535 = vtanh.f32 %v5702_v13  ;;  %v5835_v26 = vrot.slane %v5702_v13, 6  ;;  %v5917_v13 = vld [vmem:[%s11868_s11 + $0x8] sm:$0xff] }
0x38c6   :  { %v9534_v25 = vpop.eup %9533 }
0x38c7   :  { %5685 = vrot.lane.b32.xlu0 %v9534_v25, %s9630_s24  ;;  %v5916_v25 = vld [vmem:[%s11868_s11] sm:$0xff] }
0x38c8   :  { %v9536_v2 = vpop.eup %9535 }
0x38c9   :  { %5705 = vrot.lane.b32.xlu1 %v9536_v2, %s9630_s24 }
0x3939   :  { %v5686_v15 = vpop.permute.xlu0 %5685 }
0x393a   :  { %v11844_v27 = vmul.f32 %v9530_v39, %v5686_v15 }
0x393b   :  { %v5706_v31 = vpop.permute.xlu1 %5705 }
0x393c   :  { %v11846_v49 = vmul.f32 %v9532_v9, %v5706_v31  ;;  %5710 = vrot.lane.b32.xlu0 %v11844_v27, %s9631_s25  ;;  %v5929_v9 = vld [vmem:[%s11868_s11 + $0x68] sm:$0xff] }
0x393d   :  { %5971 = vmatprep.subr.mxu1 %v5929_v9  ;;  %v12007_v9 = vld [vmem:[%s11935_s19 + $0x28] sm:$0xf] }
0x393e   :  { %5714 = vrot.lane.b32.xlu1 %v11846_v49, %s9630_s24  ;;  %5972 = vmatpush1.msra.mxu1 %v5928_v53  ;;  %v6044_v53 = vld [vmem:[%s11974_s23 + $0x28] sm:$0xff] }
0x393f   :  { %5973 = vmatprep.subr.mxu1 %v5927_v63  ;;  %v6043_v63 = vld [vmem:[%s11974_s23 + $0x20] sm:$0xff] }
0x3940   :  { %5974 = vmatpush1.msra.mxu1 %v5926_v56  ;;  %v6042_v56 = vld [vmem:[%s11974_s23 + $0x18] sm:$0xff] }
0x39ae   :  { %v5711_v60 = vpop.permute.xlu0 %5710 }
0x39b0   :  { %v5715_v47 = vpop.permute.xlu1 %5714 }
0x39b1   :  { %v5717_v8 = vsel %vm1417_vm6, %v5711_v60, %v5715_v47 }
0x39b2   :  { %8127 = vmatmul.mubr.msk.f32.vlgmr.msra.gmra.mxu0 %vm2783_vm10, %v5717_v8  ;;  %v5864_v8 = vrot.slane %v11846_v49, 6 }
0x39b3   :  { %8976 = vmatprep.mubr.msk.f32.mxu0 %vm9618_vm0, %v9616_v0 }
0x3a72   :  { %v5787_v29 = vpop.f32.mrf.mxu0 }
0x3a73   :  { %v5794_v58 = vrot.slane %v5787_v29, 6 }
0x3a74   :  { %v5789_v34 = vpop.f32.mrf.mxu0 }
0x3a75   :  { %v5798_v32 = vadd.f32 %v5794_v58, %v11444_v3  ;;  %v5795_v48 = vrot.slane %v5789_v34, 6  ;;  %v5866_v58 = vrot.slane %v11823_v38, 2  ;;  %v5868_v34 = vrot.slane %v11787_v12, 6 }
0x3a77   :  { %9537 = vtanh.f32 %v5798_v32  ;;  %v5799_v37 = vadd.f32 %v5795_v48, %v5421_v54  ;;  %v5800_v10 = vsub.f32 0.0, %v5798_v32 }
0x3a79   :  { %9539 = vtanh.f32 %v5799_v37  ;;  %v5807_v35 = vsub.f32 0.0, %v5799_v37  ;;  %v5801_v7 = vmul.f32 1.442695, %v5800_v10 }
0x3a7b   :  { %v5808_v57 = vmul.f32 1.442695, %v5807_v35  ;;  %9541 = vpow2.f32 %v5801_v7  ;;  %v5932_v35 = vld [vmem:[%s7908_s15] sm:$0x3]  ;;  %s12211_s15 = sld [smem:[%s12413_s0 + %s9643_s12]]   ;;  %s9650_s12 = smov 31  }
0x3a7d   :  { %9543 = vpow2.f32 %v5808_v57 }
0x3a84   :  { %v9538_v41 = vpop.eup %9537 }
0x3a85   :  { %5819 = vrot.lane.b32.xlu1 %v9538_v41, %s9630_s24 }
0x3a86   :  { %v9540_v21 = vpop.eup %9539 }
0x3a87   :  { %5839 = vrot.lane.b32.xlu0 %v9540_v21, %s9630_s24 }
0x3a88   :  { %v9542_v43 = vpop.eup %9541 }
0x3a89   :  { %v5803_v17 = vadd.f32 1.0, %v9542_v43  ;;  %v5937_v43 = vrot.slane %v5932_v35, %v10832_v44 }
0x3a8a   :  { %v9544_v3 = vpop.eup %9543 }
0x3a8b   :  { %v5810_v19 = vadd.f32 1.0, %v9544_v3  ;;  %9545 = vrcp.f32 %v5803_v17 }
0x3a8d   :  { %9547 = vrcp.f32 %v5810_v19 }
0x3a98   :  { %v9546_v40 = vpop.eup %9545 }
0x3a99   :  { %v5817_v45 = vmul.f32 %v9546_v40, %v5815_v50 }
0x3a9a   :  { %v9548_v61 = vpop.eup %9547 }
0x3a9b   :  { %v5837_v18 = vmul.f32 %v9548_v61, %v5835_v26 }
0x3af7   :  { %v5820_v54 = vpop.permute.xlu1 %5819 }
0x3af8   :  { %v5822_v55 = vmul.f32 %v9546_v40, %v5820_v54  ;;  %v5941_v54 = vrot.slane %v5932_v35, %v10835_v42 }
0x3af9   :  { %v5840_v59 = vpop.permute.xlu0 %5839 }
0x3afa   :  { %v5842_v36 = vmul.f32 %v9548_v61, %v5840_v59  ;;  %5824 = vrot.lane.b32.xlu1 %v5822_v55, %s9631_s25 }
0x3afc   :  { %5844 = vrot.lane.b32.xlu0 %v5842_v36, %s9631_s25 }
0x3b6c   :  { %v5825_v51 = vpop.permute.xlu1 %5824 }
0x3b6d   :  { %v5827_v20 = vadd.f32 %v5825_v51, %v5817_v45  ;;  %v6048_v45 = vld [vmem:[%s11935_s19] sm:$0xff]  ;;  %v6049_v51 = vld [vmem:[%s11935_s19 + $0x8] sm:$0xff] }
0x3b6e   :  { %v5845_v16 = vpop.permute.xlu0 %5844 }
0x3b6f   :  { %9549 = vtanh.f32 %v5827_v20  ;;  %v5847_v23 = vadd.f32 %v5845_v16, %v5837_v18  ;;  %v6050_v20 = vld [vmem:[%s11935_s19 + $0x10] sm:$0xf] }
0x3b71   :  { %9551 = vtanh.f32 %v5847_v23  ;;  %v11981_v23 = vld [vmem:[%s11935_s19 + $0x18] sm:$0xff]  ;;  %s7911_s19 = sld [smem:[%s12413_s0 + %s9644_s16]]  }
0x3b7c   :  { %v9550_v24 = vpop.eup %9549 }
0x3b7d   :  { %5830 = vrot.lane.b32.xlu1 %v9550_v24, %s9630_s24 }
0x3b7e   :  { %v9552_v39 = vpop.eup %9551 }
0x3b7f   :  { %5850 = vrot.lane.b32.xlu0 %v9552_v39, %s9630_s24  ;;  %v6046_v39 = vld [vmem:[%s11974_s23 + $0x38] sm:$0xff] }
0x3b83   :  { %5892 = vrot.lane.b32.xlu0 %v11603_v52, %s9631_s25  ;;  %v5925_v52 = vld [vmem:[%s11868_s11 + $0x48] sm:$0xff] }
0x3b84   :  { %5975 = vmatprep.subr.mxu1 %v5925_v52  ;;  %v6041_v52 = vld [vmem:[%s11974_s23 + $0x10] sm:$0xff] }
0x3b85   :  { %5976 = vmatpush1.msra.mxu1 %v5924_v46  ;;  %v6040_v46 = vld [vmem:[%s11974_s23 + $0x8] sm:$0xff] }
0x3b87   :  { %5894 = vrot.lane.b32.xlu0 %v11828_v30, %s9631_s25  ;;  %v5923_v30 = vld [vmem:[%s11868_s11 + $0x38] sm:$0xff]  ;;  %s12174_s11 = sld [smem:[%s12413_s0 + %s9642_s8]]   ;;  %s9649_s8 = smov 27  }
0x3b88   :  { %5977 = vmatprep.subr.mxu1 %v5923_v30  ;;  %v6039_v30 = vld [vmem:[%s11974_s23] sm:$0xff]  ;;  %s7912_s23 = sld [smem:[%s12413_s0 + %s9645_s20]]  }
0x3b89   :  { %5978 = vmatpush1.msra.mxu1 %v5922_v14 }
0x3b8a   :  { %5979 = vmatprep.subr.mxu1 %v5921_v4 }
0x3b8b   :  { %5980 = vmatpush1.msra.mxu1 %v5920_v28 }
0x3b8c   :  { %5981 = vmatprep.subr.mxu1 %v5919_v62 }
0x3b8d   :  { %5982 = vmatpush1.msra.mxu1 %v5918_v1 }
0x3b8e   :  { %5983 = vmatprep.subr.mxu1 %v5917_v13 }
0x3b8f   :  { %5984 = vmatpush1.msra.mxu1 %v5916_v25 }
0x3b90   :  { %8985 = vmatprep.subr.mxu1 %v9616_v0 }
0x3bef   :  { %v5831_v2 = vpop.permute.xlu1 %5830 }
0x3bf0   :  { %v5833_v15 = vmul.f32 %v9546_v40, %v5831_v2 }
0x3bf1   :  { %v5851_v31 = vpop.permute.xlu0 %5850 }
0x3bf2   :  { %v5853_v60 = vmul.f32 %v9548_v61, %v5851_v31  ;;  %v5860_v47 = vsel %vm4219_vm11, %v11844_v27, %v5833_v15 }
0x3bf3   :  { %5896 = vrot.lane.b32.xlu0 %v5860_v47, %s9631_s25  ;;  %s9651_s25 = smov 33  }
0x3bf4   :  { %v5862_v29 = vrot.slane %v5853_v60, 2  ;;  %s12371_s21 = sld [smem:[%s12413_s0 + %s9651_s25]]  }
0x3bf5   :  { %v5893_v27 = vpop.permute.xlu0 %5892 }
0x3bf6   :  { %v5882_v32 = vsel %vm4219_vm11, %v5862_v29, %v5864_v8 }
0x3bf7   :  { %v5883_v48 = vsel %vm4221_vm12, %v5882_v32, %v5866_v58 }
0x3bf8   :  { %v5884_v37 = vsel %vm767_vm2, %v5883_v48, %v5868_v34 }
0x3bf9   :  { %5904 = vrot.lane.b32.xlu1 %v5884_v37, %s9630_s24  ;;  %v5895_v12 = vpop.permute.xlu0 %5894 }
0x3bfd   :  { %5906 = vrot.lane.b32.xlu1 %v11698_v6, %s9630_s24 }
0x3c01   :  { %5908 = vrot.lane.b32.xlu1 %v11511_v11, %s9630_s24 }
0x3c65   :  { %v5897_v11 = vpop.permute.xlu0 %5896 }
0x3c6b   :  { %v5905_v49 = vpop.permute.xlu1 %5904 }
0x3c6c   :  { %v11906_v38 = vsel %vm1417_vm6, %v5893_v27, %v5905_v49 }
0x3c6d   :  { %8128 = vmatmul.mubr.msk.f32.vlgmr.msra.gmra.mxu1 %vm2783_vm10, %v11906_v38 }
0x3c6e   :  { %6023 = vmatprep.mubr.f32.mxu1 %v9616_v0 }
0x3c6f   :  { %v5907_v41 = vpop.permute.xlu1 %5906 }
0x3c70   :  { %v11912_v21 = vsel %vm1417_vm6, %v5895_v12, %v5907_v41 }
0x3c71   :  { %8129 = vmatmul.mubr.msk.f32.gmra.mxu1 %vm2783_vm10, %v11912_v21 }
0x3c72   :  { %6029 = vmatprep.mubr.f32.mxu1 %v9616_v0 }
0x3c73   :  { %v5909_v6 = vpop.permute.xlu1 %5908 }
0x3c74   :  { %v11918_v10 = vsel %vm1417_vm6, %v5897_v11, %v5909_v6 }
0x3c75   :  { %8130 = vmatmul.mubr.msk.f32.gmra.mxu1 %vm2783_vm10, %v11918_v10 }
0x3c76   :  { %8991 = vmatprep.mubr.msk.f32.mxu1 %vm9618_vm0, %v9616_v0 }
0x3d2d   :  { %v6019_v7 = vpop.f32.mrf.mxu1 }
0x3d2e   :  { %v11944_v36 = vadd.f32 %v6019_v7, %v5937_v43 }
0x3d2f   :  { %v6021_v57 = vpop.f32.mrf.mxu1 }
0x3d30   :  { %v11951_v26 = vadd.f32 %v6021_v57, %v5941_v54  ;;  %v6036_v25 = vmul.f32 0.25, %v11944_v36  ;;  %v6047_v57 = vld [vmem:[%s7921_s29] sm:$0xf]  ;;  %s7914_s29 = sld [smem:[%s12413_s0 + %s9646_s26]]  }
0x3d31   :  { %v6025_v3 = vpop.f32.mrf.mxu1 }
0x3d32   :  { %v11928_v17 = vadd.f32 %v6025_v3, %v5937_v43 }
0x3d33   :  { %v6027_v19 = vpop.f32.mrf.mxu1 }
0x3d34   :  { %6056 = vrot.lane.b32.xlu1 %v11928_v17, %s9630_s24  ;;  %v11946_v50 = vadd.f32 %v6027_v19, %v5941_v54  ;;  %v6037_v29 = vmul.f32 0.25, %v11928_v17 }
0x3d35   :  { %v6031_v40 = vpop.f32.mrf.mxu1 }
0x3d36   :  { %v11938_v55 = vadd.f32 %v6031_v40, %v5937_v43 }
0x3d37   :  { %v6033_v61 = vpop.f32.mrf.mxu1 }
0x3d38   :  { %v11940_v59 = vadd.f32 %v6033_v61, %v5941_v54  ;;  %6058 = vrot.lane.b32.xlu0 %v11938_v55, %s9630_s24  ;;  %v6038_v49 = vmul.f32 0.25, %v11938_v55 }
0x3d3a   :  { %8986 = vmatpush3.msk.msra.mxu1 %vm4221_vm12, %v11940_v59 }
0x3d3b   :  { %8987 = vmatprep.subr.mxu1 %v9616_v0 }
0x3d3c   :  { %8988 = vmatpush3.msra.mxu1 %v11946_v50  ;;  %6054 = vrot.lane.b32.xlu0 %v11944_v36, %s9630_s24 }
0x3d3d   :  { %8989 = vmatprep.subr.mxu1 %v9616_v0 }
0x3d3e   :  { %8990 = vmatpush3.msra.mxu1 %v11951_v26 }
0x3d3f   :  { %8992 = vmatmul.mubr.msk.f32.vlgmr.msra.gmra.mxu1 %vm6062_vm13, %v6048_v45  ;;  %9025 = vmatprep.subr.mxu1 %v9616_v0 }
0x3d40   :  { %8994 = vmatprep.mubr.msk.f32.mxu1 %vm9618_vm0, %v9616_v0 }
0x3d43   :  { %8995 = vmatmul.mubr.msk.f32.gmra.mxu1 %vm6062_vm13, %v6049_v51 }
0x3d44   :  { %8997 = vmatprep.mubr.msk.f32.mxu1 %vm9618_vm0, %v9616_v0 }
0x3d47   :  { %8998 = vmatmul.mubr.msk.f32.gmra.mxu1 %vm6062_vm13, %v6050_v20 }
0x3d48   :  { %9031 = vmatprep.mubr.msk.f32.mxu1 %vm9618_vm0, %v9616_v0 }
0x3da6   :  { %v6057_v16 = vpop.permute.xlu1 %6056 }
0x3daa   :  { %v6059_v18 = vpop.permute.xlu0 %6058 }
0x3dab   :  { %8971 = vmatpush3.msk.msra.mxu0 %vm4221_vm12, %v6059_v18  ;;  %9026 = vmatpush3.msk.msra.mxu1 %vm4221_vm12, %v6059_v18 }
0x3dac   :  { %8972 = vmatprep.subr.mxu0 %v9616_v0  ;;  %9027 = vmatprep.subr.mxu1 %v9616_v0 }
0x3dad   :  { %8973 = vmatpush3.msra.mxu0 %v6057_v16  ;;  %9028 = vmatpush3.msra.mxu1 %v6057_v16 }
0x3dae   :  { %8974 = vmatprep.subr.mxu0 %v9616_v0  ;;  %9029 = vmatprep.subr.mxu1 %v9616_v0  ;;  %v6055_v24 = vpop.permute.xlu0 %6054 }
0x3daf   :  { %8975 = vmatpush3.msra.mxu0 %v6055_v24  ;;  %9030 = vmatpush3.msra.mxu1 %v6055_v24 }
0x3db0   :  { %8977 = vmatmul.mubr.msk.f32.vlgmr.msra.gmra.mxu0 %vm6062_vm13, %v6048_v45  ;;  %9032 = vmatmul.mubr.msk.f32.vlgmr.msra.gmra.mxu1 %vm6062_vm13, %v11981_v23 }
0x3db1   :  { %8979 = vmatprep.mubr.msk.f32.mxu0 %vm9618_vm0, %v9616_v0  ;;  %9034 = vmatprep.mubr.msk.f32.mxu1 %vm9618_vm0, %v9616_v0 }
0x3db2   :  { %9000 = vmatprep.subr.mxu0 %v9616_v0  ;;  %9055 = vmatprep.subr.mxu1 %v9616_v0 }
0x3db3   :  { %9001 = vmatpush3.msra.mxu0 %v6046_v39  ;;  %9056 = vmatpush3.msra.mxu1 %v6046_v39 }
0x3db4   :  { %8980 = vmatmul.mubr.msk.f32.gmra.mxu0 %vm6062_vm13, %v6049_v51  ;;  %9035 = vmatmul.mubr.msk.f32.gmra.mxu1 %vm6062_vm13, %v11994_v5 }
0x3db5   :  { %8982 = vmatprep.mubr.msk.f32.mxu0 %vm9618_vm0, %v9616_v0  ;;  %9037 = vmatprep.mubr.msk.f32.mxu1 %vm9618_vm0, %v9616_v0 }
0x3db6   :  { %9002 = vmatprep.subr.mxu0 %v9616_v0  ;;  %9057 = vmatprep.subr.mxu1 %v9616_v0 }
0x3db7   :  { %9003 = vmatpush3.msra.mxu0 %v6045_v22  ;;  %9058 = vmatpush3.msra.mxu1 %v6045_v22 }
0x3db8   :  { %8983 = vmatmul.mubr.msk.f32.gmra.mxu0 %vm6062_vm13, %v6050_v20  ;;  %9038 = vmatmul.mubr.msk.f32.gmra.mxu1 %vm6062_vm13, %v12007_v9 }
0x3db9   :  { %9004 = vmatprep.subr.mxu0 %v9616_v0  ;;  %9059 = vmatprep.subr.mxu1 %v9616_v0 }
0x3dba   :  { %9005 = vmatpush3.msra.mxu0 %v6044_v53  ;;  %9060 = vmatpush3.msra.mxu1 %v6044_v53 }
0x3dbb   :  { %9006 = vmatprep.subr.mxu0 %v9616_v0  ;;  %9061 = vmatprep.subr.mxu1 %v9616_v0 }
0x3dbc   :  { %9007 = vmatpush3.msra.mxu0 %v6043_v63  ;;  %9062 = vmatpush3.msra.mxu1 %v6043_v63 }
0x3dbd   :  { %9008 = vmatprep.subr.mxu0 %v9616_v0  ;;  %9063 = vmatprep.subr.mxu1 %v9616_v0 }
0x3dbe   :  { %9009 = vmatpush3.msra.mxu0 %v6042_v56  ;;  %9064 = vmatpush3.msra.mxu1 %v6042_v56 }
0x3dbf   :  { %9010 = vmatprep.subr.mxu0 %v9616_v0  ;;  %9065 = vmatprep.subr.mxu1 %v9616_v0 }
0x3dc0   :  { %9011 = vmatpush3.msra.mxu0 %v6041_v52  ;;  %9066 = vmatpush3.msra.mxu1 %v6041_v52 }
0x3dc1   :  { %9012 = vmatprep.subr.mxu0 %v9616_v0  ;;  %9067 = vmatprep.subr.mxu1 %v9616_v0 }
0x3dc2   :  { %9013 = vmatpush3.msra.mxu0 %v6040_v46  ;;  %9068 = vmatpush3.msra.mxu1 %v6040_v46 }
0x3dc3   :  { %9014 = vmatprep.subr.mxu0 %v9616_v0  ;;  %9069 = vmatprep.subr.mxu1 %v9616_v0 }
0x3dc4   :  { %9016 = vmatprep.mubr.msk.f32.mxu0 %vm9618_vm0, %v9616_v0  ;;  %9071 = vmatprep.mubr.msk.f32.mxu1 %vm9618_vm0, %v9616_v0 }
0x3dc5   :  { %9015 = vmatpush3.msra.mxu0 %v6039_v30  ;;  %9070 = vmatpush3.msra.mxu1 %v6039_v30 }
0x3dc6   :  { %9040 = vmatprep.subr.mxu0 %v9616_v0  ;;  %9091 = vmatprep.subr.mxu1 %v9616_v0 }
0x3dff   :  { %v12038_v14 = vpop.f32.mrf.mxu1 }
0x3e01   :  { %v8993_v4 = vpop.f32.mrf.mxu1 }
0x3e03   :  { %v12040_v28 = vpop.f32.mrf.mxu1 }
0x3e05   :  { %v8996_v62 = vpop.f32.mrf.mxu1 }
0x3e07   :  { %v12042_v1 = vpop.f32.mrf.mxu1 }
0x3e09   :  { %v8999_v13 = vpop.f32.mrf.mxu1 }
0x3e70   :  { %v6140_v2 = vpop.f32.mrf.mxu0  ;;  %v6408_v15 = vpop.f32.mrf.mxu1 }
0x3e71   :  { %v6237_v31 = vmul.f32 %v6140_v2, %v6036_v25  ;;  %v6502_v60 = vmul.f32 %v6408_v15, %v6036_v25 }
0x3e72   :  { %v8978_v47 = vpop.f32.mrf.mxu0  ;;  %v9033_v8 = vpop.f32.mrf.mxu1 }
0x3e73   :  { %9017 = vmatmul.mubr.msk.f32.vlgmr.msra.gmra.mxu0 %vm2783_vm10, %v6237_v31  ;;  %9072 = vmatmul.mubr.msk.f32.vlgmr.msra.gmra.mxu1 %vm2783_vm10, %v6502_v60 }
0x3e74   :  { %9041 = vmatpush3.msk.msra.mxu0 %vm4221_vm12, %v11940_v59  ;;  %v6145_v58 = vpop.f32.mrf.mxu0  ;;  %v6413_v34 = vpop.f32.mrf.mxu1  ;;  %9019 = vmatprep.mubr.msk.f32.mxu0 %vm9618_vm0, %v9616_v0 }
0x3e75   :  { %v6238_v32 = vmul.f32 %v6145_v58, %v6037_v29  ;;  %v6503_v48 = vmul.f32 %v6413_v34, %v6037_v29  ;;  %9042 = vmatprep.subr.mxu0 %v9616_v0  ;;  %9074 = vmatprep.mubr.msk.f32.mxu1 %vm9618_vm0, %v9616_v0 }
0x3e76   :  { %9043 = vmatpush3.msra.mxu0 %v11946_v50  ;;  %v8981_v37 = vpop.f32.mrf.mxu0  ;;  %v9036_v27 = vpop.f32.mrf.mxu1  ;;  %9092 = vmatpush3.msk.msra.mxu1 %vm4221_vm12, %v6047_v57 }
0x3e77   :  { %9044 = vmatprep.subr.mxu0 %v9616_v0  ;;  %9020 = vmatmul.mubr.msk.f32.gmra.mxu0 %vm2783_vm10, %v6238_v32  ;;  %v6828_v27 = vld [vmem:[%s12099_s3 + $0x38] sm:$0xff] }
0x3e78   :  { %9045 = vmatpush3.msra.mxu0 %v11951_v26  ;;  %9075 = vmatmul.mubr.msk.f32.gmra.mxu1 %vm2783_vm10, %v6503_v48  ;;  %v6150_v12 = vpop.f32.mrf.mxu0  ;;  %v6418_v41 = vpop.f32.mrf.mxu1 }
0x3e79   :  { %v6239_v11 = vmul.f32 %v6150_v12, %v6038_v49  ;;  %v6504_v6 = vmul.f32 %v6418_v41, %v6038_v49  ;;  %9022 = vmatprep.mubr.msk.f32.mxu0 %vm9618_vm0, %v9616_v0  ;;  %9077 = vmatprep.mubr.msk.f32.mxu1 %vm9618_vm0, %v9616_v0  ;;  %v6827_v49 = vld [vmem:[%s12099_s3 + $0x30] sm:$0xff] }
0x3e7a   :  { %v8984_v35 = vpop.f32.mrf.mxu0  ;;  %v9039_v7 = vpop.f32.mrf.mxu1  ;;  %9080 = vmatprep.subr.mxu0 %v9616_v0 }
0x3e7b   :  { %9023 = vmatmul.mubr.msk.f32.gmra.mxu0 %vm2783_vm10, %v6239_v11 }
0x3e7c   :  { %9078 = vmatmul.mubr.msk.f32.gmra.mxu1 %vm2783_vm10, %v6504_v6  ;;  %9046 = vmatprep.mubr.msk.f32.mxu0 %vm9618_vm0, %v9616_v0  ;;  %v6826_v6 = vld [vmem:[%s12099_s3 + $0x28] sm:$0xff] }
0x3e7d   :  { %9093 = vmatprep.mubr.msk.f32.mxu1 %vm9618_vm0, %v9616_v0 }
0x3e7f   :  { %9047 = vmatmul.mubr.msk.f32.vlgmr.msra.gmra.mxu0 %vm6062_vm13, %v11981_v23 }
0x3e80   :  { %9049 = vmatprep.mubr.msk.f32.mxu0 %vm9618_vm0, %v9616_v0  ;;  %9081 = vmatpush3.msk.msra.mxu0 %vm4221_vm12, %v6047_v57 }
0x3e81   :  { %9102 = vmatprep.subr.mxu0 %v9616_v0 }
0x3e83   :  { %9050 = vmatmul.mubr.msk.f32.gmra.mxu0 %vm6062_vm13, %v11994_v5 }
0x3e84   :  { %9052 = vmatprep.mubr.msk.f32.mxu0 %vm9618_vm0, %v9616_v0 }
0x3e87   :  { %9053 = vmatmul.mubr.msk.f32.gmra.mxu0 %vm6062_vm13, %v12007_v9 }
0x3e88   :  { %9082 = vmatprep.mubr.msk.f32.mxu0 %vm9618_vm0, %v9616_v0 }
0x3f33   :  { %v6315_v43 = vpop.f32.mrf.mxu0  ;;  %v6580_v3 = vpop.f32.mrf.mxu1 }
0x3f34   :  { %v6594_v17 = vmax.f32 %v6315_v43, %v6580_v3 }
0x3f35   :  { %v9018_v19 = vpop.f32.mrf.mxu0  ;;  %v9073_v40 = vpop.f32.mrf.mxu1 }
0x3f36   :  { %v6597_v54 = vsub.f32 %v6315_v43, %v6594_v17  ;;  %v6606_v55 = vsub.f32 %v6580_v3, %v6594_v17  ;;  %v6825_v43 = vld [vmem:[%s12099_s3 + $0x20] sm:$0xff]  ;;  %v6824_v3 = vld [vmem:[%s12099_s3 + $0x18] sm:$0xff]  ;;  %v6823_v17 = vld [vmem:[%s12099_s3 + $0x10] sm:$0xff] }
0x3f37   :  { %v6320_v61 = vpop.f32.mrf.mxu0  ;;  %v6822_v19 = vld [vmem:[%s12099_s3 + $0x8] sm:$0xff]  ;;  %v6821_v40 = vld [vmem:[%s12099_s3] sm:$0xff]  ;;  %s7916_s3 = sld [smem:[%s12413_s0 + %s9647_s30]]  }
0x3f38   :  { %v6600_v59 = vmul.f32 1.442695, %v6597_v54  ;;  %v6609_v36 = vmul.f32 1.442695, %v6606_v55  ;;  %v6585_v50 = vpop.f32.mrf.mxu1 }
0x3f39   :  { %v6595_v26 = vmax.f32 %v6320_v61, %v6585_v50  ;;  %v9021_v45 = vpop.f32.mrf.mxu0 }
0x3f3a   :  { %9553 = vpow2.f32 %v6600_v59  ;;  %v9076_v51 = vpop.f32.mrf.mxu1 }
0x3f3b   :  { %9555 = vpow2.f32 %v6609_v36  ;;  %v6598_v20 = vsub.f32 %v6320_v61, %v6595_v26  ;;  %v6607_v18 = vsub.f32 %v6585_v50, %v6595_v26  ;;  %v6325_v16 = vpop.f32.mrf.mxu0 }
0x3f3c   :  { %v6590_v23 = vpop.f32.mrf.mxu1 }
0x3f3d   :  { %v6602_v24 = vmul.f32 1.442695, %v6598_v20  ;;  %v6611_v39 = vmul.f32 1.442695, %v6607_v18  ;;  %v6596_v5 = vmax.f32 %v6325_v16, %v6590_v23  ;;  %v9024_v22 = vpop.f32.mrf.mxu0 }
0x3f3e   :  { %v9079_v9 = vpop.f32.mrf.mxu1 }
0x3f3f   :  { %9557 = vpow2.f32 %v6602_v24  ;;  %v6599_v53 = vsub.f32 %v6325_v16, %v6596_v5  ;;  %v6608_v63 = vsub.f32 %v6590_v23, %v6596_v5  ;;  %v12090_v56 = vpop.f32.mrf.mxu0 }
0x3f40   :  { %9559 = vpow2.f32 %v6611_v39 }
0x3f41   :  { %v6604_v52 = vmul.f32 1.442695, %v6599_v53  ;;  %v6613_v46 = vmul.f32 1.442695, %v6608_v63  ;;  %v9048_v30 = vpop.f32.mrf.mxu0 }
0x3f43   :  { %9561 = vpow2.f32 %v6604_v52  ;;  %v12092_v4 = vpop.f32.mrf.mxu0 }
0x3f44   :  { %9563 = vpow2.f32 %v6613_v46 }
0x3f45   :  { %v9051_v62 = vpop.f32.mrf.mxu0 }
0x3f47   :  { %v9554_v13 = vpop.eup %9553  ;;  %v12094_v25 = vpop.f32.mrf.mxu0 }
0x3f48   :  { %v9556_v2 = vpop.eup %9555 }
0x3f49   :  { %v6615_v15 = vadd.f32 %v9556_v2, %v9554_v13  ;;  %v9054_v31 = vpop.f32.mrf.mxu0 }
0x3f4b   :  { %9565 = vrcp.f32 %v6615_v15 }
0x3f4c   :  { %v9558_v60 = vpop.eup %9557 }
0x3f4d   :  { %v9560_v47 = vpop.eup %9559 }
0x3f4e   :  { %v6616_v8 = vadd.f32 %v9560_v47, %v9558_v60 }
0x3f50   :  { %v9562_v29 = vpop.eup %9561  ;;  %9567 = vrcp.f32 %v6616_v8 }
0x3f51   :  { %v9564_v58 = vpop.eup %9563 }
0x3f52   :  { %v6617_v34 = vadd.f32 %v9564_v58, %v9562_v29 }
0x3f54   :  { %9569 = vrcp.f32 %v6617_v34 }
0x3f58   :  { %v9566_v32 = vpop.eup %9565 }
0x3f59   :  { %v6621_v48 = vmul.f32 %v9566_v32, %v9554_v13  ;;  %v6723_v37 = vmul.f32 %v9566_v32, %v9556_v2 }
0x3f5b   :  { %9083 = vmatmul.mubr.msk.f32.vlgmr.msra.gmra.mxu0 %vm6624_vm14, %v6621_v48  ;;  %9094 = vmatmul.mubr.msk.f32.vlgmr.msra.gmra.mxu1 %vm6624_vm14, %v6723_v37 }
0x3f5c   :  { %9085 = vmatprep.mubr.msk.f32.mxu0 %vm9618_vm0, %v9616_v0  ;;  %9096 = vmatprep.mubr.msk.f32.mxu1 %vm9618_vm0, %v9616_v0 }
0x3f5d   :  { %v9568_v12 = vpop.eup %9567  ;;  %9103 = vmatpush3.msra.mxu0 %v6828_v27 }
0x3f5e   :  { %v6622_v41 = vmul.f32 %v9568_v12, %v9558_v60  ;;  %v6724_v11 = vmul.f32 %v9568_v12, %v9560_v47  ;;  %9104 = vmatprep.subr.mxu0 %v9616_v0 }
0x3f5f   :  { %9105 = vmatpush3.msra.mxu0 %v6827_v49 }
0x3f60   :  { %9086 = vmatmul.mubr.msk.f32.gmra.mxu0 %vm6624_vm14, %v6622_v41  ;;  %9097 = vmatmul.mubr.msk.f32.gmra.mxu1 %vm6624_vm14, %v6724_v11 }
0x3f61   :  { %v9570_v35 = vpop.eup %9569  ;;  %9088 = vmatprep.mubr.msk.f32.mxu0 %vm9618_vm0, %v9616_v0  ;;  %9099 = vmatprep.mubr.msk.f32.mxu1 %vm9618_vm0, %v9616_v0 }
0x3f62   :  { %v6623_v7 = vmul.f32 %v9570_v35, %v9562_v29  ;;  %v6725_v57 = vmul.f32 %v9570_v35, %v9564_v58  ;;  %9106 = vmatprep.subr.mxu0 %v9616_v0  ;;  %v7018_v35 = vld [vmem:[%s12174_s11 + $0xe8] sm:$0xff] }
0x3f63   :  { %9107 = vmatpush3.msra.mxu0 %v6826_v6  ;;  %7068 = vmatprep.subr.mxu1 %v7018_v35 }
0x3f64   :  { %9089 = vmatmul.mubr.msk.f32.gmra.mxu0 %vm6624_vm14, %v6623_v7  ;;  %9100 = vmatmul.mubr.msk.f32.gmra.mxu1 %vm6624_vm14, %v6725_v57  ;;  %v7020_v7 = vld [vmem:[%s12174_s11 + $0xf8] sm:$0xff]  ;;  %v7017_v57 = vld [vmem:[%s12174_s11 + $0xe0] sm:$0xff] }
0x3f65   :  { %9108 = vmatprep.subr.mxu0 %v9616_v0  ;;  %9118 = vmatprep.mubr.msk.f32.mxu0 %vm9618_vm0, %v9616_v0 }
0x3f66   :  { %9109 = vmatpush3.msra.mxu0 %v6825_v43  ;;  %7116 = vmatprep.mubr.f32.mxu1 %v9616_v0  ;;  %v7019_v43 = vld [vmem:[%s12174_s11 + $0xf0] sm:$0xff] }
0x3f67   :  { %9110 = vmatprep.subr.mxu0 %v9616_v0  ;;  %7069 = vmatpush1.msra.mxu1 %v7017_v57  ;;  %v7259_v57 = vld [vmem:[%s12211_s15 + $0xe8] sm:$0xff] }
0x3f68   :  { %9111 = vmatpush3.msra.mxu0 %v6824_v3  ;;  %v7014_v3 = vld [vmem:[%s12174_s11 + $0xc8] sm:$0xff] }
0x3f69   :  { %9112 = vmatprep.subr.mxu0 %v9616_v0  ;;  %7070 = vmatprep.subr.mxu1 %v7014_v3 }
0x3f6a   :  { %9113 = vmatpush3.msra.mxu0 %v6823_v17  ;;  %v7016_v17 = vld [vmem:[%s12174_s11 + $0xd8] sm:$0xff] }
0x3f6b   :  { %9114 = vmatprep.subr.mxu0 %v9616_v0 }
0x3f6c   :  { %9115 = vmatpush3.msra.mxu0 %v6822_v19  ;;  %v7013_v19 = vld [vmem:[%s12174_s11 + $0xc0] sm:$0xff] }
0x3f6d   :  { %9116 = vmatprep.subr.mxu0 %v9616_v0  ;;  %7071 = vmatpush1.msra.mxu1 %v7013_v19 }
0x3f6e   :  { %9117 = vmatpush3.msra.mxu0 %v6821_v40  ;;  %v7015_v40 = vld [vmem:[%s12174_s11 + $0xd0] sm:$0xff] }
0x3f6f   :  { %7151 = vmatprep.subr.mxu0 %v7020_v7 }
0x401b   :  { %v6703_v54 = vpop.f32.mrf.mxu0  ;;  %v6801_v55 = vpop.f32.mrf.mxu1 }
0x401c   :  { %v6717_v61 = vmul.f32 %v6703_v54, %v12038_v14  ;;  %v6815_v59 = vmul.f32 %v6801_v55, %v12090_v56  ;;  %v7010_v54 = vld [vmem:[%s12174_s11 + $0xa8] sm:$0xff]  ;;  %v7012_v55 = vld [vmem:[%s12174_s11 + $0xb8] sm:$0xff] }
0x401d   :  { %v9084_v36 = vpop.f32.mrf.mxu0  ;;  %v9095_v50 = vpop.f32.mrf.mxu1  ;;  %7072 = vmatprep.subr.mxu1 %v7010_v54  ;;  %v7290_v54 = vld [vmem:[%s12211_s15 + $0x1e0] sm:$0xff] }
0x401e   :  { %v6818_v26 = vadd.f32 %v6815_v59, %v6717_v61  ;;  %v7009_v61 = vld [vmem:[%s12174_s11 + $0xa0] sm:$0xff]  ;;  %v7011_v59 = vld [vmem:[%s12174_s11 + $0xb0] sm:$0xff]  ;;  %v7006_v36 = vld [vmem:[%s12174_s11 + $0x88] sm:$0xff] }
0x401f   :  { %7073 = vmatpush1.msra.mxu1 %v7009_v61  ;;  %v7008_v50 = vld [vmem:[%s12174_s11 + $0x98] sm:$0xff]  ;;  %v7274_v61 = vld [vmem:[%s12211_s15 + $0x160] sm:$0xff] }
0x4020   :  { %v6708_v45 = vpop.f32.mrf.mxu0  ;;  %v6806_v51 = vpop.f32.mrf.mxu1  ;;  %9119 = vmatmul.mubr.msk.f32.vlgmr.msra.gmra.mxu0 %vm2783_vm10, %v6818_v26  ;;  %7074 = vmatprep.subr.mxu1 %v7006_v36  ;;  %v7005_v26 = vld [vmem:[%s12174_s11 + $0x80] sm:$0xff]  ;;  %v7289_v36 = vld [vmem:[%s12211_s15 + $0x1d8] sm:$0xff] }
0x4021   :  { %v6718_v20 = vmul.f32 %v6708_v45, %v12040_v28  ;;  %v6816_v18 = vmul.f32 %v6806_v51, %v12092_v4  ;;  %9121 = vmatprep.mubr.msk.f32.mxu0 %vm9618_vm0, %v9616_v0  ;;  %7152 = vmatpush1.msra.mxu0 %v7019_v43  ;;  %v7007_v45 = vld [vmem:[%s12174_s11 + $0x90] sm:$0xff]  ;;  %v7002_v51 = vld [vmem:[%s12174_s11 + $0x68] sm:$0xff] }
0x4022   :  { %v9087_v16 = vpop.f32.mrf.mxu0  ;;  %v9098_v23 = vpop.f32.mrf.mxu1  ;;  %7153 = vmatprep.subr.mxu0 %v7016_v17  ;;  %7075 = vmatpush1.msra.mxu1 %v7005_v26  ;;  %v7291_v43 = vld [vmem:[%s12211_s15 + $0x1e8] sm:$0xff]  ;;  %v7273_v26 = vld [vmem:[%s12211_s15 + $0x158] sm:$0xff] }
0x4023   :  { %v6819_v24 = vadd.f32 %v6816_v18, %v6718_v20  ;;  %7154 = vmatpush1.msra.mxu0 %v7015_v40  ;;  %v7004_v20 = vld [vmem:[%s12174_s11 + $0x78] sm:$0xff]  ;;  %7076 = vmatprep.subr.mxu1 %v7002_v51  ;;  %v7001_v18 = vld [vmem:[%s12174_s11 + $0x60] sm:$0xff]  ;;  %v7003_v16 = vld [vmem:[%s12174_s11 + $0x70] sm:$0xff] }
0x4024   :  { %v6713_v14 = vpop.f32.mrf.mxu0  ;;  %v6811_v39 = vpop.f32.mrf.mxu1  ;;  %7155 = vmatprep.subr.mxu0 %v7012_v55  ;;  %7077 = vmatpush1.msra.mxu1 %v7001_v18  ;;  %v6998_v23 = vld [vmem:[%s12174_s11 + $0x48] sm:$0xff]  ;;  %v7258_v40 = vld [vmem:[%s12211_s15 + $0xe0] sm:$0xff]  ;;  %v7288_v51 = vld [vmem:[%s12211_s15 + $0x1d0] sm:$0xff] }
0x4025   :  { %v6719_v5 = vmul.f32 %v6713_v14, %v12042_v1  ;;  %v6817_v22 = vmul.f32 %v6811_v39, %v12094_v25  ;;  %9122 = vmatmul.mubr.msk.f32.gmra.mxu0 %vm2783_vm10, %v6819_v24  ;;  %v8164_v1 = vld [vmem:[%s7910_s7] ss:$0 sm:$0xff]  ;;  %v7000_v24 = vld [vmem:[%s12174_s11 + $0x58] sm:$0xff]  ;;  %7078 = vmatprep.subr.mxu1 %v6998_v23  ;;  %v6999_v39 = vld [vmem:[%s12174_s11 + $0x50] sm:$0xff]  ;;  %s7917_s7 = sld [smem:[%s12413_s0 + %s9648_s4]]  }
0x4026   :  { %v9090_v9 = vpop.f32.mrf.mxu0  ;;  %v9101_v53 = vpop.f32.mrf.mxu1  ;;  %9124 = vmatprep.mubr.msk.f32.mxu0 %vm9618_vm0, %v9616_v0  ;;  %7156 = vmatpush1.msra.mxu0 %v7011_v59  ;;  %v6997_v14 = vld [vmem:[%s12174_s11 + $0x40] sm:$0xff]  ;;  %v7275_v17 = vld [vmem:[%s12211_s15 + $0x168] sm:$0xff]  ;;  %v7257_v59 = vld [vmem:[%s12211_s15 + $0xd8] sm:$0xff] }
0x4027   :  { %v6820_v28 = vadd.f32 %v6817_v22, %v6719_v5  ;;  %7157 = vmatprep.subr.mxu0 %v7008_v50  ;;  %7079 = vmatpush1.msra.mxu1 %v6997_v14  ;;  %v6994_v5 = vld [vmem:[%s12174_s11 + $0x28] sm:$0xff]  ;;  %v6996_v22 = vld [vmem:[%s12174_s11 + $0x38] sm:$0xff]  ;;  %v6993_v9 = vld [vmem:[%s12174_s11 + $0x20] sm:$0xff] }
0x4028   :  { %7158 = vmatpush1.msra.mxu0 %v7007_v45  ;;  %7080 = vmatprep.subr.mxu1 %v6994_v5  ;;  %v6995_v53 = vld [vmem:[%s12174_s11 + $0x30] sm:$0xff]  ;;  %v7242_v55 = vld [vmem:[%s12211_s15 + $0x60] sm:$0xff]  ;;  %v7241_v50 = vld [vmem:[%s12211_s15 + $0x58] sm:$0xff] }
0x4029   :  { %9125 = vmatmul.mubr.msk.f32.gmra.mxu0 %vm2783_vm10, %v6820_v28  ;;  %7159 = vmatprep.subr.mxu0 %v7004_v20  ;;  %v6990_v28 = vld [vmem:[%s12174_s11 + $0x8] sm:$0xff]  ;;  %v7256_v45 = vld [vmem:[%s12211_s15 + $0xd0] sm:$0xff]  ;;  %v7286_v5 = vld [vmem:[%s12211_s15 + $0x1c0] sm:$0xff] }
0x402a   :  { %7199 = vmatprep.mubr.f32.mxu0 %v9616_v0  ;;  %7160 = vmatpush1.msra.mxu0 %v7003_v16  ;;  %v7240_v20 = vld [vmem:[%s12211_s15 + $0x50] sm:$0xff]  ;;  %v7255_v16 = vld [vmem:[%s12211_s15 + $0xc8] sm:$0xff] }
0x402b   :  { %7161 = vmatprep.subr.mxu0 %v7000_v24  ;;  %7081 = vmatpush1.msra.mxu1 %v6993_v9  ;;  %v7272_v18 = vld [vmem:[%s12211_s15 + $0x150] sm:$0xff]  ;;  %v7287_v23 = vld [vmem:[%s12211_s15 + $0x1c8] sm:$0xff]  ;;  %v7270_v9 = vld [vmem:[%s12211_s15 + $0x140] sm:$0xff] }
0x402c   :  { %7162 = vmatpush1.msra.mxu0 %v6999_v39  ;;  %7082 = vmatprep.subr.mxu1 %v6990_v28  ;;  %v7239_v24 = vld [vmem:[%s12211_s15 + $0x48] sm:$0xff]  ;;  %v7254_v39 = vld [vmem:[%s12211_s15 + $0xc0] sm:$0xff]  ;;  %v7285_v28 = vld [vmem:[%s12211_s15 + $0x1b8] sm:$0xff] }
0x402d   :  { %7163 = vmatprep.subr.mxu0 %v6996_v22  ;;  %v7271_v14 = vld [vmem:[%s12211_s15 + $0x148] sm:$0xff]  ;;  %v7238_v22 = vld [vmem:[%s12211_s15 + $0x40] sm:$0xff] }
0x402e   :  { %7164 = vmatpush1.msra.mxu0 %v6995_v53  ;;  %v7253_v53 = vld [vmem:[%s12211_s15 + $0xb8] sm:$0xff] }
0x40e0   :  { %v6911_v63 = vpop.f32.mrf.mxu0 }
0x40e1   :  { %v6912_v56 = vadd.f32 %v8164_v1, %v6911_v63  ;;  %v6989_v63 = vld [vmem:[%s12174_s11] sm:$0xff] }
0x40e2   :  { %v9120_v52 = vpop.f32.mrf.mxu0  ;;  %7083 = vmatpush1.msra.mxu1 %v6989_v63  ;;  %v7269_v63 = vld [vmem:[%s12211_s15 + $0x138] sm:$0xff] }
0x40e3   :  { %v6925_v46 = vadd.f32 %v6912_v56, %v11906_v38  ;;  %v6991_v56 = vld [vmem:[%s12174_s11 + $0x10] sm:$0xff]  ;;  %v7261_v52 = vld [vmem:[%s12211_s15 + $0xf8] sm:$0xff] }
0x40e4   :  { %8439 = vmatprep.subr.mxu1 %v7261_v52  ;;  %v7284_v52 = vld [vmem:[%s12211_s15 + $0x1b0] sm:$0xff] }
0x40e5   :  { %v6916_v30 = vpop.f32.mrf.mxu0  ;;  %v6928_v4 = vsel %vm2783_vm10, %v6925_v46, 0.0 }
0x40e6   :  { %v6917_v62 = vadd.f32 %v8164_v1, %v6916_v30  ;;  %6929 = vadd.xlane.f32.xlu1 %v6928_v4 }
0x40e7   :  { %v9123_v13 = vpop.f32.mrf.mxu0 }
0x40e8   :  { %v6926_v25 = vadd.f32 %v6917_v62, %v11912_v21 }
0x40e9   :  { %v6921_v2 = vpop.f32.mrf.mxu0 }
0x40ea   :  { %v6922_v15 = vadd.f32 %v8164_v1, %v6921_v2  ;;  %v6931_v31 = vsel %vm2783_vm10, %v6926_v25, 0.0  ;;  %v6992_v1 = vld [vmem:[%s12174_s11 + $0x18] sm:$0xff]  ;;  %s7918_s11 = sld [smem:[%s12413_s0 + %s9649_s8]]  }
0x40eb   :  { %6932 = vadd.xlane.f32.xlu0 %v6931_v31  ;;  %v9126_v60 = vpop.f32.mrf.mxu0  ;;  %7165 = vmatprep.subr.mxu0 %v6992_v1  ;;  %v7237_v1 = vld [vmem:[%s12211_s15 + $0x38] sm:$0xff] }
0x40ec   :  { %v6927_v47 = vadd.f32 %v6922_v15, %v11918_v10  ;;  %7166 = vmatpush1.msra.mxu0 %v6991_v56  ;;  %v7252_v56 = vld [vmem:[%s12211_s15 + $0xb0] sm:$0xff] }
0x40ee   :  { %v6935_v8 = vsel %vm6934_vm15, %v6927_v47, 0.0 }
0x40ef   :  { %6936 = vadd.xlane.f32.xlu0 %v6935_v8  ;;  %v8168_v8 = vld [vmem:[%s7911_s19] ss:$0 sm:$0xff] }
0x416f   :  { %v6930_v38 = vpop.xlane.xlu1 %6929 }
0x4170   :  { %v6939_v29 = vmul.f32 0.015625, %v6930_v38 }
0x4172   :  { %v12156_v58 = vsub.f32 %v6925_v46, %v6939_v29  ;;  %v7293_v46 = vld [vmem:[%s12211_s15 + $0x1f8] sm:$0xff]  ;;  %v8169_v29 = vld [vmem:[%s7912_s23] ss:$0 sm:$0xff] }
0x4173   :  { %8480 = vmatprep.subr.mxu0 %v7293_v46  ;;  %v7236_v46 = vld [vmem:[%s12211_s15 + $0x30] sm:$0xff] }
0x4174   :  { %v6933_v34 = vpop.xlane.xlu0 %6932  ;;  %v6945_v21 = vmul.f32 %v12156_v58, %v12156_v58 }
0x4175   :  { %v6940_v32 = vmul.f32 0.015625, %v6933_v34 }
0x4176   :  { %v6948_v48 = vsel %vm2783_vm10, %v6945_v21, 0.0 }
0x4177   :  { %v12161_v37 = vsub.f32 %v6926_v25, %v6940_v32  ;;  %6949 = vadd.xlane.f32.xlu1 %v6948_v48 }
0x4178   :  { %v6937_v27 = vpop.xlane.xlu0 %6936 }
0x4179   :  { %v6941_v49 = vmul.f32 0.015625, %v6937_v27  ;;  %v6946_v10 = vmul.f32 %v12161_v37, %v12161_v37  ;;  %v7245_v27 = vld [vmem:[%s12211_s15 + $0x78] sm:$0xff] }
0x417b   :  { %v12165_v12 = vsub.f32 %v6927_v47, %v6941_v49  ;;  %v6951_v41 = vsel %vm2783_vm10, %v6946_v10, 0.0  ;;  %v7277_v49 = vld [vmem:[%s12211_s15 + $0x178] sm:$0xff]  ;;  %v7260_v10 = vld [vmem:[%s12211_s15 + $0xf0] sm:$0xff] }
0x417c   :  { %6952 = vadd.xlane.f32.xlu0 %v6951_v41  ;;  %v7292_v41 = vld [vmem:[%s12211_s15 + $0x1f0] sm:$0xff] }
0x417d   :  { %v6947_v11 = vmul.f32 %v12165_v12, %v12165_v12 }
0x417f   :  { %v6954_v6 = vsel %vm6934_vm15, %v6947_v11, 0.0  ;;  %v7244_v11 = vld [vmem:[%s12211_s15 + $0x70] sm:$0xff] }
0x4180   :  { %6955 = vadd.xlane.f32.xlu1 %v6954_v6 }
0x4200   :  { %v6950_v30 = vpop.xlane.xlu1 %6949 }
0x4201   :  { %v6957_v4 = vmul.f32 0.015625, %v6950_v30  ;;  %v7268_v30 = vld [vmem:[%s12211_s15 + $0x130] sm:$0xff] }
0x4203   :  { %v6960_v62 = vadd.f32 1e-05, %v6957_v4  ;;  %v7251_v4 = vld [vmem:[%s12211_s15 + $0xa8] sm:$0xff] }
0x4205   :  { %9571 = vrsqrt.f32 %v6960_v62  ;;  %v6953_v13 = vpop.xlane.xlu0 %6952  ;;  %v7283_v62 = vld [vmem:[%s12211_s15 + $0x1a8] sm:$0xff] }
0x4206   :  { %v6958_v25 = vmul.f32 0.015625, %v6953_v13  ;;  %v7235_v13 = vld [vmem:[%s12211_s15 + $0x28] sm:$0xff] }
0x4208   :  { %v6961_v2 = vadd.f32 1e-05, %v6958_v25  ;;  %v7267_v25 = vld [vmem:[%s12211_s15 + $0x128] sm:$0xff] }
0x4209   :  { %v6956_v15 = vpop.xlane.xlu1 %6955 }
0x420a   :  { %9573 = vrsqrt.f32 %v6961_v2  ;;  %v6959_v31 = vmul.f32 0.015625, %v6956_v15  ;;  %v7250_v2 = vld [vmem:[%s12211_s15 + $0xa0] sm:$0xff] }
0x420b   :  { %v7282_v15 = vld [vmem:[%s12211_s15 + $0x1a0] sm:$0xff] }
0x420c   :  { %v6962_v60 = vadd.f32 1e-05, %v6959_v31  ;;  %v7234_v31 = vld [vmem:[%s12211_s15 + $0x20] sm:$0xff] }
0x420e   :  { %9575 = vrsqrt.f32 %v6962_v60  ;;  %v7266_v60 = vld [vmem:[%s12211_s15 + $0x120] sm:$0xff] }
0x4212   :  { %v9572_v47 = vpop.eup %9571 }
0x4213   :  { %v6966_v38 = vmul.f32 %v9572_v47, %v12156_v58  ;;  %v7249_v47 = vld [vmem:[%s12211_s15 + $0x98] sm:$0xff] }
0x4215   :  { %v6976_v34 = vmul.f32 %v8168_v8, %v6966_v38  ;;  %v7233_v38 = vld [vmem:[%s12211_s15 + $0x18] sm:$0xff] }
0x4217   :  { %v9574_v21 = vpop.eup %9573  ;;  %v12222_v32 = vadd.f32 %v8169_v29, %v6976_v34  ;;  %v7248_v34 = vld [vmem:[%s12211_s15 + $0x90] sm:$0xff] }
0x4218   :  { %v6967_v48 = vmul.f32 %v9574_v21, %v12161_v37  ;;  %v7276_v37 = vld [vmem:[%s12211_s15 + $0x170] sm:$0xff] }
0x4219   :  { %8170 = vmatmul.mubr.msk.f32.vlgmr.msra.gmra.mxu1 %vm2783_vm10, %v12222_v32  ;;  %8173 = vmatmul.mubr.msk.f32.vlgmr.msra.gmra.mxu0 %vm2783_vm10, %v12222_v32  ;;  %v7280_v21 = vld [vmem:[%s12211_s15 + $0x190] sm:$0xff] }
0x421a   :  { %7122 = vmatprep.mubr.f32.mxu1 %v9616_v0  ;;  %7205 = vmatprep.mubr.f32.mxu0 %v9616_v0  ;;  %v6977_v58 = vmul.f32 %v8168_v8, %v6967_v48  ;;  %v7232_v48 = vld [vmem:[%s12211_s15 + $0x10] sm:$0xff] }
0x421b   :  { %v9576_v6 = vpop.eup %9575  ;;  %8440 = vmatpush3.msra.mxu1 %v7245_v27  ;;  %8481 = vmatpush3.msra.mxu0 %v7277_v49  ;;  %v7264_v27 = vld [vmem:[%s12211_s15 + $0x110] sm:$0xff]  ;;  %v7247_v49 = vld [vmem:[%s12211_s15 + $0x88] sm:$0xff] }
0x421c   :  { %v6968_v35 = vmul.f32 %v9576_v6, %v12165_v12  ;;  %v12238_v7 = vadd.f32 %v8169_v29, %v6977_v58  ;;  %8441 = vmatprep.subr.mxu1 %v7260_v10  ;;  %8482 = vmatprep.subr.mxu0 %v7292_v41  ;;  %v7243_v12 = vld [vmem:[%s12211_s15 + $0x68] sm:$0xff]  ;;  %v7230_v6 = vld [vmem:[%s12211_s15] sm:$0xff] }
0x421d   :  { %8442 = vmatpush3.msra.mxu1 %v7244_v11  ;;  %8483 = vmatpush3.msra.mxu0 %v7276_v37  ;;  %v7279_v10 = vld [vmem:[%s12211_s15 + $0x188] sm:$0xff]  ;;  %v7246_v11 = vld [vmem:[%s12211_s15 + $0x80] sm:$0xff] }
0x421e   :  { %8171 = vmatmul.mubr.msk.f32.gmra.mxu1 %vm2783_vm10, %v12238_v7  ;;  %8174 = vmatmul.mubr.msk.f32.gmra.mxu0 %vm2783_vm10, %v12238_v7  ;;  %v6978_v3 = vmul.f32 %v8168_v8, %v6968_v35  ;;  %v7281_v8 = vld [vmem:[%s12211_s15 + $0x198] sm:$0xff]  ;;  %v7231_v41 = vld [vmem:[%s12211_s15 + $0x8] sm:$0xff]  ;;  %v7278_v37 = vld [vmem:[%s12211_s15 + $0x180] sm:$0xff] }
0x421f   :  { %7128 = vmatprep.mubr.f32.mxu1 %v9616_v0  ;;  %7211 = vmatprep.mubr.f32.mxu0 %v9616_v0  ;;  %v7263_v58 = vld [vmem:[%s12211_s15 + $0x108] sm:$0xff]  ;;  %v7262_v35 = vld [vmem:[%s12211_s15 + $0x100] sm:$0xff] }
0x4220   :  { %v12250_v19 = vadd.f32 %v8169_v29, %v6978_v3  ;;  %8443 = vmatprep.subr.mxu1 %v7259_v57  ;;  %8484 = vmatprep.subr.mxu0 %v7291_v43  ;;  %v7265_v29 = vld [vmem:[%s12211_s15 + $0x118] sm:$0xff]  ;;  %v7033_v57 = vsub.s32 2, %v10829_v33  ;;  %v7021_v43 = vld [vmem:[%s7914_s29] sm:$0xf]  ;;  %v7037_v3 = vsub.s32 3, %v10829_v33  ;;  %s7922_s15 = sld [smem:[%s12413_s0 + %s9650_s12]]  }
0x4221   :  { %8444 = vmatpush3.msra.mxu1 %v7243_v12  ;;  %8485 = vmatpush3.msra.mxu0 %v7275_v17  ;;  %v7026_v12 = vrot.slane %v7021_v43, %v10832_v44 }
0x4222   :  { %8172 = vmatmul.mubr.msk.f32.gmra.mxu1 %vm2783_vm10, %v12250_v19  ;;  %8175 = vmatmul.mubr.msk.f32.gmra.mxu0 %vm2783_vm10, %v12250_v19  ;;  %v7034_v17 = vrot.slane %v7021_v43, %v7033_v57 }
0x4223   :  { %8445 = vmatprep.subr.mxu1 %v7258_v40  ;;  %8486 = vmatprep.subr.mxu0 %v7290_v54  ;;  %v7030_v40 = vrot.slane %v7021_v43, %v10835_v42  ;;  %v7038_v54 = vrot.slane %v7021_v43, %v7037_v3 }
0x4224   :  { %8446 = vmatpush3.msra.mxu1 %v7242_v55  ;;  %8487 = vmatpush3.msra.mxu0 %v7274_v61 }
0x4225   :  { %8447 = vmatprep.subr.mxu1 %v7257_v59  ;;  %8488 = vmatprep.subr.mxu0 %v7289_v36 }
0x4226   :  { %8448 = vmatpush3.msra.mxu1 %v7241_v50  ;;  %8489 = vmatpush3.msra.mxu0 %v7273_v26 }
0x4227   :  { %8449 = vmatprep.subr.mxu1 %v7256_v45  ;;  %8490 = vmatprep.subr.mxu0 %v7288_v51 }
0x4228   :  { %8450 = vmatpush3.msra.mxu1 %v7240_v20  ;;  %8491 = vmatpush3.msra.mxu0 %v7272_v18 }
0x4229   :  { %8451 = vmatprep.subr.mxu1 %v7255_v16  ;;  %8492 = vmatprep.subr.mxu0 %v7287_v23 }
0x422a   :  { %8452 = vmatpush3.msra.mxu1 %v7239_v24  ;;  %8493 = vmatpush3.msra.mxu0 %v7271_v14 }
0x422b   :  { %8453 = vmatprep.subr.mxu1 %v7254_v39  ;;  %8494 = vmatprep.subr.mxu0 %v7286_v5 }
0x422c   :  { %8454 = vmatpush3.msra.mxu1 %v7238_v22  ;;  %8495 = vmatpush3.msra.mxu0 %v7270_v9 }
0x422d   :  { %8455 = vmatprep.subr.mxu1 %v7253_v53  ;;  %8496 = vmatprep.subr.mxu0 %v7285_v28 }
0x422e   :  { %8456 = vmatpush3.msra.mxu1 %v7237_v1  ;;  %8497 = vmatpush3.msra.mxu0 %v7269_v63 }
0x422f   :  { %8457 = vmatprep.subr.mxu1 %v7252_v56  ;;  %8498 = vmatprep.subr.mxu0 %v7284_v52 }
0x4230   :  { %8458 = vmatpush3.msra.mxu1 %v7236_v46  ;;  %8499 = vmatpush3.msra.mxu0 %v7268_v30 }
0x4231   :  { %8459 = vmatprep.subr.mxu1 %v7251_v4  ;;  %8500 = vmatprep.subr.mxu0 %v7283_v62 }
0x4232   :  { %8460 = vmatpush3.msra.mxu1 %v7235_v13  ;;  %8501 = vmatpush3.msra.mxu0 %v7267_v25 }
0x4233   :  { %8461 = vmatprep.subr.mxu1 %v7250_v2  ;;  %8502 = vmatprep.subr.mxu0 %v7282_v15 }
0x4234   :  { %8462 = vmatpush3.msra.mxu1 %v7234_v31  ;;  %8503 = vmatpush3.msra.mxu0 %v7266_v60 }
0x4235   :  { %8463 = vmatprep.subr.mxu1 %v7249_v47  ;;  %8504 = vmatprep.subr.mxu0 %v7281_v8 }
0x4236   :  { %8464 = vmatpush3.msra.mxu1 %v7233_v38  ;;  %8505 = vmatpush3.msra.mxu0 %v7265_v29 }
0x4237   :  { %8465 = vmatprep.subr.mxu1 %v7248_v34  ;;  %8506 = vmatprep.subr.mxu0 %v7280_v21 }
0x4238   :  { %8466 = vmatpush3.msra.mxu1 %v7232_v48  ;;  %8507 = vmatpush3.msra.mxu0 %v7264_v27 }
0x4239   :  { %8467 = vmatprep.subr.mxu1 %v7247_v49  ;;  %8508 = vmatprep.subr.mxu0 %v7279_v10  ;;  %v8176_v10 = vld [vmem:[%s7916_s3] ss:$0 sm:$0xff] }
0x423a   :  { %8468 = vmatpush3.msra.mxu1 %v7231_v41  ;;  %8509 = vmatpush3.msra.mxu0 %v7263_v58 }
0x423b   :  { %8469 = vmatprep.subr.mxu1 %v7246_v11  ;;  %8510 = vmatprep.subr.mxu0 %v7278_v37 }
0x423c   :  { %8470 = vmatpush3.msra.mxu1 %v7230_v6  ;;  %8511 = vmatpush3.msra.mxu0 %v7262_v35 }
0x423d   :  { %9127 = vmatprep.subr.mxu1 %v9616_v0  ;;  %9147 = vmatprep.subr.mxu0 %v9616_v0 }
0x42d9   :  { %v7118_v55 = vpop.f32.mrf.mxu1  ;;  %v7201_v61 = vpop.f32.mrf.mxu0 }
0x42da   :  { %v7119_v59 = vadd.f32 %v7118_v55, %v7026_v12  ;;  %v7202_v36 = vadd.f32 %v7201_v61, %v7034_v17 }
0x42db   :  { %v7120_v50 = vpop.f32.mrf.mxu1  ;;  %v7203_v26 = vpop.f32.mrf.mxu0 }
0x42dc   :  { %v7121_v45 = vadd.f32 %v7120_v50, %v7030_v40  ;;  %v7204_v51 = vadd.f32 %v7203_v26, %v7038_v54  ;;  %v7218_v24 = vmax.f32 %v7119_v59, 0.0  ;;  %v7220_v33 = vmax.f32 %v7202_v36, 0.0 }
0x42de   :  { %v7219_v20 = vmax.f32 %v7121_v45, 0.0  ;;  %v7221_v18 = vmax.f32 %v7204_v51, 0.0  ;;  %v7124_v16 = vpop.f32.mrf.mxu1  ;;  %v7207_v23 = vpop.f32.mrf.mxu0 }
0x42df   :  { %v7125_v14 = vadd.f32 %v7124_v16, %v7026_v12  ;;  %v7208_v44 = vadd.f32 %v7207_v23, %v7034_v17 }
0x42e0   :  { %v7126_v39 = vpop.f32.mrf.mxu1  ;;  %v7209_v5 = vpop.f32.mrf.mxu0  ;;  %7365 = vmatprep.mubr.f32.mxu1 %v7219_v20  ;;  %7445 = vmatprep.mubr.f32.mxu0 %v7221_v18 }
0x42e1   :  { %v7127_v42 = vadd.f32 %v7126_v39, %v7030_v40  ;;  %v7210_v22 = vadd.f32 %v7209_v5, %v7038_v54  ;;  %7366 = vmatmul.mubr.f32.vlgmr.msra.gmra.mxu1 %v7218_v24  ;;  %7446 = vmatmul.mubr.f32.vlgmr.msra.gmra.mxu0 %v7220_v33  ;;  %v7222_v63 = vmax.f32 %v7125_v14, 0.0  ;;  %v7224_v56 = vmax.f32 %v7208_v44, 0.0 }
0x42e2   :  { %v7130_v9 = vpop.f32.mrf.mxu1  ;;  %v7213_v53 = vpop.f32.mrf.mxu0 }
0x42e3   :  { %v7223_v28 = vmax.f32 %v7127_v42, 0.0  ;;  %v7225_v1 = vmax.f32 %v7210_v22, 0.0  ;;  %v7131_v52 = vadd.f32 %v7130_v9, %v7026_v12  ;;  %v7214_v46 = vadd.f32 %v7213_v53, %v7034_v17 }
0x42e4   :  { %v7132_v30 = vpop.f32.mrf.mxu1  ;;  %v7215_v4 = vpop.f32.mrf.mxu0 }
0x42e5   :  { %v7133_v62 = vadd.f32 %v7132_v30, %v7030_v40  ;;  %v7216_v13 = vadd.f32 %v7215_v4, %v7038_v54  ;;  %7370 = vmatprep.mubr.f32.mxu1 %v7223_v28  ;;  %7450 = vmatprep.mubr.f32.mxu0 %v7225_v1  ;;  %v7226_v15 = vmax.f32 %v7131_v52, 0.0  ;;  %v7228_v31 = vmax.f32 %v7214_v46, 0.0 }
0x42e6   :  { %7371 = vmatmul.mubr.f32.gmra.mxu1 %v7222_v63  ;;  %7451 = vmatmul.mubr.f32.gmra.mxu0 %v7224_v56 }
0x42e7   :  { %v7227_v25 = vmax.f32 %v7133_v62, 0.0  ;;  %v7229_v2 = vmax.f32 %v7216_v13, 0.0  ;;  %v8177_v13 = vld [vmem:[%s7917_s7] ss:$0 sm:$0xff] }
0x42e9   :  { %7375 = vmatprep.mubr.f32.mxu1 %v7227_v25  ;;  %7455 = vmatprep.mubr.f32.mxu0 %v7229_v2 }
0x42ea   :  { %7376 = vmatmul.mubr.f32.gmra.mxu1 %v7226_v15  ;;  %7456 = vmatmul.mubr.f32.gmra.mxu0 %v7228_v31 }
0x42eb   :  { %9133 = vmatprep.mubr.msk.f32.mxu1 %vm9618_vm0, %v9616_v0  ;;  %9153 = vmatprep.mubr.msk.f32.mxu0 %vm9618_vm0, %v9616_v0 }
0x43a1   :  { %v8471_v60 = vpop.f32.mrf.mxu1  ;;  %v8512_v47 = vpop.f32.mrf.mxu0 }
0x43a3   :  { %v8472_v8 = vpop.f32.mrf.mxu1  ;;  %v8513_v38 = vpop.f32.mrf.mxu0 }
0x43a4   :  { %v8473_v27 = vadd.f32 %v8472_v8, %v8471_v60  ;;  %v8514_v12 = vadd.f32 %v8513_v38, %v8512_v47  ;;  %v8178_v60 = vld [vmem:[%s7918_s11] ss:$0 sm:$0xff] }
0x43a6   :  { %v8474_v29 = vpop.f32.mrf.mxu1  ;;  %v8515_v34 = vpop.f32.mrf.mxu0  ;;  %v7368_v57 = vadd.f32 %v8473_v27, %v8176_v10 }
0x43a8   :  { %v8475_v21 = vpop.f32.mrf.mxu1  ;;  %v8516_v48 = vpop.f32.mrf.mxu0  ;;  %v7448_v55 = vadd.f32 %v8514_v12, %v7368_v57 }
0x43a9   :  { %v8476_v49 = vadd.f32 %v8475_v21, %v8474_v29  ;;  %v8517_v37 = vadd.f32 %v8516_v48, %v8515_v34  ;;  %v7523_v21 = vld [vmem:[%s7922_s15] sm:$0x3] }
0x43aa   :  { %v8477_v41 = vpop.f32.mrf.mxu1  ;;  %v8518_v58 = vpop.f32.mrf.mxu0  ;;  %v7461_v26 = vadd.f32 %v7448_v55, %v12222_v32  ;;  %v7600_v48 = vld [vmem:[%s7923_s18] sm:$0xff] }
0x43ab   :  { %v7373_v11 = vadd.f32 %v8476_v49, %v8176_v10 }
0x43ac   :  { %v8478_v6 = vpop.f32.mrf.mxu1  ;;  %v8519_v35 = vpop.f32.mrf.mxu0  ;;  %v7464_v45 = vsel %vm2783_vm10, %v7461_v26, 0.0 }
0x43ad   :  { %v7453_v43 = vadd.f32 %v8517_v37, %v7373_v11  ;;  %v8479_v3 = vadd.f32 %v8478_v6, %v8477_v41  ;;  %v8520_v40 = vadd.f32 %v8519_v35, %v8518_v58  ;;  %v7602_v41 = vld [vmem:[%s7923_s18 + $0x10] sm:$0xf] }
0x43af   :  { %v7378_v17 = vadd.f32 %v8479_v3, %v8176_v10  ;;  %v7462_v54 = vadd.f32 %v7453_v43, %v12238_v7  ;;  %v7601_v10 = vld [vmem:[%s7923_s18 + $0x8] sm:$0xff] }
0x43b1   :  { %v7458_v61 = vadd.f32 %v8520_v40, %v7378_v17  ;;  %v7467_v59 = vsel %vm2783_vm10, %v7462_v54, 0.0 }
0x43b2   :  { %7468 = vadd.xlane.f32.xlu1 %v7467_v59  ;;  %v7807_v59 = vld [vmem:[%s12371_s21 + $0x70] sm:$0xff] }
0x43b3   :  { %v7463_v36 = vadd.f32 %v7458_v61, %v12250_v19  ;;  %v7808_v61 = vld [vmem:[%s12371_s21 + $0x78] sm:$0xff] }
0x43b5   :  { %v7470_v50 = vsel %vm6934_vm15, %v7463_v36, 0.0 }
0x43b6   :  { %7471 = vadd.xlane.f32.xlu0 %v7470_v50  ;;  %v7805_v50 = vld [vmem:[%s12371_s21 + $0x60] sm:$0xff] }
0x43ba   :  { %7465 = vadd.xlane.f32.xlu0 %v7464_v45  ;;  %v7803_v45 = vld [vmem:[%s12371_s21 + $0x50] sm:$0xff] }
0x443b   :  { %v7469_v51 = vpop.xlane.xlu1 %7468 }
0x443c   :  { %v7474_v20 = vmul.f32 0.015625, %v7469_v51  ;;  %v7802_v51 = vld [vmem:[%s12371_s21 + $0x48] sm:$0xff] }
0x443e   :  { %v7477_v18 = vsub.f32 %v7462_v54, %v7474_v20  ;;  %v7699_v54 = vmul.f32 10.0, %v7523_v21  ;;  %v7801_v20 = vld [vmem:[%s12371_s21 + $0x40] sm:$0xff] }
0x443f   :  { %v7472_v16 = vpop.xlane.xlu0 %7471 }
0x4440   :  { %v7475_v7 = vmul.f32 0.015625, %v7472_v16  ;;  %v7480_v23 = vmul.f32 %v7477_v18, %v7477_v18  ;;  %v7799_v16 = vld [vmem:[%s12371_s21 + $0x30] sm:$0xff] }
0x4442   :  { %v7478_v24 = vsub.f32 %v7463_v36, %v7475_v7  ;;  %v7485_v33 = vsel %vm2783_vm10, %v7480_v23, 0.0  ;;  %v7806_v36 = vld [vmem:[%s12371_s21 + $0x68] sm:$0xff]  ;;  %v7797_v23 = vld [vmem:[%s12371_s21 + $0x20] sm:$0xff] }
0x4443   :  { %7486 = vadd.xlane.f32.xlu0 %v7485_v33  ;;  %v7466_v14 = vpop.xlane.xlu0 %7465  ;;  %v7798_v7 = vld [vmem:[%s12371_s21 + $0x28] sm:$0xff]  ;;  %v7795_v33 = vld [vmem:[%s12371_s21 + $0x10] sm:$0xff] }
0x4444   :  { %v7473_v19 = vmul.f32 0.015625, %v7466_v14  ;;  %v7481_v44 = vmul.f32 %v7478_v24, %v7478_v24  ;;  %v7794_v14 = vld [vmem:[%s12371_s21 + $0x8] sm:$0xff] }
0x4446   :  { %v7476_v39 = vsub.f32 %v7461_v26, %v7473_v19  ;;  %v7488_v32 = vsel %vm6934_vm15, %v7481_v44, 0.0  ;;  %v7804_v26 = vld [vmem:[%s12371_s21 + $0x58] sm:$0xff] }
0x4447   :  { %7489 = vadd.xlane.f32.xlu1 %v7488_v32  ;;  %v7793_v32 = vld [vmem:[%s12371_s21] sm:$0xff] }
0x4448   :  { %v7479_v5 = vmul.f32 %v7476_v39, %v7476_v39 }
0x444a   :  { %v7482_v42 = vsel %vm2783_vm10, %v7479_v5, 0.0 }
0x444b   :  { %7483 = vadd.xlane.f32.xlu1 %v7482_v42 }
0x44cc   :  { %v7487_v22 = vpop.xlane.xlu0 %7486 }
0x44cd   :  { %v7492_v9 = vmul.f32 0.015625, %v7487_v22 }
0x44cf   :  { %v7495_v53 = vadd.f32 1e-05, %v7492_v9 }
0x44d0   :  { %v7490_v28 = vpop.xlane.xlu1 %7489 }
0x44d1   :  { %9577 = vrsqrt.f32 %v7495_v53  ;;  %v7493_v1 = vmul.f32 0.015625, %v7490_v28 }
0x44d3   :  { %v7496_v63 = vadd.f32 1e-05, %v7493_v1 }
0x44d4   :  { %v7484_v56 = vpop.xlane.xlu1 %7483 }
0x44d5   :  { %9579 = vrsqrt.f32 %v7496_v63  ;;  %v7491_v52 = vmul.f32 0.015625, %v7484_v56 }
0x44d7   :  { %v7494_v46 = vadd.f32 1e-05, %v7491_v52 }
0x44d9   :  { %9581 = vrsqrt.f32 %v7494_v46 }
0x44de   :  { %v9578_v30 = vpop.eup %9577 }
0x44df   :  { %v7501_v4 = vmul.f32 %v9578_v30, %v7477_v18  ;;  %v7800_v18 = vld [vmem:[%s12371_s21 + $0x38] sm:$0xff] }
0x44e1   :  { %v7511_v15 = vmul.f32 %v8177_v13, %v7501_v4 }
0x44e2   :  { %v9580_v62 = vpop.eup %9579 }
0x44e3   :  { %v7502_v25 = vmul.f32 %v9580_v62, %v7478_v24  ;;  %v7521_v38 = vadd.f32 %v8178_v60, %v7511_v15  ;;  %v7796_v24 = vld [vmem:[%s12371_s21 + $0x18] sm:$0xff] }
0x44e5   :  { %v7512_v2 = vmul.f32 %v8177_v13, %v7502_v25 }
0x44e6   :  { %v9582_v31 = vpop.eup %9581 }
0x44e7   :  { %v7522_v47 = vadd.f32 %v8178_v60, %v7512_v2  ;;  %v7500_v8 = vmul.f32 %v9582_v31, %v7476_v39 }
0x44e9   :  { %9128 = vmatpush3.msk.msra.mxu1 %vm4221_vm12, %v7522_v47  ;;  %v7510_v29 = vmul.f32 %v8177_v13, %v7500_v8 }
0x44ea   :  { %9129 = vmatprep.subr.mxu1 %v9616_v0 }
0x44eb   :  { %9130 = vmatpush3.msra.mxu1 %v7521_v38  ;;  %v7520_v34 = vadd.f32 %v8178_v60, %v7510_v29 }
0x44ec   :  { %9131 = vmatprep.subr.mxu1 %v9616_v0 }
0x44ed   :  { %9132 = vmatpush3.msra.mxu1 %v7520_v34 }
0x44ee   :  { %9134 = vmatmul.mubr.msk.f32.vlgmr.msra.gmra.mxu1 %vm6062_vm13, %v7523_v21  ;;  %9136 = vmatprep.subr.mxu1 %v9616_v0 }
0x44ef   :  { %9138 = vmatprep.mubr.msk.f32.mxu1 %vm9618_vm0, %v9616_v0 }
0x45ae   :  { %v12353_v27 = vpop.f32.mrf.mxu1 }
0x45af   :  { %9137 = vmatpush3.msk.msra.mxu1 %vm4219_vm11, %v12353_v27 }
0x45b0   :  { %9139 = vmatmul.mubr.msk.f32.vlgmr.msra.gmra.mxu1 %vm7603_vm1, %v7600_v48  ;;  %v9135_v49 = vpop.f32.mrf.mxu1  ;;  %9156 = vmatprep.subr.mxu1 %v9616_v0 }
0x45b1   :  { %9141 = vmatprep.mubr.msk.f32.mxu1 %vm9618_vm0, %v9616_v0  ;;  %9157 = vmatpush3.msra.mxu1 %v7808_v61 }
0x45b2   :  { %9158 = vmatprep.subr.mxu1 %v9616_v0 }
0x45b3   :  { %9159 = vmatpush3.msra.mxu1 %v7807_v59 }
0x45b4   :  { %9142 = vmatmul.mubr.msk.f32.gmra.mxu1 %vm7603_vm1, %v7601_v10  ;;  %9160 = vmatprep.subr.mxu1 %v9616_v0 }
0x45b5   :  { %9144 = vmatprep.mubr.msk.f32.mxu1 %vm9618_vm0, %v9616_v0  ;;  %9161 = vmatpush3.msra.mxu1 %v7806_v36 }
0x45b6   :  { %9162 = vmatprep.subr.mxu1 %v9616_v0 }
0x45b7   :  { %9163 = vmatpush3.msra.mxu1 %v7805_v50 }
0x45b8   :  { %9145 = vmatmul.mubr.msk.f32.gmra.mxu1 %vm7603_vm1, %v7602_v41  ;;  %9164 = vmatprep.subr.mxu1 %v9616_v0 }
0x45b9   :  { %9188 = vmatprep.mubr.msk.f32.mxu1 %vm9618_vm0, %v9616_v0  ;;  %9165 = vmatpush3.msra.mxu1 %v7804_v26 }
0x45ba   :  { %9166 = vmatprep.subr.mxu1 %v9616_v0 }
0x45bb   :  { %9167 = vmatpush3.msra.mxu1 %v7803_v45 }
0x45bc   :  { %9168 = vmatprep.subr.mxu1 %v9616_v0 }
0x45bd   :  { %9169 = vmatpush3.msra.mxu1 %v7802_v51 }
0x45be   :  { %9170 = vmatprep.subr.mxu1 %v9616_v0 }
0x45bf   :  { %9171 = vmatpush3.msra.mxu1 %v7801_v20 }
0x45c0   :  { %9172 = vmatprep.subr.mxu1 %v9616_v0 }
0x45c1   :  { %9173 = vmatpush3.msra.mxu1 %v7800_v18 }
0x45c2   :  { %9174 = vmatprep.subr.mxu1 %v9616_v0 }
0x45c3   :  { %9175 = vmatpush3.msra.mxu1 %v7799_v16 }
0x45c4   :  { %9176 = vmatprep.subr.mxu1 %v9616_v0 }
0x45c5   :  { %9177 = vmatpush3.msra.mxu1 %v7798_v7 }
0x45c6   :  { %9178 = vmatprep.subr.mxu1 %v9616_v0 }
0x45c7   :  { %9179 = vmatpush3.msra.mxu1 %v7797_v23 }
0x45c8   :  { %9180 = vmatprep.subr.mxu1 %v9616_v0 }
0x45c9   :  { %9181 = vmatpush3.msra.mxu1 %v7796_v24 }
0x45ca   :  { %9182 = vmatprep.subr.mxu1 %v9616_v0 }
0x45cb   :  { %9183 = vmatpush3.msra.mxu1 %v7795_v33 }
0x45cc   :  { %9184 = vmatprep.subr.mxu1 %v9616_v0 }
0x45cd   :  { %9185 = vmatpush3.msra.mxu1 %v7794_v14 }
0x45ce   :  { %9186 = vmatprep.subr.mxu1 %v9616_v0 }
0x45cf   :  { %9187 = vmatpush3.msra.mxu1 %v7793_v32 }
0x4670   :  { %v7682_v58 = vpop.f32.mrf.mxu1 }
0x4671   :  { %v7696_v12 = vsub.f32 %v7520_v34, %v7682_v58 }
0x4672   :  { %v9140_v11 = vpop.f32.mrf.mxu1 }
0x4673   :  { %v7700_v55 = vmul.f32 %v7696_v12, %v7696_v12 }
0x4674   :  { %v7687_v37 = vpop.f32.mrf.mxu1 }
0x4675   :  { %v7697_v57 = vsub.f32 %v7521_v38, %v7687_v37 }
0x4676   :  { %v9143_v6 = vpop.f32.mrf.mxu1 }
0x4677   :  { %v7701_v40 = vmul.f32 %v7697_v57, %v7697_v57 }
0x4678   :  { %v7692_v35 = vpop.f32.mrf.mxu1 }
0x4679   :  { %v7698_v43 = vsub.f32 %v7522_v47, %v7692_v35 }
0x467a   :  { %v9146_v3 = vpop.f32.mrf.mxu1 }
0x467b   :  { %v7702_v17 = vmul.f32 %v7698_v43, %v7698_v43 }
0x467d   :  { %9148 = vmatpush3.msk.msra.mxu0 %vm4221_vm12, %v7702_v17 }
0x467e   :  { %9149 = vmatprep.subr.mxu0 %v9616_v0 }
0x467f   :  { %9150 = vmatpush3.msra.mxu0 %v7701_v40 }
0x4680   :  { %9151 = vmatprep.subr.mxu0 %v9616_v0  ;;  %v8187_v0 = vld [vmem:[%s7925_s27] ss:$0 sm:$0xff] }
0x4681   :  { %9152 = vmatpush3.msra.mxu0 %v7700_v55 }
0x4682   :  { %9154 = vmatmul.mubr.msk.f32.vlgmr.msra.gmra.mxu0 %vm6062_vm13, %v7699_v54 }
0x4742   :  { %v7775_v19 = vpop.f32.mrf.mxu0 }
0x4743   :  { %v7780_v44 = vmul.f32 0.11111111, %v7775_v19 }
0x4744   :  { %v9155_v39 = vpop.f32.mrf.mxu0 }
0x4745   :  { %9583 = vrsqrt.f32 %v7780_v44  ;;  %vm7783_vm0 = vcmp.eq.f32.partialorder %v7780_v44, inf  ;;  %v7786_v22 = vand.u32 2147483648, %v7780_v44  ;;  %vm7785_vm2 = vcmp.eq.f32.partialorder %v7780_v44, 0.0 }
0x4752   :  { %v9584_v5 = vpop.eup %9583 }
0x4753   :  { %v7782_v42 = vmul.f32 %v9584_v5, %v7780_v44 }
0x4755   :  { %v7784_v9 = vsel %vm7783_vm0, %v7780_v44, %v7782_v42 }
0x4756   :  { %v7787_v53 = vsel %vm7785_vm2, %v7786_v22, %v7784_v9 }
0x4757   :  { %7789 = vrot.lane.b32.xlu0 %v7787_v53, %s9630_s24 }
0x47c9   :  { %v7790_v28 = vpop.permute.xlu0 %7789 }
0x47ca   :  { %v7792_v1 = vsel %vm2783_vm10, %v12353_v27, %v7790_v28 }
0x47cb   :  { %9189 = vmatmul.mubr.f32.vlgmr.msra.gmra.mxu1 %v7792_v1 }
0x488b   :  { %v7882_v63 = vpop.f32.mrf.mxu1 }
0x488c   :  { %v7883_v56 = vadd.f32 %v8187_v0, %v7882_v63 }
0x488d   :  { %v9190_v52 = vpop.f32.mrf.mxu1 }
0x488e   :  { %7887 = vst.msk [vmem:[%s7926_s1] sm:$0x3] %vm7886_vm3, %v7883_v56 }

</bundles_post_ra>
